<compile_context>
chip_gen: v7x
topology: tpu7x:2x2x1
jax: 0.10.0
libtpu: 0.0.40
codegen_flags: <defaults>
</compile_context>

<pallas_src>
import functools

import jax
import jax.numpy as jnp
from jax import lax
from jax.experimental import pallas as pl
from jax.experimental.pallas import tpu as pltpu

EPS = 1e-5
NEG_SLOPE = 0.2        # PyG GATConv default LeakyReLU slope
MASK_VALUE = -1e30
FOUT = 256             # per-head output channels (fixed by the architecture)


def _elu(z):
    # Overflow-safe ELU: exp only evaluated on clamped non-positive values.
    return jnp.where(z > 0.0, z, jnp.exp(jnp.minimum(z, 0.0)) - 1.0)


def _batchnorm_train(y, gamma, beta):
    # nn.BatchNorm1d training mode: biased variance over the batch (node) axis.
    mean = jnp.mean(y, axis=0, keepdims=True)
    var = jnp.mean(jnp.square(y - mean), axis=0, keepdims=True)
    return (y - mean) * lax.rsqrt(var + EPS) * gamma + beta


# ----------------------------------------------------------------------------
# Single fused kernel: 3x (Linear -> BN -> ELU) then n_layers x (GAT -> BN -> ELU)
# ----------------------------------------------------------------------------
def gatsy_fused_kernel(*refs, n_layers, heads, fout):
    # ref layout (all positional):
    #   [0] x (bf16, [N, FIN_PAD])       [1] additive mask (bf16, [N, N])
    #   [2:14]   3 MLP layers x (w_bf16, b_f32, bn_g, bn_b)
    #   [14:14+4L] L GAT layers x (w_aug_bf16 [in, H*F+128], bias, bn_g, bn_b)
    #   then: o_ref (f32 [N, H*F])
    x_ref, mask_ref = refs[0], refs[1]
    mlp_refs = refs[2:14]
    gat_refs = refs[14:14 + 4 * n_layers]
    o_ref = refs[14 + 4 * n_layers]

    # Additive attention mask: 0 on edges / self-loops, -1e30 elsewhere.
    # Kept in bf16; the per-head `e + mask` add upcasts to f32.
    mask = mask_ref[...]                                          # bf16 [N, N]

    hf = heads * fout

    # --- MLP head: three fused Linear -> BatchNorm -> ELU layers -------------
    h = x_ref[...]                                                # bf16 [N, FIN_PAD]
    for li in range(3):
        w_ref, b_ref, g_ref, bb_ref = mlp_refs[4 * li:4 * li + 4]
        y = jnp.dot(h, w_ref[...], preferred_element_type=jnp.float32)
        y = y + b_ref[...]
        z = _elu(_batchnorm_train(y, g_ref[...], bb_ref[...]))    # f32 [N, 256]
        h = z.astype(jnp.bfloat16)

    # --- GAT layers: GATConv (dense adjacency, concat heads) -> BN -> ELU ----
    for li in range(n_layers):
        w_ref, bias_ref, g_ref, bb_ref = gat_refs[4 * li:4 * li + 4]

        # One MXU matmul yields both xW and all heads' (alpha_src | alpha_dst):
        # w_aug = [W | pad128(W @ a_proj)]  ->  [N, H*F + 128] f32.
        xw_all = jnp.dot(h, w_ref[...], preferred_element_type=jnp.float32)
        xwb = xw_all[:, :hf].astype(jnp.bfloat16)                 # [N, H*F] values
        alphas = xw_all[:, hf:hf + 2 * heads]                     # [N, 2H] f32
        src_t = alphas[:, :heads].T                               # [H, N]

        head_outs = []
        for hd in range(heads):                                   # static head loop
            src_row = src_t[hd:hd + 1, :]                         # [1, N] (source j)
            dst_col = alphas[:, heads + hd:heads + hd + 1]        # [N, 1] (target i)
            # e[i, j] = LeakyReLU(alpha_dst[i] + alpha_src[j]) on edge j -> i
            e = dst_col + src_row
            e = jnp.where(e > 0.0, e, NEG_SLOPE * e)
            e = e + mask                                          # -1e30 off-graph
            e = e - jnp.max(e, axis=-1, keepdims=True)
            p = jnp.exp(e)                                        # masked -> exactly 0
            inv = pl.reciprocal(jnp.sum(p, axis=-1, keepdims=True), approx=True)
            attn = (p * inv).astype(jnp.bfloat16)                 # [N, N]
            head_outs.append(jnp.dot(
                attn, xwb[:, hd * fout:(hd + 1) * fout],
                preferred_element_type=jnp.float32))              # [N, F] value

        # Heads concatenated along the lane axis (128-aligned, no relayout).
        y = jnp.concatenate(head_outs, axis=1) + bias_ref[...]    # [N, H*F]
        z = _elu(_batchnorm_train(y, g_ref[...], bb_ref[...]))
        if li == n_layers - 1:
            # NOTE: could emit bf16 here to halve writeback if the consumer allows.
            o_ref[...] = z
        else:
            h = z.astype(jnp.bfloat16)


# ----------------------------------------------------------------------------
# One-time parameter / graph preparation (hoisted out of the per-call path).
# ----------------------------------------------------------------------------
def _build_a_proj(a_src, a_dst, heads, fout):
    # [H*F, 2H]: column h = a_src[h] on its head's block, column H+h = a_dst[h].
    proj = jnp.zeros((heads * fout, 2 * heads), jnp.float32)
    for hd in range(heads):
        proj = proj.at[hd * fout:(hd + 1) * fout, hd].set(a_src[hd])
        proj = proj.at[hd * fout:(hd + 1) * fout, heads + hd].set(a_dst[hd])
    return proj


def prepare_params(params, *, n_heads, fout=FOUT):
    """Run ONCE: pad/cast weights to bf16 and fold the attention projection
    into each GAT weight.  Returns a flat tuple of kernel operands."""
    prep = []
    fin = params["w1"].shape[0]
    fin_pad = pl.cdiv(fin, 128) * 128
    w1 = jnp.pad(params["w1"], ((0, fin_pad - fin), (0, 0)))
    for i, w in ((1, w1), (2, params["w2"]), (3, params["w3"])):
        prep += [w.astype(jnp.bfloat16), params[f"b{i}"],
                 params[f"bn{i}_g"], params[f"bn{i}_b"]]
    for lp in params["gat"]:
        a_proj = _build_a_proj(lp["a_src"], lp["a_dst"], n_heads, fout)  # f32
        w_alpha = lp["w"] @ a_proj                                       # [in, 2H] f32
        w_alpha = jnp.pad(w_alpha, ((0, 0), (0, 128 - 2 * n_heads)))     # lane-pad
        w_aug = jnp.concatenate([lp["w"], w_alpha], axis=1)              # [in, H*F+128]
        prep += [w_aug.astype(jnp.bfloat16), lp["bias"], lp["bn_g"], lp["bn_b"]]
    return tuple(jax.device_put(p) for p in prep), fin_pad


def build_mask(edge_index, n):
    """Run ONCE per (static) graph: dense additive mask with self-loops."""
    src, dst = edge_index[0], edge_index[1]
    adj = jnp.zeros((n, n), jnp.float32).at[dst, src].set(1.0)
    adj = jnp.maximum(adj, jnp.eye(n, dtype=jnp.float32))
    return jnp.where(adj > 0.0, 0.0, MASK_VALUE).astype(jnp.bfloat16)


# ----------------------------------------------------------------------------
# Fused forward call (jitted): only the feature pad/cast remains per-call.
# ----------------------------------------------------------------------------
def gatsy_forward(prep_weights, x, mask, *, n_heads, n_layers, fin_pad):
    n = x.shape[0]
    x_p = jnp.pad(x, ((0, 0), (0, fin_pad - x.shape[1]))).astype(jnp.bfloat16)
    inputs = [x_p, mask] + list(prep_weights)

    kernel = functools.partial(gatsy_fused_kernel, n_layers=n_layers,
                               heads=n_heads, fout=FOUT)
    return pl.pallas_call(
        kernel,
        out_shape=jax.ShapeDtypeStruct((n, n_heads * FOUT), jnp.float32),
        in_specs=[pl.BlockSpec(memory_space=pltpu.MemorySpace.VMEM)] * len(inputs),
        out_specs=pl.BlockSpec(memory_space=pltpu.MemorySpace.VMEM),
    )(*inputs)


# ----------------------------------------------------------------------------
# Deterministic synthetic parameter init (shapes from GATSY.__init__).
# ----------------------------------------------------------------------------
def init_params(key, *, n_heads, n_layers, fin=2613):
    keys = iter(jax.random.split(key, 64))

    def rnd(shape, scale=0.05):
        return (scale * jax.random.normal(next(keys), shape)).astype(jnp.float32)

    params = {}
    params["w1"] = rnd((fin, 256)); params["b1"] = rnd((1, 256))
    params["w2"] = rnd((256, 256)); params["b2"] = rnd((1, 256))
    params["w3"] = rnd((256, 256)); params["b3"] = rnd((1, 256))
    for i in (1, 2, 3):
        params[f"bn{i}_g"] = 1.0 + rnd((1, 256))
        params[f"bn{i}_b"] = rnd((1, 256))

    gat = []
    in_dim = 256
    for _ in range(n_layers):
        gat.append({
            "w": rnd((in_dim, n_heads * 256)),
            "a_src": rnd((n_heads, 256)),
            "a_dst": rnd((n_heads, 256)),
            "bias": rnd((1, n_heads * 256)),
            "bn_g": 1.0 + rnd((1, n_heads * 256)),
            "bn_b": rnd((1, n_heads * 256)),
        })
        in_dim = n_heads * 256
    params["gat"] = gat
    return params


if __name__ == "__main__":
    N_NODES = 32
    N_HEADS = 2
    N_LAYERS = 2
    FIN = 2613

    key = jax.random.PRNGKey(0)
    k_x, k_p = jax.random.split(key)

    x = jax.random.normal(k_x, (N_NODES, FIN), dtype=jnp.float32)
    # deterministic ring graph: i -> i+1 and i -> i-1 (mod N)
    idx = jnp.arange(N_NODES)
    src = jnp.concatenate([idx, idx])
    dst = jnp.concatenate([(idx + 1) % N_NODES, (idx - 1) % N_NODES])
    edge_index = jnp.stack([src, dst]).astype(jnp.int32)  # [2, E]

    params = init_params(k_p, n_heads=N_HEADS, n_layers=N_LAYERS, fin=FIN)

    # One-time preparation (hoisted out of the per-call path).
    prep_weights, fin_pad = prepare_params(params, n_heads=N_HEADS)
    mask = jax.device_put(build_mask(edge_index, N_NODES))

    fwd = jax.jit(functools.partial(gatsy_forward, n_heads=N_HEADS,
                                    n_layers=N_LAYERS, fin_pad=fin_pad))
    out = fwd(prep_weights, x, mask)
    out = jax.block_until_ready(out)

    assert out.shape == (N_NODES, N_HEADS * 256), out.shape
    assert bool(jnp.all(jnp.isfinite(out)))
    print("KERNEL_OK")
</pallas_src>

<mosaic_0001>
module attributes {stable_mosaic.version = 11 : i64} {
  func.func @gatsy_fused_kernel(%arg0: memref<32x2688xbf16, #tpu.memory_space<vmem>>, %arg1: memref<32x32xbf16, #tpu.memory_space<vmem>>, %arg2: memref<2688x256xbf16, #tpu.memory_space<vmem>>, %arg3: memref<1x256xf32, #tpu.memory_space<vmem>>, %arg4: memref<1x256xf32, #tpu.memory_space<vmem>>, %arg5: memref<1x256xf32, #tpu.memory_space<vmem>>, %arg6: memref<256x256xbf16, #tpu.memory_space<vmem>>, %arg7: memref<1x256xf32, #tpu.memory_space<vmem>>, %arg8: memref<1x256xf32, #tpu.memory_space<vmem>>, %arg9: memref<1x256xf32, #tpu.memory_space<vmem>>, %arg10: memref<256x256xbf16, #tpu.memory_space<vmem>>, %arg11: memref<1x256xf32, #tpu.memory_space<vmem>>, %arg12: memref<1x256xf32, #tpu.memory_space<vmem>>, %arg13: memref<1x256xf32, #tpu.memory_space<vmem>>, %arg14: memref<256x640xbf16, #tpu.memory_space<vmem>>, %arg15: memref<1x512xf32, #tpu.memory_space<vmem>>, %arg16: memref<1x512xf32, #tpu.memory_space<vmem>>, %arg17: memref<1x512xf32, #tpu.memory_space<vmem>>, %arg18: memref<512x640xbf16, #tpu.memory_space<vmem>>, %arg19: memref<1x512xf32, #tpu.memory_space<vmem>>, %arg20: memref<1x512xf32, #tpu.memory_space<vmem>>, %arg21: memref<1x512xf32, #tpu.memory_space<vmem>>, %arg22: memref<32x512xf32, #tpu.memory_space<vmem>>) attributes {dimension_semantics = [], scalar_prefetch = 0 : i64, scratch_operands = 0 : i64, tpu.core_type = #tpu.core_type<tc>} {
    %c0 = arith.constant 0 : index
    %c0_0 = arith.constant 0 : index
    %0 = vector.load %arg1[%c0, %c0_0] : memref<32x32xbf16, #tpu.memory_space<vmem>>, vector<32x32xbf16>
    %c0_1 = arith.constant 0 : index
    %c0_2 = arith.constant 0 : index
    %1 = vector.load %arg0[%c0_1, %c0_2] : memref<32x2688xbf16, #tpu.memory_space<vmem>>, vector<32x2688xbf16>
    %c0_3 = arith.constant 0 : index
    %c0_4 = arith.constant 0 : index
    %2 = vector.load %arg2[%c0_3, %c0_4] : memref<2688x256xbf16, #tpu.memory_space<vmem>>, vector<2688x256xbf16>
    %cst = arith.constant dense<0.000000e+00> : vector<32x256xf32>
    %3 = tpu.matmul %1, %2, %cst {dimension_numbers = #tpu.dot_dimension_numbers<[1], [0], [0], [1], [0, 0, 1, 1], [], []>} : vector<32x2688xbf16>, vector<2688x256xbf16>, vector<32x256xf32> -> vector<32x256xf32>
    %c0_5 = arith.constant 0 : index
    %c0_6 = arith.constant 0 : index
    %4 = vector.load %arg3[%c0_5, %c0_6] : memref<1x256xf32, #tpu.memory_space<vmem>>, vector<1x256xf32>
    %5 = vector.broadcast %4 : vector<1x256xf32> to vector<32x256xf32>
    %6 = arith.addf %3, %5 : vector<32x256xf32>
    %c0_7 = arith.constant 0 : index
    %c0_8 = arith.constant 0 : index
    %7 = vector.load %arg4[%c0_7, %c0_8] : memref<1x256xf32, #tpu.memory_space<vmem>>, vector<1x256xf32>
    %c0_9 = arith.constant 0 : index
    %c0_10 = arith.constant 0 : index
    %8 = vector.load %arg5[%c0_9, %c0_10] : memref<1x256xf32, #tpu.memory_space<vmem>>, vector<1x256xf32>
    %cst_11 = arith.constant dense<0.000000e+00> : vector<256xf32>
    %9 = vector.multi_reduction <add>, %6, %cst_11 [0] : vector<32x256xf32> to vector<256xf32>
    %10 = vector.shape_cast %9 : vector<256xf32> to vector<1x256xf32>
    %cst_12 = arith.constant 3.200000e+01 : f32
    %11 = vector.broadcast %cst_12 : f32 to vector<1x256xf32>
    %12 = arith.divf %10, %11 : vector<1x256xf32>
    %13 = vector.broadcast %12 : vector<1x256xf32> to vector<32x256xf32>
    %14 = arith.subf %6, %13 : vector<32x256xf32>
    %15 = arith.mulf %14, %14 : vector<32x256xf32>
    %cst_13 = arith.constant dense<0.000000e+00> : vector<256xf32>
    %16 = vector.multi_reduction <add>, %15, %cst_13 [0] : vector<32x256xf32> to vector<256xf32>
    %17 = vector.shape_cast %16 : vector<256xf32> to vector<1x256xf32>
    %cst_14 = arith.constant 3.200000e+01 : f32
    %18 = vector.broadcast %cst_14 : f32 to vector<1x256xf32>
    %19 = arith.divf %17, %18 : vector<1x256xf32>
    %20 = vector.broadcast %12 : vector<1x256xf32> to vector<32x256xf32>
    %21 = arith.subf %6, %20 : vector<32x256xf32>
    %cst_15 = arith.constant 9.99999974E-6 : f32
    %22 = vector.broadcast %cst_15 : f32 to vector<1x256xf32>
    %23 = arith.addf %19, %22 : vector<1x256xf32>
    %24 = math.rsqrt %23 : vector<1x256xf32>
    %25 = vector.broadcast %24 : vector<1x256xf32> to vector<32x256xf32>
    %26 = arith.mulf %21, %25 : vector<32x256xf32>
    %27 = vector.broadcast %7 : vector<1x256xf32> to vector<32x256xf32>
    %28 = arith.mulf %26, %27 : vector<32x256xf32>
    %29 = vector.broadcast %8 : vector<1x256xf32> to vector<32x256xf32>
    %30 = arith.addf %28, %29 : vector<32x256xf32>
    %cst_16 = arith.constant 0.000000e+00 : f32
    %31 = vector.broadcast %cst_16 : f32 to vector<32x256xf32>
    %32 = arith.cmpf ogt, %30, %31 : vector<32x256xf32>
    %cst_17 = arith.constant 0.000000e+00 : f32
    %33 = vector.broadcast %cst_17 : f32 to vector<32x256xf32>
    %34 = arith.minimumf %30, %33 : vector<32x256xf32>
    %35 = math.exp %34 : vector<32x256xf32>
    %cst_18 = arith.constant 1.000000e+00 : f32
    %36 = vector.broadcast %cst_18 : f32 to vector<32x256xf32>
    %37 = arith.subf %35, %36 : vector<32x256xf32>
    %38 = arith.select %32, %30, %37 : vector<32x256xi1>, vector<32x256xf32>
    %39 = arith.truncf %38 : vector<32x256xf32> to vector<32x256xbf16>
    %c0_19 = arith.constant 0 : index
    %c0_20 = arith.constant 0 : index
    %40 = vector.load %arg6[%c0_19, %c0_20] : memref<256x256xbf16, #tpu.memory_space<vmem>>, vector<256x256xbf16>
    %cst_21 = arith.constant dense<0.000000e+00> : vector<32x256xf32>
    %41 = tpu.matmul %39, %40, %cst_21 {dimension_numbers = #tpu.dot_dimension_numbers<[1], [0], [0], [1], [0, 0, 1, 1], [], []>} : vector<32x256xbf16>, vector<256x256xbf16>, vector<32x256xf32> -> vector<32x256xf32>
    %c0_22 = arith.constant 0 : index
    %c0_23 = arith.constant 0 : index
    %42 = vector.load %arg7[%c0_22, %c0_23] : memref<1x256xf32, #tpu.memory_space<vmem>>, vector<1x256xf32>
    %43 = vector.broadcast %42 : vector<1x256xf32> to vector<32x256xf32>
    %44 = arith.addf %41, %43 : vector<32x256xf32>
    %c0_24 = arith.constant 0 : index
    %c0_25 = arith.constant 0 : index
    %45 = vector.load %arg8[%c0_24, %c0_25] : memref<1x256xf32, #tpu.memory_space<vmem>>, vector<1x256xf32>
    %c0_26 = arith.constant 0 : index
    %c0_27 = arith.constant 0 : index
    %46 = vector.load %arg9[%c0_26, %c0_27] : memref<1x256xf32, #tpu.memory_space<vmem>>, vector<1x256xf32>
    %cst_28 = arith.constant dense<0.000000e+00> : vector<256xf32>
    %47 = vector.multi_reduction <add>, %44, %cst_28 [0] : vector<32x256xf32> to vector<256xf32>
    %48 = vector.shape_cast %47 : vector<256xf32> to vector<1x256xf32>
    %cst_29 = arith.constant 3.200000e+01 : f32
    %49 = vector.broadcast %cst_29 : f32 to vector<1x256xf32>
    %50 = arith.divf %48, %49 : vector<1x256xf32>
    %51 = vector.broadcast %50 : vector<1x256xf32> to vector<32x256xf32>
    %52 = arith.subf %44, %51 : vector<32x256xf32>
    %53 = arith.mulf %52, %52 : vector<32x256xf32>
    %cst_30 = arith.constant dense<0.000000e+00> : vector<256xf32>
    %54 = vector.multi_reduction <add>, %53, %cst_30 [0] : vector<32x256xf32> to vector<256xf32>
    %55 = vector.shape_cast %54 : vector<256xf32> to vector<1x256xf32>
    %cst_31 = arith.constant 3.200000e+01 : f32
    %56 = vector.broadcast %cst_31 : f32 to vector<1x256xf32>
    %57 = arith.divf %55, %56 : vector<1x256xf32>
    %58 = vector.broadcast %50 : vector<1x256xf32> to vector<32x256xf32>
    %59 = arith.subf %44, %58 : vector<32x256xf32>
    %cst_32 = arith.constant 9.99999974E-6 : f32
    %60 = vector.broadcast %cst_32 : f32 to vector<1x256xf32>
    %61 = arith.addf %57, %60 : vector<1x256xf32>
    %62 = math.rsqrt %61 : vector<1x256xf32>
    %63 = vector.broadcast %62 : vector<1x256xf32> to vector<32x256xf32>
    %64 = arith.mulf %59, %63 : vector<32x256xf32>
    %65 = vector.broadcast %45 : vector<1x256xf32> to vector<32x256xf32>
    %66 = arith.mulf %64, %65 : vector<32x256xf32>
    %67 = vector.broadcast %46 : vector<1x256xf32> to vector<32x256xf32>
    %68 = arith.addf %66, %67 : vector<32x256xf32>
    %cst_33 = arith.constant 0.000000e+00 : f32
    %69 = vector.broadcast %cst_33 : f32 to vector<32x256xf32>
    %70 = arith.cmpf ogt, %68, %69 : vector<32x256xf32>
    %cst_34 = arith.constant 0.000000e+00 : f32
    %71 = vector.broadcast %cst_34 : f32 to vector<32x256xf32>
    %72 = arith.minimumf %68, %71 : vector<32x256xf32>
    %73 = math.exp %72 : vector<32x256xf32>
    %cst_35 = arith.constant 1.000000e+00 : f32
    %74 = vector.broadcast %cst_35 : f32 to vector<32x256xf32>
    %75 = arith.subf %73, %74 : vector<32x256xf32>
    %76 = arith.select %70, %68, %75 : vector<32x256xi1>, vector<32x256xf32>
    %77 = arith.truncf %76 : vector<32x256xf32> to vector<32x256xbf16>
    %c0_36 = arith.constant 0 : index
    %c0_37 = arith.constant 0 : index
    %78 = vector.load %arg10[%c0_36, %c0_37] : memref<256x256xbf16, #tpu.memory_space<vmem>>, vector<256x256xbf16>
    %cst_38 = arith.constant dense<0.000000e+00> : vector<32x256xf32>
    %79 = tpu.matmul %77, %78, %cst_38 {dimension_numbers = #tpu.dot_dimension_numbers<[1], [0], [0], [1], [0, 0, 1, 1], [], []>} : vector<32x256xbf16>, vector<256x256xbf16>, vector<32x256xf32> -> vector<32x256xf32>
    %c0_39 = arith.constant 0 : index
    %c0_40 = arith.constant 0 : index
    %80 = vector.load %arg11[%c0_39, %c0_40] : memref<1x256xf32, #tpu.memory_space<vmem>>, vector<1x256xf32>
    %81 = vector.broadcast %80 : vector<1x256xf32> to vector<32x256xf32>
    %82 = arith.addf %79, %81 : vector<32x256xf32>
    %c0_41 = arith.constant 0 : index
    %c0_42 = arith.constant 0 : index
    %83 = vector.load %arg12[%c0_41, %c0_42] : memref<1x256xf32, #tpu.memory_space<vmem>>, vector<1x256xf32>
    %c0_43 = arith.constant 0 : index
    %c0_44 = arith.constant 0 : index
    %84 = vector.load %arg13[%c0_43, %c0_44] : memref<1x256xf32, #tpu.memory_space<vmem>>, vector<1x256xf32>
    %cst_45 = arith.constant dense<0.000000e+00> : vector<256xf32>
    %85 = vector.multi_reduction <add>, %82, %cst_45 [0] : vector<32x256xf32> to vector<256xf32>
    %86 = vector.shape_cast %85 : vector<256xf32> to vector<1x256xf32>
    %cst_46 = arith.constant 3.200000e+01 : f32
    %87 = vector.broadcast %cst_46 : f32 to vector<1x256xf32>
    %88 = arith.divf %86, %87 : vector<1x256xf32>
    %89 = vector.broadcast %88 : vector<1x256xf32> to vector<32x256xf32>
    %90 = arith.subf %82, %89 : vector<32x256xf32>
    %91 = arith.mulf %90, %90 : vector<32x256xf32>
    %cst_47 = arith.constant dense<0.000000e+00> : vector<256xf32>
    %92 = vector.multi_reduction <add>, %91, %cst_47 [0] : vector<32x256xf32> to vector<256xf32>
    %93 = vector.shape_cast %92 : vector<256xf32> to vector<1x256xf32>
    %cst_48 = arith.constant 3.200000e+01 : f32
    %94 = vector.broadcast %cst_48 : f32 to vector<1x256xf32>
    %95 = arith.divf %93, %94 : vector<1x256xf32>
    %96 = vector.broadcast %88 : vector<1x256xf32> to vector<32x256xf32>
    %97 = arith.subf %82, %96 : vector<32x256xf32>
    %cst_49 = arith.constant 9.99999974E-6 : f32
    %98 = vector.broadcast %cst_49 : f32 to vector<1x256xf32>
    %99 = arith.addf %95, %98 : vector<1x256xf32>
    %100 = math.rsqrt %99 : vector<1x256xf32>
    %101 = vector.broadcast %100 : vector<1x256xf32> to vector<32x256xf32>
    %102 = arith.mulf %97, %101 : vector<32x256xf32>
    %103 = vector.broadcast %83 : vector<1x256xf32> to vector<32x256xf32>
    %104 = arith.mulf %102, %103 : vector<32x256xf32>
    %105 = vector.broadcast %84 : vector<1x256xf32> to vector<32x256xf32>
    %106 = arith.addf %104, %105 : vector<32x256xf32>
    %cst_50 = arith.constant 0.000000e+00 : f32
    %107 = vector.broadcast %cst_50 : f32 to vector<32x256xf32>
    %108 = arith.cmpf ogt, %106, %107 : vector<32x256xf32>
    %cst_51 = arith.constant 0.000000e+00 : f32
    %109 = vector.broadcast %cst_51 : f32 to vector<32x256xf32>
    %110 = arith.minimumf %106, %109 : vector<32x256xf32>
    %111 = math.exp %110 : vector<32x256xf32>
    %cst_52 = arith.constant 1.000000e+00 : f32
    %112 = vector.broadcast %cst_52 : f32 to vector<32x256xf32>
    %113 = arith.subf %111, %112 : vector<32x256xf32>
    %114 = arith.select %108, %106, %113 : vector<32x256xi1>, vector<32x256xf32>
    %115 = arith.truncf %114 : vector<32x256xf32> to vector<32x256xbf16>
    %c0_53 = arith.constant 0 : index
    %c0_54 = arith.constant 0 : index
    %116 = vector.load %arg14[%c0_53, %c0_54] : memref<256x640xbf16, #tpu.memory_space<vmem>>, vector<256x640xbf16>
    %cst_55 = arith.constant dense<0.000000e+00> : vector<32x640xf32>
    %117 = tpu.matmul %115, %116, %cst_55 {dimension_numbers = #tpu.dot_dimension_numbers<[1], [0], [0], [1], [0, 0, 1, 1], [], []>} : vector<32x256xbf16>, vector<256x640xbf16>, vector<32x640xf32> -> vector<32x640xf32>
    %118 = vector.extract_strided_slice %117 {offsets = [0, 0], sizes = [32, 512], strides = [1, 1]} : vector<32x640xf32> to vector<32x512xf32>
    %119 = arith.truncf %118 : vector<32x512xf32> to vector<32x512xbf16>
    %120 = vector.extract_strided_slice %117 {offsets = [0, 512], sizes = [32, 4], strides = [1, 1]} : vector<32x640xf32> to vector<32x4xf32>
    %121 = vector.extract_strided_slice %120 {offsets = [0, 0], sizes = [32, 2], strides = [1, 1]} : vector<32x4xf32> to vector<32x2xf32>
    %122 = tpu.transpose %121, [1, 0] : vector<32x2xf32> -> vector<2x32xf32>
    %123 = vector.extract_strided_slice %122 {offsets = [0, 0], sizes = [1, 32], strides = [1, 1]} : vector<2x32xf32> to vector<1x32xf32>
    %124 = vector.extract_strided_slice %120 {offsets = [0, 2], sizes = [32, 1], strides = [1, 1]} : vector<32x4xf32> to vector<32x1xf32>
    %125 = vector.broadcast %124 : vector<32x1xf32> to vector<32x32xf32>
    %126 = vector.broadcast %123 : vector<1x32xf32> to vector<32x32xf32>
    %127 = arith.addf %125, %126 : vector<32x32xf32>
    %cst_56 = arith.constant 0.000000e+00 : f32
    %128 = vector.broadcast %cst_56 : f32 to vector<32x32xf32>
    %129 = arith.cmpf ogt, %127, %128 : vector<32x32xf32>
    %cst_57 = arith.constant 2.000000e-01 : f32
    %130 = vector.broadcast %cst_57 : f32 to vector<32x32xf32>
    %131 = arith.mulf %130, %127 : vector<32x32xf32>
    %132 = arith.select %129, %127, %131 : vector<32x32xi1>, vector<32x32xf32>
    %133 = arith.extf %0 : vector<32x32xbf16> to vector<32x32xf32>
    %134 = arith.addf %132, %133 : vector<32x32xf32>
    %cst_58 = arith.constant dense<0xFF800000> : vector<32xf32>
    %135 = vector.multi_reduction <maximumf>, %134, %cst_58 [1] : vector<32x32xf32> to vector<32xf32>
    %136 = vector.shape_cast %135 : vector<32xf32> to vector<32x1xf32>
    %137 = vector.broadcast %136 : vector<32x1xf32> to vector<32x32xf32>
    %138 = arith.subf %134, %137 : vector<32x32xf32>
    %139 = math.exp %138 : vector<32x32xf32>
    %cst_59 = arith.constant dense<0.000000e+00> : vector<32xf32>
    %140 = vector.multi_reduction <add>, %139, %cst_59 [1] : vector<32x32xf32> to vector<32xf32>
    %141 = vector.shape_cast %140 : vector<32xf32> to vector<32x1xf32>
    %142 = tpu.reciprocal %141 {approx = true} : vector<32x1xf32> -> vector<32x1xf32>
    %143 = vector.broadcast %142 : vector<32x1xf32> to vector<32x32xf32>
    %144 = arith.mulf %139, %143 : vector<32x32xf32>
    %145 = arith.truncf %144 : vector<32x32xf32> to vector<32x32xbf16>
    %146 = vector.extract_strided_slice %119 {offsets = [0, 0], sizes = [32, 256], strides = [1, 1]} : vector<32x512xbf16> to vector<32x256xbf16>
    %cst_60 = arith.constant dense<0.000000e+00> : vector<32x256xf32>
    %147 = tpu.matmul %145, %146, %cst_60 {dimension_numbers = #tpu.dot_dimension_numbers<[1], [0], [0], [1], [0, 0, 1, 1], [], []>} : vector<32x32xbf16>, vector<32x256xbf16>, vector<32x256xf32> -> vector<32x256xf32>
    %148 = vector.extract_strided_slice %122 {offsets = [1, 0], sizes = [1, 32], strides = [1, 1]} : vector<2x32xf32> to vector<1x32xf32>
    %149 = vector.extract_strided_slice %120 {offsets = [0, 3], sizes = [32, 1], strides = [1, 1]} : vector<32x4xf32> to vector<32x1xf32>
    %150 = vector.broadcast %149 : vector<32x1xf32> to vector<32x32xf32>
    %151 = vector.broadcast %148 : vector<1x32xf32> to vector<32x32xf32>
    %152 = arith.addf %150, %151 : vector<32x32xf32>
    %cst_61 = arith.constant 0.000000e+00 : f32
    %153 = vector.broadcast %cst_61 : f32 to vector<32x32xf32>
    %154 = arith.cmpf ogt, %152, %153 : vector<32x32xf32>
    %cst_62 = arith.constant 2.000000e-01 : f32
    %155 = vector.broadcast %cst_62 : f32 to vector<32x32xf32>
    %156 = arith.mulf %155, %152 : vector<32x32xf32>
    %157 = arith.select %154, %152, %156 : vector<32x32xi1>, vector<32x32xf32>
    %158 = arith.extf %0 : vector<32x32xbf16> to vector<32x32xf32>
    %159 = arith.addf %157, %158 : vector<32x32xf32>
    %cst_63 = arith.constant dense<0xFF800000> : vector<32xf32>
    %160 = vector.multi_reduction <maximumf>, %159, %cst_63 [1] : vector<32x32xf32> to vector<32xf32>
    %161 = vector.shape_cast %160 : vector<32xf32> to vector<32x1xf32>
    %162 = vector.broadcast %161 : vector<32x1xf32> to vector<32x32xf32>
    %163 = arith.subf %159, %162 : vector<32x32xf32>
    %164 = math.exp %163 : vector<32x32xf32>
    %cst_64 = arith.constant dense<0.000000e+00> : vector<32xf32>
    %165 = vector.multi_reduction <add>, %164, %cst_64 [1] : vector<32x32xf32> to vector<32xf32>
    %166 = vector.shape_cast %165 : vector<32xf32> to vector<32x1xf32>
    %167 = tpu.reciprocal %166 {approx = true} : vector<32x1xf32> -> vector<32x1xf32>
    %168 = vector.broadcast %167 : vector<32x1xf32> to vector<32x32xf32>
    %169 = arith.mulf %164, %168 : vector<32x32xf32>
    %170 = arith.truncf %169 : vector<32x32xf32> to vector<32x32xbf16>
    %171 = vector.extract_strided_slice %119 {offsets = [0, 256], sizes = [32, 256], strides = [1, 1]} : vector<32x512xbf16> to vector<32x256xbf16>
    %cst_65 = arith.constant dense<0.000000e+00> : vector<32x256xf32>
    %172 = tpu.matmul %170, %171, %cst_65 {dimension_numbers = #tpu.dot_dimension_numbers<[1], [0], [0], [1], [0, 0, 1, 1], [], []>} : vector<32x32xbf16>, vector<32x256xbf16>, vector<32x256xf32> -> vector<32x256xf32>
    %173 = tpu.concatenate %147, %172 in 1 : vector<32x256xf32>, vector<32x256xf32> -> vector<32x512xf32>
    %c0_66 = arith.constant 0 : index
    %c0_67 = arith.constant 0 : index
    %174 = vector.load %arg15[%c0_66, %c0_67] : memref<1x512xf32, #tpu.memory_space<vmem>>, vector<1x512xf32>
    %175 = vector.broadcast %174 : vector<1x512xf32> to vector<32x512xf32>
    %176 = arith.addf %173, %175 : vector<32x512xf32>
    %c0_68 = arith.constant 0 : index
    %c0_69 = arith.constant 0 : index
    %177 = vector.load %arg16[%c0_68, %c0_69] : memref<1x512xf32, #tpu.memory_space<vmem>>, vector<1x512xf32>
    %c0_70 = arith.constant 0 : index
    %c0_71 = arith.constant 0 : index
    %178 = vector.load %arg17[%c0_70, %c0_71] : memref<1x512xf32, #tpu.memory_space<vmem>>, vector<1x512xf32>
    %cst_72 = arith.constant dense<0.000000e+00> : vector<512xf32>
    %179 = vector.multi_reduction <add>, %176, %cst_72 [0] : vector<32x512xf32> to vector<512xf32>
    %180 = vector.shape_cast %179 : vector<512xf32> to vector<1x512xf32>
    %cst_73 = arith.constant 3.200000e+01 : f32
    %181 = vector.broadcast %cst_73 : f32 to vector<1x512xf32>
    %182 = arith.divf %180, %181 : vector<1x512xf32>
    %183 = vector.broadcast %182 : vector<1x512xf32> to vector<32x512xf32>
    %184 = arith.subf %176, %183 : vector<32x512xf32>
    %185 = arith.mulf %184, %184 : vector<32x512xf32>
    %cst_74 = arith.constant dense<0.000000e+00> : vector<512xf32>
    %186 = vector.multi_reduction <add>, %185, %cst_74 [0] : vector<32x512xf32> to vector<512xf32>
    %187 = vector.shape_cast %186 : vector<512xf32> to vector<1x512xf32>
    %cst_75 = arith.constant 3.200000e+01 : f32
    %188 = vector.broadcast %cst_75 : f32 to vector<1x512xf32>
    %189 = arith.divf %187, %188 : vector<1x512xf32>
    %190 = vector.broadcast %182 : vector<1x512xf32> to vector<32x512xf32>
    %191 = arith.subf %176, %190 : vector<32x512xf32>
    %cst_76 = arith.constant 9.99999974E-6 : f32
    %192 = vector.broadcast %cst_76 : f32 to vector<1x512xf32>
    %193 = arith.addf %189, %192 : vector<1x512xf32>
    %194 = math.rsqrt %193 : vector<1x512xf32>
    %195 = vector.broadcast %194 : vector<1x512xf32> to vector<32x512xf32>
    %196 = arith.mulf %191, %195 : vector<32x512xf32>
    %197 = vector.broadcast %177 : vector<1x512xf32> to vector<32x512xf32>
    %198 = arith.mulf %196, %197 : vector<32x512xf32>
    %199 = vector.broadcast %178 : vector<1x512xf32> to vector<32x512xf32>
    %200 = arith.addf %198, %199 : vector<32x512xf32>
    %cst_77 = arith.constant 0.000000e+00 : f32
    %201 = vector.broadcast %cst_77 : f32 to vector<32x512xf32>
    %202 = arith.cmpf ogt, %200, %201 : vector<32x512xf32>
    %cst_78 = arith.constant 0.000000e+00 : f32
    %203 = vector.broadcast %cst_78 : f32 to vector<32x512xf32>
    %204 = arith.minimumf %200, %203 : vector<32x512xf32>
    %205 = math.exp %204 : vector<32x512xf32>
    %cst_79 = arith.constant 1.000000e+00 : f32
    %206 = vector.broadcast %cst_79 : f32 to vector<32x512xf32>
    %207 = arith.subf %205, %206 : vector<32x512xf32>
    %208 = arith.select %202, %200, %207 : vector<32x512xi1>, vector<32x512xf32>
    %209 = arith.truncf %208 : vector<32x512xf32> to vector<32x512xbf16>
    %c0_80 = arith.constant 0 : index
    %c0_81 = arith.constant 0 : index
    %210 = vector.load %arg18[%c0_80, %c0_81] : memref<512x640xbf16, #tpu.memory_space<vmem>>, vector<512x640xbf16>
    %cst_82 = arith.constant dense<0.000000e+00> : vector<32x640xf32>
    %211 = tpu.matmul %209, %210, %cst_82 {dimension_numbers = #tpu.dot_dimension_numbers<[1], [0], [0], [1], [0, 0, 1, 1], [], []>} : vector<32x512xbf16>, vector<512x640xbf16>, vector<32x640xf32> -> vector<32x640xf32>
    %212 = vector.extract_strided_slice %211 {offsets = [0, 0], sizes = [32, 512], strides = [1, 1]} : vector<32x640xf32> to vector<32x512xf32>
    %213 = arith.truncf %212 : vector<32x512xf32> to vector<32x512xbf16>
    %214 = vector.extract_strided_slice %211 {offsets = [0, 512], sizes = [32, 4], strides = [1, 1]} : vector<32x640xf32> to vector<32x4xf32>
    %215 = vector.extract_strided_slice %214 {offsets = [0, 0], sizes = [32, 2], strides = [1, 1]} : vector<32x4xf32> to vector<32x2xf32>
    %216 = tpu.transpose %215, [1, 0] : vector<32x2xf32> -> vector<2x32xf32>
    %217 = vector.extract_strided_slice %216 {offsets = [0, 0], sizes = [1, 32], strides = [1, 1]} : vector<2x32xf32> to vector<1x32xf32>
    %218 = vector.extract_strided_slice %214 {offsets = [0, 2], sizes = [32, 1], strides = [1, 1]} : vector<32x4xf32> to vector<32x1xf32>
    %219 = vector.broadcast %218 : vector<32x1xf32> to vector<32x32xf32>
    %220 = vector.broadcast %217 : vector<1x32xf32> to vector<32x32xf32>
    %221 = arith.addf %219, %220 : vector<32x32xf32>
    %cst_83 = arith.constant 0.000000e+00 : f32
    %222 = vector.broadcast %cst_83 : f32 to vector<32x32xf32>
    %223 = arith.cmpf ogt, %221, %222 : vector<32x32xf32>
    %cst_84 = arith.constant 2.000000e-01 : f32
    %224 = vector.broadcast %cst_84 : f32 to vector<32x32xf32>
    %225 = arith.mulf %224, %221 : vector<32x32xf32>
    %226 = arith.select %223, %221, %225 : vector<32x32xi1>, vector<32x32xf32>
    %227 = arith.extf %0 : vector<32x32xbf16> to vector<32x32xf32>
    %228 = arith.addf %226, %227 : vector<32x32xf32>
    %cst_85 = arith.constant dense<0xFF800000> : vector<32xf32>
    %229 = vector.multi_reduction <maximumf>, %228, %cst_85 [1] : vector<32x32xf32> to vector<32xf32>
    %230 = vector.shape_cast %229 : vector<32xf32> to vector<32x1xf32>
    %231 = vector.broadcast %230 : vector<32x1xf32> to vector<32x32xf32>
    %232 = arith.subf %228, %231 : vector<32x32xf32>
    %233 = math.exp %232 : vector<32x32xf32>
    %cst_86 = arith.constant dense<0.000000e+00> : vector<32xf32>
    %234 = vector.multi_reduction <add>, %233, %cst_86 [1] : vector<32x32xf32> to vector<32xf32>
    %235 = vector.shape_cast %234 : vector<32xf32> to vector<32x1xf32>
    %236 = tpu.reciprocal %235 {approx = true} : vector<32x1xf32> -> vector<32x1xf32>
    %237 = vector.broadcast %236 : vector<32x1xf32> to vector<32x32xf32>
    %238 = arith.mulf %233, %237 : vector<32x32xf32>
    %239 = arith.truncf %238 : vector<32x32xf32> to vector<32x32xbf16>
    %240 = vector.extract_strided_slice %213 {offsets = [0, 0], sizes = [32, 256], strides = [1, 1]} : vector<32x512xbf16> to vector<32x256xbf16>
    %cst_87 = arith.constant dense<0.000000e+00> : vector<32x256xf32>
    %241 = tpu.matmul %239, %240, %cst_87 {dimension_numbers = #tpu.dot_dimension_numbers<[1], [0], [0], [1], [0, 0, 1, 1], [], []>} : vector<32x32xbf16>, vector<32x256xbf16>, vector<32x256xf32> -> vector<32x256xf32>
    %242 = vector.extract_strided_slice %216 {offsets = [1, 0], sizes = [1, 32], strides = [1, 1]} : vector<2x32xf32> to vector<1x32xf32>
    %243 = vector.extract_strided_slice %214 {offsets = [0, 3], sizes = [32, 1], strides = [1, 1]} : vector<32x4xf32> to vector<32x1xf32>
    %244 = vector.broadcast %243 : vector<32x1xf32> to vector<32x32xf32>
    %245 = vector.broadcast %242 : vector<1x32xf32> to vector<32x32xf32>
    %246 = arith.addf %244, %245 : vector<32x32xf32>
    %cst_88 = arith.constant 0.000000e+00 : f32
    %247 = vector.broadcast %cst_88 : f32 to vector<32x32xf32>
    %248 = arith.cmpf ogt, %246, %247 : vector<32x32xf32>
    %cst_89 = arith.constant 2.000000e-01 : f32
    %249 = vector.broadcast %cst_89 : f32 to vector<32x32xf32>
    %250 = arith.mulf %249, %246 : vector<32x32xf32>
    %251 = arith.select %248, %246, %250 : vector<32x32xi1>, vector<32x32xf32>
    %252 = arith.extf %0 : vector<32x32xbf16> to vector<32x32xf32>
    %253 = arith.addf %251, %252 : vector<32x32xf32>
    %cst_90 = arith.constant dense<0xFF800000> : vector<32xf32>
    %254 = vector.multi_reduction <maximumf>, %253, %cst_90 [1] : vector<32x32xf32> to vector<32xf32>
    %255 = vector.shape_cast %254 : vector<32xf32> to vector<32x1xf32>
    %256 = vector.broadcast %255 : vector<32x1xf32> to vector<32x32xf32>
    %257 = arith.subf %253, %256 : vector<32x32xf32>
    %258 = math.exp %257 : vector<32x32xf32>
    %cst_91 = arith.constant dense<0.000000e+00> : vector<32xf32>
    %259 = vector.multi_reduction <add>, %258, %cst_91 [1] : vector<32x32xf32> to vector<32xf32>
    %260 = vector.shape_cast %259 : vector<32xf32> to vector<32x1xf32>
    %261 = tpu.reciprocal %260 {approx = true} : vector<32x1xf32> -> vector<32x1xf32>
    %262 = vector.broadcast %261 : vector<32x1xf32> to vector<32x32xf32>
    %263 = arith.mulf %258, %262 : vector<32x32xf32>
    %264 = arith.truncf %263 : vector<32x32xf32> to vector<32x32xbf16>
    %265 = vector.extract_strided_slice %213 {offsets = [0, 256], sizes = [32, 256], strides = [1, 1]} : vector<32x512xbf16> to vector<32x256xbf16>
    %cst_92 = arith.constant dense<0.000000e+00> : vector<32x256xf32>
    %266 = tpu.matmul %264, %265, %cst_92 {dimension_numbers = #tpu.dot_dimension_numbers<[1], [0], [0], [1], [0, 0, 1, 1], [], []>} : vector<32x32xbf16>, vector<32x256xbf16>, vector<32x256xf32> -> vector<32x256xf32>
    %267 = tpu.concatenate %241, %266 in 1 : vector<32x256xf32>, vector<32x256xf32> -> vector<32x512xf32>
    %c0_93 = arith.constant 0 : index
    %c0_94 = arith.constant 0 : index
    %268 = vector.load %arg19[%c0_93, %c0_94] : memref<1x512xf32, #tpu.memory_space<vmem>>, vector<1x512xf32>
    %269 = vector.broadcast %268 : vector<1x512xf32> to vector<32x512xf32>
    %270 = arith.addf %267, %269 : vector<32x512xf32>
    %c0_95 = arith.constant 0 : index
    %c0_96 = arith.constant 0 : index
    %271 = vector.load %arg20[%c0_95, %c0_96] : memref<1x512xf32, #tpu.memory_space<vmem>>, vector<1x512xf32>
    %c0_97 = arith.constant 0 : index
    %c0_98 = arith.constant 0 : index
    %272 = vector.load %arg21[%c0_97, %c0_98] : memref<1x512xf32, #tpu.memory_space<vmem>>, vector<1x512xf32>
    %cst_99 = arith.constant dense<0.000000e+00> : vector<512xf32>
    %273 = vector.multi_reduction <add>, %270, %cst_99 [0] : vector<32x512xf32> to vector<512xf32>
    %274 = vector.shape_cast %273 : vector<512xf32> to vector<1x512xf32>
    %cst_100 = arith.constant 3.200000e+01 : f32
    %275 = vector.broadcast %cst_100 : f32 to vector<1x512xf32>
    %276 = arith.divf %274, %275 : vector<1x512xf32>
    %277 = vector.broadcast %276 : vector<1x512xf32> to vector<32x512xf32>
    %278 = arith.subf %270, %277 : vector<32x512xf32>
    %279 = arith.mulf %278, %278 : vector<32x512xf32>
    %cst_101 = arith.constant dense<0.000000e+00> : vector<512xf32>
    %280 = vector.multi_reduction <add>, %279, %cst_101 [0] : vector<32x512xf32> to vector<512xf32>
    %281 = vector.shape_cast %280 : vector<512xf32> to vector<1x512xf32>
    %cst_102 = arith.constant 3.200000e+01 : f32
    %282 = vector.broadcast %cst_102 : f32 to vector<1x512xf32>
    %283 = arith.divf %281, %282 : vector<1x512xf32>
    %284 = vector.broadcast %276 : vector<1x512xf32> to vector<32x512xf32>
    %285 = arith.subf %270, %284 : vector<32x512xf32>
    %cst_103 = arith.constant 9.99999974E-6 : f32
    %286 = vector.broadcast %cst_103 : f32 to vector<1x512xf32>
    %287 = arith.addf %283, %286 : vector<1x512xf32>
    %288 = math.rsqrt %287 : vector<1x512xf32>
    %289 = vector.broadcast %288 : vector<1x512xf32> to vector<32x512xf32>
    %290 = arith.mulf %285, %289 : vector<32x512xf32>
    %291 = vector.broadcast %271 : vector<1x512xf32> to vector<32x512xf32>
    %292 = arith.mulf %290, %291 : vector<32x512xf32>
    %293 = vector.broadcast %272 : vector<1x512xf32> to vector<32x512xf32>
    %294 = arith.addf %292, %293 : vector<32x512xf32>
    %cst_104 = arith.constant 0.000000e+00 : f32
    %295 = vector.broadcast %cst_104 : f32 to vector<32x512xf32>
    %296 = arith.cmpf ogt, %294, %295 : vector<32x512xf32>
    %cst_105 = arith.constant 0.000000e+00 : f32
    %297 = vector.broadcast %cst_105 : f32 to vector<32x512xf32>
    %298 = arith.minimumf %294, %297 : vector<32x512xf32>
    %299 = math.exp %298 : vector<32x512xf32>
    %cst_106 = arith.constant 1.000000e+00 : f32
    %300 = vector.broadcast %cst_106 : f32 to vector<32x512xf32>
    %301 = arith.subf %299, %300 : vector<32x512xf32>
    %302 = arith.select %296, %294, %301 : vector<32x512xi1>, vector<32x512xf32>
    %c0_107 = arith.constant 0 : index
    %c0_108 = arith.constant 0 : index
    %303 = vector.load %arg22[%c0_107, %c0_108] : memref<32x512xf32, #tpu.memory_space<vmem>>, vector<32x512xf32>
    tpu.vector_store %arg22[%c0_107, %c0_108], %302 {strides = array<i32>} : memref<32x512xf32, #tpu.memory_space<vmem>>, vector<32x512xf32>,
    return
  }
}

</mosaic_0001>

<bundles_post_ra>
// kernel: gatsy_forward.1
= control target key start
LH: loop header
LB: loop body
LE: loop exit
PB: predicated region body
PF: predicated region fallthrough
CT: control target
= control target key end

     0   :  { %s11521_s0 = inlined_call_operand.vmem [shape: bf16[32,2688], index: 0, kind: input, shape index: {}]   ;;  %s11522_s1 = inlined_call_operand.hbm [shape: bf16[32,32], index: 1, kind: input, shape index: {}]   ;;  %s11523_s2 = inlined_call_operand.hbm [shape: bf16[2688,256], index: 2, kind: input, shape index: {}]   ;;  %s11524_s3 = inlined_call_operand.hbm [shape: f32[1,256], index: 3, kind: input, shape index: {}]   ;;  %s11525_s4 = inlined_call_operand.hbm [shape: f32[1,256], index: 4, kind: input, shape index: {}]   ;;  %s11526_s5 = inlined_call_operand.hbm [shape: f32[1,256], index: 5, kind: input, shape index: {}]   ;;  %s11527_s6 = inlined_call_operand.hbm [shape: bf16[256,256], index: 6, kind: input, shape index: {}]   ;;  %s11528_s7 = inlined_call_operand.hbm [shape: f32[1,256], index: 7, kind: input, shape index: {}]   ;;  %s11529_s8 = inlined_call_operand.hbm [shape: f32[1,256], index: 8, kind: input, shape index: {}]   ;;  %s11530_s9 = inlined_call_operand.hbm [shape: f32[1,256], index: 9, kind: input, shape index: {}]   ;;  %s11531_s10 = inlined_call_operand.hbm [shape: bf16[256,256], index: 10, kind: input, shape index: {}]   ;;  %s11532_s11 = inlined_call_operand.hbm [shape: f32[1,256], index: 11, kind: input, shape index: {}]   ;;  %s11533_s12 = inlined_call_operand.hbm [shape: f32[1,256], index: 12, kind: input, shape index: {}]   ;;  %s11534_s13 = inlined_call_operand.hbm [shape: f32[1,256], index: 13, kind: input, shape index: {}]   ;;  %s11535_s14 = inlined_call_operand.hbm [shape: bf16[256,640], index: 14, kind: input, shape index: {}]   ;;  %s11536_s15 = inlined_call_operand.hbm [shape: f32[1,512], index: 15, kind: input, shape index: {}]   ;;  %s11537_s16 = inlined_call_operand.hbm [shape: f32[1,512], index: 16, kind: input, shape index: {}]   ;;  %s11538_s17 = inlined_call_operand.hbm [shape: f32[1,512], index: 17, kind: input, shape index: {}]   ;;  %s11539_s18 = inlined_call_operand.hbm [shape: bf16[512,640], index: 18, kind: input, shape index: {}]   ;;  %s11540_s19 = inlined_call_operand.hbm [shape: f32[1,512], index: 19, kind: input, shape index: {}]   ;;  %s11541_s20 = inlined_call_operand.hbm [shape: f32[1,512], index: 20, kind: input, shape index: {}]   ;;  %s11542_s21 = inlined_call_operand.hbm [shape: f32[1,512], index: 21, kind: input, shape index: {}]   ;;  %s11543_s22 = inlined_call_operand.hbm [shape: f32[32,512], index: 22, kind: output, shape index: {}]  }
   0x1   :  { %11554 = sst [smem:[#allocation48_spill]] %s11521_s0 }
   0x2   :  { %11555 = sst [smem:[#allocation49_spill]] %s11522_s1 }
   0x3   :  { %11556 = sst [smem:[#allocation50_spill]] %s11523_s2 }
   0x4   :  { %11557 = sst [smem:[#allocation51_spill]] %s11524_s3 }
   0x5   :  { %11558 = sst [smem:[#allocation52_spill]] %s11525_s4 }
   0x6   :  { %11559 = sst [smem:[#allocation53_spill]] %s11526_s5 }
   0x7   :  { %11560 = sst [smem:[#allocation54_spill]] %s11527_s6 }
   0x8   :  { %11561 = sst [smem:[#allocation55_spill]] %s11540_s19 }
   0x9   :  { %11562 = sst [smem:[#allocation56_spill]] %s11542_s21 }
   0xa   :  { %11563 = sst [smem:[#allocation57_spill]] %s11543_s22 }
   0xb   :  { %27 = vsyncpa [#allocation3], 0 }
   0xc   :  { %28 = vsyncpa [#allocation6], 0 }
   0xd   :  { %29 = vsyncpa [#allocation9], 0 }
   0xe   :  { %30 = vsyncpa [#allocation12], 0 }
   0xf   :  { %31 = vsyncpa [#allocation15], 0 }
  0x10   :  { %32 = vsyncpa [#allocation18], 0 }
  0x11   :  { %33 = vsyncpa [#allocation21], 0 }
  0x12   :  { %34 = vsyncpa [#allocation24], 0 }
  0x13   :  { %35 = vsyncpa [#allocation27], 0 }
  0x14   :  { %36 = vsyncpa [#allocation30], 0 }
  0x15   :  { %37 = vsyncpa [#allocation33], 0 }
  0x16   :  { %38 = vsyncpa [#allocation4], 0  ;;  %s10306_s3 = smov [#allocation5]   ;;  %s11564_s4 = sld [smem:[#allocation50_spill]] }
  0x17   :  { %s58_s28 = sshll.u32 %s10306_s3, 4  ;;  %s59_s28 = int_to_ptr.vmem [resolvable:$true] %s58_s28 }
  0x1c   :  { %s9798_s0 = scalar_lea.hbm %s11564_s4, 43008 }
  0x1d   :  { %p9799_p0 = scmp.ne.s32.totalorder %s11564_s4, %s9798_s0  ;;  %p9802_p1 = scmp.lt.u32.totalorder %s9798_s0, %s11564_s4 }
  0x1f   :  { %p9804_p2 = pnand %p9802_p1, %p9799_p0 }
  0x21   :  { %9807 = shalt.err (!%p9804_p2)
}
  0x22   :  { %s9808_s6 = scalar_lea.vmem %s59_s28, 43008  ;;  %p9813_p4 = scmp.lt.s32.totalorder %s59_s28, %s59_s28 }
  0x23   :  { %p9809_p3 = scmp.ne.s32.totalorder %s59_s28, %s9808_s6  ;;  %p9814_p5 = scmp.lt.s32.totalorder %s9808_s6, %s9808_s6 }
  0x25   :  { %p9815_p6 = por %p9814_p5, %p9813_p4 }
  0x27   :  { %p9816_p7 = pnand %p9815_p6, %p9809_p3 }
  0x29   :  { %9819 = shalt.err (!%p9816_p7)
}
  0x2a   :  { %s10307_s25 = smov 128   ;;  %s10308_s26 = smov 8  }
  0x2b   :  { %64 = dma.hbm_to_vmem [thread:$0]  %s11564_s4, 43008, %s59_s28, [#allocation6], %s10307_s25, %s10307_s25, %s10308_s26  }
  0x2c   :  { %s10309_s3 = smov [#allocation8]   ;;  %s10310_s30 = smov [#allocation11]  }
  0x2d   :  { %s81_s29 = sshll.u32 %s10309_s3, 4  ;;  %s100_s0 = sshll.u32 %s10310_s30, 4  ;;  %s82_s29 = int_to_ptr.vmem [resolvable:$true] %s81_s29  ;;  %s101_s0 = int_to_ptr.vmem [resolvable:$true] %s100_s0 }
  0x2e   :  { %s11565_s5 = sld [smem:[#allocation52_spill]] }
  0x34   :  { %s9820_s24 = scalar_lea.hbm %s11565_s5, 32 }
  0x35   :  { %p9821_p8 = scmp.ne.s32.totalorder %s11565_s5, %s9820_s24  ;;  %p9824_p9 = scmp.lt.u32.totalorder %s9820_s24, %s11565_s5 }
  0x37   :  { %p9826_p10 = pnand %p9824_p9, %p9821_p8 }
  0x39   :  { %9829 = shalt.err (!%p9826_p10)
}
  0x3a   :  { %s9830_s28 = scalar_lea.vmem %s82_s29, 32  ;;  %p9835_p12 = scmp.lt.s32.totalorder %s82_s29, %s82_s29 }
  0x3b   :  { %p9831_p11 = scmp.ne.s32.totalorder %s82_s29, %s9830_s28  ;;  %p9836_p13 = scmp.lt.s32.totalorder %s9830_s28, %s9830_s28 }
  0x3d   :  { %p9837_p0 = por %p9836_p13, %p9835_p12 }
  0x3f   :  { %p9838_p1 = pnand %p9837_p0, %p9831_p11 }
  0x41   :  { %9841 = shalt.err (!%p9838_p1)
}
  0x42   :  { %84 = dma.hbm_to_vmem [thread:$0]  %s11565_s5, 32, %s82_s29, [#allocation9]  }
  0x43   :  { %s11566_s3 = sld [smem:[#allocation54_spill]] }
  0x49   :  { %s9842_s30 = scalar_lea.hbm %s11566_s3, 4096 }
  0x4a   :  { %p9843_p2 = scmp.ne.s32.totalorder %s11566_s3, %s9842_s30  ;;  %p9846_p3 = scmp.lt.u32.totalorder %s9842_s30, %s11566_s3 }
  0x4c   :  { %p9848_p4 = pnand %p9846_p3, %p9843_p2 }
  0x4e   :  { %9851 = shalt.err (!%p9848_p4)
}
  0x4f   :  { %s9852_s24 = scalar_lea.vmem %s101_s0, 4096  ;;  %p9857_p6 = scmp.lt.s32.totalorder %s101_s0, %s101_s0 }
  0x50   :  { %p9853_p5 = scmp.ne.s32.totalorder %s101_s0, %s9852_s24  ;;  %p9858_p7 = scmp.lt.s32.totalorder %s9852_s24, %s9852_s24 }
  0x52   :  { %p9859_p8 = por %p9858_p7, %p9857_p6 }
  0x54   :  { %p9860_p9 = pnand %p9859_p8, %p9853_p5 }
  0x56   :  { %9863 = shalt.err (!%p9860_p9)
}
  0x57   :  { %106 = dma.hbm_to_vmem [thread:$0]  %s11566_s3, 4096, %s101_s0, [#allocation12], %s10307_s25, %s10307_s25, %s10308_s26  }
  0x58   :  { %s10311_s6 = smov [#allocation14]   ;;  %s10312_s4 = smov [#allocation17]  }
  0x59   :  { %s123_s28 = sshll.u32 %s10311_s6, 4  ;;  %s142_s2 = sshll.u32 %s10312_s4, 4  ;;  %s124_s28 = int_to_ptr.vmem [resolvable:$true] %s123_s28  ;;  %s143_s2 = int_to_ptr.vmem [resolvable:$true] %s142_s2 }
  0x5a   :  { %s9864_s30 = scalar_lea.hbm %s11529_s8, 32 }
  0x5b   :  { %p9865_p10 = scmp.ne.s32.totalorder %s11529_s8, %s9864_s30  ;;  %p9868_p11 = scmp.lt.u32.totalorder %s9864_s30, %s11529_s8 }
  0x5d   :  { %p9870_p12 = pnand %p9868_p11, %p9865_p10 }
  0x5f   :  { %9873 = shalt.err (!%p9870_p12)
}
  0x60   :  { %s9874_s0 = scalar_lea.vmem %s124_s28, 32  ;;  %p9879_p0 = scmp.lt.s32.totalorder %s124_s28, %s124_s28 }
  0x61   :  { %p9875_p13 = scmp.ne.s32.totalorder %s124_s28, %s9874_s0  ;;  %p9880_p1 = scmp.lt.s32.totalorder %s9874_s0, %s9874_s0 }
  0x63   :  { %p9881_p2 = por %p9880_p1, %p9879_p0 }
  0x65   :  { %p9882_p3 = pnand %p9881_p2, %p9875_p13 }
  0x67   :  { %9885 = shalt.err (!%p9882_p3)
}
  0x68   :  { %126 = dma.hbm_to_vmem [thread:$0]  %s11529_s8, 32, %s124_s28, [#allocation15]  }
  0x69   :  { %s9886_s6 = scalar_lea.hbm %s11531_s10, 4096 }
  0x6a   :  { %p9887_p4 = scmp.ne.s32.totalorder %s11531_s10, %s9886_s6  ;;  %p9890_p5 = scmp.lt.u32.totalorder %s9886_s6, %s11531_s10 }
  0x6c   :  { %p9892_p6 = pnand %p9890_p5, %p9887_p4 }
  0x6e   :  { %9895 = shalt.err (!%p9892_p6)
}
  0x6f   :  { %s9896_s19 = scalar_lea.vmem %s143_s2, 4096  ;;  %p9901_p8 = scmp.lt.s32.totalorder %s143_s2, %s143_s2 }
  0x70   :  { %p9897_p7 = scmp.ne.s32.totalorder %s143_s2, %s9896_s19  ;;  %p9902_p9 = scmp.lt.s32.totalorder %s9896_s19, %s9896_s19 }
  0x72   :  { %p9903_p10 = por %p9902_p9, %p9901_p8 }
  0x74   :  { %p9904_p11 = pnand %p9903_p10, %p9897_p7 }
  0x76   :  { %9907 = shalt.err (!%p9904_p11)
}
  0x77   :  { %148 = dma.hbm_to_vmem [thread:$0]  %s11531_s10, 4096, %s143_s2, [#allocation18], %s10307_s25, %s10307_s25, %s10308_s26  }
  0x78   :  { %s10313_s21 = smov [#allocation20]   ;;  %s10314_s1 = smov [#allocation23]  }
  0x79   :  { %s165_s23 = sshll.u32 %s10313_s21, 4  ;;  %s184_s0 = sshll.u32 %s10314_s1, 4  ;;  %s166_s23 = int_to_ptr.vmem [resolvable:$true] %s165_s23  ;;  %s185_s0 = int_to_ptr.vmem [resolvable:$true] %s184_s0 }
  0x7a   :  { %s9908_s29 = scalar_lea.hbm %s11533_s12, 32 }
  0x7b   :  { %p9909_p12 = scmp.ne.s32.totalorder %s11533_s12, %s9908_s29  ;;  %p9912_p13 = scmp.lt.u32.totalorder %s9908_s29, %s11533_s12 }
  0x7d   :  { %p9914_p0 = pnand %p9912_p13, %p9909_p12 }
  0x7f   :  { %9917 = shalt.err (!%p9914_p0)
}
  0x80   :  { %s9918_s10 = scalar_lea.vmem %s166_s23, 32  ;;  %p9923_p2 = scmp.lt.s32.totalorder %s166_s23, %s166_s23 }
  0x81   :  { %p9919_p1 = scmp.ne.s32.totalorder %s166_s23, %s9918_s10  ;;  %p9924_p3 = scmp.lt.s32.totalorder %s9918_s10, %s9918_s10 }
  0x83   :  { %p9925_p4 = por %p9924_p3, %p9923_p2 }
  0x85   :  { %p9926_p5 = pnand %p9925_p4, %p9919_p1 }
  0x87   :  { %9929 = shalt.err (!%p9926_p5)
}
  0x88   :  { %168 = dma.hbm_to_vmem [thread:$0]  %s11533_s12, 32, %s166_s23, [#allocation21]  }
  0x89   :  { %s9930_s30 = scalar_lea.hbm %s11535_s14, 10240 }
  0x8a   :  { %p9931_p6 = scmp.ne.s32.totalorder %s11535_s14, %s9930_s30  ;;  %p9934_p7 = scmp.lt.u32.totalorder %s9930_s30, %s11535_s14 }
  0x8c   :  { %p9936_p8 = pnand %p9934_p7, %p9931_p6 }
  0x8e   :  { %9939 = shalt.err (!%p9936_p8)
}
  0x8f   :  { %s9940_s1 = scalar_lea.vmem %s185_s0, 10240  ;;  %p9945_p10 = scmp.lt.s32.totalorder %s185_s0, %s185_s0 }
  0x90   :  { %p9941_p9 = scmp.ne.s32.totalorder %s185_s0, %s9940_s1  ;;  %p9946_p11 = scmp.lt.s32.totalorder %s9940_s1, %s9940_s1 }
  0x92   :  { %p9947_p12 = por %p9946_p11, %p9945_p10 }
  0x94   :  { %p9948_p13 = pnand %p9947_p12, %p9941_p9 }
  0x96   :  { %9951 = shalt.err (!%p9948_p13)
}
  0x97   :  { %s10315_s12 = smov 320   ;;  %s10316_s23 = smov 20  }
  0x98   :  { %190 = dma.hbm_to_vmem [thread:$0]  %s11535_s14, 10240, %s185_s0, [#allocation24], %s10315_s12, %s10315_s12, %s10316_s23  }
  0x99   :  { %s10317_s29 = smov [#allocation26]   ;;  %s10318_s6 = smov [#allocation29]  }
  0x9a   :  { %s207_s5 = sshll.u32 %s10317_s29, 4  ;;  %s226_s4 = sshll.u32 %s10318_s6, 4  ;;  %s208_s5 = int_to_ptr.vmem [resolvable:$true] %s207_s5  ;;  %s227_s4 = int_to_ptr.vmem [resolvable:$true] %s226_s4 }
  0x9b   :  { %s9952_s25 = scalar_lea.hbm %s11537_s16, 64 }
  0x9c   :  { %p9953_p0 = scmp.ne.s32.totalorder %s11537_s16, %s9952_s25  ;;  %p9956_p1 = scmp.lt.u32.totalorder %s9952_s25, %s11537_s16 }
  0x9e   :  { %p9958_p2 = pnand %p9956_p1, %p9953_p0 }
  0xa0   :  { %9961 = shalt.err (!%p9958_p2)
}
  0xa1   :  { %s9962_s14 = scalar_lea.vmem %s208_s5, 64  ;;  %p9967_p4 = scmp.lt.s32.totalorder %s208_s5, %s208_s5 }
  0xa2   :  { %p9963_p3 = scmp.ne.s32.totalorder %s208_s5, %s9962_s14  ;;  %p9968_p5 = scmp.lt.s32.totalorder %s9962_s14, %s9962_s14 }
  0xa4   :  { %p9969_p6 = por %p9968_p5, %p9967_p4 }
  0xa6   :  { %p9970_p7 = pnand %p9969_p6, %p9963_p3 }
  0xa8   :  { %9973 = shalt.err (!%p9970_p7)
}
  0xa9   :  { %210 = dma.hbm_to_vmem [thread:$0]  %s11537_s16, 64, %s208_s5, [#allocation27]  }
  0xaa   :  { %s9974_s21 = scalar_lea.hbm %s11539_s18, 20480 }
  0xab   :  { %p9975_p8 = scmp.ne.s32.totalorder %s11539_s18, %s9974_s21  ;;  %p9978_p9 = scmp.lt.u32.totalorder %s9974_s21, %s11539_s18 }
  0xad   :  { %p9980_p10 = pnand %p9978_p9, %p9975_p8 }
  0xaf   :  { %9983 = shalt.err (!%p9980_p10)
}
  0xb0   :  { %s9984_s6 = scalar_lea.vmem %s227_s4, 20480  ;;  %p9989_p12 = scmp.lt.s32.totalorder %s227_s4, %s227_s4 }
  0xb1   :  { %p9985_p11 = scmp.ne.s32.totalorder %s227_s4, %s9984_s6  ;;  %p9990_p13 = scmp.lt.s32.totalorder %s9984_s6, %s9984_s6 }
  0xb3   :  { %p9991_p0 = por %p9990_p13, %p9989_p12 }
  0xb5   :  { %p9992_p1 = pnand %p9991_p0, %p9985_p11 }
  0xb7   :  { %9995 = shalt.err (!%p9992_p1)
}
  0xb8   :  { %232 = dma.hbm_to_vmem [thread:$0]  %s11539_s18, 20480, %s227_s4, [#allocation30], %s10315_s12, %s10315_s12, %s10316_s23  }
  0xb9   :  { %s10319_s22 = smov [#allocation32]   ;;  %s10320_s25 = smov [#allocation2]  }
  0xba   :  { %s249_s10 = sshll.u32 %s10319_s22, 4  ;;  %s46_s26 = sshll.u32 %s10320_s25, 4  ;;  %s250_s10 = int_to_ptr.vmem [resolvable:$true] %s249_s10  ;;  %s47_s26 = int_to_ptr.vmem [resolvable:$true] %s46_s26 }
  0xbb   :  { %s9996_s30 = scalar_lea.hbm %s11541_s20, 64 }
  0xbc   :  { %p9997_p2 = scmp.ne.s32.totalorder %s11541_s20, %s9996_s30  ;;  %p10000_p3 = scmp.lt.u32.totalorder %s9996_s30, %s11541_s20 }
  0xbe   :  { %p10002_p4 = pnand %p10000_p3, %p9997_p2 }
  0xc0   :  { %10005 = shalt.err (!%p10002_p4)
}
  0xc1   :  { %s10006_s18 = scalar_lea.vmem %s250_s10, 64  ;;  %p10011_p6 = scmp.lt.s32.totalorder %s250_s10, %s250_s10 }
  0xc2   :  { %p10007_p5 = scmp.ne.s32.totalorder %s250_s10, %s10006_s18  ;;  %p10012_p7 = scmp.lt.s32.totalorder %s10006_s18, %s10006_s18 }
  0xc4   :  { %p10013_p8 = por %p10012_p7, %p10011_p6 }
  0xc6   :  { %p10014_p9 = pnand %p10013_p8, %p10007_p5 }
  0xc8   :  { %10017 = shalt.err (!%p10014_p9)
}
  0xc9   :  { %252 = dma.hbm_to_vmem [thread:$0]  %s11541_s20, 64, %s250_s10, [#allocation33]  }
  0xca   :  { %s11567_s21 = sld [smem:[#allocation49_spill]] }
  0xd0   :  { %s10018_s1 = scalar_lea.hbm %s11567_s21, 256 }
  0xd1   :  { %p10019_p10 = scmp.ne.s32.totalorder %s11567_s21, %s10018_s1  ;;  %p10022_p11 = scmp.lt.u32.totalorder %s10018_s1, %s11567_s21 }
  0xd3   :  { %p10024_p12 = pnand %p10022_p11, %p10019_p10 }
  0xd5   :  { %10027 = shalt.err (!%p10024_p12)
}
  0xd6   :  { %s10028_s16 = scalar_lea.vmem %s47_s26, 256  ;;  %p10033_p0 = scmp.lt.s32.totalorder %s47_s26, %s47_s26 }
  0xd7   :  { %p10029_p13 = scmp.ne.s32.totalorder %s47_s26, %s10028_s16  ;;  %p10034_p1 = scmp.lt.s32.totalorder %s10028_s16, %s10028_s16 }
  0xd9   :  { %p10035_p2 = por %p10034_p1, %p10033_p0 }
  0xdb   :  { %p10036_p3 = pnand %p10035_p2, %p10029_p13 }
  0xdd   :  { %10039 = shalt.err (!%p10036_p3)
}
  0xde   :  { %s10321_s20 = smov 64   ;;  %s10322_s5 = smov 4  }
  0xdf   :  { %52 = dma.hbm_to_vmem [thread:$0]  %s11567_s21, 256, %s47_s26, [#allocation3], %s10321_s20, %s10321_s20, %s10322_s5  }
  0xe0   :  { %s10323_s25 = smov [#allocation7]   ;;  %s10324_s27 = smov [#allocation10]  }
  0xe1   :  { %s71_s2 = sshll.u32 %s10323_s25, 4  ;;  %s91_s30 = sshll.u32 %s10324_s27, 4  ;;  %s72_s2 = int_to_ptr.vmem [resolvable:$true] %s71_s2  ;;  %s92_s30 = int_to_ptr.vmem [resolvable:$true] %s91_s30 }
  0xe2   :  { %s11568_s19 = sld [smem:[#allocation51_spill]] }
  0xe8   :  { %s10040_s8 = scalar_lea.hbm %s11568_s19, 32 }
  0xe9   :  { %p10041_p4 = scmp.ne.s32.totalorder %s11568_s19, %s10040_s8  ;;  %p10044_p5 = scmp.lt.u32.totalorder %s10040_s8, %s11568_s19 }
  0xeb   :  { %p10046_p6 = pnand %p10044_p5, %p10041_p4 }
  0xed   :  { %10049 = shalt.err (!%p10046_p6)
}
  0xee   :  { %s10050_s26 = scalar_lea.vmem %s72_s2, 32  ;;  %p10055_p8 = scmp.lt.s32.totalorder %s72_s2, %s72_s2 }
  0xef   :  { %p10051_p7 = scmp.ne.s32.totalorder %s72_s2, %s10050_s26  ;;  %p10056_p9 = scmp.lt.s32.totalorder %s10050_s26, %s10050_s26 }
  0xf1   :  { %p10057_p10 = por %p10056_p9, %p10055_p8 }
  0xf3   :  { %p10058_p11 = pnand %p10057_p10, %p10051_p7 }
  0xf5   :  { %10061 = shalt.err (!%p10058_p11)
}
  0xf6   :  { %74 = dma.hbm_to_vmem [thread:$0]  %s11568_s19, 32, %s72_s2, [#allocation6]  }
  0xf7   :  { %s11569_s24 = sld [smem:[#allocation53_spill]] }
  0xfd   :  { %s10062_s29 = scalar_lea.hbm %s11569_s24, 32 }
  0xfe   :  { %p10063_p12 = scmp.ne.s32.totalorder %s11569_s24, %s10062_s29  ;;  %p10066_p13 = scmp.lt.u32.totalorder %s10062_s29, %s11569_s24 }
 0x100   :  { %p10068_p0 = pnand %p10066_p13, %p10063_p12 }
 0x102   :  { %10071 = shalt.err (!%p10068_p0)
}
 0x103   :  { %s10072_s22 = scalar_lea.vmem %s92_s30, 32  ;;  %p10077_p2 = scmp.lt.s32.totalorder %s92_s30, %s92_s30 }
 0x104   :  { %p10073_p1 = scmp.ne.s32.totalorder %s92_s30, %s10072_s22  ;;  %p10078_p3 = scmp.lt.s32.totalorder %s10072_s22, %s10072_s22 }
 0x106   :  { %p10079_p4 = por %p10078_p3, %p10077_p2 }
 0x108   :  { %p10080_p5 = pnand %p10079_p4, %p10073_p1 }
 0x10a   :  { %10083 = shalt.err (!%p10080_p5)
}
 0x10b   :  { %94 = dma.hbm_to_vmem [thread:$0]  %s11569_s24, 32, %s92_s30, [#allocation9]  }
 0x10c   :  { %s10325_s2 = smov [#allocation13]   ;;  %s10326_s14 = smov [#allocation16]  }
 0x10d   :  { %s113_s27 = sshll.u32 %s10325_s2, 4  ;;  %s133_s0 = sshll.u32 %s10326_s14, 4  ;;  %s114_s27 = int_to_ptr.vmem [resolvable:$true] %s113_s27  ;;  %s134_s0 = int_to_ptr.vmem [resolvable:$true] %s133_s0 }
 0x10e   :  { %s10084_s18 = scalar_lea.hbm %s11528_s7, 32 }
 0x10f   :  { %p10085_p6 = scmp.ne.s32.totalorder %s11528_s7, %s10084_s18  ;;  %p10088_p7 = scmp.lt.u32.totalorder %s10084_s18, %s11528_s7 }
 0x111   :  { %p10090_p8 = pnand %p10088_p7, %p10085_p6 }
 0x113   :  { %10093 = shalt.err (!%p10090_p8)
}
 0x114   :  { %s10094_s30 = scalar_lea.vmem %s114_s27, 32  ;;  %p10099_p10 = scmp.lt.s32.totalorder %s114_s27, %s114_s27 }
 0x115   :  { %p10095_p9 = scmp.ne.s32.totalorder %s114_s27, %s10094_s30  ;;  %p10100_p11 = scmp.lt.s32.totalorder %s10094_s30, %s10094_s30 }
 0x117   :  { %p10101_p12 = por %p10100_p11, %p10099_p10 }
 0x119   :  { %p10102_p13 = pnand %p10101_p12, %p10095_p9 }
 0x11b   :  { %10105 = shalt.err (!%p10102_p13)
}
 0x11c   :  { %116 = dma.hbm_to_vmem [thread:$0]  %s11528_s7, 32, %s114_s27, [#allocation12]  }
 0x11d   :  { %s10106_s24 = scalar_lea.hbm %s11530_s9, 32 }
 0x11e   :  { %p10107_p0 = scmp.ne.s32.totalorder %s11530_s9, %s10106_s24  ;;  %p10110_p1 = scmp.lt.u32.totalorder %s10106_s24, %s11530_s9 }
 0x120   :  { %p10112_p2 = pnand %p10110_p1, %p10107_p0 }
 0x122   :  { %10115 = shalt.err (!%p10112_p2)
}
 0x123   :  { %s10116_s5 = scalar_lea.vmem %s134_s0, 32  ;;  %p10121_p4 = scmp.lt.s32.totalorder %s134_s0, %s134_s0 }
 0x124   :  { %p10117_p3 = scmp.ne.s32.totalorder %s134_s0, %s10116_s5  ;;  %p10122_p5 = scmp.lt.s32.totalorder %s10116_s5, %s10116_s5 }
 0x126   :  { %p10123_p6 = por %p10122_p5, %p10121_p4 }
 0x128   :  { %p10124_p7 = pnand %p10123_p6, %p10117_p3 }
 0x12a   :  { %10127 = shalt.err (!%p10124_p7)
}
 0x12b   :  { %136 = dma.hbm_to_vmem [thread:$0]  %s11530_s9, 32, %s134_s0, [#allocation15]  }
 0x12c   :  { %s10327_s10 = smov [#allocation19]   ;;  %s10328_s2 = smov [#allocation22]  }
 0x12d   :  { %s155_s25 = sshll.u32 %s10327_s10, 4  ;;  %s175_s27 = sshll.u32 %s10328_s2, 4  ;;  %s156_s25 = int_to_ptr.vmem [resolvable:$true] %s155_s25  ;;  %s176_s27 = int_to_ptr.vmem [resolvable:$true] %s175_s27 }
 0x12e   :  { %s10128_s8 = scalar_lea.hbm %s11532_s11, 32 }
 0x12f   :  { %p10129_p8 = scmp.ne.s32.totalorder %s11532_s11, %s10128_s8  ;;  %p10132_p9 = scmp.lt.u32.totalorder %s10128_s8, %s11532_s11 }
 0x131   :  { %p10134_p10 = pnand %p10132_p9, %p10129_p8 }
 0x133   :  { %10137 = shalt.err (!%p10134_p10)
}
 0x134   :  { %s10138_s9 = scalar_lea.vmem %s156_s25, 32  ;;  %p10143_p12 = scmp.lt.s32.totalorder %s156_s25, %s156_s25 }
 0x135   :  { %p10139_p11 = scmp.ne.s32.totalorder %s156_s25, %s10138_s9  ;;  %p10144_p13 = scmp.lt.s32.totalorder %s10138_s9, %s10138_s9 }
 0x137   :  { %p10145_p0 = por %p10144_p13, %p10143_p12 }
 0x139   :  { %p10146_p1 = pnand %p10145_p0, %p10139_p11 }
 0x13b   :  { %10149 = shalt.err (!%p10146_p1)
}
 0x13c   :  { %158 = dma.hbm_to_vmem [thread:$0]  %s11532_s11, 32, %s156_s25, [#allocation18]  }
 0x13d   :  { %s10150_s21 = scalar_lea.hbm %s11534_s13, 32 }
 0x13e   :  { %p10151_p2 = scmp.ne.s32.totalorder %s11534_s13, %s10150_s21  ;;  %p10154_p3 = scmp.lt.u32.totalorder %s10150_s21, %s11534_s13 }
 0x140   :  { %p10156_p4 = pnand %p10154_p3, %p10151_p2 }
 0x142   :  { %10159 = shalt.err (!%p10156_p4)
}
 0x143   :  { %s10160_s6 = scalar_lea.vmem %s176_s27, 32  ;;  %p10165_p6 = scmp.lt.s32.totalorder %s176_s27, %s176_s27 }
 0x144   :  { %p10161_p5 = scmp.ne.s32.totalorder %s176_s27, %s10160_s6  ;;  %p10166_p7 = scmp.lt.s32.totalorder %s10160_s6, %s10160_s6 }
 0x146   :  { %p10167_p8 = por %p10166_p7, %p10165_p6 }
 0x148   :  { %p10168_p9 = pnand %p10167_p8, %p10161_p5 }
 0x14a   :  { %10171 = shalt.err (!%p10168_p9)
}
 0x14b   :  { %178 = dma.hbm_to_vmem [thread:$0]  %s11534_s13, 32, %s176_s27, [#allocation21]  }
 0x14c   :  { %s10329_s20 = smov [#allocation25]   ;;  %s10330_s7 = smov [#allocation28]  }
 0x14d   :  { %s197_s5 = sshll.u32 %s10329_s20, 4  ;;  %s217_s22 = sshll.u32 %s10330_s7, 4  ;;  %s198_s5 = int_to_ptr.vmem [resolvable:$true] %s197_s5  ;;  %s218_s22 = int_to_ptr.vmem [resolvable:$true] %s217_s22 }
 0x14e   :  { %s10172_s2 = scalar_lea.hbm %s11536_s15, 64 }
 0x14f   :  { %p10173_p10 = scmp.ne.s32.totalorder %s11536_s15, %s10172_s2  ;;  %p10176_p11 = scmp.lt.u32.totalorder %s10172_s2, %s11536_s15 }
 0x151   :  { %p10178_p12 = pnand %p10176_p11, %p10173_p10 }
 0x153   :  { %10181 = shalt.err (!%p10178_p12)
}
 0x154   :  { %s10182_s13 = scalar_lea.vmem %s198_s5, 64  ;;  %p10187_p0 = scmp.lt.s32.totalorder %s198_s5, %s198_s5 }
 0x155   :  { %p10183_p13 = scmp.ne.s32.totalorder %s198_s5, %s10182_s13  ;;  %p10188_p1 = scmp.lt.s32.totalorder %s10182_s13, %s10182_s13 }
 0x157   :  { %p10189_p2 = por %p10188_p1, %p10187_p0 }
 0x159   :  { %p10190_p3 = pnand %p10189_p2, %p10183_p13 }
 0x15b   :  { %10193 = shalt.err (!%p10190_p3)
}
 0x15c   :  { %200 = dma.hbm_to_vmem [thread:$0]  %s11536_s15, 64, %s198_s5, [#allocation24]  }
 0x15d   :  { %s10194_s9 = scalar_lea.hbm %s11538_s17, 64 }
 0x15e   :  { %p10195_p4 = scmp.ne.s32.totalorder %s11538_s17, %s10194_s9  ;;  %p10198_p5 = scmp.lt.u32.totalorder %s10194_s9, %s11538_s17 }
 0x160   :  { %p10200_p6 = pnand %p10198_p5, %p10195_p4 }
 0x162   :  { %10203 = shalt.err (!%p10200_p6)
}
 0x163   :  { %s10204_s21 = scalar_lea.vmem %s218_s22, 64  ;;  %p10209_p8 = scmp.lt.s32.totalorder %s218_s22, %s218_s22 }
 0x164   :  { %p10205_p7 = scmp.ne.s32.totalorder %s218_s22, %s10204_s21  ;;  %p10210_p9 = scmp.lt.s32.totalorder %s10204_s21, %s10204_s21 }
 0x166   :  { %p10211_p10 = por %p10210_p9, %p10209_p8 }
 0x168   :  { %p10212_p11 = pnand %p10211_p10, %p10205_p7 }
 0x16a   :  { %10215 = shalt.err (!%p10212_p11)
}
 0x16b   :  { %220 = dma.hbm_to_vmem [thread:$0]  %s11538_s17, 64, %s218_s22, [#allocation27]  }
 0x16c   :  { %s10331_s3 = smov [#allocation31]   ;;  %s10332_s29 = smov [#allocation34]  }
 0x16d   :  { %s239_s24 = sshll.u32 %s10331_s3, 4  ;;  %s259_s6 = sshll.u32 %s10332_s29, 4  ;;  %s240_s24 = int_to_ptr.vmem [resolvable:$true] %s239_s24  ;;  %s260_s6 = int_to_ptr.vmem [resolvable:$true] %s259_s6 }
 0x16e   :  { %s11570_s20 = sld [smem:[#allocation55_spill]] }
 0x174   :  { %s10216_s5 = scalar_lea.hbm %s11570_s20, 64 }
 0x175   :  { %p10217_p12 = scmp.ne.s32.totalorder %s11570_s20, %s10216_s5  ;;  %p10220_p13 = scmp.lt.u32.totalorder %s10216_s5, %s11570_s20 }
 0x177   :  { %p10222_p0 = pnand %p10220_p13, %p10217_p12 }
 0x179   :  { %10225 = shalt.err (!%p10222_p0)
}
 0x17a   :  { %s10226_s17 = scalar_lea.vmem %s240_s24, 64  ;;  %p10231_p2 = scmp.lt.s32.totalorder %s240_s24, %s240_s24 }
 0x17b   :  { %p10227_p1 = scmp.ne.s32.totalorder %s240_s24, %s10226_s17  ;;  %p10232_p3 = scmp.lt.s32.totalorder %s10226_s17, %s10226_s17 }
 0x17d   :  { %p10233_p4 = por %p10232_p3, %p10231_p2 }
 0x17f   :  { %p10234_p5 = pnand %p10233_p4, %p10227_p1 }
 0x181   :  { %10237 = shalt.err (!%p10234_p5)
}
 0x182   :  { %242 = dma.hbm_to_vmem [thread:$0]  %s11570_s20, 64, %s240_s24, [#allocation30]  }
 0x183   :  { %s11571_s18 = sld [smem:[#allocation56_spill]] }
 0x189   :  { %s10238_s13 = scalar_lea.hbm %s11571_s18, 64 }
 0x18a   :  { %p10239_p6 = scmp.ne.s32.totalorder %s11571_s18, %s10238_s13  ;;  %p10242_p7 = scmp.lt.u32.totalorder %s10238_s13, %s11571_s18 }
 0x18c   :  { %p10244_p8 = pnand %p10242_p7, %p10239_p6 }
 0x18e   :  { %10247 = shalt.err (!%p10244_p8)
}
 0x18f   :  { %s10248_s9 = scalar_lea.vmem %s260_s6, 64  ;;  %p10253_p10 = scmp.lt.s32.totalorder %s260_s6, %s260_s6 }
 0x190   :  { %p10249_p9 = scmp.ne.s32.totalorder %s260_s6, %s10248_s9  ;;  %p10254_p11 = scmp.lt.s32.totalorder %s10248_s9, %s10248_s9 }
 0x192   :  { %p10255_p12 = por %p10254_p11, %p10253_p10 }
 0x194   :  { %p10256_p13 = pnand %p10255_p12, %p10249_p9 }
 0x196   :  { %10259 = shalt.err (!%p10256_p13)
}
 0x197   :  { %262 = dma.hbm_to_vmem [thread:$0]  %s11571_s18, 64, %s260_s6, [#allocation33]  }
 0x198   :  { %10282 = dma.done.wait [#allocation3], 256  }
 0x199   :  { %10283 = vsyncadd [#allocation3], 4294967040 }
 0x19a   :  { %10284 = dma.done.wait [#allocation6], 43040  }
 0x19b   :  { %10285 = vsyncadd [#allocation6], 4294924256 }
 0x19c   :  { %10286 = dma.done.wait [#allocation9], 64  }
 0x19d   :  { %10287 = vsyncadd [#allocation9], 4294967232 }
 0x19e   :  { %10288 = dma.done.wait [#allocation12], 4128  }
 0x19f   :  { %10289 = vsyncadd [#allocation12], 4294963168 }
 0x1a0   :  { %10290 = dma.done.wait [#allocation15], 64  }
 0x1a1   :  { %10291 = vsyncadd [#allocation15], 4294967232 }
 0x1a2   :  { %10292 = dma.done.wait [#allocation18], 4128  }
 0x1a3   :  { %10293 = vsyncadd [#allocation18], 4294963168 }
 0x1a4   :  { %10294 = dma.done.wait [#allocation21], 64  }
 0x1a5   :  { %10295 = vsyncadd [#allocation21], 4294967232 }
 0x1a6   :  { %10296 = dma.done.wait [#allocation24], 10304  }
 0x1a7   :  { %10297 = vsyncadd [#allocation24], 4294956992 }
 0x1a8   :  { %10298 = dma.done.wait [#allocation27], 128  }
 0x1a9   :  { %10299 = vsyncadd [#allocation27], 4294967168 }
 0x1aa   :  { %10300 = dma.done.wait [#allocation30], 20544  }
 0x1ab   :  { %10301 = vsyncadd [#allocation30], 4294946752 }
 0x1ac   :  { %10302 = dma.done.wait [#allocation33], 128  }
 0x1ad   :  { %10303 = vsyncadd [#allocation33], 4294967168  ;;  %v8596_v0 = vld [vmem:[#allocation5 + $0x4] ss:$8 sps:$4 sm:$0xff]   ;;  %v8598_v1 = vld [vmem:[#allocation5] ss:$8 sps:$4 sm:$0xff]  }
 0x1ae   :  { %2615 = vmatprep.subr.bf16.mxu0 %v8596_v0  ;;  %v8599_v2 = vld [vmem:[#allocation5 + $0x14] ss:$8 sps:$4 sm:$0xff]   ;;  %v8601_v3 = vld [vmem:[#allocation5 + $0x10] ss:$8 sps:$4 sm:$0xff]   ;;  %v8602_v4 = vld [vmem:[#allocation5 + $0x24] ss:$8 sps:$4 sm:$0xff]  }
 0x1af   :  { %2616 = vmatpush1.bf16.msra.mxu0 %v8598_v1  ;;  %v8604_v5 = vld [vmem:[#allocation5 + $0x20] ss:$8 sps:$4 sm:$0xff]   ;;  %v8605_v6 = vld [vmem:[#allocation5 + $0x34] ss:$8 sps:$4 sm:$0xff]   ;;  %v8607_v7 = vld [vmem:[#allocation5 + $0x30] ss:$8 sps:$4 sm:$0xff]  }
 0x1b0   :  { %2617 = vmatprep.subr.bf16.mxu0 %v8599_v2  ;;  %v8608_v8 = vld [vmem:[#allocation5 + $0x44] ss:$8 sps:$4 sm:$0xff]   ;;  %v8610_v9 = vld [vmem:[#allocation5 + $0x40] ss:$8 sps:$4 sm:$0xff]   ;;  %v8611_v10 = vld [vmem:[#allocation5 + $0x54] ss:$8 sps:$4 sm:$0xff]  }
 0x1b1   :  { %v8613_v11 = vld [vmem:[#allocation5 + $0x50] ss:$8 sps:$4 sm:$0xff]   ;;  %v8614_v12 = vld [vmem:[#allocation5 + $0x64] ss:$8 sps:$4 sm:$0xff]   ;;  %s11572_s21 = sld [smem:[#allocation48_spill]] }
 0x1b2   :  { %v8616_v14 = vld [vmem:[#allocation5 + $0x60] ss:$8 sps:$4 sm:$0xff]   ;;  %v8617_v15 = vld [vmem:[#allocation5 + $0x74] ss:$8 sps:$4 sm:$0xff]   ;;  %v8619_v16 = vld [vmem:[#allocation5 + $0x70] ss:$8 sps:$4 sm:$0xff]  }
 0x1b3   :  { %2618 = vmatpush1.bf16.msra.mxu0 %v8601_v3  ;;  %v8620_v17 = vld [vmem:[#allocation5 + $0x84] ss:$8 sps:$4 sm:$0xff]   ;;  %v8622_v18 = vld [vmem:[#allocation5 + $0x80] ss:$8 sps:$4 sm:$0xff]   ;;  %v8623_v19 = vld [vmem:[#allocation5 + $0x94] ss:$8 sps:$4 sm:$0xff]  }
 0x1b4   :  { %2619 = vmatprep.subr.bf16.mxu0 %v8602_v4  ;;  %v8625_v20 = vld [vmem:[#allocation5 + $0x90] ss:$8 sps:$4 sm:$0xff]   ;;  %v8626_v21 = vld [vmem:[#allocation5 + $0xa4] ss:$8 sps:$4 sm:$0xff]   ;;  %v8628_v22 = vld [vmem:[#allocation5 + $0xa0] ss:$8 sps:$4 sm:$0xff]  }
 0x1b5   :  { %v8629_v23 = vld [vmem:[#allocation5 + $0xb4] ss:$8 sps:$4 sm:$0xff]   ;;  %v8631_v24 = vld [vmem:[#allocation5 + $0xb0] ss:$8 sps:$4 sm:$0xff]   ;;  %v8632_v25 = vld [vmem:[#allocation5 + $0xc4] ss:$8 sps:$4 sm:$0xff]  }
 0x1b6   :  { %v8634_v26 = vld [vmem:[#allocation5 + $0xc0] ss:$8 sps:$4 sm:$0xff]   ;;  %v8635_v27 = vld [vmem:[#allocation5 + $0xd4] ss:$8 sps:$4 sm:$0xff]   ;;  %v8637_v28 = vld [vmem:[#allocation5 + $0xd0] ss:$8 sps:$4 sm:$0xff]  }
 0x1b7   :  { %2620 = vmatpush1.bf16.msra.mxu0 %v8604_v5  ;;  %v8646_v13 = vld [vmem:[%s11572_s21 + $0x4] ss:$84 sps:$4 sm:$0xff]   ;;  %v8638_v29 = vld [vmem:[#allocation5 + $0xe4] ss:$8 sps:$4 sm:$0xff]   ;;  %v8643_v32 = vld [vmem:[#allocation5 + $0xf0] ss:$8 sps:$4 sm:$0xff]  }
 0x1b8   :  { %2621 = vmatprep.subr.bf16.mxu0 %v8605_v6  ;;  %2647 = vmatprep.mubr.bf16.mxu0 %v8646_v13  ;;  %v8640_v30 = vld [vmem:[#allocation5 + $0xe0] ss:$8 sps:$4 sm:$0xff]   ;;  %v8641_v31 = vld [vmem:[#allocation5 + $0xf4] ss:$8 sps:$4 sm:$0xff]   ;;  %v8649_v33 = vld [vmem:[#allocation5 + $0x104] ss:$8 sps:$4 sm:$0xff]  }
 0x1b9   :  { %v8644_v34 = vld [vmem:[%s11572_s21] ss:$84 sps:$4 sm:$0xff]   ;;  %v8647_v35 = vld [vmem:[#allocation5 + $0x100] ss:$8 sps:$4 sm:$0xff]   ;;  %v8652_v37 = vld [vmem:[#allocation5 + $0x114] ss:$8 sps:$4 sm:$0xff]  }
 0x1ba   :  { %v8689_v36 = vld [vmem:[%s11572_s21 + $0xac] ss:$84 sps:$4 sm:$0xff]   ;;  %v8655_v39 = vld [vmem:[#allocation5 + $0x124] ss:$8 sps:$4 sm:$0xff]   ;;  %v8653_v41 = vld [vmem:[#allocation5 + $0x120] ss:$8 sps:$4 sm:$0xff]  }
 0x1bb   :  { %2622 = vmatpush1.bf16.msra.mxu0 %v8607_v7  ;;  %v8650_v38 = vld [vmem:[#allocation5 + $0x110] ss:$8 sps:$4 sm:$0xff]   ;;  %v8658_v43 = vld [vmem:[#allocation5 + $0x134] ss:$8 sps:$4 sm:$0xff]   ;;  %v8661_v45 = vld [vmem:[#allocation5 + $0x144] ss:$8 sps:$4 sm:$0xff]  }
 0x1bc   :  { %2623 = vmatprep.subr.bf16.mxu0 %v8608_v8  ;;  %v8694_v40 = vld [vmem:[%s11572_s21 + $0xa8] ss:$84 sps:$4 sm:$0xff]   ;;  %v8700_v42 = vld [vmem:[%s11572_s21 + $0xc] ss:$84 sps:$4 sm:$0xff]   ;;  %v8659_v46 = vld [vmem:[#allocation5 + $0x140] ss:$8 sps:$4 sm:$0xff]  }
 0x1bd   :  { %v8656_v44 = vld [vmem:[#allocation5 + $0x130] ss:$8 sps:$4 sm:$0xff]   ;;  %v8664_v47 = vld [vmem:[#allocation5 + $0x154] ss:$8 sps:$4 sm:$0xff]   ;;  %v8667_v49 = vld [vmem:[#allocation5 + $0x164] ss:$8 sps:$4 sm:$0xff]  }
 0x1be   :  { %v8662_v48 = vld [vmem:[#allocation5 + $0x150] ss:$8 sps:$4 sm:$0xff]   ;;  %v8665_v50 = vld [vmem:[#allocation5 + $0x160] ss:$8 sps:$4 sm:$0xff]   ;;  %v8670_v51 = vld [vmem:[#allocation5 + $0x174] ss:$8 sps:$4 sm:$0xff]  }
 0x1bf   :  { %2624 = vmatpush1.bf16.msra.mxu0 %v8610_v9  ;;  %v8668_v52 = vld [vmem:[#allocation5 + $0x170] ss:$8 sps:$4 sm:$0xff]   ;;  %v8673_v53 = vld [vmem:[#allocation5 + $0x184] ss:$8 sps:$4 sm:$0xff]   ;;  %v8671_v54 = vld [vmem:[#allocation5 + $0x180] ss:$8 sps:$4 sm:$0xff]  }
 0x1c0   :  { %2625 = vmatprep.subr.bf16.mxu0 %v8611_v10  ;;  %v8676_v55 = vld [vmem:[#allocation5 + $0x194] ss:$8 sps:$4 sm:$0xff]   ;;  %v8674_v56 = vld [vmem:[#allocation5 + $0x190] ss:$8 sps:$4 sm:$0xff]   ;;  %v8679_v57 = vld [vmem:[#allocation5 + $0x1a4] ss:$8 sps:$4 sm:$0xff]  }
 0x1c1   :  { %v8677_v58 = vld [vmem:[#allocation5 + $0x1a0] ss:$8 sps:$4 sm:$0xff]   ;;  %v8682_v59 = vld [vmem:[#allocation5 + $0x1b4] ss:$8 sps:$4 sm:$0xff]   ;;  %v8680_v60 = vld [vmem:[#allocation5 + $0x1b0] ss:$8 sps:$4 sm:$0xff]  }
 0x1c2   :  { %v8685_v61 = vld [vmem:[#allocation5 + $0x1c4] ss:$8 sps:$4 sm:$0xff]   ;;  %v8683_v62 = vld [vmem:[#allocation5 + $0x1c0] ss:$8 sps:$4 sm:$0xff]   ;;  %v8688_v63 = vld [vmem:[#allocation5 + $0x1d4] ss:$8 sps:$4 sm:$0xff]  }
 0x1c3   :  { %2626 = vmatpush1.bf16.msra.mxu0 %v8613_v11  ;;  %v8686_v0 = vld [vmem:[#allocation5 + $0x1d0] ss:$8 sps:$4 sm:$0xff]   ;;  %v8693_v1 = vld [vmem:[#allocation5 + $0x1e4] ss:$8 sps:$4 sm:$0xff]   ;;  %v8691_v2 = vld [vmem:[#allocation5 + $0x1e0] ss:$8 sps:$4 sm:$0xff]  }
 0x1c4   :  { %2627 = vmatprep.subr.bf16.mxu0 %v8614_v12  ;;  %v8697_v3 = vld [vmem:[#allocation5 + $0x1f4] ss:$8 sps:$4 sm:$0xff]   ;;  %v8695_v4 = vld [vmem:[#allocation5 + $0x1f0] ss:$8 sps:$4 sm:$0xff]   ;;  %v8703_v5 = vld [vmem:[#allocation5 + $0x204] ss:$8 sps:$4 sm:$0xff]  }
 0x1c5   :  { %v8698_v6 = vld [vmem:[%s11572_s21 + $0x8] ss:$84 sps:$4 sm:$0xff]   ;;  %v8701_v7 = vld [vmem:[#allocation5 + $0x200] ss:$8 sps:$4 sm:$0xff]   ;;  %v8706_v9 = vld [vmem:[#allocation5 + $0x214] ss:$8 sps:$4 sm:$0xff]  }
 0x1c6   :  { %v8743_v8 = vld [vmem:[%s11572_s21 + $0xb4] ss:$84 sps:$4 sm:$0xff]   ;;  %v8748_v12 = vld [vmem:[%s11572_s21 + $0xb0] ss:$84 sps:$4 sm:$0xff]  }
 0x1c7   :  { %2628 = vmatpush1.bf16.msra.mxu0 %v8616_v14  ;;  %v8704_v10 = vld [vmem:[#allocation5 + $0x210] ss:$8 sps:$4 sm:$0xff]   ;;  %v8709_v11 = vld [vmem:[#allocation5 + $0x224] ss:$8 sps:$4 sm:$0xff]   ;;  %v8707_v13 = vld [vmem:[#allocation5 + $0x220] ss:$8 sps:$4 sm:$0xff]  }
 0x1c8   :  { %2629 = vmatprep.subr.bf16.mxu0 %v8617_v15  ;;  %v8712_v14 = vld [vmem:[#allocation5 + $0x234] ss:$8 sps:$4 sm:$0xff]   ;;  %v8754_v15 = vld [vmem:[%s11572_s21 + $0x14] ss:$84 sps:$4 sm:$0xff]  }
 0x1cb   :  { %2630 = vmatpush1.bf16.msra.mxu0 %v8619_v16  ;;  %v8710_v16 = vld [vmem:[#allocation5 + $0x230] ss:$8 sps:$4 sm:$0xff]  }
 0x1cc   :  { %2631 = vmatprep.subr.bf16.mxu0 %v8620_v17  ;;  %v8715_v17 = vld [vmem:[#allocation5 + $0x244] ss:$8 sps:$4 sm:$0xff]  }
 0x1cf   :  { %2632 = vmatpush1.bf16.msra.mxu0 %v8622_v18  ;;  %v8713_v18 = vld [vmem:[#allocation5 + $0x240] ss:$8 sps:$4 sm:$0xff]  }
 0x1d0   :  { %2633 = vmatprep.subr.bf16.mxu0 %v8623_v19  ;;  %v8718_v19 = vld [vmem:[#allocation5 + $0x254] ss:$8 sps:$4 sm:$0xff]  }
 0x1d3   :  { %2634 = vmatpush1.bf16.msra.mxu0 %v8625_v20  ;;  %v8716_v20 = vld [vmem:[#allocation5 + $0x250] ss:$8 sps:$4 sm:$0xff]  }
 0x1d4   :  { %2635 = vmatprep.subr.bf16.mxu0 %v8626_v21  ;;  %v8721_v21 = vld [vmem:[#allocation5 + $0x264] ss:$8 sps:$4 sm:$0xff]  }
 0x1d7   :  { %2636 = vmatpush1.bf16.msra.mxu0 %v8628_v22  ;;  %v8719_v22 = vld [vmem:[#allocation5 + $0x260] ss:$8 sps:$4 sm:$0xff]  }
 0x1d8   :  { %2637 = vmatprep.subr.bf16.mxu0 %v8629_v23  ;;  %v8724_v23 = vld [vmem:[#allocation5 + $0x274] ss:$8 sps:$4 sm:$0xff]  }
 0x1db   :  { %2638 = vmatpush1.bf16.msra.mxu0 %v8631_v24  ;;  %v8722_v24 = vld [vmem:[#allocation5 + $0x270] ss:$8 sps:$4 sm:$0xff]  }
 0x1dc   :  { %2639 = vmatprep.subr.bf16.mxu0 %v8632_v25  ;;  %v8727_v25 = vld [vmem:[#allocation5 + $0x284] ss:$8 sps:$4 sm:$0xff]  }
 0x1df   :  { %2640 = vmatpush1.bf16.msra.mxu0 %v8634_v26  ;;  %v8725_v26 = vld [vmem:[#allocation5 + $0x280] ss:$8 sps:$4 sm:$0xff]  }
 0x1e0   :  { %2641 = vmatprep.subr.bf16.mxu0 %v8635_v27  ;;  %v8730_v27 = vld [vmem:[#allocation5 + $0x294] ss:$8 sps:$4 sm:$0xff]  }
 0x1e3   :  { %2642 = vmatpush1.bf16.msra.mxu0 %v8637_v28  ;;  %v8728_v28 = vld [vmem:[#allocation5 + $0x290] ss:$8 sps:$4 sm:$0xff]  }
 0x1e4   :  { %2643 = vmatprep.subr.bf16.mxu0 %v8638_v29  ;;  %v8733_v29 = vld [vmem:[#allocation5 + $0x2a4] ss:$8 sps:$4 sm:$0xff]  }
 0x1e7   :  { %2644 = vmatpush1.bf16.msra.mxu0 %v8640_v30  ;;  %v8731_v30 = vld [vmem:[#allocation5 + $0x2a0] ss:$8 sps:$4 sm:$0xff]  }
 0x1e8   :  { %2645 = vmatprep.subr.bf16.mxu0 %v8641_v31  ;;  %v8736_v31 = vld [vmem:[#allocation5 + $0x2b4] ss:$8 sps:$4 sm:$0xff]  }
 0x1eb   :  { %2646 = vmatpush1.bf16.msra.mxu0 %v8643_v32  ;;  %v8734_v32 = vld [vmem:[#allocation5 + $0x2b0] ss:$8 sps:$4 sm:$0xff]  }
 0x1ec   :  { %2668 = vmatprep.subr.bf16.mxu0 %v8649_v33  ;;  %v8739_v33 = vld [vmem:[#allocation5 + $0x2c4] ss:$8 sps:$4 sm:$0xff]  }
 0x1ee   :  { %2648 = vmatmul.mubr.bf16.vlgmr.msra.gmra.mrb[0].mxu0 %v8644_v34  ;;  %v8737_v34 = vld [vmem:[#allocation5 + $0x2c0] ss:$8 sps:$4 sm:$0xff]  }
 0x1ef   :  { %2669 = vmatpush1.bf16.msra.mxu0 %v8647_v35  ;;  %2657 = vmatprep.mubr.bf16.mxu0 %v8689_v36  ;;  %v8742_v35 = vld [vmem:[#allocation5 + $0x2d4] ss:$8 sps:$4 sm:$0xff]   ;;  %v8740_v36 = vld [vmem:[#allocation5 + $0x2d0] ss:$8 sps:$4 sm:$0xff]  }
 0x1f0   :  { %2670 = vmatprep.subr.bf16.mxu0 %v8652_v37  ;;  %v8747_v37 = vld [vmem:[#allocation5 + $0x2e4] ss:$8 sps:$4 sm:$0xff]  }
 0x1f3   :  { %2671 = vmatpush1.bf16.msra.mxu0 %v8650_v38  ;;  %v8745_v38 = vld [vmem:[#allocation5 + $0x2e0] ss:$8 sps:$4 sm:$0xff]  }
 0x1f4   :  { %2672 = vmatprep.subr.bf16.mxu0 %v8655_v39  ;;  %v8751_v39 = vld [vmem:[#allocation5 + $0x2f4] ss:$8 sps:$4 sm:$0xff]  }
 0x1f6   :  { %2658 = vmatmul.mubr.bf16.gmra.mrb[4].mxu0 %v8694_v40  ;;  %v8749_v40 = vld [vmem:[#allocation5 + $0x2f0] ss:$8 sps:$4 sm:$0xff]  }
 0x1f7   :  { %2673 = vmatpush1.bf16.msra.mxu0 %v8653_v41  ;;  %2700 = vmatprep.mubr.bf16.mxu0 %v8700_v42  ;;  %v8757_v41 = vld [vmem:[#allocation5 + $0x304] ss:$8 sps:$4 sm:$0xff]   ;;  %v8752_v42 = vld [vmem:[%s11572_s21 + $0x10] ss:$84 sps:$4 sm:$0xff]  }
 0x1f8   :  { %2674 = vmatprep.subr.bf16.mxu0 %v8658_v43  ;;  %v8755_v43 = vld [vmem:[#allocation5 + $0x300] ss:$8 sps:$4 sm:$0xff]  }
 0x1fb   :  { %2675 = vmatpush1.bf16.msra.mxu0 %v8656_v44  ;;  %v8797_v44 = vld [vmem:[%s11572_s21 + $0xbc] ss:$84 sps:$4 sm:$0xff]  }
 0x1fc   :  { %2676 = vmatprep.subr.bf16.mxu0 %v8661_v45  ;;  %v8760_v45 = vld [vmem:[#allocation5 + $0x314] ss:$8 sps:$4 sm:$0xff]  }
 0x1ff   :  { %2677 = vmatpush1.bf16.msra.mxu0 %v8659_v46  ;;  %v8758_v46 = vld [vmem:[#allocation5 + $0x310] ss:$8 sps:$4 sm:$0xff]  }
 0x200   :  { %2678 = vmatprep.subr.bf16.mxu0 %v8664_v47  ;;  %v8763_v47 = vld [vmem:[#allocation5 + $0x324] ss:$8 sps:$4 sm:$0xff]  }
 0x203   :  { %2679 = vmatpush1.bf16.msra.mxu0 %v8662_v48  ;;  %v8802_v48 = vld [vmem:[%s11572_s21 + $0xb8] ss:$84 sps:$4 sm:$0xff]  }
 0x204   :  { %2680 = vmatprep.subr.bf16.mxu0 %v8667_v49  ;;  %v8761_v49 = vld [vmem:[#allocation5 + $0x320] ss:$8 sps:$4 sm:$0xff]  }
 0x207   :  { %2681 = vmatpush1.bf16.msra.mxu0 %v8665_v50  ;;  %v8766_v50 = vld [vmem:[#allocation5 + $0x334] ss:$8 sps:$4 sm:$0xff]  }
 0x208   :  { %2682 = vmatprep.subr.bf16.mxu0 %v8670_v51  ;;  %v8808_v51 = vld [vmem:[%s11572_s21 + $0x1c] ss:$84 sps:$4 sm:$0xff]  }
 0x20b   :  { %2683 = vmatpush1.bf16.msra.mxu0 %v8668_v52  ;;  %v8764_v52 = vld [vmem:[#allocation5 + $0x330] ss:$8 sps:$4 sm:$0xff]  }
 0x20c   :  { %2684 = vmatprep.subr.bf16.mxu0 %v8673_v53  ;;  %v8769_v53 = vld [vmem:[#allocation5 + $0x344] ss:$8 sps:$4 sm:$0xff]  }
 0x20f   :  { %2685 = vmatpush1.bf16.msra.mxu0 %v8671_v54  ;;  %v8767_v54 = vld [vmem:[#allocation5 + $0x340] ss:$8 sps:$4 sm:$0xff]  }
 0x210   :  { %2686 = vmatprep.subr.bf16.mxu0 %v8676_v55  ;;  %v8772_v55 = vld [vmem:[#allocation5 + $0x354] ss:$8 sps:$4 sm:$0xff]  }
 0x213   :  { %2687 = vmatpush1.bf16.msra.mxu0 %v8674_v56  ;;  %v8770_v56 = vld [vmem:[#allocation5 + $0x350] ss:$8 sps:$4 sm:$0xff]  }
 0x214   :  { %2688 = vmatprep.subr.bf16.mxu0 %v8679_v57  ;;  %v8775_v57 = vld [vmem:[#allocation5 + $0x364] ss:$8 sps:$4 sm:$0xff]  }
 0x217   :  { %2689 = vmatpush1.bf16.msra.mxu0 %v8677_v58  ;;  %v8773_v58 = vld [vmem:[#allocation5 + $0x360] ss:$8 sps:$4 sm:$0xff]  }
 0x218   :  { %2690 = vmatprep.subr.bf16.mxu0 %v8682_v59  ;;  %v8778_v59 = vld [vmem:[#allocation5 + $0x374] ss:$8 sps:$4 sm:$0xff]  }
 0x21b   :  { %2691 = vmatpush1.bf16.msra.mxu0 %v8680_v60  ;;  %v8776_v60 = vld [vmem:[#allocation5 + $0x370] ss:$8 sps:$4 sm:$0xff]  }
 0x21c   :  { %2692 = vmatprep.subr.bf16.mxu0 %v8685_v61  ;;  %v8781_v61 = vld [vmem:[#allocation5 + $0x384] ss:$8 sps:$4 sm:$0xff]  }
 0x21f   :  { %2693 = vmatpush1.bf16.msra.mxu0 %v8683_v62  ;;  %v8779_v62 = vld [vmem:[#allocation5 + $0x380] ss:$8 sps:$4 sm:$0xff]  }
 0x220   :  { %2694 = vmatprep.subr.bf16.mxu0 %v8688_v63  ;;  %v8784_v63 = vld [vmem:[#allocation5 + $0x394] ss:$8 sps:$4 sm:$0xff]  }
 0x223   :  { %2695 = vmatpush1.bf16.msra.mxu0 %v8686_v0  ;;  %v8782_v0 = vld [vmem:[#allocation5 + $0x390] ss:$8 sps:$4 sm:$0xff]  }
 0x224   :  { %2696 = vmatprep.subr.bf16.mxu0 %v8693_v1  ;;  %v8787_v1 = vld [vmem:[#allocation5 + $0x3a4] ss:$8 sps:$4 sm:$0xff]  }
 0x227   :  { %2697 = vmatpush1.bf16.msra.mxu0 %v8691_v2  ;;  %v8785_v2 = vld [vmem:[#allocation5 + $0x3a0] ss:$8 sps:$4 sm:$0xff]  }
 0x228   :  { %2698 = vmatprep.subr.bf16.mxu0 %v8697_v3  ;;  %v8790_v3 = vld [vmem:[#allocation5 + $0x3b4] ss:$8 sps:$4 sm:$0xff]  }
 0x22b   :  { %2699 = vmatpush1.bf16.msra.mxu0 %v8695_v4  ;;  %v8788_v4 = vld [vmem:[#allocation5 + $0x3b0] ss:$8 sps:$4 sm:$0xff]  }
 0x22c   :  { %2721 = vmatprep.subr.bf16.mxu0 %v8703_v5  ;;  %v8793_v5 = vld [vmem:[#allocation5 + $0x3c4] ss:$8 sps:$4 sm:$0xff]  }
 0x22e   :  { %2701 = vmatmul.mubr.bf16.vlgmr.msra.gmra.mrb[0].mxu0 %v8698_v6  ;;  %v8791_v6 = vld [vmem:[#allocation5 + $0x3c0] ss:$8 sps:$4 sm:$0xff]  }
 0x22f   :  { %2722 = vmatpush1.bf16.msra.mxu0 %v8701_v7  ;;  %2710 = vmatprep.mubr.bf16.mxu0 %v8743_v8  ;;  %v8796_v7 = vld [vmem:[#allocation5 + $0x3d4] ss:$8 sps:$4 sm:$0xff]   ;;  %v8794_v8 = vld [vmem:[#allocation5 + $0x3d0] ss:$8 sps:$4 sm:$0xff]  }
 0x230   :  { %2723 = vmatprep.subr.bf16.mxu0 %v8706_v9  ;;  %v8801_v9 = vld [vmem:[#allocation5 + $0x3e4] ss:$8 sps:$4 sm:$0xff]  }
 0x233   :  { %2724 = vmatpush1.bf16.msra.mxu0 %v8704_v10  ;;  %v8799_v10 = vld [vmem:[#allocation5 + $0x3e0] ss:$8 sps:$4 sm:$0xff]  }
 0x234   :  { %2725 = vmatprep.subr.bf16.mxu0 %v8709_v11  ;;  %v8805_v11 = vld [vmem:[#allocation5 + $0x3f4] ss:$8 sps:$4 sm:$0xff]  }
 0x236   :  { %2711 = vmatmul.mubr.bf16.gmra.mrb[4].mxu0 %v8748_v12  ;;  %v8803_v12 = vld [vmem:[#allocation5 + $0x3f0] ss:$8 sps:$4 sm:$0xff]  }
 0x237   :  { %2726 = vmatpush1.bf16.msra.mxu0 %v8707_v13  ;;  %2753 = vmatprep.mubr.bf16.mxu0 %v8754_v15  ;;  %v8811_v13 = vld [vmem:[#allocation5 + $0x404] ss:$8 sps:$4 sm:$0xff]   ;;  %v8809_v15 = vld [vmem:[#allocation5 + $0x400] ss:$8 sps:$4 sm:$0xff]  }
 0x238   :  { %2727 = vmatprep.subr.bf16.mxu0 %v8712_v14  ;;  %v8806_v14 = vld [vmem:[%s11572_s21 + $0x18] ss:$84 sps:$4 sm:$0xff]  }
 0x23b   :  { %2728 = vmatpush1.bf16.msra.mxu0 %v8710_v16  ;;  %v8851_v16 = vld [vmem:[%s11572_s21 + $0xc4] ss:$84 sps:$4 sm:$0xff]  }
 0x23c   :  { %2729 = vmatprep.subr.bf16.mxu0 %v8715_v17  ;;  %v8814_v17 = vld [vmem:[#allocation5 + $0x414] ss:$8 sps:$4 sm:$0xff]  }
 0x23f   :  { %2730 = vmatpush1.bf16.msra.mxu0 %v8713_v18  ;;  %v8812_v18 = vld [vmem:[#allocation5 + $0x410] ss:$8 sps:$4 sm:$0xff]  }
 0x240   :  { %2731 = vmatprep.subr.bf16.mxu0 %v8718_v19  ;;  %v8817_v19 = vld [vmem:[#allocation5 + $0x424] ss:$8 sps:$4 sm:$0xff]  }
 0x243   :  { %2732 = vmatpush1.bf16.msra.mxu0 %v8716_v20  ;;  %v8856_v20 = vld [vmem:[%s11572_s21 + $0xc0] ss:$84 sps:$4 sm:$0xff]  }
 0x244   :  { %2733 = vmatprep.subr.bf16.mxu0 %v8721_v21  ;;  %v8815_v21 = vld [vmem:[#allocation5 + $0x420] ss:$8 sps:$4 sm:$0xff]  }
 0x247   :  { %2734 = vmatpush1.bf16.msra.mxu0 %v8719_v22  ;;  %v8820_v22 = vld [vmem:[#allocation5 + $0x434] ss:$8 sps:$4 sm:$0xff]  }
 0x248   :  { %2735 = vmatprep.subr.bf16.mxu0 %v8724_v23  ;;  %v8862_v23 = vld [vmem:[%s11572_s21 + $0x24] ss:$84 sps:$4 sm:$0xff]  }
 0x24b   :  { %2736 = vmatpush1.bf16.msra.mxu0 %v8722_v24  ;;  %v8818_v24 = vld [vmem:[#allocation5 + $0x430] ss:$8 sps:$4 sm:$0xff]  }
 0x24c   :  { %2737 = vmatprep.subr.bf16.mxu0 %v8727_v25  ;;  %v8823_v25 = vld [vmem:[#allocation5 + $0x444] ss:$8 sps:$4 sm:$0xff]  }
 0x24f   :  { %2738 = vmatpush1.bf16.msra.mxu0 %v8725_v26  ;;  %v8821_v26 = vld [vmem:[#allocation5 + $0x440] ss:$8 sps:$4 sm:$0xff]  }
 0x250   :  { %2739 = vmatprep.subr.bf16.mxu0 %v8730_v27  ;;  %v8826_v27 = vld [vmem:[#allocation5 + $0x454] ss:$8 sps:$4 sm:$0xff]  }
 0x253   :  { %2740 = vmatpush1.bf16.msra.mxu0 %v8728_v28  ;;  %v8824_v28 = vld [vmem:[#allocation5 + $0x450] ss:$8 sps:$4 sm:$0xff]  }
 0x254   :  { %2741 = vmatprep.subr.bf16.mxu0 %v8733_v29  ;;  %v8829_v29 = vld [vmem:[#allocation5 + $0x464] ss:$8 sps:$4 sm:$0xff]  }
 0x257   :  { %2742 = vmatpush1.bf16.msra.mxu0 %v8731_v30  ;;  %v8827_v30 = vld [vmem:[#allocation5 + $0x460] ss:$8 sps:$4 sm:$0xff]  }
 0x258   :  { %2743 = vmatprep.subr.bf16.mxu0 %v8736_v31  ;;  %v8832_v31 = vld [vmem:[#allocation5 + $0x474] ss:$8 sps:$4 sm:$0xff]  }
 0x25b   :  { %2744 = vmatpush1.bf16.msra.mxu0 %v8734_v32  ;;  %v8830_v32 = vld [vmem:[#allocation5 + $0x470] ss:$8 sps:$4 sm:$0xff]  }
 0x25c   :  { %2745 = vmatprep.subr.bf16.mxu0 %v8739_v33  ;;  %v8835_v33 = vld [vmem:[#allocation5 + $0x484] ss:$8 sps:$4 sm:$0xff]  }
 0x25f   :  { %2746 = vmatpush1.bf16.msra.mxu0 %v8737_v34  ;;  %v8833_v34 = vld [vmem:[#allocation5 + $0x480] ss:$8 sps:$4 sm:$0xff]  }
 0x260   :  { %2747 = vmatprep.subr.bf16.mxu0 %v8742_v35  ;;  %v8838_v35 = vld [vmem:[#allocation5 + $0x494] ss:$8 sps:$4 sm:$0xff]  }
 0x263   :  { %2748 = vmatpush1.bf16.msra.mxu0 %v8740_v36  ;;  %v8836_v36 = vld [vmem:[#allocation5 + $0x490] ss:$8 sps:$4 sm:$0xff]  }
 0x264   :  { %2749 = vmatprep.subr.bf16.mxu0 %v8747_v37  ;;  %v8841_v37 = vld [vmem:[#allocation5 + $0x4a4] ss:$8 sps:$4 sm:$0xff]  }
 0x267   :  { %2750 = vmatpush1.bf16.msra.mxu0 %v8745_v38  ;;  %v8839_v38 = vld [vmem:[#allocation5 + $0x4a0] ss:$8 sps:$4 sm:$0xff]  }
 0x268   :  { %2751 = vmatprep.subr.bf16.mxu0 %v8751_v39  ;;  %v8844_v39 = vld [vmem:[#allocation5 + $0x4b4] ss:$8 sps:$4 sm:$0xff]  }
 0x26b   :  { %2752 = vmatpush1.bf16.msra.mxu0 %v8749_v40  ;;  %v8842_v40 = vld [vmem:[#allocation5 + $0x4b0] ss:$8 sps:$4 sm:$0xff]  }
 0x26c   :  { %2774 = vmatprep.subr.bf16.mxu0 %v8757_v41  ;;  %v8847_v41 = vld [vmem:[#allocation5 + $0x4c4] ss:$8 sps:$4 sm:$0xff]  }
 0x26e   :  { %2754 = vmatmul.mubr.bf16.vlgmr.msra.gmra.mrb[0].mxu0 %v8752_v42  ;;  %v8845_v42 = vld [vmem:[#allocation5 + $0x4c0] ss:$8 sps:$4 sm:$0xff]  }
 0x26f   :  { %2775 = vmatpush1.bf16.msra.mxu0 %v8755_v43  ;;  %2763 = vmatprep.mubr.bf16.mxu0 %v8797_v44  ;;  %v8850_v43 = vld [vmem:[#allocation5 + $0x4d4] ss:$8 sps:$4 sm:$0xff]   ;;  %v8848_v44 = vld [vmem:[#allocation5 + $0x4d0] ss:$8 sps:$4 sm:$0xff]  }
 0x270   :  { %2776 = vmatprep.subr.bf16.mxu0 %v8760_v45  ;;  %v8855_v45 = vld [vmem:[#allocation5 + $0x4e4] ss:$8 sps:$4 sm:$0xff]  }
 0x273   :  { %2777 = vmatpush1.bf16.msra.mxu0 %v8758_v46  ;;  %v8853_v46 = vld [vmem:[#allocation5 + $0x4e0] ss:$8 sps:$4 sm:$0xff]  }
 0x274   :  { %2778 = vmatprep.subr.bf16.mxu0 %v8763_v47  ;;  %v8859_v47 = vld [vmem:[#allocation5 + $0x4f4] ss:$8 sps:$4 sm:$0xff]  }
 0x276   :  { %2764 = vmatmul.mubr.bf16.gmra.mrb[4].mxu0 %v8802_v48  ;;  %v8857_v48 = vld [vmem:[#allocation5 + $0x4f0] ss:$8 sps:$4 sm:$0xff]  }
 0x277   :  { %2779 = vmatpush1.bf16.msra.mxu0 %v8761_v49  ;;  %2806 = vmatprep.mubr.bf16.mxu0 %v8808_v51  ;;  %v8865_v49 = vld [vmem:[#allocation5 + $0x504] ss:$8 sps:$4 sm:$0xff]   ;;  %v8863_v51 = vld [vmem:[#allocation5 + $0x500] ss:$8 sps:$4 sm:$0xff]  }
 0x278   :  { %2780 = vmatprep.subr.bf16.mxu0 %v8766_v50  ;;  %v8860_v50 = vld [vmem:[%s11572_s21 + $0x20] ss:$84 sps:$4 sm:$0xff]  }
 0x27b   :  { %2781 = vmatpush1.bf16.msra.mxu0 %v8764_v52  ;;  %v8905_v52 = vld [vmem:[%s11572_s21 + $0xcc] ss:$84 sps:$4 sm:$0xff]  }
 0x27c   :  { %2782 = vmatprep.subr.bf16.mxu0 %v8769_v53  ;;  %v8868_v53 = vld [vmem:[#allocation5 + $0x514] ss:$8 sps:$4 sm:$0xff]  }
 0x27f   :  { %2783 = vmatpush1.bf16.msra.mxu0 %v8767_v54  ;;  %v8866_v54 = vld [vmem:[#allocation5 + $0x510] ss:$8 sps:$4 sm:$0xff]  }
 0x280   :  { %2784 = vmatprep.subr.bf16.mxu0 %v8772_v55  ;;  %v8871_v55 = vld [vmem:[#allocation5 + $0x524] ss:$8 sps:$4 sm:$0xff]  }
 0x283   :  { %2785 = vmatpush1.bf16.msra.mxu0 %v8770_v56  ;;  %v8910_v56 = vld [vmem:[%s11572_s21 + $0xc8] ss:$84 sps:$4 sm:$0xff]  }
 0x284   :  { %2786 = vmatprep.subr.bf16.mxu0 %v8775_v57  ;;  %v8869_v57 = vld [vmem:[#allocation5 + $0x520] ss:$8 sps:$4 sm:$0xff]  }
 0x287   :  { %2787 = vmatpush1.bf16.msra.mxu0 %v8773_v58  ;;  %v8874_v58 = vld [vmem:[#allocation5 + $0x534] ss:$8 sps:$4 sm:$0xff]  }
 0x288   :  { %2788 = vmatprep.subr.bf16.mxu0 %v8778_v59  ;;  %v8916_v59 = vld [vmem:[%s11572_s21 + $0x2c] ss:$84 sps:$4 sm:$0xff]  }
 0x28b   :  { %2789 = vmatpush1.bf16.msra.mxu0 %v8776_v60  ;;  %v8872_v60 = vld [vmem:[#allocation5 + $0x530] ss:$8 sps:$4 sm:$0xff]  }
 0x28c   :  { %2790 = vmatprep.subr.bf16.mxu0 %v8781_v61  ;;  %v8877_v61 = vld [vmem:[#allocation5 + $0x544] ss:$8 sps:$4 sm:$0xff]  }
 0x28f   :  { %2791 = vmatpush1.bf16.msra.mxu0 %v8779_v62  ;;  %v8875_v62 = vld [vmem:[#allocation5 + $0x540] ss:$8 sps:$4 sm:$0xff]  }
 0x290   :  { %2792 = vmatprep.subr.bf16.mxu0 %v8784_v63  ;;  %v8880_v63 = vld [vmem:[#allocation5 + $0x554] ss:$8 sps:$4 sm:$0xff]  }
 0x293   :  { %2793 = vmatpush1.bf16.msra.mxu0 %v8782_v0  ;;  %v8878_v0 = vld [vmem:[#allocation5 + $0x550] ss:$8 sps:$4 sm:$0xff]  }
 0x294   :  { %2794 = vmatprep.subr.bf16.mxu0 %v8787_v1  ;;  %v8883_v1 = vld [vmem:[#allocation5 + $0x564] ss:$8 sps:$4 sm:$0xff]  }
 0x297   :  { %2795 = vmatpush1.bf16.msra.mxu0 %v8785_v2  ;;  %v8881_v2 = vld [vmem:[#allocation5 + $0x560] ss:$8 sps:$4 sm:$0xff]  }
 0x298   :  { %2796 = vmatprep.subr.bf16.mxu0 %v8790_v3  ;;  %v8886_v3 = vld [vmem:[#allocation5 + $0x574] ss:$8 sps:$4 sm:$0xff]  }
 0x29b   :  { %2797 = vmatpush1.bf16.msra.mxu0 %v8788_v4  ;;  %v8884_v4 = vld [vmem:[#allocation5 + $0x570] ss:$8 sps:$4 sm:$0xff]  }
 0x29c   :  { %2798 = vmatprep.subr.bf16.mxu0 %v8793_v5  ;;  %v8889_v5 = vld [vmem:[#allocation5 + $0x584] ss:$8 sps:$4 sm:$0xff]  }
 0x29f   :  { %2799 = vmatpush1.bf16.msra.mxu0 %v8791_v6  ;;  %v8887_v6 = vld [vmem:[#allocation5 + $0x580] ss:$8 sps:$4 sm:$0xff]  }
 0x2a0   :  { %2800 = vmatprep.subr.bf16.mxu0 %v8796_v7  ;;  %v8892_v7 = vld [vmem:[#allocation5 + $0x594] ss:$8 sps:$4 sm:$0xff]  }
 0x2a3   :  { %2801 = vmatpush1.bf16.msra.mxu0 %v8794_v8  ;;  %v8890_v8 = vld [vmem:[#allocation5 + $0x590] ss:$8 sps:$4 sm:$0xff]  }
 0x2a4   :  { %2802 = vmatprep.subr.bf16.mxu0 %v8801_v9  ;;  %v8895_v9 = vld [vmem:[#allocation5 + $0x5a4] ss:$8 sps:$4 sm:$0xff]  }
 0x2a7   :  { %2803 = vmatpush1.bf16.msra.mxu0 %v8799_v10  ;;  %v8893_v10 = vld [vmem:[#allocation5 + $0x5a0] ss:$8 sps:$4 sm:$0xff]  }
 0x2a8   :  { %2804 = vmatprep.subr.bf16.mxu0 %v8805_v11  ;;  %v8898_v11 = vld [vmem:[#allocation5 + $0x5b4] ss:$8 sps:$4 sm:$0xff]  }
 0x2ab   :  { %2805 = vmatpush1.bf16.msra.mxu0 %v8803_v12  ;;  %v8896_v12 = vld [vmem:[#allocation5 + $0x5b0] ss:$8 sps:$4 sm:$0xff]  }
 0x2ac   :  { %2827 = vmatprep.subr.bf16.mxu0 %v8811_v13  ;;  %v8901_v13 = vld [vmem:[#allocation5 + $0x5c4] ss:$8 sps:$4 sm:$0xff]  }
 0x2ae   :  { %2807 = vmatmul.mubr.bf16.vlgmr.msra.gmra.mrb[0].mxu0 %v8806_v14  ;;  %v8899_v14 = vld [vmem:[#allocation5 + $0x5c0] ss:$8 sps:$4 sm:$0xff]  }
 0x2af   :  { %2828 = vmatpush1.bf16.msra.mxu0 %v8809_v15  ;;  %2816 = vmatprep.mubr.bf16.mxu0 %v8851_v16  ;;  %v8904_v15 = vld [vmem:[#allocation5 + $0x5d4] ss:$8 sps:$4 sm:$0xff]   ;;  %v8902_v16 = vld [vmem:[#allocation5 + $0x5d0] ss:$8 sps:$4 sm:$0xff]  }
 0x2b0   :  { %2829 = vmatprep.subr.bf16.mxu0 %v8814_v17  ;;  %v8909_v17 = vld [vmem:[#allocation5 + $0x5e4] ss:$8 sps:$4 sm:$0xff]  }
 0x2b3   :  { %2830 = vmatpush1.bf16.msra.mxu0 %v8812_v18  ;;  %v8907_v18 = vld [vmem:[#allocation5 + $0x5e0] ss:$8 sps:$4 sm:$0xff]  }
 0x2b4   :  { %2831 = vmatprep.subr.bf16.mxu0 %v8817_v19  ;;  %v8913_v19 = vld [vmem:[#allocation5 + $0x5f4] ss:$8 sps:$4 sm:$0xff]  }
 0x2b6   :  { %2817 = vmatmul.mubr.bf16.gmra.mrb[4].mxu0 %v8856_v20  ;;  %v8911_v20 = vld [vmem:[#allocation5 + $0x5f0] ss:$8 sps:$4 sm:$0xff]  }
 0x2b7   :  { %2832 = vmatpush1.bf16.msra.mxu0 %v8815_v21  ;;  %2859 = vmatprep.mubr.bf16.mxu0 %v8862_v23  ;;  %v8919_v21 = vld [vmem:[#allocation5 + $0x604] ss:$8 sps:$4 sm:$0xff]   ;;  %v8917_v23 = vld [vmem:[#allocation5 + $0x600] ss:$8 sps:$4 sm:$0xff]  }
 0x2b8   :  { %2833 = vmatprep.subr.bf16.mxu0 %v8820_v22  ;;  %v8914_v22 = vld [vmem:[%s11572_s21 + $0x28] ss:$84 sps:$4 sm:$0xff]  }
 0x2bb   :  { %2834 = vmatpush1.bf16.msra.mxu0 %v8818_v24  ;;  %v8959_v24 = vld [vmem:[%s11572_s21 + $0xd4] ss:$84 sps:$4 sm:$0xff]  }
 0x2bc   :  { %2835 = vmatprep.subr.bf16.mxu0 %v8823_v25  ;;  %v8922_v25 = vld [vmem:[#allocation5 + $0x614] ss:$8 sps:$4 sm:$0xff]  }
 0x2bf   :  { %2836 = vmatpush1.bf16.msra.mxu0 %v8821_v26  ;;  %v8920_v26 = vld [vmem:[#allocation5 + $0x610] ss:$8 sps:$4 sm:$0xff]  }
 0x2c0   :  { %2837 = vmatprep.subr.bf16.mxu0 %v8826_v27  ;;  %v8925_v27 = vld [vmem:[#allocation5 + $0x624] ss:$8 sps:$4 sm:$0xff]  }
 0x2c3   :  { %2838 = vmatpush1.bf16.msra.mxu0 %v8824_v28  ;;  %v8964_v28 = vld [vmem:[%s11572_s21 + $0xd0] ss:$84 sps:$4 sm:$0xff]  }
 0x2c4   :  { %2839 = vmatprep.subr.bf16.mxu0 %v8829_v29  ;;  %v8923_v29 = vld [vmem:[#allocation5 + $0x620] ss:$8 sps:$4 sm:$0xff]  }
 0x2c7   :  { %2840 = vmatpush1.bf16.msra.mxu0 %v8827_v30  ;;  %v8970_v30 = vld [vmem:[%s11572_s21 + $0x34] ss:$84 sps:$4 sm:$0xff]  }
 0x2c8   :  { %2841 = vmatprep.subr.bf16.mxu0 %v8832_v31  ;;  %v8928_v31 = vld [vmem:[#allocation5 + $0x634] ss:$8 sps:$4 sm:$0xff]  }
 0x2cb   :  { %2842 = vmatpush1.bf16.msra.mxu0 %v8830_v32  ;;  %v8926_v32 = vld [vmem:[#allocation5 + $0x630] ss:$8 sps:$4 sm:$0xff]  }
 0x2cc   :  { %2843 = vmatprep.subr.bf16.mxu0 %v8835_v33  ;;  %v8931_v33 = vld [vmem:[#allocation5 + $0x644] ss:$8 sps:$4 sm:$0xff]  }
 0x2cf   :  { %2844 = vmatpush1.bf16.msra.mxu0 %v8833_v34  ;;  %v8929_v34 = vld [vmem:[#allocation5 + $0x640] ss:$8 sps:$4 sm:$0xff]  }
 0x2d0   :  { %2845 = vmatprep.subr.bf16.mxu0 %v8838_v35  ;;  %v8934_v35 = vld [vmem:[#allocation5 + $0x654] ss:$8 sps:$4 sm:$0xff]  }
 0x2d3   :  { %2846 = vmatpush1.bf16.msra.mxu0 %v8836_v36  ;;  %v8932_v36 = vld [vmem:[#allocation5 + $0x650] ss:$8 sps:$4 sm:$0xff]  }
 0x2d4   :  { %2847 = vmatprep.subr.bf16.mxu0 %v8841_v37  ;;  %v8937_v37 = vld [vmem:[#allocation5 + $0x664] ss:$8 sps:$4 sm:$0xff]  }
 0x2d7   :  { %2848 = vmatpush1.bf16.msra.mxu0 %v8839_v38  ;;  %v8935_v38 = vld [vmem:[#allocation5 + $0x660] ss:$8 sps:$4 sm:$0xff]  }
 0x2d8   :  { %2849 = vmatprep.subr.bf16.mxu0 %v8844_v39  ;;  %v8940_v39 = vld [vmem:[#allocation5 + $0x674] ss:$8 sps:$4 sm:$0xff]  }
 0x2db   :  { %2850 = vmatpush1.bf16.msra.mxu0 %v8842_v40  ;;  %v8938_v40 = vld [vmem:[#allocation5 + $0x670] ss:$8 sps:$4 sm:$0xff]  }
 0x2dc   :  { %2851 = vmatprep.subr.bf16.mxu0 %v8847_v41  ;;  %v8943_v41 = vld [vmem:[#allocation5 + $0x684] ss:$8 sps:$4 sm:$0xff]  }
 0x2df   :  { %2852 = vmatpush1.bf16.msra.mxu0 %v8845_v42  ;;  %v8941_v42 = vld [vmem:[#allocation5 + $0x680] ss:$8 sps:$4 sm:$0xff]  }
 0x2e0   :  { %2853 = vmatprep.subr.bf16.mxu0 %v8850_v43  ;;  %v8946_v43 = vld [vmem:[#allocation5 + $0x694] ss:$8 sps:$4 sm:$0xff]  }
 0x2e3   :  { %2854 = vmatpush1.bf16.msra.mxu0 %v8848_v44  ;;  %v8944_v44 = vld [vmem:[#allocation5 + $0x690] ss:$8 sps:$4 sm:$0xff]  }
 0x2e4   :  { %2855 = vmatprep.subr.bf16.mxu0 %v8855_v45  ;;  %v8949_v45 = vld [vmem:[#allocation5 + $0x6a4] ss:$8 sps:$4 sm:$0xff]  }
 0x2e7   :  { %2856 = vmatpush1.bf16.msra.mxu0 %v8853_v46  ;;  %v8947_v46 = vld [vmem:[#allocation5 + $0x6a0] ss:$8 sps:$4 sm:$0xff]  }
 0x2e8   :  { %2857 = vmatprep.subr.bf16.mxu0 %v8859_v47  ;;  %v8952_v47 = vld [vmem:[#allocation5 + $0x6b4] ss:$8 sps:$4 sm:$0xff]  }
 0x2eb   :  { %2858 = vmatpush1.bf16.msra.mxu0 %v8857_v48  ;;  %v8950_v48 = vld [vmem:[#allocation5 + $0x6b0] ss:$8 sps:$4 sm:$0xff]  }
 0x2ec   :  { %2880 = vmatprep.subr.bf16.mxu0 %v8865_v49  ;;  %v8955_v49 = vld [vmem:[#allocation5 + $0x6c4] ss:$8 sps:$4 sm:$0xff]  }
 0x2ee   :  { %2860 = vmatmul.mubr.bf16.vlgmr.msra.gmra.mrb[0].mxu0 %v8860_v50  ;;  %v8953_v50 = vld [vmem:[#allocation5 + $0x6c0] ss:$8 sps:$4 sm:$0xff]  }
 0x2ef   :  { %2881 = vmatpush1.bf16.msra.mxu0 %v8863_v51  ;;  %2869 = vmatprep.mubr.bf16.mxu0 %v8905_v52  ;;  %v8958_v51 = vld [vmem:[#allocation5 + $0x6d4] ss:$8 sps:$4 sm:$0xff]   ;;  %v8956_v52 = vld [vmem:[#allocation5 + $0x6d0] ss:$8 sps:$4 sm:$0xff]  }
 0x2f0   :  { %2882 = vmatprep.subr.bf16.mxu0 %v8868_v53  ;;  %v8963_v53 = vld [vmem:[#allocation5 + $0x6e4] ss:$8 sps:$4 sm:$0xff]  }
 0x2f3   :  { %2883 = vmatpush1.bf16.msra.mxu0 %v8866_v54  ;;  %v8961_v54 = vld [vmem:[#allocation5 + $0x6e0] ss:$8 sps:$4 sm:$0xff]  }
 0x2f4   :  { %2884 = vmatprep.subr.bf16.mxu0 %v8871_v55  ;;  %v8967_v55 = vld [vmem:[#allocation5 + $0x6f4] ss:$8 sps:$4 sm:$0xff]  }
 0x2f6   :  { %2870 = vmatmul.mubr.bf16.gmra.mrb[4].mxu0 %v8910_v56  ;;  %v8965_v56 = vld [vmem:[#allocation5 + $0x6f0] ss:$8 sps:$4 sm:$0xff]  }
 0x2f7   :  { %2885 = vmatpush1.bf16.msra.mxu0 %v8869_v57  ;;  %2912 = vmatprep.mubr.bf16.mxu0 %v8916_v59  ;;  %v8973_v57 = vld [vmem:[#allocation5 + $0x704] ss:$8 sps:$4 sm:$0xff]   ;;  %v8971_v59 = vld [vmem:[#allocation5 + $0x700] ss:$8 sps:$4 sm:$0xff]  }
 0x2f8   :  { %2886 = vmatprep.subr.bf16.mxu0 %v8874_v58  ;;  %v8968_v58 = vld [vmem:[%s11572_s21 + $0x30] ss:$84 sps:$4 sm:$0xff]  }
 0x2fb   :  { %2887 = vmatpush1.bf16.msra.mxu0 %v8872_v60  ;;  %v9013_v60 = vld [vmem:[%s11572_s21 + $0xdc] ss:$84 sps:$4 sm:$0xff]  }
 0x2fc   :  { %2888 = vmatprep.subr.bf16.mxu0 %v8877_v61  ;;  %v8976_v61 = vld [vmem:[#allocation5 + $0x714] ss:$8 sps:$4 sm:$0xff]  }
 0x2ff   :  { %2889 = vmatpush1.bf16.msra.mxu0 %v8875_v62  ;;  %v8974_v62 = vld [vmem:[#allocation5 + $0x710] ss:$8 sps:$4 sm:$0xff]  }
 0x300   :  { %2890 = vmatprep.subr.bf16.mxu0 %v8880_v63  ;;  %v8979_v63 = vld [vmem:[#allocation5 + $0x724] ss:$8 sps:$4 sm:$0xff]  }
 0x303   :  { %2891 = vmatpush1.bf16.msra.mxu0 %v8878_v0  ;;  %v9018_v0 = vld [vmem:[%s11572_s21 + $0xd8] ss:$84 sps:$4 sm:$0xff]  }
 0x304   :  { %2892 = vmatprep.subr.bf16.mxu0 %v8883_v1  ;;  %v8977_v1 = vld [vmem:[#allocation5 + $0x720] ss:$8 sps:$4 sm:$0xff]  }
 0x307   :  { %2893 = vmatpush1.bf16.msra.mxu0 %v8881_v2  ;;  %v9024_v2 = vld [vmem:[%s11572_s21 + $0x3c] ss:$84 sps:$4 sm:$0xff]  }
 0x308   :  { %2894 = vmatprep.subr.bf16.mxu0 %v8886_v3  ;;  %v8982_v3 = vld [vmem:[#allocation5 + $0x734] ss:$8 sps:$4 sm:$0xff]  }
 0x30b   :  { %2895 = vmatpush1.bf16.msra.mxu0 %v8884_v4  ;;  %v8980_v4 = vld [vmem:[#allocation5 + $0x730] ss:$8 sps:$4 sm:$0xff]  }
 0x30c   :  { %2896 = vmatprep.subr.bf16.mxu0 %v8889_v5  ;;  %v8985_v5 = vld [vmem:[#allocation5 + $0x744] ss:$8 sps:$4 sm:$0xff]  }
 0x30f   :  { %2897 = vmatpush1.bf16.msra.mxu0 %v8887_v6  ;;  %v8983_v6 = vld [vmem:[#allocation5 + $0x740] ss:$8 sps:$4 sm:$0xff]  }
 0x310   :  { %2898 = vmatprep.subr.bf16.mxu0 %v8892_v7  ;;  %v8988_v7 = vld [vmem:[#allocation5 + $0x754] ss:$8 sps:$4 sm:$0xff]  }
 0x313   :  { %2899 = vmatpush1.bf16.msra.mxu0 %v8890_v8  ;;  %v8986_v8 = vld [vmem:[#allocation5 + $0x750] ss:$8 sps:$4 sm:$0xff]  }
 0x314   :  { %2900 = vmatprep.subr.bf16.mxu0 %v8895_v9  ;;  %v8991_v9 = vld [vmem:[#allocation5 + $0x764] ss:$8 sps:$4 sm:$0xff]  }
 0x317   :  { %2901 = vmatpush1.bf16.msra.mxu0 %v8893_v10  ;;  %v8989_v10 = vld [vmem:[#allocation5 + $0x760] ss:$8 sps:$4 sm:$0xff]  }
 0x318   :  { %2902 = vmatprep.subr.bf16.mxu0 %v8898_v11  ;;  %v8994_v11 = vld [vmem:[#allocation5 + $0x774] ss:$8 sps:$4 sm:$0xff]  }
 0x31b   :  { %2903 = vmatpush1.bf16.msra.mxu0 %v8896_v12  ;;  %v8992_v12 = vld [vmem:[#allocation5 + $0x770] ss:$8 sps:$4 sm:$0xff]  }
 0x31c   :  { %2904 = vmatprep.subr.bf16.mxu0 %v8901_v13  ;;  %v8997_v13 = vld [vmem:[#allocation5 + $0x784] ss:$8 sps:$4 sm:$0xff]  }
 0x31f   :  { %2905 = vmatpush1.bf16.msra.mxu0 %v8899_v14  ;;  %v8995_v14 = vld [vmem:[#allocation5 + $0x780] ss:$8 sps:$4 sm:$0xff]  }
 0x320   :  { %2906 = vmatprep.subr.bf16.mxu0 %v8904_v15  ;;  %v9000_v15 = vld [vmem:[#allocation5 + $0x794] ss:$8 sps:$4 sm:$0xff]  }
 0x323   :  { %2907 = vmatpush1.bf16.msra.mxu0 %v8902_v16  ;;  %v8998_v16 = vld [vmem:[#allocation5 + $0x790] ss:$8 sps:$4 sm:$0xff]  }
 0x324   :  { %2908 = vmatprep.subr.bf16.mxu0 %v8909_v17  ;;  %v9003_v17 = vld [vmem:[#allocation5 + $0x7a4] ss:$8 sps:$4 sm:$0xff]  }
 0x327   :  { %2909 = vmatpush1.bf16.msra.mxu0 %v8907_v18  ;;  %v9001_v18 = vld [vmem:[#allocation5 + $0x7a0] ss:$8 sps:$4 sm:$0xff]  }
 0x328   :  { %2910 = vmatprep.subr.bf16.mxu0 %v8913_v19  ;;  %v9006_v19 = vld [vmem:[#allocation5 + $0x7b4] ss:$8 sps:$4 sm:$0xff]  }
 0x32b   :  { %2911 = vmatpush1.bf16.msra.mxu0 %v8911_v20  ;;  %v9004_v20 = vld [vmem:[#allocation5 + $0x7b0] ss:$8 sps:$4 sm:$0xff]  }
 0x32c   :  { %2933 = vmatprep.subr.bf16.mxu0 %v8919_v21  ;;  %v9009_v21 = vld [vmem:[#allocation5 + $0x7c4] ss:$8 sps:$4 sm:$0xff]  }
 0x32e   :  { %2913 = vmatmul.mubr.bf16.vlgmr.msra.gmra.mrb[0].mxu0 %v8914_v22  ;;  %v9007_v22 = vld [vmem:[#allocation5 + $0x7c0] ss:$8 sps:$4 sm:$0xff]  }
 0x32f   :  { %2934 = vmatpush1.bf16.msra.mxu0 %v8917_v23  ;;  %2922 = vmatprep.mubr.bf16.mxu0 %v8959_v24  ;;  %v9012_v23 = vld [vmem:[#allocation5 + $0x7d4] ss:$8 sps:$4 sm:$0xff]   ;;  %v9010_v24 = vld [vmem:[#allocation5 + $0x7d0] ss:$8 sps:$4 sm:$0xff]  }
 0x330   :  { %2935 = vmatprep.subr.bf16.mxu0 %v8922_v25  ;;  %v9017_v25 = vld [vmem:[#allocation5 + $0x7e4] ss:$8 sps:$4 sm:$0xff]  }
 0x333   :  { %2936 = vmatpush1.bf16.msra.mxu0 %v8920_v26  ;;  %v9015_v26 = vld [vmem:[#allocation5 + $0x7e0] ss:$8 sps:$4 sm:$0xff]  }
 0x334   :  { %2937 = vmatprep.subr.bf16.mxu0 %v8925_v27  ;;  %v9021_v27 = vld [vmem:[#allocation5 + $0x7f4] ss:$8 sps:$4 sm:$0xff]  }
 0x336   :  { %2923 = vmatmul.mubr.bf16.gmra.mrb[4].mxu0 %v8964_v28  ;;  %v9019_v28 = vld [vmem:[#allocation5 + $0x7f0] ss:$8 sps:$4 sm:$0xff]  }
 0x337   :  { %2938 = vmatpush1.bf16.msra.mxu0 %v8923_v29  ;;  %2965 = vmatprep.mubr.bf16.mxu0 %v8970_v30  ;;  %v9027_v29 = vld [vmem:[#allocation5 + $0x804] ss:$8 sps:$4 sm:$0xff]   ;;  %v9022_v30 = vld [vmem:[%s11572_s21 + $0x38] ss:$84 sps:$4 sm:$0xff]  }
 0x338   :  { %2939 = vmatprep.subr.bf16.mxu0 %v8928_v31  ;;  %v9025_v31 = vld [vmem:[#allocation5 + $0x800] ss:$8 sps:$4 sm:$0xff]  }
 0x33b   :  { %2940 = vmatpush1.bf16.msra.mxu0 %v8926_v32  ;;  %v9067_v32 = vld [vmem:[%s11572_s21 + $0xe4] ss:$84 sps:$4 sm:$0xff]  }
 0x33c   :  { %2941 = vmatprep.subr.bf16.mxu0 %v8931_v33  ;;  %v9030_v33 = vld [vmem:[#allocation5 + $0x814] ss:$8 sps:$4 sm:$0xff]  }
 0x33f   :  { %2942 = vmatpush1.bf16.msra.mxu0 %v8929_v34  ;;  %v9028_v34 = vld [vmem:[#allocation5 + $0x810] ss:$8 sps:$4 sm:$0xff]  }
 0x340   :  { %2943 = vmatprep.subr.bf16.mxu0 %v8934_v35  ;;  %v9033_v35 = vld [vmem:[#allocation5 + $0x824] ss:$8 sps:$4 sm:$0xff]  }
 0x343   :  { %2944 = vmatpush1.bf16.msra.mxu0 %v8932_v36  ;;  %v9072_v36 = vld [vmem:[%s11572_s21 + $0xe0] ss:$84 sps:$4 sm:$0xff]  }
 0x344   :  { %2945 = vmatprep.subr.bf16.mxu0 %v8937_v37  ;;  %v9031_v37 = vld [vmem:[#allocation5 + $0x820] ss:$8 sps:$4 sm:$0xff]  }
 0x347   :  { %2946 = vmatpush1.bf16.msra.mxu0 %v8935_v38  ;;  %v9078_v38 = vld [vmem:[%s11572_s21 + $0x44] ss:$84 sps:$4 sm:$0xff]  }
 0x348   :  { %2947 = vmatprep.subr.bf16.mxu0 %v8940_v39  ;;  %v9036_v39 = vld [vmem:[#allocation5 + $0x834] ss:$8 sps:$4 sm:$0xff]  }
 0x34b   :  { %2948 = vmatpush1.bf16.msra.mxu0 %v8938_v40  ;;  %v9034_v40 = vld [vmem:[#allocation5 + $0x830] ss:$8 sps:$4 sm:$0xff]  }
 0x34c   :  { %2949 = vmatprep.subr.bf16.mxu0 %v8943_v41  ;;  %v9039_v41 = vld [vmem:[#allocation5 + $0x844] ss:$8 sps:$4 sm:$0xff]  }
 0x34f   :  { %2950 = vmatpush1.bf16.msra.mxu0 %v8941_v42  ;;  %v9037_v42 = vld [vmem:[#allocation5 + $0x840] ss:$8 sps:$4 sm:$0xff]  }
 0x350   :  { %2951 = vmatprep.subr.bf16.mxu0 %v8946_v43  ;;  %v9042_v43 = vld [vmem:[#allocation5 + $0x854] ss:$8 sps:$4 sm:$0xff]  }
 0x353   :  { %2952 = vmatpush1.bf16.msra.mxu0 %v8944_v44  ;;  %v9040_v44 = vld [vmem:[#allocation5 + $0x850] ss:$8 sps:$4 sm:$0xff]  }
 0x354   :  { %2953 = vmatprep.subr.bf16.mxu0 %v8949_v45  ;;  %v9045_v45 = vld [vmem:[#allocation5 + $0x864] ss:$8 sps:$4 sm:$0xff]  }
 0x357   :  { %2954 = vmatpush1.bf16.msra.mxu0 %v8947_v46  ;;  %v9043_v46 = vld [vmem:[#allocation5 + $0x860] ss:$8 sps:$4 sm:$0xff]  }
 0x358   :  { %2955 = vmatprep.subr.bf16.mxu0 %v8952_v47  ;;  %v9048_v47 = vld [vmem:[#allocation5 + $0x874] ss:$8 sps:$4 sm:$0xff]  }
 0x35b   :  { %2956 = vmatpush1.bf16.msra.mxu0 %v8950_v48  ;;  %v9046_v48 = vld [vmem:[#allocation5 + $0x870] ss:$8 sps:$4 sm:$0xff]  }
 0x35c   :  { %2957 = vmatprep.subr.bf16.mxu0 %v8955_v49  ;;  %v9051_v49 = vld [vmem:[#allocation5 + $0x884] ss:$8 sps:$4 sm:$0xff]  }
 0x35f   :  { %2958 = vmatpush1.bf16.msra.mxu0 %v8953_v50  ;;  %v9049_v50 = vld [vmem:[#allocation5 + $0x880] ss:$8 sps:$4 sm:$0xff]  }
 0x360   :  { %2959 = vmatprep.subr.bf16.mxu0 %v8958_v51  ;;  %v9054_v51 = vld [vmem:[#allocation5 + $0x894] ss:$8 sps:$4 sm:$0xff]  }
 0x363   :  { %2960 = vmatpush1.bf16.msra.mxu0 %v8956_v52  ;;  %v9052_v52 = vld [vmem:[#allocation5 + $0x890] ss:$8 sps:$4 sm:$0xff]  }
 0x364   :  { %2961 = vmatprep.subr.bf16.mxu0 %v8963_v53  ;;  %v9057_v53 = vld [vmem:[#allocation5 + $0x8a4] ss:$8 sps:$4 sm:$0xff]  }
 0x367   :  { %2962 = vmatpush1.bf16.msra.mxu0 %v8961_v54  ;;  %v9055_v54 = vld [vmem:[#allocation5 + $0x8a0] ss:$8 sps:$4 sm:$0xff]  }
 0x368   :  { %2963 = vmatprep.subr.bf16.mxu0 %v8967_v55  ;;  %v9060_v55 = vld [vmem:[#allocation5 + $0x8b4] ss:$8 sps:$4 sm:$0xff]  }
 0x36b   :  { %2964 = vmatpush1.bf16.msra.mxu0 %v8965_v56  ;;  %v9058_v56 = vld [vmem:[#allocation5 + $0x8b0] ss:$8 sps:$4 sm:$0xff]  }
 0x36c   :  { %2986 = vmatprep.subr.bf16.mxu0 %v8973_v57  ;;  %v9063_v57 = vld [vmem:[#allocation5 + $0x8c4] ss:$8 sps:$4 sm:$0xff]  }
 0x36e   :  { %2966 = vmatmul.mubr.bf16.vlgmr.msra.gmra.mrb[0].mxu0 %v8968_v58  ;;  %v9061_v58 = vld [vmem:[#allocation5 + $0x8c0] ss:$8 sps:$4 sm:$0xff]  }
 0x36f   :  { %2987 = vmatpush1.bf16.msra.mxu0 %v8971_v59  ;;  %2975 = vmatprep.mubr.bf16.mxu0 %v9013_v60  ;;  %v9066_v59 = vld [vmem:[#allocation5 + $0x8d4] ss:$8 sps:$4 sm:$0xff]   ;;  %v9064_v60 = vld [vmem:[#allocation5 + $0x8d0] ss:$8 sps:$4 sm:$0xff]  }
 0x370   :  { %2988 = vmatprep.subr.bf16.mxu0 %v8976_v61  ;;  %v9071_v61 = vld [vmem:[#allocation5 + $0x8e4] ss:$8 sps:$4 sm:$0xff]  }
 0x373   :  { %2989 = vmatpush1.bf16.msra.mxu0 %v8974_v62  ;;  %v9069_v62 = vld [vmem:[#allocation5 + $0x8e0] ss:$8 sps:$4 sm:$0xff]  }
 0x374   :  { %2990 = vmatprep.subr.bf16.mxu0 %v8979_v63  ;;  %v9075_v63 = vld [vmem:[#allocation5 + $0x8f4] ss:$8 sps:$4 sm:$0xff]  }
 0x376   :  { %2976 = vmatmul.mubr.bf16.gmra.mrb[4].mxu0 %v9018_v0  ;;  %v9073_v0 = vld [vmem:[#allocation5 + $0x8f0] ss:$8 sps:$4 sm:$0xff]  }
 0x377   :  { %2991 = vmatpush1.bf16.msra.mxu0 %v8977_v1  ;;  %3018 = vmatprep.mubr.bf16.mxu0 %v9024_v2  ;;  %v9081_v1 = vld [vmem:[#allocation5 + $0x904] ss:$8 sps:$4 sm:$0xff]  }
 0x378   :  { %2992 = vmatprep.subr.bf16.mxu0 %v8982_v3  ;;  %v9076_v2 = vld [vmem:[%s11572_s21 + $0x40] ss:$84 sps:$4 sm:$0xff]   ;;  %v9079_v3 = vld [vmem:[#allocation5 + $0x900] ss:$8 sps:$4 sm:$0xff]  }
 0x37b   :  { %2993 = vmatpush1.bf16.msra.mxu0 %v8980_v4  ;;  %v9121_v4 = vld [vmem:[%s11572_s21 + $0xec] ss:$84 sps:$4 sm:$0xff]  }
 0x37c   :  { %2994 = vmatprep.subr.bf16.mxu0 %v8985_v5  ;;  %v9084_v5 = vld [vmem:[#allocation5 + $0x914] ss:$8 sps:$4 sm:$0xff]  }
 0x37f   :  { %2995 = vmatpush1.bf16.msra.mxu0 %v8983_v6  ;;  %v9082_v6 = vld [vmem:[#allocation5 + $0x910] ss:$8 sps:$4 sm:$0xff]  }
 0x380   :  { %2996 = vmatprep.subr.bf16.mxu0 %v8988_v7  ;;  %v9087_v7 = vld [vmem:[#allocation5 + $0x924] ss:$8 sps:$4 sm:$0xff]  }
 0x383   :  { %2997 = vmatpush1.bf16.msra.mxu0 %v8986_v8  ;;  %v9126_v8 = vld [vmem:[%s11572_s21 + $0xe8] ss:$84 sps:$4 sm:$0xff]  }
 0x384   :  { %2998 = vmatprep.subr.bf16.mxu0 %v8991_v9  ;;  %v9085_v9 = vld [vmem:[#allocation5 + $0x920] ss:$8 sps:$4 sm:$0xff]  }
 0x387   :  { %2999 = vmatpush1.bf16.msra.mxu0 %v8989_v10  ;;  %v9132_v10 = vld [vmem:[%s11572_s21 + $0x4c] ss:$84 sps:$4 sm:$0xff]  }
 0x388   :  { %3000 = vmatprep.subr.bf16.mxu0 %v8994_v11  ;;  %v9090_v11 = vld [vmem:[#allocation5 + $0x934] ss:$8 sps:$4 sm:$0xff]  }
 0x38b   :  { %3001 = vmatpush1.bf16.msra.mxu0 %v8992_v12  ;;  %v9088_v12 = vld [vmem:[#allocation5 + $0x930] ss:$8 sps:$4 sm:$0xff]  }
 0x38c   :  { %3002 = vmatprep.subr.bf16.mxu0 %v8997_v13  ;;  %v9093_v13 = vld [vmem:[#allocation5 + $0x944] ss:$8 sps:$4 sm:$0xff]  }
 0x38f   :  { %3003 = vmatpush1.bf16.msra.mxu0 %v8995_v14  ;;  %v9091_v14 = vld [vmem:[#allocation5 + $0x940] ss:$8 sps:$4 sm:$0xff]  }
 0x390   :  { %3004 = vmatprep.subr.bf16.mxu0 %v9000_v15  ;;  %v9096_v15 = vld [vmem:[#allocation5 + $0x954] ss:$8 sps:$4 sm:$0xff]  }
 0x393   :  { %3005 = vmatpush1.bf16.msra.mxu0 %v8998_v16  ;;  %v9094_v16 = vld [vmem:[#allocation5 + $0x950] ss:$8 sps:$4 sm:$0xff]  }
 0x394   :  { %3006 = vmatprep.subr.bf16.mxu0 %v9003_v17  ;;  %v9099_v17 = vld [vmem:[#allocation5 + $0x964] ss:$8 sps:$4 sm:$0xff]  }
 0x397   :  { %3007 = vmatpush1.bf16.msra.mxu0 %v9001_v18  ;;  %v9097_v18 = vld [vmem:[#allocation5 + $0x960] ss:$8 sps:$4 sm:$0xff]  }
 0x398   :  { %3008 = vmatprep.subr.bf16.mxu0 %v9006_v19  ;;  %v9102_v19 = vld [vmem:[#allocation5 + $0x974] ss:$8 sps:$4 sm:$0xff]  }
 0x39b   :  { %3009 = vmatpush1.bf16.msra.mxu0 %v9004_v20  ;;  %v9100_v20 = vld [vmem:[#allocation5 + $0x970] ss:$8 sps:$4 sm:$0xff]  }
 0x39c   :  { %3010 = vmatprep.subr.bf16.mxu0 %v9009_v21  ;;  %v9105_v21 = vld [vmem:[#allocation5 + $0x984] ss:$8 sps:$4 sm:$0xff]  }
 0x39f   :  { %3011 = vmatpush1.bf16.msra.mxu0 %v9007_v22  ;;  %v9103_v22 = vld [vmem:[#allocation5 + $0x980] ss:$8 sps:$4 sm:$0xff]  }
 0x3a0   :  { %3012 = vmatprep.subr.bf16.mxu0 %v9012_v23  ;;  %v9108_v23 = vld [vmem:[#allocation5 + $0x994] ss:$8 sps:$4 sm:$0xff]  }
 0x3a3   :  { %3013 = vmatpush1.bf16.msra.mxu0 %v9010_v24  ;;  %v9106_v24 = vld [vmem:[#allocation5 + $0x990] ss:$8 sps:$4 sm:$0xff]  }
 0x3a4   :  { %3014 = vmatprep.subr.bf16.mxu0 %v9017_v25  ;;  %v9111_v25 = vld [vmem:[#allocation5 + $0x9a4] ss:$8 sps:$4 sm:$0xff]  }
 0x3a7   :  { %3015 = vmatpush1.bf16.msra.mxu0 %v9015_v26  ;;  %v9109_v26 = vld [vmem:[#allocation5 + $0x9a0] ss:$8 sps:$4 sm:$0xff]  }
 0x3a8   :  { %3016 = vmatprep.subr.bf16.mxu0 %v9021_v27  ;;  %v9114_v27 = vld [vmem:[#allocation5 + $0x9b4] ss:$8 sps:$4 sm:$0xff]  }
 0x3ab   :  { %3017 = vmatpush1.bf16.msra.mxu0 %v9019_v28  ;;  %v9112_v28 = vld [vmem:[#allocation5 + $0x9b0] ss:$8 sps:$4 sm:$0xff]  }
 0x3ac   :  { %3039 = vmatprep.subr.bf16.mxu0 %v9027_v29  ;;  %v9117_v29 = vld [vmem:[#allocation5 + $0x9c4] ss:$8 sps:$4 sm:$0xff]  }
 0x3ae   :  { %3019 = vmatmul.mubr.bf16.vlgmr.msra.gmra.mrb[0].mxu0 %v9022_v30  ;;  %v9115_v30 = vld [vmem:[#allocation5 + $0x9c0] ss:$8 sps:$4 sm:$0xff]  }
 0x3af   :  { %3040 = vmatpush1.bf16.msra.mxu0 %v9025_v31  ;;  %3028 = vmatprep.mubr.bf16.mxu0 %v9067_v32  ;;  %v9120_v31 = vld [vmem:[#allocation5 + $0x9d4] ss:$8 sps:$4 sm:$0xff]   ;;  %v9118_v32 = vld [vmem:[#allocation5 + $0x9d0] ss:$8 sps:$4 sm:$0xff]  }
 0x3b0   :  { %3041 = vmatprep.subr.bf16.mxu0 %v9030_v33  ;;  %v9125_v33 = vld [vmem:[#allocation5 + $0x9e4] ss:$8 sps:$4 sm:$0xff]  }
 0x3b3   :  { %3042 = vmatpush1.bf16.msra.mxu0 %v9028_v34  ;;  %v9123_v34 = vld [vmem:[#allocation5 + $0x9e0] ss:$8 sps:$4 sm:$0xff]  }
 0x3b4   :  { %3043 = vmatprep.subr.bf16.mxu0 %v9033_v35  ;;  %v9129_v35 = vld [vmem:[#allocation5 + $0x9f4] ss:$8 sps:$4 sm:$0xff]  }
 0x3b6   :  { %3029 = vmatmul.mubr.bf16.gmra.mrb[4].mxu0 %v9072_v36  ;;  %v9127_v36 = vld [vmem:[#allocation5 + $0x9f0] ss:$8 sps:$4 sm:$0xff]  }
 0x3b7   :  { %3044 = vmatpush1.bf16.msra.mxu0 %v9031_v37  ;;  %3071 = vmatprep.mubr.bf16.mxu0 %v9078_v38  ;;  %v9135_v37 = vld [vmem:[#allocation5 + $0xa04] ss:$8 sps:$4 sm:$0xff]  }
 0x3b8   :  { %3045 = vmatprep.subr.bf16.mxu0 %v9036_v39  ;;  %v9130_v38 = vld [vmem:[%s11572_s21 + $0x48] ss:$84 sps:$4 sm:$0xff]   ;;  %v9133_v39 = vld [vmem:[#allocation5 + $0xa00] ss:$8 sps:$4 sm:$0xff]  }
 0x3bb   :  { %3046 = vmatpush1.bf16.msra.mxu0 %v9034_v40  ;;  %v9151_v40 = vld [vmem:[%s11572_s21 + $0xf4] ss:$84 sps:$4 sm:$0xff]  }
 0x3bc   :  { %3047 = vmatprep.subr.bf16.mxu0 %v9039_v41  ;;  %v9138_v41 = vld [vmem:[#allocation5 + $0xa14] ss:$8 sps:$4 sm:$0xff]  }
 0x3bf   :  { %3048 = vmatpush1.bf16.msra.mxu0 %v9037_v42  ;;  %v9136_v42 = vld [vmem:[#allocation5 + $0xa10] ss:$8 sps:$4 sm:$0xff]  }
 0x3c0   :  { %3049 = vmatprep.subr.bf16.mxu0 %v9042_v43  ;;  %v9141_v43 = vld [vmem:[#allocation5 + $0xa24] ss:$8 sps:$4 sm:$0xff]  }
 0x3c3   :  { %3050 = vmatpush1.bf16.msra.mxu0 %v9040_v44  ;;  %v9153_v44 = vld [vmem:[%s11572_s21 + $0xf0] ss:$84 sps:$4 sm:$0xff]  }
 0x3c4   :  { %3051 = vmatprep.subr.bf16.mxu0 %v9045_v45  ;;  %v9139_v45 = vld [vmem:[#allocation5 + $0xa20] ss:$8 sps:$4 sm:$0xff]  }
 0x3c7   :  { %3052 = vmatpush1.bf16.msra.mxu0 %v9043_v46  ;;  %v9144_v46 = vld [vmem:[#allocation5 + $0xa34] ss:$8 sps:$4 sm:$0xff]  }
 0x3c8   :  { %3053 = vmatprep.subr.bf16.mxu0 %v9048_v47  ;;  %v9142_v47 = vld [vmem:[#allocation5 + $0xa30] ss:$8 sps:$4 sm:$0xff]  }
 0x3cb   :  { %3054 = vmatpush1.bf16.msra.mxu0 %v9046_v48  ;;  %v10333_v48 = vmov 0  }
 0x3cc   :  { %3055 = vmatprep.subr.bf16.mxu0 %v9051_v49  ;;  %v9147_v49 = vld [vmem:[#allocation5 + $0xa44] ss:$8 sps:$4 sm:$0xff]  }
 0x3cf   :  { %3056 = vmatpush1.bf16.msra.mxu0 %v9049_v50  ;;  %v9145_v50 = vld [vmem:[#allocation5 + $0xa40] ss:$8 sps:$4 sm:$0xff]  }
 0x3d0   :  { %3057 = vmatprep.subr.bf16.mxu0 %v9054_v51  ;;  %v9150_v51 = vld [vmem:[#allocation5 + $0xa54] ss:$8 sps:$4 sm:$0xff]  }
 0x3d3   :  { %3058 = vmatpush1.bf16.msra.mxu0 %v9052_v52  ;;  %v9148_v52 = vld [vmem:[#allocation5 + $0xa50] ss:$8 sps:$4 sm:$0xff]  }
 0x3d4   :  { %3059 = vmatprep.subr.bf16.mxu0 %v9057_v53  ;;  %v9156_v53 = vld [vmem:[#allocation5 + $0xa64] ss:$8 sps:$4 sm:$0xff]  }
 0x3d7   :  { %3060 = vmatpush1.bf16.msra.mxu0 %v9055_v54  ;;  %v9154_v54 = vld [vmem:[#allocation5 + $0xa60] ss:$8 sps:$4 sm:$0xff]  }
 0x3d8   :  { %3061 = vmatprep.subr.bf16.mxu0 %v9060_v55  ;;  %v9159_v55 = vld [vmem:[#allocation5 + $0xa74] ss:$8 sps:$4 sm:$0xff]  }
 0x3db   :  { %3062 = vmatpush1.bf16.msra.mxu0 %v9058_v56  ;;  %v9157_v56 = vld [vmem:[#allocation5 + $0xa70] ss:$8 sps:$4 sm:$0xff]  }
 0x3dc   :  { %3063 = vmatprep.subr.bf16.mxu0 %v9063_v57  ;;  %v9160_v57 = vld [vmem:[%s11572_s21 + $0x50] ss:$84 sps:$4 sm:$0xff]  }
 0x3df   :  { %3064 = vmatpush1.bf16.msra.mxu0 %v9061_v58  ;;  %v9161_v58 = vld [vmem:[%s11572_s21 + $0xf8] ss:$84 sps:$4 sm:$0xff]   ;;  %s10336_s21 = smov [#allocation35]  }
 0x3e0   :  { %3065 = vmatprep.subr.bf16.mxu0 %v9066_v59  ;;  %v9162_v59 = vld [vmem:[#allocation11 + $0x4] ss:$8 sps:$4 sm:$0xff]   ;;  %s7588_s12 = sshll.u32 %s10336_s21, 4  ;;  %s7589_s12 = int_to_ptr.vmem [resolvable:$true] %s7588_s12 }
 0x3e1   :  { %3563 = vmatprep.subr.bf16.mxu1 %v9162_v59  ;;  %s10260_s23 = scalar_lea.vmem %s7589_s12, 2048  ;;  %p10265_p1 = scmp.lt.s32.totalorder %s7589_s12, %s7589_s12 }
 0x3e2   :  { %p10261_p0 = scmp.ne.s32.totalorder %s7589_s12, %s10260_s23  ;;  %p10266_p2 = scmp.lt.s32.totalorder %s10260_s23, %s10260_s23 }
 0x3e3   :  { %3066 = vmatpush1.bf16.msra.mxu0 %v9064_v60  ;;  %v9164_v60 = vld [vmem:[#allocation11] ss:$8 sps:$4 sm:$0xff]  }
 0x3e4   :  { %3067 = vmatprep.subr.bf16.mxu0 %v9071_v61  ;;  %3564 = vmatpush1.bf16.msra.mxu1 %v9164_v60  ;;  %v9165_v61 = vld [vmem:[#allocation11 + $0x14] ss:$8 sps:$4 sm:$0xff]   ;;  %p10267_p3 = por %p10266_p2, %p10265_p1 }
 0x3e5   :  { %3565 = vmatprep.subr.bf16.mxu1 %v9165_v61 }
 0x3e6   :  { %p10268_p4 = pnand %p10267_p3, %p10261_p0 }
 0x3e7   :  { %3068 = vmatpush1.bf16.msra.mxu0 %v9069_v62  ;;  %v9167_v62 = vld [vmem:[#allocation11 + $0x10] ss:$8 sps:$4 sm:$0xff]  }
 0x3e8   :  { %3069 = vmatprep.subr.bf16.mxu0 %v9075_v63  ;;  %3566 = vmatpush1.bf16.msra.mxu1 %v9167_v62  ;;  %v9168_v63 = vld [vmem:[#allocation11 + $0x24] ss:$8 sps:$4 sm:$0xff]  }
 0x3e9   :  { %3567 = vmatprep.subr.bf16.mxu1 %v9168_v63 }
 0x3eb   :  { %3070 = vmatpush1.bf16.msra.mxu0 %v9073_v0  ;;  %v9170_v0 = vld [vmem:[#allocation11 + $0x20] ss:$8 sps:$4 sm:$0xff]  }
 0x3ec   :  { %3092 = vmatprep.subr.bf16.mxu0 %v9081_v1  ;;  %3568 = vmatpush1.bf16.msra.mxu1 %v9170_v0  ;;  %v9171_v1 = vld [vmem:[#allocation11 + $0x34] ss:$8 sps:$4 sm:$0xff]  }
 0x3ed   :  { %3569 = vmatprep.subr.bf16.mxu1 %v9171_v1 }
 0x3ee   :  { %3072 = vmatmul.mubr.bf16.vlgmr.msra.gmra.mrb[0].mxu0 %v9076_v2  ;;  %v9173_v2 = vld [vmem:[#allocation11 + $0x30] ss:$8 sps:$4 sm:$0xff]  }
 0x3ef   :  { %3093 = vmatpush1.bf16.msra.mxu0 %v9079_v3  ;;  %3081 = vmatprep.mubr.bf16.mxu0 %v9121_v4  ;;  %v9174_v3 = vld [vmem:[#allocation11 + $0x44] ss:$8 sps:$4 sm:$0xff]   ;;  %v9176_v4 = vld [vmem:[#allocation11 + $0x40] ss:$8 sps:$4 sm:$0xff]  }
 0x3f0   :  { %3094 = vmatprep.subr.bf16.mxu0 %v9084_v5  ;;  %3570 = vmatpush1.bf16.msra.mxu1 %v9173_v2  ;;  %v9177_v5 = vld [vmem:[#allocation11 + $0x54] ss:$8 sps:$4 sm:$0xff]  }
 0x3f1   :  { %3571 = vmatprep.subr.bf16.mxu1 %v9174_v3 }
 0x3f3   :  { %3095 = vmatpush1.bf16.msra.mxu0 %v9082_v6  ;;  %v9179_v6 = vld [vmem:[#allocation11 + $0x50] ss:$8 sps:$4 sm:$0xff]  }
 0x3f4   :  { %3096 = vmatprep.subr.bf16.mxu0 %v9087_v7  ;;  %3572 = vmatpush1.bf16.msra.mxu1 %v9176_v4  ;;  %v9180_v7 = vld [vmem:[#allocation11 + $0x64] ss:$8 sps:$4 sm:$0xff]  }
 0x3f5   :  { %3573 = vmatprep.subr.bf16.mxu1 %v9177_v5 }
 0x3f6   :  { %3082 = vmatmul.mubr.bf16.gmra.mrb[4].mxu0 %v9126_v8  ;;  %v9182_v8 = vld [vmem:[#allocation11 + $0x60] ss:$8 sps:$4 sm:$0xff]  }
 0x3f7   :  { %3097 = vmatpush1.bf16.msra.mxu0 %v9085_v9  ;;  %3124 = vmatprep.mubr.bf16.mxu0 %v9132_v10  ;;  %v9183_v9 = vld [vmem:[#allocation11 + $0x74] ss:$8 sps:$4 sm:$0xff]   ;;  %v9185_v10 = vld [vmem:[#allocation11 + $0x70] ss:$8 sps:$4 sm:$0xff]  }
 0x3f8   :  { %3098 = vmatprep.subr.bf16.mxu0 %v9090_v11  ;;  %3574 = vmatpush1.bf16.msra.mxu1 %v9179_v6  ;;  %v9186_v11 = vld [vmem:[#allocation11 + $0x84] ss:$8 sps:$4 sm:$0xff]  }
 0x3f9   :  { %3575 = vmatprep.subr.bf16.mxu1 %v9180_v7 }
 0x3fb   :  { %3099 = vmatpush1.bf16.msra.mxu0 %v9088_v12  ;;  %v9188_v12 = vld [vmem:[#allocation11 + $0x80] ss:$8 sps:$4 sm:$0xff]  }
 0x3fc   :  { %3100 = vmatprep.subr.bf16.mxu0 %v9093_v13  ;;  %3576 = vmatpush1.bf16.msra.mxu1 %v9182_v8  ;;  %v9189_v13 = vld [vmem:[#allocation11 + $0x94] ss:$8 sps:$4 sm:$0xff]  }
 0x3fd   :  { %3577 = vmatprep.subr.bf16.mxu1 %v9183_v9 }
 0x3ff   :  { %3101 = vmatpush1.bf16.msra.mxu0 %v9091_v14  ;;  %v9191_v14 = vld [vmem:[#allocation11 + $0x90] ss:$8 sps:$4 sm:$0xff]  }
 0x400   :  { %3102 = vmatprep.subr.bf16.mxu0 %v9096_v15  ;;  %3578 = vmatpush1.bf16.msra.mxu1 %v9185_v10  ;;  %v9192_v15 = vld [vmem:[#allocation11 + $0xa4] ss:$8 sps:$4 sm:$0xff]  }
 0x401   :  { %3579 = vmatprep.subr.bf16.mxu1 %v9186_v11 }
 0x403   :  { %3103 = vmatpush1.bf16.msra.mxu0 %v9094_v16  ;;  %v9194_v16 = vld [vmem:[#allocation11 + $0xa0] ss:$8 sps:$4 sm:$0xff]  }
 0x404   :  { %3104 = vmatprep.subr.bf16.mxu0 %v9099_v17  ;;  %3580 = vmatpush1.bf16.msra.mxu1 %v9188_v12  ;;  %v9195_v17 = vld [vmem:[#allocation11 + $0xb4] ss:$8 sps:$4 sm:$0xff]  }
 0x405   :  { %3581 = vmatprep.subr.bf16.mxu1 %v9189_v13 }
 0x407   :  { %3105 = vmatpush1.bf16.msra.mxu0 %v9097_v18  ;;  %v9197_v18 = vld [vmem:[#allocation11 + $0xb0] ss:$8 sps:$4 sm:$0xff]  }
 0x408   :  { %3106 = vmatprep.subr.bf16.mxu0 %v9102_v19  ;;  %3582 = vmatpush1.bf16.msra.mxu1 %v9191_v14  ;;  %v9198_v19 = vld [vmem:[#allocation11 + $0xc4] ss:$8 sps:$4 sm:$0xff]  }
 0x409   :  { %3583 = vmatprep.subr.bf16.mxu1 %v9192_v15 }
 0x40b   :  { %3107 = vmatpush1.bf16.msra.mxu0 %v9100_v20  ;;  %v9200_v20 = vld [vmem:[#allocation11 + $0xc0] ss:$8 sps:$4 sm:$0xff]  }
 0x40c   :  { %3108 = vmatprep.subr.bf16.mxu0 %v9105_v21  ;;  %3584 = vmatpush1.bf16.msra.mxu1 %v9194_v16  ;;  %v9201_v21 = vld [vmem:[#allocation11 + $0xd4] ss:$8 sps:$4 sm:$0xff]  }
 0x40d   :  { %3585 = vmatprep.subr.bf16.mxu1 %v9195_v17 }
 0x40f   :  { %3109 = vmatpush1.bf16.msra.mxu0 %v9103_v22  ;;  %v9203_v22 = vld [vmem:[#allocation11 + $0xd0] ss:$8 sps:$4 sm:$0xff]  }
 0x410   :  { %3110 = vmatprep.subr.bf16.mxu0 %v9108_v23  ;;  %3586 = vmatpush1.bf16.msra.mxu1 %v9197_v18  ;;  %v9204_v23 = vld [vmem:[#allocation11 + $0xe4] ss:$8 sps:$4 sm:$0xff]  }
 0x411   :  { %3587 = vmatprep.subr.bf16.mxu1 %v9198_v19 }
 0x413   :  { %3111 = vmatpush1.bf16.msra.mxu0 %v9106_v24  ;;  %v9206_v24 = vld [vmem:[#allocation11 + $0xe0] ss:$8 sps:$4 sm:$0xff]  }
 0x414   :  { %3112 = vmatprep.subr.bf16.mxu0 %v9111_v25  ;;  %3588 = vmatpush1.bf16.msra.mxu1 %v9200_v20  ;;  %v9207_v25 = vld [vmem:[#allocation11 + $0xf4] ss:$8 sps:$4 sm:$0xff]  }
 0x415   :  { %3589 = vmatprep.subr.bf16.mxu1 %v9201_v21 }
 0x417   :  { %3113 = vmatpush1.bf16.msra.mxu0 %v9109_v26  ;;  %v9209_v26 = vld [vmem:[#allocation11 + $0xf0] ss:$8 sps:$4 sm:$0xff]  }
 0x418   :  { %3114 = vmatprep.subr.bf16.mxu0 %v9114_v27  ;;  %3590 = vmatpush1.bf16.msra.mxu1 %v9203_v22  ;;  %v713_v27 = vlaneseq }
 0x419   :  { %3591 = vmatprep.subr.bf16.mxu1 %v9204_v23 }
 0x41b   :  { %3115 = vmatpush1.bf16.msra.mxu0 %v9112_v28  ;;  %v10849_v28 = vshrl.u32 %v713_v27, 7 }
 0x41c   :  { %3116 = vmatprep.subr.bf16.mxu0 %v9117_v29  ;;  %3592 = vmatpush1.bf16.msra.mxu1 %v9206_v24 }
 0x41d   :  { %3593 = vmatprep.subr.bf16.mxu1 %v9207_v25  ;;  %v10852_v29 = vsub.s32 0, %v10849_v28 }
 0x41f   :  { %3117 = vmatpush1.bf16.msra.mxu0 %v9115_v30  ;;  %v711_v30 = vld [vmem:[#allocation7] sm:$0x3] }
 0x420   :  { %3118 = vmatprep.subr.bf16.mxu0 %v9120_v31  ;;  %3594 = vmatpush1.bf16.msra.mxu1 %v9209_v26  ;;  %v10855_v31 = vsub.s32 1, %v10849_v28 }
 0x423   :  { %3119 = vmatpush1.bf16.msra.mxu0 %v9118_v32  ;;  %v716_v32 = vrot.slane %v711_v30, %v10852_v29 }
 0x424   :  { %3120 = vmatprep.subr.bf16.mxu0 %v9125_v33 }
 0x427   :  { %3121 = vmatpush1.bf16.msra.mxu0 %v9123_v34  ;;  %v720_v34 = vrot.slane %v711_v30, %v10855_v31 }
 0x428   :  { %3122 = vmatprep.subr.bf16.mxu0 %v9129_v35 }
 0x42b   :  { %3123 = vmatpush1.bf16.msra.mxu0 %v9127_v36 }
 0x42c   :  { %3145 = vmatprep.subr.bf16.mxu0 %v9135_v37 }
 0x42e   :  { %3125 = vmatmul.mubr.bf16.vlgmr.msra.gmra.mrb[0].mxu0 %v9130_v38 }
 0x42f   :  { %3146 = vmatpush1.bf16.msra.mxu0 %v9133_v39  ;;  %3134 = vmatprep.mubr.bf16.mxu0 %v9151_v40 }
 0x430   :  { %3147 = vmatprep.subr.bf16.mxu0 %v9138_v41 }
 0x433   :  { %3148 = vmatpush1.bf16.msra.mxu0 %v9136_v42 }
 0x434   :  { %3149 = vmatprep.subr.bf16.mxu0 %v9141_v43 }
 0x436   :  { %3135 = vmatmul.mubr.bf16.gmra.mrb[4].mxu0 %v9153_v44 }
 0x437   :  { %3150 = vmatpush1.bf16.msra.mxu0 %v9139_v45  ;;  %3177 = vmatprep.mubr.bf16.mxu0 %v10333_v48 }
 0x438   :  { %3151 = vmatprep.subr.bf16.mxu0 %v9144_v46 }
 0x43b   :  { %3152 = vmatpush1.bf16.msra.mxu0 %v9142_v47 }
 0x43c   :  { %3153 = vmatprep.subr.bf16.mxu0 %v9147_v49 }
 0x43f   :  { %3154 = vmatpush1.bf16.msra.mxu0 %v9145_v50 }
 0x440   :  { %3155 = vmatprep.subr.bf16.mxu0 %v9150_v51 }
 0x443   :  { %3156 = vmatpush1.bf16.msra.mxu0 %v9148_v52 }
 0x444   :  { %3157 = vmatprep.subr.bf16.mxu0 %v9156_v53 }
 0x447   :  { %3158 = vmatpush1.bf16.msra.mxu0 %v9154_v54 }
 0x448   :  { %3159 = vmatprep.subr.bf16.mxu0 %v9159_v55 }
 0x44b   :  { %3160 = vmatpush1.bf16.msra.mxu0 %v9157_v56 }
 0x44e   :  { %3178 = vmatmul.mubr.bf16.vlgmr.msra.gmra.mrb[0].mxu0 %v9160_v57 }
 0x44f   :  { %3187 = vmatprep.mubr.bf16.mxu0 %v10333_v48 }
 0x456   :  { %3188 = vmatmul.mubr.bf16.gmra.mrb[4].mxu0 %v9161_v58 }
 0x521   :  { %v3179_v33 = vpop.f32.mrb[0].mxu0 }
 0x522   :  { %v3181_v35 = vpop.f32.mrb[1].mxu0  ;;  %v8449_v37 = vadd.f32 %v3179_v33, %v716_v32 }
 0x523   :  { %v3183_v36 = vpop.f32.mrb[2].mxu0  ;;  %v8450_v40 = vadd.f32 %v3181_v35, %v720_v34 }
 0x524   :  { %v8451_v38 = vadd.f32 %v3183_v36, %v716_v32  ;;  %v3185_v39 = vpop.f32.mrb[3].mxu0 }
 0x525   :  { %v8452_v41 = vadd.f32 %v3185_v39, %v720_v34 }
 0x526   :  { %v3200_v42 = vadd.f32 %v8451_v38, %v8449_v37 }
 0x527   :  { %v3209_v43 = vadd.f32 %v8452_v41, %v8450_v40 }
 0x529   :  { %v3189_v44 = vpop.f32.mrb[4].mxu0 }
 0x52a   :  { %v8453_v45 = vadd.f32 %v3189_v44, %v716_v32  ;;  %v3191_v46 = vpop.f32.mrb[5].mxu0 }
 0x52b   :  { %v8454_v47 = vadd.f32 %v3191_v46, %v720_v34  ;;  %v3193_v49 = vpop.f32.mrb[6].mxu0 }
 0x52c   :  { %v3201_v50 = vadd.f32 %v8453_v45, %v3200_v42  ;;  %v8455_v51 = vadd.f32 %v3193_v49, %v716_v32  ;;  %v3195_v52 = vpop.f32.mrb[7].mxu0  ;;  %v3198_v49 = vld [vmem:[#allocation8] sm:$0x3] }
 0x52d   :  { %v3210_v53 = vadd.f32 %v8454_v47, %v3209_v43  ;;  %v8456_v54 = vadd.f32 %v3195_v52, %v720_v34 }
 0x52e   :  { %v3202_v55 = vadd.f32 %v8455_v51, %v3201_v50  ;;  %v3199_v50 = vld [vmem:[#allocation10] sm:$0x3] }
 0x52f   :  { %v3211_v56 = vadd.f32 %v8456_v54, %v3210_v53  ;;  %v3292_v53 = vrot.slane %v3199_v50, %v10852_v29 }
 0x530   :  { %v3203_v57 = vrot.slane %v3202_v55, 4 }
 0x531   :  { %v3212_v58 = vrot.slane %v3211_v56, 4 }
 0x532   :  { %v3204_v59 = vadd.f32 %v3203_v57, %v3202_v55  ;;  %v3296_v55 = vrot.slane %v3199_v50, %v10855_v31 }
 0x533   :  { %v3213_v60 = vadd.f32 %v3212_v58, %v3211_v56 }
 0x534   :  { %v3205_v61 = vrot.slane %v3204_v59, 2 }
 0x535   :  { %v3214_v62 = vrot.slane %v3213_v60, 2 }
 0x536   :  { %v3206_v63 = vadd.f32 %v3205_v61, %v3204_v59 }
 0x537   :  { %v3215_v0 = vadd.f32 %v3214_v62, %v3213_v60 }
 0x538   :  { %v3207_v1 = vrot.slane %v3206_v63, 1 }
 0x539   :  { %v3216_v2 = vrot.slane %v3215_v0, 1 }
 0x53a   :  { %v3208_v3 = vadd.f32 %v3207_v1, %v3206_v63 }
 0x53b   :  { %v3217_v4 = vadd.f32 %v3216_v2, %v3215_v0 }
 0x53c   :  { %v3219_v5 = vmul.f32 0.03125, %v3208_v3 }
 0x53d   :  { %v3220_v6 = vmul.f32 0.03125, %v3217_v4 }
 0x53e   :  { %v3221_v7 = vsub.f32 %v8449_v37, %v3219_v5  ;;  %v3223_v8 = vsub.f32 %v8451_v38, %v3219_v5  ;;  %v3225_v9 = vsub.f32 %v8453_v45, %v3219_v5  ;;  %v3227_v10 = vsub.f32 %v8455_v51, %v3219_v5 }
 0x53f   :  { %v3222_v11 = vsub.f32 %v8450_v40, %v3220_v6  ;;  %v3224_v12 = vsub.f32 %v8452_v41, %v3220_v6  ;;  %v3226_v13 = vsub.f32 %v8454_v47, %v3220_v6  ;;  %v3228_v14 = vsub.f32 %v8456_v54, %v3220_v6 }
 0x540   :  { %v3229_v15 = vmul.f32 %v3221_v7, %v3221_v7  ;;  %v3231_v16 = vmul.f32 %v3223_v8, %v3223_v8  ;;  %v3233_v19 = vmul.f32 %v3225_v9, %v3225_v9  ;;  %v3235_v23 = vmul.f32 %v3227_v10, %v3227_v10 }
 0x541   :  { %v3230_v17 = vmul.f32 %v3222_v11, %v3222_v11  ;;  %v3232_v18 = vmul.f32 %v3224_v12, %v3224_v12  ;;  %v3234_v21 = vmul.f32 %v3226_v13, %v3226_v13  ;;  %v3236_v25 = vmul.f32 %v3228_v14, %v3228_v14 }
 0x542   :  { %v3237_v20 = vadd.f32 %v3231_v16, %v3229_v15  ;;  %v3273_v51 = vrot.slane %v3198_v49, %v10852_v29  ;;  %v3277_v54 = vrot.slane %v3198_v49, %v10855_v31 }
 0x543   :  { %v3246_v22 = vadd.f32 %v3232_v18, %v3230_v17 }
 0x544   :  { %v3238_v24 = vadd.f32 %v3237_v20, %v3233_v19 }
 0x545   :  { %v3247_v26 = vadd.f32 %v3246_v22, %v3234_v21 }
 0x546   :  { %v3239_v27 = vadd.f32 %v3238_v24, %v3235_v23 }
 0x547   :  { %v3248_v30 = vadd.f32 %v3247_v26, %v3236_v25 }
 0x548   :  { %v3240_v32 = vrot.slane %v3239_v27, 4 }
 0x549   :  { %v3249_v33 = vrot.slane %v3248_v30, 4 }
 0x54a   :  { %v3241_v34 = vadd.f32 %v3240_v32, %v3239_v27 }
 0x54b   :  { %v3250_v35 = vadd.f32 %v3249_v33, %v3248_v30 }
 0x54c   :  { %v3242_v36 = vrot.slane %v3241_v34, 2 }
 0x54d   :  { %v3251_v37 = vrot.slane %v3250_v35, 2 }
 0x54e   :  { %v3243_v38 = vadd.f32 %v3242_v36, %v3241_v34 }
 0x54f   :  { %v3252_v39 = vadd.f32 %v3251_v37, %v3250_v35 }
 0x550   :  { %v3244_v40 = vrot.slane %v3243_v38, 1 }
 0x551   :  { %v3253_v41 = vrot.slane %v3252_v39, 1 }
 0x552   :  { %v3245_v42 = vadd.f32 %v3244_v40, %v3243_v38 }
 0x553   :  { %v3254_v43 = vadd.f32 %v3253_v41, %v3252_v39 }
 0x554   :  { %v3255_v44 = vmul.f32 0.03125, %v3245_v42 }
 0x555   :  { %v3256_v45 = vmul.f32 0.03125, %v3254_v43 }
 0x556   :  { %v3257_v46 = vadd.f32 1e-05, %v3255_v44 }
 0x557   :  { %v3258_v47 = vadd.f32 1e-05, %v3256_v45 }
 0x558   :  { %9594 = vrsqrt.f32 %v3257_v46 }
 0x559   :  { %9596 = vrsqrt.f32 %v3258_v47 }
 0x562   :  { %v9595_v52 = vpop.eup %9594 }
 0x563   :  { %v9597_v56 = vpop.eup %9596  ;;  %v3267_v57 = vmul.f32 %v9595_v52, %v3227_v10  ;;  %v3261_v58 = vmul.f32 %v9595_v52, %v3221_v7  ;;  %v3263_v59 = vmul.f32 %v9595_v52, %v3223_v8  ;;  %v3265_v60 = vmul.f32 %v9595_v52, %v3225_v9 }
 0x564   :  { %v3268_v61 = vmul.f32 %v9597_v56, %v3228_v14  ;;  %v3262_v62 = vmul.f32 %v9597_v56, %v3222_v11  ;;  %v3264_v63 = vmul.f32 %v9597_v56, %v3224_v12  ;;  %v3266_v0 = vmul.f32 %v9597_v56, %v3226_v13 }
 0x565   :  { %v3286_v1 = vmul.f32 %v3273_v51, %v3267_v57  ;;  %v3280_v2 = vmul.f32 %v3273_v51, %v3261_v58  ;;  %v3282_v3 = vmul.f32 %v3273_v51, %v3263_v59  ;;  %v3284_v4 = vmul.f32 %v3273_v51, %v3265_v60 }
 0x566   :  { %v3287_v5 = vmul.f32 %v3277_v54, %v3268_v61  ;;  %v3281_v6 = vmul.f32 %v3277_v54, %v3262_v62  ;;  %v3283_v15 = vmul.f32 %v3277_v54, %v3264_v63  ;;  %v3285_v16 = vmul.f32 %v3277_v54, %v3266_v0 }
 0x567   :  { %v10863_v17 = vadd.f32 %v3292_v53, %v3286_v1  ;;  %v3299_v18 = vadd.f32 %v3292_v53, %v3280_v2  ;;  %v3301_v19 = vadd.f32 %v3292_v53, %v3282_v3  ;;  %v3303_v13 = vadd.f32 %v3292_v53, %v3284_v4  ;;  %v9212_v1 = vld [vmem:[#allocation17 + $0x4] ss:$8 sps:$4 sm:$0xff]   ;;  %v9210_v2 = vld [vmem:[#allocation17] ss:$8 sps:$4 sm:$0xff]   ;;  %v9215_v3 = vld [vmem:[#allocation17 + $0x14] ss:$8 sps:$4 sm:$0xff]  }
 0x568   :  { %v3306_v10 = vadd.f32 %v3296_v55, %v3287_v5  ;;  %v3300_v7 = vadd.f32 %v3296_v55, %v3281_v6  ;;  %v3302_v8 = vadd.f32 %v3296_v55, %v3283_v15  ;;  %v3304_v9 = vadd.f32 %v3296_v55, %v3285_v16  ;;  %3980 = vmatprep.subr.bf16.mxu1 %v9212_v1  ;;  %v9213_v4 = vld [vmem:[#allocation17 + $0x10] ss:$8 sps:$4 sm:$0xff]   ;;  %v9218_v5 = vld [vmem:[#allocation17 + $0x24] ss:$8 sps:$4 sm:$0xff]   ;;  %v9216_v6 = vld [vmem:[#allocation17 + $0x20] ss:$8 sps:$4 sm:$0xff]  }
 0x569   :  { %v3315_v14 = vmin.f32 %v3299_v18, 0.0  ;;  %v3317_v21 = vmin.f32 %v3301_v19, 0.0  ;;  %v3321_v23 = vmin.f32 %v10863_v17, 0.0  ;;  %v3319_v33 = vmin.f32 %v3303_v13, 0.0  ;;  %v9221_v15 = vld [vmem:[#allocation17 + $0x34] ss:$8 sps:$4 sm:$0xff]  }
 0x56a   :  { %v3322_v11 = vmin.f32 %v3306_v10, 0.0  ;;  %v3316_v12 = vmin.f32 %v3300_v7, 0.0  ;;  %v3318_v20 = vmin.f32 %v3302_v8, 0.0  ;;  %v3320_v25 = vmin.f32 %v3304_v9, 0.0  ;;  %v9219_v16 = vld [vmem:[#allocation17 + $0x30] ss:$8 sps:$4 sm:$0xff]  }
 0x56b   :  { %v3323_v22 = vmul.f32 1.442695, %v3315_v14  ;;  %v3327_v27 = vmul.f32 1.442695, %v3317_v21  ;;  %v3331_v34 = vmul.f32 1.442695, %v3319_v33 }
 0x56c   :  { %v3325_v24 = vmul.f32 1.442695, %v3316_v12  ;;  %v3329_v26 = vmul.f32 1.442695, %v3318_v20  ;;  %v3333_v30 = vmul.f32 1.442695, %v3320_v25 }
 0x56d   :  { %9598 = vpow2.f32 %v3323_v22  ;;  %v3337_v32 = vmul.f32 1.442695, %v3322_v11  ;;  %v3335_v35 = vmul.f32 1.442695, %v3321_v23  ;;  %vm3308_vm0 = vcmp.gt.f32.partialorder %v3300_v7, 0.0 }
 0x56e   :  { %9600 = vpow2.f32 %v3325_v24  ;;  %vm3307_vm1 = vcmp.gt.f32.partialorder %v3299_v18, 0.0  ;;  %vm3310_vm2 = vcmp.gt.f32.partialorder %v3302_v8, 0.0  ;;  %vm3309_vm3 = vcmp.gt.f32.partialorder %v3301_v19, 0.0  ;;  %v9231_v14 = vld [vmem:[#allocation17 + $0x70] ss:$8 sps:$4 sm:$0xff]  }
 0x56f   :  { %9602 = vpow2.f32 %v3329_v26  ;;  %vm3312_vm4 = vcmp.gt.f32.partialorder %v3304_v9, 0.0  ;;  %vm3314_vm5 = vcmp.gt.f32.partialorder %v3306_v10, 0.0  ;;  %vm3311_vm6 = vcmp.gt.f32.partialorder %v3303_v13, 0.0  ;;  %v9236_v11 = vld [vmem:[#allocation17 + $0x84] ss:$8 sps:$4 sm:$0xff]  }
 0x570   :  { %9604 = vpow2.f32 %v3327_v27  ;;  %vm3313_vm7 = vcmp.gt.f32.partialorder %v10863_v17, 0.0  ;;  %v9234_v12 = vld [vmem:[#allocation17 + $0x80] ss:$8 sps:$4 sm:$0xff]   ;;  %v9237_v20 = vld [vmem:[#allocation17 + $0x90] ss:$8 sps:$4 sm:$0xff]  }
 0x571   :  { %9606 = vpow2.f32 %v3333_v30  ;;  %v9240_v21 = vld [vmem:[#allocation17 + $0xa0] ss:$8 sps:$4 sm:$0xff]   ;;  %v9242_v22 = vld [vmem:[#allocation17 + $0xa4] ss:$8 sps:$4 sm:$0xff]   ;;  %v9245_v23 = vld [vmem:[#allocation17 + $0xb4] ss:$8 sps:$4 sm:$0xff]  }
 0x572   :  { %9608 = vpow2.f32 %v3337_v32  ;;  %v9243_v24 = vld [vmem:[#allocation17 + $0xb0] ss:$8 sps:$4 sm:$0xff]   ;;  %v9248_v25 = vld [vmem:[#allocation17 + $0xc4] ss:$8 sps:$4 sm:$0xff]   ;;  %v9246_v26 = vld [vmem:[#allocation17 + $0xc0] ss:$8 sps:$4 sm:$0xff]  }
 0x573   :  { %9610 = vpow2.f32 %v3331_v34  ;;  %v9251_v27 = vld [vmem:[#allocation17 + $0xd4] ss:$8 sps:$4 sm:$0xff]   ;;  %v9249_v30 = vld [vmem:[#allocation17 + $0xd0] ss:$8 sps:$4 sm:$0xff]   ;;  %v9254_v32 = vld [vmem:[#allocation17 + $0xe4] ss:$8 sps:$4 sm:$0xff]  }
 0x574   :  { %9612 = vpow2.f32 %v3335_v35  ;;  %v9252_v33 = vld [vmem:[#allocation17 + $0xe0] ss:$8 sps:$4 sm:$0xff]   ;;  %v9257_v34 = vld [vmem:[#allocation17 + $0xf4] ss:$8 sps:$4 sm:$0xff]   ;;  %v9255_v35 = vld [vmem:[#allocation17 + $0xf0] ss:$8 sps:$4 sm:$0xff]  }
 0x577   :  { %v9599_v36 = vpop.eup %9598 }
 0x578   :  { %v9601_v37 = vpop.eup %9600  ;;  %v7988_v38 = vadd.f32 -1.0, %v9599_v36  ;;  %v3391_v36 = vld [vmem:[#allocation13] sm:$0x3] }
 0x579   :  { %v9603_v39 = vpop.eup %9602  ;;  %v7989_v40 = vadd.f32 -1.0, %v9601_v37  ;;  %v3396_v37 = vrot.slane %v3391_v36, %v10852_v29 }
 0x57a   :  { %v9605_v41 = vpop.eup %9604  ;;  %v7991_v42 = vadd.f32 -1.0, %v9603_v39  ;;  %v3347_v46 = vsel %vm3307_vm1, %v3299_v18, %v7988_v38  ;;  %v9222_v18 = vld [vmem:[#allocation17 + $0x40] ss:$8 sps:$4 sm:$0xff]   ;;  %v3400_v39 = vrot.slane %v3391_v36, %v10855_v31 }
 0x57b   :  { %v9607_v43 = vpop.eup %9606  ;;  %v3348_v44 = vsel %vm3308_vm0, %v3300_v7, %v7989_v40  ;;  %v7990_v45 = vadd.f32 -1.0, %v9605_v41  ;;  %v9230_v7 = vld [vmem:[#allocation17 + $0x64] ss:$8 sps:$4 sm:$0xff]  }
 0x57c   :  { %v9609_v47 = vpop.eup %9608  ;;  %v3350_v49 = vsel %vm3310_vm2, %v3302_v8, %v7991_v42  ;;  %v7993_v50 = vadd.f32 -1.0, %v9607_v43  ;;  %v9228_v8 = vld [vmem:[#allocation17 + $0x60] ss:$8 sps:$4 sm:$0xff]  }
 0x57d   :  { %v9611_v51 = vpop.eup %9610  ;;  %v3356_v52 = vpack.c.bf16 %v3350_v49, %v3348_v44  ;;  %v3349_v53 = vsel %vm3309_vm3, %v3301_v19, %v7990_v45  ;;  %v7995_v54 = vadd.f32 -1.0, %v9609_v47  ;;  %v9227_v19 = vld [vmem:[#allocation17 + $0x54] ss:$8 sps:$4 sm:$0xff]  }
 0x57e   :  { %v9613_v55 = vpop.eup %9612  ;;  %v3355_v56 = vpack.c.bf16 %v3349_v53, %v3347_v46  ;;  %v3352_v57 = vsel %vm3312_vm4, %v3304_v9, %v7993_v50  ;;  %v7992_v58 = vadd.f32 -1.0, %v9611_v51  ;;  %v9233_v9 = vld [vmem:[#allocation17 + $0x74] ss:$8 sps:$4 sm:$0xff]  }
 0x57f   :  { %3595 = vmatprep.mubr.bf16.mxu1 %v3356_v52  ;;  %v3354_v59 = vsel %vm3314_vm5, %v3306_v10, %v7995_v54  ;;  %v7994_v60 = vadd.f32 -1.0, %v9613_v55  ;;  %v9225_v10 = vld [vmem:[#allocation17 + $0x50] ss:$8 sps:$4 sm:$0xff]  }
 0x580   :  { %3596 = vmatmul.mubr.bf16.vlgmr.msra.gmra.mrb[0].mxu1 %v3355_v56  ;;  %v3358_v61 = vpack.c.bf16 %v3354_v59, %v3352_v57  ;;  %v3351_v62 = vsel %vm3311_vm6, %v3303_v13, %v7992_v58  ;;  %v9239_v13 = vld [vmem:[#allocation17 + $0x94] ss:$8 sps:$4 sm:$0xff]  }
 0x581   :  { %v3353_v63 = vsel %vm3313_vm7, %v10863_v17, %v7994_v60  ;;  %3981 = vmatpush1.bf16.msra.mxu1 %v9210_v2  ;;  %v9224_v17 = vld [vmem:[#allocation17 + $0x44] ss:$8 sps:$4 sm:$0xff]  }
 0x582   :  { %3605 = vmatprep.mubr.bf16.mxu1 %v3358_v61  ;;  %v3357_v0 = vpack.c.bf16 %v3353_v63, %v3351_v62  ;;  %3982 = vmatprep.subr.bf16.mxu1 %v9215_v3 }
 0x585   :  { %3983 = vmatpush1.bf16.msra.mxu1 %v9213_v4 }
 0x586   :  { %3984 = vmatprep.subr.bf16.mxu1 %v9218_v5 }
 0x588   :  { %3606 = vmatmul.mubr.bf16.gmra.mrb[4].mxu1 %v3357_v0 }
 0x589   :  { %3985 = vmatpush1.bf16.msra.mxu1 %v9216_v6 }
 0x58a   :  { %3986 = vmatprep.subr.bf16.mxu1 %v9221_v15 }
 0x58d   :  { %3987 = vmatpush1.bf16.msra.mxu1 %v9219_v16 }
 0x58e   :  { %3988 = vmatprep.subr.bf16.mxu1 %v9224_v17 }
 0x591   :  { %3989 = vmatpush1.bf16.msra.mxu1 %v9222_v18 }
 0x592   :  { %3990 = vmatprep.subr.bf16.mxu1 %v9227_v19 }
 0x595   :  { %3991 = vmatpush1.bf16.msra.mxu1 %v9225_v10 }
 0x596   :  { %3992 = vmatprep.subr.bf16.mxu1 %v9230_v7 }
 0x599   :  { %3993 = vmatpush1.bf16.msra.mxu1 %v9228_v8 }
 0x59a   :  { %3994 = vmatprep.subr.bf16.mxu1 %v9233_v9 }
 0x59d   :  { %3995 = vmatpush1.bf16.msra.mxu1 %v9231_v14 }
 0x59e   :  { %3996 = vmatprep.subr.bf16.mxu1 %v9236_v11 }
 0x5a1   :  { %3997 = vmatpush1.bf16.msra.mxu1 %v9234_v12 }
 0x5a2   :  { %3998 = vmatprep.subr.bf16.mxu1 %v9239_v13 }
 0x5a5   :  { %3999 = vmatpush1.bf16.msra.mxu1 %v9237_v20 }
 0x5a6   :  { %4000 = vmatprep.subr.bf16.mxu1 %v9242_v22 }
 0x5a9   :  { %4001 = vmatpush1.bf16.msra.mxu1 %v9240_v21 }
 0x5aa   :  { %4002 = vmatprep.subr.bf16.mxu1 %v9245_v23 }
 0x5ad   :  { %4003 = vmatpush1.bf16.msra.mxu1 %v9243_v24 }
 0x5ae   :  { %4004 = vmatprep.subr.bf16.mxu1 %v9248_v25 }
 0x5b1   :  { %4005 = vmatpush1.bf16.msra.mxu1 %v9246_v26 }
 0x5b2   :  { %4006 = vmatprep.subr.bf16.mxu1 %v9251_v27 }
 0x5b5   :  { %4007 = vmatpush1.bf16.msra.mxu1 %v9249_v30 }
 0x5b6   :  { %4008 = vmatprep.subr.bf16.mxu1 %v9254_v32 }
 0x5b9   :  { %4009 = vmatpush1.bf16.msra.mxu1 %v9252_v33 }
 0x5ba   :  { %4010 = vmatprep.subr.bf16.mxu1 %v9257_v34 }
 0x5bd   :  { %4011 = vmatpush1.bf16.msra.mxu1 %v9255_v35 }
 0x653   :  { %v3597_v38 = vpop.f32.mrb[0].mxu1 }
 0x654   :  { %v3599_v40 = vpop.f32.mrb[1].mxu1  ;;  %v3598_v42 = vadd.f32 %v3597_v38, %v3396_v37 }
 0x655   :  { %v3601_v41 = vpop.f32.mrb[2].mxu1  ;;  %v3600_v45 = vadd.f32 %v3599_v40, %v3400_v39 }
 0x656   :  { %v3602_v43 = vadd.f32 %v3601_v41, %v3396_v37  ;;  %v3603_v44 = vpop.f32.mrb[3].mxu1 }
 0x657   :  { %v3604_v46 = vadd.f32 %v3603_v44, %v3400_v39 }
 0x658   :  { %v3618_v47 = vadd.f32 %v3602_v43, %v3598_v42 }
 0x659   :  { %v3627_v49 = vadd.f32 %v3604_v46, %v3600_v45 }
 0x65b   :  { %v3607_v50 = vpop.f32.mrb[4].mxu1 }
 0x65c   :  { %v3608_v51 = vadd.f32 %v3607_v50, %v3396_v37  ;;  %v3609_v52 = vpop.f32.mrb[5].mxu1 }
 0x65d   :  { %v3610_v53 = vadd.f32 %v3609_v52, %v3400_v39  ;;  %v3611_v54 = vpop.f32.mrb[6].mxu1 }
 0x65e   :  { %v3619_v55 = vadd.f32 %v3618_v47, %v3608_v51  ;;  %v3612_v56 = vadd.f32 %v3611_v54, %v3396_v37  ;;  %v3613_v57 = vpop.f32.mrb[7].mxu1  ;;  %v3616_v54 = vld [vmem:[#allocation14] sm:$0x3] }
 0x65f   :  { %v3628_v58 = vadd.f32 %v3627_v49, %v3610_v53  ;;  %v3614_v59 = vadd.f32 %v3613_v57, %v3400_v39 }
 0x660   :  { %v3620_v60 = vadd.f32 %v3619_v55, %v3612_v56  ;;  %v3617_v55 = vld [vmem:[#allocation16] sm:$0x3] }
 0x661   :  { %v3629_v61 = vadd.f32 %v3628_v58, %v3614_v59  ;;  %v3709_v58 = vrot.slane %v3617_v55, %v10852_v29 }
 0x662   :  { %v3621_v62 = vrot.slane %v3620_v60, 4 }
 0x663   :  { %v3630_v63 = vrot.slane %v3629_v61, 4 }
 0x664   :  { %v3622_v0 = vadd.f32 %v3621_v62, %v3620_v60  ;;  %v3713_v60 = vrot.slane %v3617_v55, %v10855_v31 }
 0x665   :  { %v3631_v1 = vadd.f32 %v3630_v63, %v3629_v61 }
 0x666   :  { %v3623_v2 = vrot.slane %v3622_v0, 2 }
 0x667   :  { %v3632_v3 = vrot.slane %v3631_v1, 2 }
 0x668   :  { %v3624_v4 = vadd.f32 %v3623_v2, %v3622_v0 }
 0x669   :  { %v3633_v5 = vadd.f32 %v3632_v3, %v3631_v1 }
 0x66a   :  { %v3625_v6 = vrot.slane %v3624_v4, 1 }
 0x66b   :  { %v3634_v15 = vrot.slane %v3633_v5, 1 }
 0x66c   :  { %v3626_v16 = vadd.f32 %v3625_v6, %v3624_v4 }
 0x66d   :  { %v3635_v17 = vadd.f32 %v3634_v15, %v3633_v5 }
 0x66e   :  { %v3636_v18 = vmul.f32 0.03125, %v3626_v16 }
 0x66f   :  { %v3637_v19 = vmul.f32 0.03125, %v3635_v17 }
 0x670   :  { %v3638_v10 = vsub.f32 %v3598_v42, %v3636_v18  ;;  %v3640_v7 = vsub.f32 %v3602_v43, %v3636_v18  ;;  %v3642_v8 = vsub.f32 %v3608_v51, %v3636_v18  ;;  %v3644_v9 = vsub.f32 %v3612_v56, %v3636_v18 }
 0x671   :  { %v3639_v14 = vsub.f32 %v3600_v45, %v3637_v19  ;;  %v3641_v11 = vsub.f32 %v3604_v46, %v3637_v19  ;;  %v3643_v12 = vsub.f32 %v3610_v53, %v3637_v19  ;;  %v3645_v13 = vsub.f32 %v3614_v59, %v3637_v19 }
 0x672   :  { %v3646_v20 = vmul.f32 %v3638_v10, %v3638_v10  ;;  %v3648_v21 = vmul.f32 %v3640_v7, %v3640_v7  ;;  %v3650_v24 = vmul.f32 %v3642_v8, %v3642_v8  ;;  %v3652_v30 = vmul.f32 %v3644_v9, %v3644_v9 }
 0x673   :  { %v3647_v22 = vmul.f32 %v3639_v14, %v3639_v14  ;;  %v3649_v23 = vmul.f32 %v3641_v11, %v3641_v11  ;;  %v3651_v26 = vmul.f32 %v3643_v12, %v3643_v12  ;;  %v3653_v33 = vmul.f32 %v3645_v13, %v3645_v13 }
 0x674   :  { %v3654_v25 = vadd.f32 %v3648_v21, %v3646_v20  ;;  %v3690_v56 = vrot.slane %v3616_v54, %v10852_v29  ;;  %v3694_v59 = vrot.slane %v3616_v54, %v10855_v31 }
 0x675   :  { %v3663_v27 = vadd.f32 %v3649_v23, %v3647_v22 }
 0x676   :  { %v3655_v32 = vadd.f32 %v3654_v25, %v3650_v24 }
 0x677   :  { %v3664_v34 = vadd.f32 %v3663_v27, %v3651_v26 }
 0x678   :  { %v3656_v35 = vadd.f32 %v3655_v32, %v3652_v30 }
 0x679   :  { %v3665_v36 = vadd.f32 %v3664_v34, %v3653_v33 }
 0x67a   :  { %v3657_v37 = vrot.slane %v3656_v35, 4 }
 0x67b   :  { %v3666_v38 = vrot.slane %v3665_v36, 4 }
 0x67c   :  { %v3658_v39 = vadd.f32 %v3657_v37, %v3656_v35 }
 0x67d   :  { %v3667_v40 = vadd.f32 %v3666_v38, %v3665_v36 }
 0x67e   :  { %v3659_v41 = vrot.slane %v3658_v39, 2 }
 0x67f   :  { %v3668_v42 = vrot.slane %v3667_v40, 2 }
 0x680   :  { %v3660_v43 = vadd.f32 %v3659_v41, %v3658_v39 }
 0x681   :  { %v3669_v44 = vadd.f32 %v3668_v42, %v3667_v40 }
 0x682   :  { %v3661_v45 = vrot.slane %v3660_v43, 1 }
 0x683   :  { %v3670_v46 = vrot.slane %v3669_v44, 1 }
 0x684   :  { %v3662_v47 = vadd.f32 %v3661_v45, %v3660_v43 }
 0x685   :  { %v3671_v49 = vadd.f32 %v3670_v46, %v3669_v44 }
 0x686   :  { %v3672_v50 = vmul.f32 0.03125, %v3662_v47 }
 0x687   :  { %v3673_v51 = vmul.f32 0.03125, %v3671_v49 }
 0x688   :  { %v3674_v52 = vadd.f32 1e-05, %v3672_v50 }
 0x689   :  { %v3675_v53 = vadd.f32 1e-05, %v3673_v51 }
 0x68a   :  { %9614 = vrsqrt.f32 %v3674_v52 }
 0x68b   :  { %9616 = vrsqrt.f32 %v3675_v53 }
 0x694   :  { %v9615_v57 = vpop.eup %9614 }
 0x695   :  { %v9617_v61 = vpop.eup %9616  ;;  %v3678_v62 = vmul.f32 %v9615_v57, %v3638_v10  ;;  %v3680_v63 = vmul.f32 %v9615_v57, %v3640_v7  ;;  %v3684_v0 = vmul.f32 %v9615_v57, %v3644_v9  ;;  %v3682_v1 = vmul.f32 %v9615_v57, %v3642_v8 }
 0x696   :  { %v3685_v2 = vmul.f32 %v9617_v61, %v3645_v13  ;;  %v3679_v3 = vmul.f32 %v9617_v61, %v3639_v14  ;;  %v3681_v4 = vmul.f32 %v9617_v61, %v3641_v11  ;;  %v3683_v5 = vmul.f32 %v9617_v61, %v3643_v12 }
 0x697   :  { %v3697_v6 = vmul.f32 %v3690_v56, %v3678_v62  ;;  %v3699_v15 = vmul.f32 %v3690_v56, %v3680_v63  ;;  %v3703_v16 = vmul.f32 %v3690_v56, %v3684_v0  ;;  %v3701_v17 = vmul.f32 %v3690_v56, %v3682_v1 }
 0x698   :  { %v3704_v18 = vmul.f32 %v3694_v59, %v3685_v2  ;;  %v3698_v19 = vmul.f32 %v3694_v59, %v3679_v3  ;;  %v3700_v20 = vmul.f32 %v3694_v59, %v3681_v4  ;;  %v3702_v21 = vmul.f32 %v3694_v59, %v3683_v5 }
 0x699   :  { %v10874_v22 = vadd.f32 %v3709_v58, %v3703_v16  ;;  %v3716_v23 = vadd.f32 %v3709_v58, %v3697_v6  ;;  %v3718_v24 = vadd.f32 %v3709_v58, %v3699_v15  ;;  %v3720_v12 = vadd.f32 %v3709_v58, %v3701_v17  ;;  %v9260_v6 = vld [vmem:[#allocation23 + $0x4] ss:$20 sps:$4 sm:$0xff]   ;;  %v9258_v15 = vld [vmem:[#allocation23] ss:$20 sps:$4 sm:$0xff]   ;;  %v9261_v17 = vld [vmem:[#allocation23 + $0x28] ss:$20 sps:$4 sm:$0xff]  }
 0x69a   :  { %v3723_v10 = vadd.f32 %v3713_v60, %v3704_v18  ;;  %v3717_v7 = vadd.f32 %v3713_v60, %v3698_v19  ;;  %v3719_v9 = vadd.f32 %v3713_v60, %v3700_v20  ;;  %v3721_v8 = vadd.f32 %v3713_v60, %v3702_v21  ;;  %4705 = vmatprep.subr.bf16.mxu1 %v9260_v6  ;;  %v9263_v16 = vld [vmem:[#allocation23 + $0x2c] ss:$20 sps:$4 sm:$0xff]   ;;  %v9266_v18 = vld [vmem:[#allocation23 + $0x54] ss:$20 sps:$4 sm:$0xff]   ;;  %v9264_v19 = vld [vmem:[#allocation23 + $0x50] ss:$20 sps:$4 sm:$0xff]  }
 0x69b   :  { %v3732_v13 = vmin.f32 %v3716_v23, 0.0  ;;  %v3734_v26 = vmin.f32 %v3718_v24, 0.0  ;;  %v3738_v30 = vmin.f32 %v10874_v22, 0.0  ;;  %v3736_v38 = vmin.f32 %v3720_v12, 0.0  ;;  %v9269_v20 = vld [vmem:[#allocation23 + $0x7c] ss:$20 sps:$4 sm:$0xff]  }
 0x69c   :  { %v3739_v14 = vmin.f32 %v3723_v10, 0.0  ;;  %v3733_v11 = vmin.f32 %v3717_v7, 0.0  ;;  %v3735_v25 = vmin.f32 %v3719_v9, 0.0  ;;  %v3737_v33 = vmin.f32 %v3721_v8, 0.0  ;;  %v9267_v21 = vld [vmem:[#allocation23 + $0x78] ss:$20 sps:$4 sm:$0xff]  }
 0x69d   :  { %v3740_v27 = vmul.f32 1.442695, %v3732_v13  ;;  %v3744_v35 = vmul.f32 1.442695, %v3734_v26  ;;  %v3748_v39 = vmul.f32 1.442695, %v3736_v38 }
 0x69e   :  { %v3742_v32 = vmul.f32 1.442695, %v3733_v11  ;;  %v3746_v34 = vmul.f32 1.442695, %v3735_v25  ;;  %v3750_v36 = vmul.f32 1.442695, %v3737_v33 }
 0x69f   :  { %9618 = vpow2.f32 %v3740_v27  ;;  %v3754_v37 = vmul.f32 1.442695, %v3739_v14  ;;  %v3752_v40 = vmul.f32 1.442695, %v3738_v30  ;;  %vm3725_vm8 = vcmp.gt.f32.partialorder %v3717_v7, 0.0 }
 0x6a0   :  { %9620 = vpow2.f32 %v3742_v32  ;;  %vm3724_vm9 = vcmp.gt.f32.partialorder %v3716_v23, 0.0  ;;  %vm3727_vm10 = vcmp.gt.f32.partialorder %v3719_v9, 0.0  ;;  %vm3726_vm11 = vcmp.gt.f32.partialorder %v3718_v24, 0.0  ;;  %v9279_v13 = vld [vmem:[#allocation23 + $0x118] ss:$20 sps:$4 sm:$0xff]  }
 0x6a1   :  { %9622 = vpow2.f32 %v3746_v34  ;;  %vm3729_vm12 = vcmp.gt.f32.partialorder %v3721_v8, 0.0  ;;  %vm3731_vm13 = vcmp.gt.f32.partialorder %v3723_v10, 0.0  ;;  %vm3728_vm14 = vcmp.gt.f32.partialorder %v3720_v12, 0.0  ;;  %v9284_v14 = vld [vmem:[#allocation23 + $0x144] ss:$20 sps:$4 sm:$0xff]  }
 0x6a2   :  { %9624 = vpow2.f32 %v3744_v35  ;;  %vm3730_vm15 = vcmp.gt.f32.partialorder %v10874_v22, 0.0  ;;  %v9282_v11 = vld [vmem:[#allocation23 + $0x140] ss:$20 sps:$4 sm:$0xff]   ;;  %v9285_v25 = vld [vmem:[#allocation23 + $0x168] ss:$20 sps:$4 sm:$0xff]  }
 0x6a3   :  { %9626 = vpow2.f32 %v3750_v36  ;;  %v9288_v26 = vld [vmem:[#allocation23 + $0x190] ss:$20 sps:$4 sm:$0xff]   ;;  %v9290_v27 = vld [vmem:[#allocation23 + $0x194] ss:$20 sps:$4 sm:$0xff]   ;;  %v9291_v32 = vld [vmem:[#allocation23 + $0x1b8] ss:$20 sps:$4 sm:$0xff]  }
 0x6a4   :  { %9628 = vpow2.f32 %v3754_v37  ;;  %v9293_v30 = vld [vmem:[#allocation23 + $0x1bc] ss:$20 sps:$4 sm:$0xff]   ;;  %v9296_v33 = vld [vmem:[#allocation23 + $0x1e4] ss:$20 sps:$4 sm:$0xff]   ;;  %v9294_v34 = vld [vmem:[#allocation23 + $0x1e0] ss:$20 sps:$4 sm:$0xff]  }
 0x6a5   :  { %9630 = vpow2.f32 %v3748_v39  ;;  %v9299_v35 = vld [vmem:[#allocation23 + $0x20c] ss:$20 sps:$4 sm:$0xff]   ;;  %v9297_v36 = vld [vmem:[#allocation23 + $0x208] ss:$20 sps:$4 sm:$0xff]   ;;  %v9300_v38 = vld [vmem:[#allocation23 + $0x230] ss:$20 sps:$4 sm:$0xff]  }
 0x6a6   :  { %9632 = vpow2.f32 %v3752_v40  ;;  %v9302_v37 = vld [vmem:[#allocation23 + $0x234] ss:$20 sps:$4 sm:$0xff]   ;;  %v9305_v39 = vld [vmem:[#allocation23 + $0x25c] ss:$20 sps:$4 sm:$0xff]   ;;  %v9303_v40 = vld [vmem:[#allocation23 + $0x258] ss:$20 sps:$4 sm:$0xff]  }
 0x6a9   :  { %v9619_v41 = vpop.eup %9618 }
 0x6aa   :  { %v9621_v42 = vpop.eup %9620  ;;  %v8028_v43 = vadd.f32 -1.0, %v9619_v41  ;;  %v9308_v41 = vld [vmem:[#allocation23 + $0xc] ss:$20 sps:$4 sm:$0xff]  }
 0x6ab   :  { %v9623_v44 = vpop.eup %9622  ;;  %v8029_v45 = vadd.f32 -1.0, %v9621_v42  ;;  %v3808_v42 = vld [vmem:[#allocation19] sm:$0x3] }
 0x6ac   :  { %v9625_v46 = vpop.eup %9624  ;;  %v8031_v47 = vadd.f32 -1.0, %v9623_v44  ;;  %v3764_v52 = vsel %vm3724_vm9, %v3716_v23, %v8028_v43  ;;  %v9270_v23 = vld [vmem:[#allocation23 + $0xa0] ss:$20 sps:$4 sm:$0xff]   ;;  %v3813_v43 = vrot.slane %v3808_v42, %v10852_v29 }
 0x6ad   :  { %v9627_v49 = vpop.eup %9626  ;;  %v3765_v50 = vsel %vm3725_vm8, %v3717_v7, %v8029_v45  ;;  %v8030_v51 = vadd.f32 -1.0, %v9625_v46  ;;  %v9278_v7 = vld [vmem:[#allocation23 + $0xf4] ss:$20 sps:$4 sm:$0xff]   ;;  %v3817_v45 = vrot.slane %v3808_v42, %v10855_v31 }
 0x6ae   :  { %v9629_v53 = vpop.eup %9628  ;;  %v3767_v54 = vsel %vm3727_vm10, %v3719_v9, %v8031_v47  ;;  %v8033_v55 = vadd.f32 -1.0, %v9627_v49  ;;  %v9276_v9 = vld [vmem:[#allocation23 + $0xf0] ss:$20 sps:$4 sm:$0xff]   ;;  %vm4948_vm10 = vcmask 261120  }
 0x6af   :  { %v9631_v56 = vpop.eup %9630  ;;  %v3773_v57 = vpack.c.bf16 %v3767_v54, %v3765_v50  ;;  %v3766_v58 = vsel %vm3726_vm11, %v3718_v24, %v8030_v51  ;;  %v8035_v59 = vadd.f32 -1.0, %v9629_v53  ;;  %v9275_v24 = vld [vmem:[#allocation23 + $0xcc] ss:$20 sps:$4 sm:$0xff]  }
 0x6b0   :  { %v9633_v60 = vpop.eup %9632  ;;  %v3772_v61 = vpack.c.bf16 %v3766_v58, %v3764_v52  ;;  %v3769_v62 = vsel %vm3729_vm12, %v3721_v8, %v8033_v55  ;;  %v8032_v63 = vadd.f32 -1.0, %v9631_v56  ;;  %v9281_v8 = vld [vmem:[#allocation23 + $0x11c] ss:$20 sps:$4 sm:$0xff]  }
 0x6b1   :  { %4012 = vmatprep.mubr.bf16.mxu1 %v3773_v57  ;;  %v3771_v0 = vsel %vm3731_vm13, %v3723_v10, %v8035_v59  ;;  %v8034_v1 = vadd.f32 -1.0, %v9633_v60  ;;  %v9273_v10 = vld [vmem:[#allocation23 + $0xc8] ss:$20 sps:$4 sm:$0xff]  }
 0x6b2   :  { %4013 = vmatmul.mubr.bf16.vlgmr.msra.gmra.mrb[8].mxu1 %v3772_v61  ;;  %v3775_v2 = vpack.c.bf16 %v3771_v0, %v3769_v62  ;;  %v3768_v3 = vsel %vm3728_vm14, %v3720_v12, %v8032_v63  ;;  %v9287_v12 = vld [vmem:[#allocation23 + $0x16c] ss:$20 sps:$4 sm:$0xff]  }
 0x6b3   :  { %v3770_v4 = vsel %vm3730_vm15, %v10874_v22, %v8034_v1  ;;  %4706 = vmatpush1.bf16.msra.mxu1 %v9258_v15  ;;  %v9272_v22 = vld [vmem:[#allocation23 + $0xa4] ss:$20 sps:$4 sm:$0xff]  }
 0x6b4   :  { %4022 = vmatprep.mubr.bf16.mxu1 %v3775_v2  ;;  %v3774_v5 = vpack.c.bf16 %v3770_v4, %v3768_v3  ;;  %4707 = vmatprep.subr.bf16.mxu1 %v9263_v16 }
 0x6b7   :  { %4708 = vmatpush1.bf16.msra.mxu1 %v9261_v17 }
 0x6b8   :  { %4709 = vmatprep.subr.bf16.mxu1 %v9266_v18 }
 0x6ba   :  { %4023 = vmatmul.mubr.bf16.gmra.mrb[12].mxu1 %v3774_v5 }
 0x6bb   :  { %4710 = vmatpush1.bf16.msra.mxu1 %v9264_v19 }
 0x6bc   :  { %4711 = vmatprep.subr.bf16.mxu1 %v9269_v20 }
 0x6bf   :  { %4712 = vmatpush1.bf16.msra.mxu1 %v9267_v21 }
 0x6c0   :  { %4713 = vmatprep.subr.bf16.mxu1 %v9272_v22 }
 0x6c3   :  { %4714 = vmatpush1.bf16.msra.mxu1 %v9270_v23 }
 0x6c4   :  { %4715 = vmatprep.subr.bf16.mxu1 %v9275_v24 }
 0x6c7   :  { %4716 = vmatpush1.bf16.msra.mxu1 %v9273_v10 }
 0x6c8   :  { %4717 = vmatprep.subr.bf16.mxu1 %v9278_v7 }
 0x6cb   :  { %4718 = vmatpush1.bf16.msra.mxu1 %v9276_v9 }
 0x6cc   :  { %4719 = vmatprep.subr.bf16.mxu1 %v9281_v8 }
 0x6cf   :  { %4720 = vmatpush1.bf16.msra.mxu1 %v9279_v13 }
 0x6d0   :  { %4721 = vmatprep.subr.bf16.mxu1 %v9284_v14 }
 0x6d3   :  { %4722 = vmatpush1.bf16.msra.mxu1 %v9282_v11 }
 0x6d4   :  { %4723 = vmatprep.subr.bf16.mxu1 %v9287_v12 }
 0x6d7   :  { %4724 = vmatpush1.bf16.msra.mxu1 %v9285_v25 }
 0x6d8   :  { %4725 = vmatprep.subr.bf16.mxu1 %v9290_v27 }
 0x6db   :  { %4726 = vmatpush1.bf16.msra.mxu1 %v9288_v26 }
 0x6dc   :  { %4727 = vmatprep.subr.bf16.mxu1 %v9293_v30 }
 0x6df   :  { %4728 = vmatpush1.bf16.msra.mxu1 %v9291_v32 }
 0x6e0   :  { %4729 = vmatprep.subr.bf16.mxu1 %v9296_v33 }
 0x6e3   :  { %4730 = vmatpush1.bf16.msra.mxu1 %v9294_v34 }
 0x6e4   :  { %4731 = vmatprep.subr.bf16.mxu1 %v9299_v35 }
 0x6e7   :  { %4732 = vmatpush1.bf16.msra.mxu1 %v9297_v36 }
 0x6e8   :  { %4733 = vmatprep.subr.bf16.mxu1 %v9302_v37 }
 0x6eb   :  { %4734 = vmatpush1.bf16.msra.mxu1 %v9300_v38 }
 0x6ec   :  { %4735 = vmatprep.subr.bf16.mxu1 %v9305_v39 }
 0x6ef   :  { %4736 = vmatpush1.bf16.msra.mxu1 %v9303_v40 }
 0x6f0   :  { %4758 = vmatprep.subr.bf16.mxu1 %v9308_v41 }
 0x785   :  { %v4014_v44 = vpop.f32.mrb[8].mxu1 }
 0x786   :  { %v4016_v46 = vpop.f32.mrb[9].mxu1  ;;  %v4015_v49 = vadd.f32 %v4014_v44, %v3813_v43 }
 0x787   :  { %v4018_v47 = vpop.f32.mrb[10].mxu1  ;;  %v4017_v52 = vadd.f32 %v4016_v46, %v3817_v45 }
 0x788   :  { %v4019_v50 = vadd.f32 %v4018_v47, %v3813_v43  ;;  %v4020_v51 = vpop.f32.mrb[11].mxu1 }
 0x789   :  { %v4021_v53 = vadd.f32 %v4020_v51, %v3817_v45 }
 0x78a   :  { %v4035_v54 = vadd.f32 %v4019_v50, %v4015_v49 }
 0x78b   :  { %v4044_v55 = vadd.f32 %v4021_v53, %v4017_v52 }
 0x78d   :  { %v4024_v56 = vpop.f32.mrb[12].mxu1 }
 0x78e   :  { %v4025_v57 = vadd.f32 %v4024_v56, %v3813_v43  ;;  %v4026_v58 = vpop.f32.mrb[13].mxu1 }
 0x78f   :  { %v4027_v59 = vadd.f32 %v4026_v58, %v3817_v45  ;;  %v4028_v60 = vpop.f32.mrb[14].mxu1 }
 0x790   :  { %v4036_v61 = vadd.f32 %v4035_v54, %v4025_v57  ;;  %v4029_v62 = vadd.f32 %v4028_v60, %v3813_v43  ;;  %v4030_v63 = vpop.f32.mrb[15].mxu1  ;;  %v4033_v60 = vld [vmem:[#allocation20] sm:$0x3] }
 0x791   :  { %v4045_v0 = vadd.f32 %v4044_v55, %v4027_v59  ;;  %v4031_v1 = vadd.f32 %v4030_v63, %v3817_v45 }
 0x792   :  { %v4037_v2 = vadd.f32 %v4036_v61, %v4029_v62  ;;  %v4034_v61 = vld [vmem:[#allocation22] sm:$0x3] }
 0x793   :  { %v4046_v3 = vadd.f32 %v4045_v0, %v4031_v1  ;;  %v4126_v0 = vrot.slane %v4034_v61, %v10852_v29 }
 0x794   :  { %v4038_v4 = vrot.slane %v4037_v2, 4 }
 0x795   :  { %v4047_v5 = vrot.slane %v4046_v3, 4 }
 0x796   :  { %v4039_v6 = vadd.f32 %v4038_v4, %v4037_v2  ;;  %v4130_v2 = vrot.slane %v4034_v61, %v10855_v31 }
 0x797   :  { %v4048_v15 = vadd.f32 %v4047_v5, %v4046_v3 }
 0x798   :  { %v4040_v16 = vrot.slane %v4039_v6, 2 }
 0x799   :  { %v4049_v17 = vrot.slane %v4048_v15, 2 }
 0x79a   :  { %v4041_v18 = vadd.f32 %v4040_v16, %v4039_v6 }
 0x79b   :  { %v4050_v19 = vadd.f32 %v4049_v17, %v4048_v15 }
 0x79c   :  { %v4042_v20 = vrot.slane %v4041_v18, 1 }
 0x79d   :  { %v4051_v21 = vrot.slane %v4050_v19, 1 }
 0x79e   :  { %v4043_v22 = vadd.f32 %v4042_v20, %v4041_v18 }
 0x79f   :  { %v4052_v23 = vadd.f32 %v4051_v21, %v4050_v19 }
 0x7a0   :  { %v4053_v24 = vmul.f32 0.03125, %v4043_v22 }
 0x7a1   :  { %v4054_v10 = vmul.f32 0.03125, %v4052_v23 }
 0x7a2   :  { %v4055_v7 = vsub.f32 %v4015_v49, %v4053_v24  ;;  %v4057_v9 = vsub.f32 %v4019_v50, %v4053_v24  ;;  %v4059_v8 = vsub.f32 %v4025_v57, %v4053_v24  ;;  %v4061_v13 = vsub.f32 %v4029_v62, %v4053_v24 }
 0x7a3   :  { %v4056_v14 = vsub.f32 %v4017_v52, %v4054_v10  ;;  %v4058_v11 = vsub.f32 %v4021_v53, %v4054_v10  ;;  %v4060_v12 = vsub.f32 %v4027_v59, %v4054_v10  ;;  %v4062_v25 = vsub.f32 %v4031_v1, %v4054_v10 }
 0x7a4   :  { %v4063_v26 = vmul.f32 %v4055_v7, %v4055_v7  ;;  %v4065_v27 = vmul.f32 %v4057_v9, %v4057_v9  ;;  %v4067_v33 = vmul.f32 %v4059_v8, %v4059_v8  ;;  %v4069_v37 = vmul.f32 %v4061_v13, %v4061_v13 }
 0x7a5   :  { %v4064_v30 = vmul.f32 %v4056_v14, %v4056_v14  ;;  %v4066_v32 = vmul.f32 %v4058_v11, %v4058_v11  ;;  %v4068_v35 = vmul.f32 %v4060_v12, %v4060_v12  ;;  %v4070_v39 = vmul.f32 %v4062_v25, %v4062_v25 }
 0x7a6   :  { %v4071_v34 = vadd.f32 %v4065_v27, %v4063_v26  ;;  %v4107_v62 = vrot.slane %v4033_v60, %v10852_v29  ;;  %v4111_v1 = vrot.slane %v4033_v60, %v10855_v31 }
 0x7a7   :  { %v4080_v36 = vadd.f32 %v4066_v32, %v4064_v30 }
 0x7a8   :  { %v4072_v38 = vadd.f32 %v4071_v34, %v4067_v33 }
 0x7a9   :  { %v4081_v40 = vadd.f32 %v4080_v36, %v4068_v35 }
 0x7aa   :  { %v4073_v41 = vadd.f32 %v4072_v38, %v4069_v37 }
 0x7ab   :  { %v4082_v42 = vadd.f32 %v4081_v40, %v4070_v39 }
 0x7ac   :  { %v4074_v43 = vrot.slane %v4073_v41, 4 }
 0x7ad   :  { %v4083_v44 = vrot.slane %v4082_v42, 4 }
 0x7ae   :  { %v4075_v45 = vadd.f32 %v4074_v43, %v4073_v41 }
 0x7af   :  { %v4084_v46 = vadd.f32 %v4083_v44, %v4082_v42 }
 0x7b0   :  { %v4076_v47 = vrot.slane %v4075_v45, 2 }
 0x7b1   :  { %v4085_v49 = vrot.slane %v4084_v46, 2 }
 0x7b2   :  { %v4077_v50 = vadd.f32 %v4076_v47, %v4075_v45 }
 0x7b3   :  { %v4086_v51 = vadd.f32 %v4085_v49, %v4084_v46 }
 0x7b4   :  { %v4078_v52 = vrot.slane %v4077_v50, 1 }
 0x7b5   :  { %v4087_v53 = vrot.slane %v4086_v51, 1 }
 0x7b6   :  { %v4079_v54 = vadd.f32 %v4078_v52, %v4077_v50 }
 0x7b7   :  { %v4088_v55 = vadd.f32 %v4087_v53, %v4086_v51 }
 0x7b8   :  { %v4089_v56 = vmul.f32 0.03125, %v4079_v54 }
 0x7b9   :  { %v4090_v57 = vmul.f32 0.03125, %v4088_v55 }
 0x7ba   :  { %v4091_v58 = vadd.f32 1e-05, %v4089_v56 }
 0x7bb   :  { %v4092_v59 = vadd.f32 1e-05, %v4090_v57 }
 0x7bc   :  { %9634 = vrsqrt.f32 %v4091_v58 }
 0x7bd   :  { %9636 = vrsqrt.f32 %v4092_v59 }
 0x7c6   :  { %v9635_v63 = vpop.eup %9634 }
 0x7c7   :  { %v9637_v3 = vpop.eup %9636  ;;  %v4095_v4 = vmul.f32 %v9635_v63, %v4055_v7  ;;  %v4097_v5 = vmul.f32 %v9635_v63, %v4057_v9  ;;  %v4101_v6 = vmul.f32 %v9635_v63, %v4061_v13  ;;  %v4099_v15 = vmul.f32 %v9635_v63, %v4059_v8 }
 0x7c8   :  { %v4102_v16 = vmul.f32 %v9637_v3, %v4062_v25  ;;  %v4096_v17 = vmul.f32 %v9637_v3, %v4056_v14  ;;  %v4098_v18 = vmul.f32 %v9637_v3, %v4058_v11  ;;  %v4100_v19 = vmul.f32 %v9637_v3, %v4060_v12 }
 0x7c9   :  { %v4114_v20 = vmul.f32 %v4107_v62, %v4095_v4  ;;  %v4116_v21 = vmul.f32 %v4107_v62, %v4097_v5  ;;  %v4120_v22 = vmul.f32 %v4107_v62, %v4101_v6  ;;  %v4118_v23 = vmul.f32 %v4107_v62, %v4099_v15  ;;  %v9311_v6 = vld [vmem:[#allocation23 + $0x34] ss:$20 sps:$4 sm:$0xff]  }
 0x7ca   :  { %v4121_v24 = vmul.f32 %v4111_v1, %v4102_v16  ;;  %v4115_v10 = vmul.f32 %v4111_v1, %v4096_v17  ;;  %v4117_v26 = vmul.f32 %v4111_v1, %v4098_v18  ;;  %v4119_v27 = vmul.f32 %v4111_v1, %v4100_v19 }
 0x7cb   :  { %v10885_v30 = vadd.f32 %v4126_v0, %v4120_v22  ;;  %v4133_v32 = vadd.f32 %v4126_v0, %v4114_v20  ;;  %v4135_v33 = vadd.f32 %v4126_v0, %v4116_v21  ;;  %v4137_v12 = vadd.f32 %v4126_v0, %v4118_v23  ;;  %v9306_v0 = vld [vmem:[#allocation23 + $0x8] ss:$20 sps:$4 sm:$0xff]   ;;  %v9309_v20 = vld [vmem:[#allocation23 + $0x30] ss:$20 sps:$4 sm:$0xff]  }
 0x7cc   :  { %v4140_v7 = vadd.f32 %v4130_v2, %v4121_v24  ;;  %v4134_v9 = vadd.f32 %v4130_v2, %v4115_v10  ;;  %v4136_v13 = vadd.f32 %v4130_v2, %v4117_v26  ;;  %v4138_v8 = vadd.f32 %v4130_v2, %v4119_v27  ;;  %v9314_v22 = vld [vmem:[#allocation23 + $0x5c] ss:$20 sps:$4 sm:$0xff]   ;;  %v9312_v24 = vld [vmem:[#allocation23 + $0x58] ss:$20 sps:$4 sm:$0xff]   ;;  %v9315_v26 = vld [vmem:[#allocation23 + $0x80] ss:$20 sps:$4 sm:$0xff]  }
 0x7cd   :  { %v4149_v25 = vmin.f32 %v4133_v32, 0.0  ;;  %v4151_v35 = vmin.f32 %v4135_v33, 0.0  ;;  %v4155_v37 = vmin.f32 %v10885_v30, 0.0  ;;  %v4153_v44 = vmin.f32 %v4137_v12, 0.0  ;;  %v9317_v10 = vld [vmem:[#allocation23 + $0x84] ss:$20 sps:$4 sm:$0xff]  }
 0x7ce   :  { %v4156_v14 = vmin.f32 %v4140_v7, 0.0  ;;  %v4150_v11 = vmin.f32 %v4134_v9, 0.0  ;;  %v4152_v34 = vmin.f32 %v4136_v13, 0.0  ;;  %v4154_v39 = vmin.f32 %v4138_v8, 0.0  ;;  %v9320_v27 = vld [vmem:[#allocation23 + $0xac] ss:$20 sps:$4 sm:$0xff]  }
 0x7cf   :  { %v4157_v36 = vmul.f32 1.442695, %v4149_v25  ;;  %v4161_v41 = vmul.f32 1.442695, %v4151_v35  ;;  %v4165_v45 = vmul.f32 1.442695, %v4153_v44 }
 0x7d0   :  { %v4159_v38 = vmul.f32 1.442695, %v4150_v11  ;;  %v4163_v40 = vmul.f32 1.442695, %v4152_v34  ;;  %v4167_v42 = vmul.f32 1.442695, %v4154_v39 }
 0x7d1   :  { %9638 = vpow2.f32 %v4157_v36  ;;  %v4171_v43 = vmul.f32 1.442695, %v4156_v14  ;;  %v4169_v46 = vmul.f32 1.442695, %v4155_v37  ;;  %vm4142_vm0 = vcmp.gt.f32.partialorder %v4134_v9, 0.0 }
 0x7d2   :  { %9640 = vpow2.f32 %v4159_v38  ;;  %vm4141_vm1 = vcmp.gt.f32.partialorder %v4133_v32, 0.0  ;;  %vm4144_vm2 = vcmp.gt.f32.partialorder %v4136_v13, 0.0  ;;  %vm4143_vm3 = vcmp.gt.f32.partialorder %v4135_v33, 0.0  ;;  %v9332_v25 = vld [vmem:[#allocation23 + $0x14c] ss:$20 sps:$4 sm:$0xff]  }
 0x7d3   :  { %9642 = vpow2.f32 %v4163_v40  ;;  %vm4146_vm4 = vcmp.gt.f32.partialorder %v4138_v8, 0.0  ;;  %vm4148_vm5 = vcmp.gt.f32.partialorder %v4140_v7, 0.0  ;;  %vm4145_vm6 = vcmp.gt.f32.partialorder %v4137_v12, 0.0  ;;  %v9330_v14 = vld [vmem:[#allocation23 + $0x148] ss:$20 sps:$4 sm:$0xff]  }
 0x7d4   :  { %9644 = vpow2.f32 %v4161_v41  ;;  %vm4147_vm7 = vcmp.gt.f32.partialorder %v10885_v30, 0.0  ;;  %v9335_v11 = vld [vmem:[#allocation23 + $0x174] ss:$20 sps:$4 sm:$0xff]   ;;  %v9338_v34 = vld [vmem:[#allocation23 + $0x19c] ss:$20 sps:$4 sm:$0xff]  }
 0x7d5   :  { %9646 = vpow2.f32 %v4167_v42  ;;  %v9336_v35 = vld [vmem:[#allocation23 + $0x198] ss:$20 sps:$4 sm:$0xff]   ;;  %v9339_v37 = vld [vmem:[#allocation23 + $0x1c0] ss:$20 sps:$4 sm:$0xff]   ;;  %v9342_v39 = vld [vmem:[#allocation23 + $0x1e8] ss:$20 sps:$4 sm:$0xff]  }
 0x7d6   :  { %9648 = vpow2.f32 %v4171_v43  ;;  %v9341_v36 = vld [vmem:[#allocation23 + $0x1c4] ss:$20 sps:$4 sm:$0xff]   ;;  %v9344_v38 = vld [vmem:[#allocation23 + $0x1ec] ss:$20 sps:$4 sm:$0xff]   ;;  %v9347_v40 = vld [vmem:[#allocation23 + $0x214] ss:$20 sps:$4 sm:$0xff]  }
 0x7d7   :  { %9650 = vpow2.f32 %v4165_v45  ;;  %v9345_v41 = vld [vmem:[#allocation23 + $0x210] ss:$20 sps:$4 sm:$0xff]   ;;  %v9348_v43 = vld [vmem:[#allocation23 + $0x238] ss:$20 sps:$4 sm:$0xff]   ;;  %v9351_v45 = vld [vmem:[#allocation23 + $0x260] ss:$20 sps:$4 sm:$0xff]  }
 0x7d8   :  { %9652 = vpow2.f32 %v4169_v46  ;;  %v9350_v42 = vld [vmem:[#allocation23 + $0x23c] ss:$20 sps:$4 sm:$0xff]   ;;  %v9353_v44 = vld [vmem:[#allocation23 + $0x264] ss:$20 sps:$4 sm:$0xff]  }
 0x7d9   :  { %v9354_v46 = vld [vmem:[#allocation23 + $0x150] ss:$20 sps:$4 sm:$0xff]  }
 0x7db   :  { %v9639_v47 = vpop.eup %9638 }
 0x7dc   :  { %v9641_v49 = vpop.eup %9640  ;;  %v8068_v50 = vadd.f32 -1.0, %v9639_v47  ;;  %v9355_v47 = vld [vmem:[#allocation23 + $0x10] ss:$20 sps:$4 sm:$0xff]  }
 0x7dd   :  { %v9643_v51 = vpop.eup %9642  ;;  %v8069_v52 = vadd.f32 -1.0, %v9641_v49  ;;  %v9356_v49 = vld [vmem:[#allocation23 + $0x178] ss:$20 sps:$4 sm:$0xff]  }
 0x7de   :  { %v9645_v53 = vpop.eup %9644  ;;  %v8071_v54 = vadd.f32 -1.0, %v9643_v51  ;;  %v4181_v58 = vsel %vm4141_vm1, %v4133_v32, %v8068_v50  ;;  %v9323_v32 = vld [vmem:[#allocation23 + $0xd4] ss:$20 sps:$4 sm:$0xff]   ;;  %v9357_v50 = vld [vmem:[#allocation23 + $0x38] ss:$20 sps:$4 sm:$0xff]  }
 0x7df   :  { %v9647_v55 = vpop.eup %9646  ;;  %v4182_v56 = vsel %vm4142_vm0, %v4134_v9, %v8069_v52  ;;  %v8070_v57 = vadd.f32 -1.0, %v9645_v53  ;;  %v9324_v9 = vld [vmem:[#allocation23 + $0xf8] ss:$20 sps:$4 sm:$0xff]   ;;  %v9358_v51 = vld [vmem:[#allocation23 + $0x1a0] ss:$20 sps:$4 sm:$0xff]  }
 0x7e0   :  { %v9649_v59 = vpop.eup %9648  ;;  %v4184_v60 = vsel %vm4144_vm2, %v4136_v13, %v8071_v54  ;;  %v8073_v61 = vadd.f32 -1.0, %v9647_v55  ;;  %v9329_v13 = vld [vmem:[#allocation23 + $0x124] ss:$20 sps:$4 sm:$0xff]   ;;  %v9359_v52 = vld [vmem:[#allocation23 + $0x60] ss:$20 sps:$4 sm:$0xff]  }
 0x7e1   :  { %v9651_v62 = vpop.eup %9650  ;;  %v10888_v63 = vpack.c.bf16 %v4184_v60, %v4182_v56  ;;  %v4183_v1 = vsel %vm4143_vm3, %v4135_v33, %v8070_v57  ;;  %v8075_v2 = vadd.f32 -1.0, %v9649_v59  ;;  %v9321_v33 = vld [vmem:[#allocation23 + $0xd0] ss:$20 sps:$4 sm:$0xff]   ;;  %v9360_v53 = vld [vmem:[#allocation23 + $0x1c8] ss:$20 sps:$4 sm:$0xff]  }
 0x7e2   :  { %v9653_v3 = vpop.eup %9652  ;;  %v10890_v4 = vpack.c.bf16 %v4183_v1, %v4181_v58  ;;  %v4186_v5 = vsel %vm4146_vm4, %v4138_v8, %v8073_v61  ;;  %v8072_v15 = vadd.f32 -1.0, %v9651_v62  ;;  %v9327_v8 = vld [vmem:[#allocation23 + $0x120] ss:$20 sps:$4 sm:$0xff]   ;;  %v9361_v54 = vld [vmem:[#allocation23 + $0x88] ss:$20 sps:$4 sm:$0xff]  }
 0x7e3   :  { %4737 = vmatprep.mubr.bf16.mxu1 %v10888_v63  ;;  %v4188_v16 = vsel %vm4148_vm5, %v4140_v7, %v8075_v2  ;;  %v8074_v17 = vadd.f32 -1.0, %v9653_v3  ;;  %v9326_v7 = vld [vmem:[#allocation23 + $0xfc] ss:$20 sps:$4 sm:$0xff]   ;;  %v9364_v57 = vld [vmem:[#allocation23 + $0x218] ss:$20 sps:$4 sm:$0xff]  }
 0x7e4   :  { %4738 = vmatmul.mubr.bf16.vlgmr.msra.gmra.mrb[16].mxu1 %v10890_v4  ;;  %v10894_v18 = vpack.c.bf16 %v4188_v16, %v4186_v5  ;;  %v4185_v19 = vsel %vm4145_vm6, %v4137_v12, %v8072_v15  ;;  %v9333_v12 = vld [vmem:[#allocation23 + $0x170] ss:$20 sps:$4 sm:$0xff]   ;;  %v9365_v58 = vld [vmem:[#allocation23 + $0xd8] ss:$20 sps:$4 sm:$0xff]   ;;  %v9366_v59 = vld [vmem:[#allocation23 + $0x240] ss:$20 sps:$4 sm:$0xff]  }
 0x7e5   :  { %4759 = vmatpush1.bf16.msra.mxu1 %v9306_v0  ;;  %v4187_v21 = vsel %vm4147_vm7, %v10885_v30, %v8074_v17  ;;  %v9318_v30 = vld [vmem:[#allocation23 + $0xa8] ss:$20 sps:$4 sm:$0xff]   ;;  %v9362_v55 = vld [vmem:[#allocation23 + $0x1f0] ss:$20 sps:$4 sm:$0xff]   ;;  %v9367_v60 = vld [vmem:[#allocation23 + $0x100] ss:$20 sps:$4 sm:$0xff]  }
 0x7e6   :  { %4747 = vmatprep.mubr.bf16.mxu1 %v10894_v18  ;;  %4760 = vmatprep.subr.bf16.mxu1 %v9311_v6  ;;  %v10899_v23 = vpack.c.bf16 %v4187_v21, %v4185_v19  ;;  %v9363_v56 = vld [vmem:[#allocation23 + $0xb0] ss:$20 sps:$4 sm:$0xff]   ;;  %v9368_v61 = vld [vmem:[#allocation23 + $0x268] ss:$20 sps:$4 sm:$0xff]  }
 0x7e7   :  { %v9369_v62 = vld [vmem:[#allocation23 + $0x128] ss:$20 sps:$4 sm:$0xff]  }
 0x7e9   :  { %4761 = vmatpush1.bf16.msra.mxu1 %v9309_v20 }
 0x7ea   :  { %4762 = vmatprep.subr.bf16.mxu1 %v9314_v22 }
 0x7ec   :  { %4748 = vmatmul.mubr.bf16.gmra.mrb[20].mxu1 %v10899_v23 }
 0x7ed   :  { %4763 = vmatpush1.bf16.msra.mxu1 %v9312_v24  ;;  %4790 = vmatprep.mubr.bf16.mxu1 %v10888_v63 }
 0x7ee   :  { %4764 = vmatprep.subr.bf16.mxu1 %v9317_v10 }
 0x7f1   :  { %4765 = vmatpush1.bf16.msra.mxu1 %v9315_v26 }
 0x7f2   :  { %4766 = vmatprep.subr.bf16.mxu1 %v9320_v27 }
 0x7f5   :  { %4767 = vmatpush1.bf16.msra.mxu1 %v9318_v30 }
 0x7f6   :  { %4768 = vmatprep.subr.bf16.mxu1 %v9323_v32 }
 0x7f9   :  { %4769 = vmatpush1.bf16.msra.mxu1 %v9321_v33 }
 0x7fa   :  { %4770 = vmatprep.subr.bf16.mxu1 %v9326_v7 }
 0x7fd   :  { %4771 = vmatpush1.bf16.msra.mxu1 %v9324_v9 }
 0x7fe   :  { %4772 = vmatprep.subr.bf16.mxu1 %v9329_v13 }
 0x801   :  { %4773 = vmatpush1.bf16.msra.mxu1 %v9327_v8 }
 0x802   :  { %4774 = vmatprep.subr.bf16.mxu1 %v9332_v25 }
 0x805   :  { %4775 = vmatpush1.bf16.msra.mxu1 %v9330_v14 }
 0x806   :  { %4776 = vmatprep.subr.bf16.mxu1 %v9335_v11 }
 0x809   :  { %4777 = vmatpush1.bf16.msra.mxu1 %v9333_v12 }
 0x80a   :  { %4778 = vmatprep.subr.bf16.mxu1 %v9338_v34 }
 0x80d   :  { %4779 = vmatpush1.bf16.msra.mxu1 %v9336_v35 }
 0x80e   :  { %4780 = vmatprep.subr.bf16.mxu1 %v9341_v36 }
 0x811   :  { %4781 = vmatpush1.bf16.msra.mxu1 %v9339_v37 }
 0x812   :  { %4782 = vmatprep.subr.bf16.mxu1 %v9344_v38 }
 0x815   :  { %4783 = vmatpush1.bf16.msra.mxu1 %v9342_v39  ;;  %v10335_v39 = vmov 3  }
 0x816   :  { %4784 = vmatprep.subr.bf16.mxu1 %v9347_v40 }
 0x819   :  { %4785 = vmatpush1.bf16.msra.mxu1 %v9345_v41 }
 0x81a   :  { %4786 = vmatprep.subr.bf16.mxu1 %v9350_v42 }
 0x81d   :  { %4787 = vmatpush1.bf16.msra.mxu1 %v9348_v43 }
 0x81e   :  { %4788 = vmatprep.subr.bf16.mxu1 %v9353_v44 }
 0x821   :  { %4789 = vmatpush1.bf16.msra.mxu1 %v9351_v45 }
 0x822   :  { %8365 = vmatprep.subr.bf16.mxu1 %v9354_v46 }
 0x824   :  { %4791 = vmatmul.mubr.bf16.vlgmr.msra.gmra.mrb[24].mxu1 %v10890_v4 }
 0x825   :  { %4800 = vmatprep.mubr.bf16.mxu1 %v10894_v18  ;;  %8366 = vmatpush3.bf16.msra.mxu1 %v9355_v47  ;;  %v8357_v47 = vld [vmem:[#allocation2] sm:$0xff]  }
 0x826   :  { %8367 = vmatprep.subr.bf16.mxu1 %v9356_v49 }
 0x829   :  { %8368 = vmatpush3.bf16.msra.mxu1 %v9357_v50 }
 0x82a   :  { %8369 = vmatprep.subr.bf16.mxu1 %v9358_v51 }
 0x82c   :  { %4801 = vmatmul.mubr.bf16.gmra.mrb[28].mxu1 %v10899_v23 }
 0x82d   :  { %8370 = vmatpush3.bf16.msra.mxu1 %v9359_v52  ;;  %4843 = vmatprep.mubr.bf16.mxu1 %v10888_v63  ;;  %v10334_v63 = vmov 2   ;;  %v8364_v52 = vld [vmem:[#allocation2 + $0x8] sm:$0xff]  }
 0x82e   :  { %8371 = vmatprep.subr.bf16.mxu1 %v9360_v53  ;;  %8587 = vset.pattern.permute.xlu0 %v10334_v63 }
 0x82f   :  { %8588 = vset.pattern.permute.xlu1 %v10334_v63 }
 0x831   :  { %8372 = vmatpush3.bf16.msra.mxu1 %v9361_v54 }
 0x832   :  { %8373 = vmatprep.subr.bf16.mxu1 %v9362_v55  ;;  %v10935_v55 = vunpack.c.h.bf16 %v8357_v47 }
 0x835   :  { %8374 = vmatpush3.bf16.msra.mxu1 %v9363_v56  ;;  %v10937_v56 = vunpack.c.l.bf16 %v8357_v47 }
 0x836   :  { %8375 = vmatprep.subr.bf16.mxu1 %v9364_v57 }
 0x839   :  { %8376 = vmatpush3.bf16.msra.mxu1 %v9365_v58 }
 0x83a   :  { %8377 = vmatprep.subr.bf16.mxu1 %v9366_v59 }
 0x83d   :  { %8378 = vmatpush3.bf16.msra.mxu1 %v9367_v60  ;;  %v10939_v60 = vunpack.c.l.bf16 %v8364_v52 }
 0x83e   :  { %8379 = vmatprep.subr.bf16.mxu1 %v9368_v61 }
 0x841   :  { %8380 = vmatpush3.bf16.msra.mxu1 %v9369_v62 }
 0x844   :  { %4844 = vmatmul.mubr.bf16.vlgmr.msra.gmra.mrb[32].mxu1 %v10890_v4 }
 0x845   :  { %4851 = vmatprep.mubr.bf16.mxu1 %v10894_v18 }
 0x84c   :  { %4852 = vmatmul.mubr.bf16.gmra.mrb[36].mxu1 %v10899_v23 }
 0x84d   :  { %5033 = vmatprep.mubr.bf16.mxu1 %v10333_v48 }
 0x8b7   :  { %v4739_v0 = vpop.f32.mrb[16].mxu1 }
 0x8b8   :  { %v4741_v1 = vpop.f32.mrb[17].mxu1 }
 0x8b9   :  { %v4743_v2 = vpop.f32.mrb[18].mxu1 }
 0x8ba   :  { %v4860_v3 = vpack.c.bf16 %v4743_v2, %v4739_v0  ;;  %v4745_v5 = vpop.f32.mrb[19].mxu1 }
 0x8bb   :  { %v4861_v6 = vpack.c.bf16 %v4745_v5, %v4741_v1 }
 0x8bd   :  { %5001 = vmatprep.subr.bf16.mxu1 %v4861_v6 }
 0x8be   :  { %5002 = vmatpush1.bf16.msra.mxu1 %v4860_v3 }
 0x8bf   :  { %v4749_v4 = vpop.f32.mrb[20].mxu1 }
 0x8c0   :  { %v4751_v15 = vpop.f32.mrb[21].mxu1 }
 0x8c1   :  { %v4753_v16 = vpop.f32.mrb[22].mxu1 }
 0x8c2   :  { %v4864_v17 = vpack.c.bf16 %v4753_v16, %v4749_v4  ;;  %v4755_v18 = vpop.f32.mrb[23].mxu1 }
 0x8c3   :  { %v4865_v19 = vpack.c.bf16 %v4755_v18, %v4751_v15 }
 0x8c5   :  { %5003 = vmatprep.subr.bf16.mxu1 %v4865_v19 }
 0x8c6   :  { %5004 = vmatpush1.bf16.msra.mxu1 %v4864_v17  ;;  %v10946_v17 = vunpack.c.h.bf16 %v8364_v52 }
 0x8f7   :  { %v10913_v20 = vpop.f32.mrb[24].mxu1 }
 0x8f8   :  { %v4794_v21 = vpop.f32.mrb[25].mxu1 }
 0x8f9   :  { %v10915_v22 = vpop.f32.mrb[26].mxu1 }
 0x8fa   :  { %v4862_v23 = vpack.c.bf16 %v10915_v22, %v10913_v20  ;;  %v4798_v24 = vpop.f32.mrb[27].mxu1 }
 0x8fb   :  { %v4863_v10 = vpack.c.bf16 %v4798_v24, %v4794_v21 }
 0x8fd   :  { %5146 = vmatprep.subr.bf16.mxu1 %v4863_v10 }
 0x8ff   :  { %v10919_v26 = vpop.f32.mrb[28].mxu1 }
 0x900   :  { %v10921_v27 = vpop.f32.mrb[29].mxu1 }
 0x901   :  { %v10923_v30 = vpop.f32.mrb[30].mxu1 }
 0x902   :  { %v4866_v32 = vpack.c.bf16 %v10923_v30, %v10919_v26  ;;  %v10927_v33 = vpop.f32.mrb[31].mxu1 }
 0x903   :  { %v4867_v7 = vpack.c.bf16 %v10927_v33, %v10921_v27 }
 0x917   :  { %v8381_v9 = vpop.f32.mrb[32].mxu1 }
 0x918   :  { %v8382_v13 = vpop.f32.mrb[33].mxu1 }
 0x919   :  { %v8383_v8 = vadd.f32 %v8382_v13, %v8381_v9  ;;  %v8384_v25 = vpop.f32.mrb[34].mxu1 }
 0x91a   :  { %v8385_v14 = vpop.f32.mrb[35].mxu1 }
 0x91b   :  { %v8386_v11 = vadd.f32 %v8385_v14, %v8384_v25  ;;  %4902 = vperm.xlu0 %8587, %v8383_v8  }
 0x91f   :  { %v8387_v12 = vpop.f32.mrb[36].mxu1  ;;  %4907 = vperm.xlu0 %8587, %v8386_v11  }
 0x920   :  { %v8388_v34 = vpop.f32.mrb[37].mxu1 }
 0x921   :  { %v8389_v35 = vadd.f32 %v8388_v34, %v8387_v12  ;;  %v8390_v36 = vpop.f32.mrb[38].mxu1 }
 0x922   :  { %v8391_v37 = vpop.f32.mrb[39].mxu1 }
 0x923   :  { %v8392_v38 = vadd.f32 %v8391_v37, %v8390_v36  ;;  %4912 = vperm.xlu1 %8588, %v8389_v35  }
 0x927   :  { %4917 = vperm.xlu1 %8588, %v8392_v38  }
 0x92b   :  { %8589 = vset.pattern.permute.xlu1 %v10335_v39 }
 0x92c   :  { %5055 = vperm.xlu1 %8589, %v8383_v8  }
 0x930   :  { %5059 = vperm.xlu1 %8589, %v8386_v11  }
 0x934   :  { %5063 = vperm.xlu1 %8589, %v8389_v35  }
 0x938   :  { %5067 = vperm.xlu1 %8589, %v8392_v38  }
 0x93c   :  { %8590 = vset.pattern.permute.xlu1 %v10334_v63 }
 0x93d   :  { %4868 = vxpose.xlu0.b32.start [1/4] (short) (narrow) %v8383_v8, 8 }
 0x941   :  { %4869 = vxpose.xlu0.b32.cont [2/4] (short) (narrow) %v8386_v11, 8 }
 0x945   :  { %4870 = vxpose.xlu0.b32.cont [3/4] (short) (narrow) %v8389_v35, 8 }
 0x949   :  { %4871 = vxpose.xlu0.b32.end [4/4] (short) (narrow) %v8392_v38, 8 }
 0x99a   :  { %v4903_v41 = vpop.permute.xlu0 %4902 }
 0x99e   :  { %v4908_v43 = vpop.permute.xlu0 %4907 }
 0x9a2   :  { %v4913_v40 = vpop.permute.xlu1 %4912 }
 0x9a6   :  { %v4918_v42 = vpop.permute.xlu1 %4917 }
 0x9ab   :  { %v5056_v44 = vpop.permute.xlu1 %5055 }
 0x9af   :  { %v5060_v59 = vpop.permute.xlu1 %5059 }
 0x9b3   :  { %v5064_v24 = vpop.permute.xlu1 %5063 }
 0x9b7   :  { %v5068_v14 = vpop.permute.xlu1 %5067 }
 0x9bd   :  { %v4884_v45 = vpop.trf.xlu0 }
 0x9be   :  { %v4923_v46 = vrot.slane %v4884_v45, %v10852_v29  ;;  %v5073_v49 = vrot.slane %v4884_v45, %v10855_v31 }
 0x9c0   :  { %v4925_v50 = vadd.f32 %v4923_v46, %v4908_v43  ;;  %v4924_v51 = vadd.f32 %v4923_v46, %v4903_v41  ;;  %v4926_v53 = vadd.f32 %v4923_v46, %v4913_v40  ;;  %v4927_v54 = vadd.f32 %v4923_v46, %v4918_v42 }
 0x9c1   :  { %v5074_v2 = vadd.f32 %v5073_v49, %v5056_v44  ;;  %v5075_v21 = vadd.f32 %v5073_v49, %v5060_v59  ;;  %v5076_v25 = vadd.f32 %v5073_v49, %v5064_v24  ;;  %v5077_v36 = vadd.f32 %v5073_v49, %v5068_v14 }
 0x9c2   :  { %vm4929_vm8 = vcmp.gt.f32.partialorder %v4925_v50, 0.0  ;;  %v4933_v57 = vmul.f32 0.2, %v4925_v50  ;;  %vm4928_vm9 = vcmp.gt.f32.partialorder %v4924_v51, 0.0  ;;  %v4932_v58 = vmul.f32 0.2, %v4924_v51 }
 0x9c3   :  { %vm4930_vm11 = vcmp.gt.f32.partialorder %v4926_v53, 0.0  ;;  %v4934_v61 = vmul.f32 0.2, %v4926_v53  ;;  %v4935_v1 = vmul.f32 0.2, %v4927_v54  ;;  %vm4931_vm12 = vcmp.gt.f32.partialorder %v4927_v54, 0.0 }
 0x9c4   :  { %v4937_v62 = vsel %vm4929_vm8, %v4925_v50, %v4933_v57  ;;  %v4936_v0 = vsel %vm4928_vm9, %v4924_v51, %v4932_v58  ;;  %v5082_v19 = vmul.f32 0.2, %v5074_v2  ;;  %vm5078_vm13 = vcmp.gt.f32.partialorder %v5074_v2, 0.0 }
 0x9c5   :  { %v4945_v3 = vadd.f32 %v10935_v55, %v4937_v62  ;;  %v4944_v5 = vadd.f32 %v10937_v56, %v4936_v0  ;;  %v4938_v6 = vsel %vm4930_vm11, %v4926_v53, %v4934_v61  ;;  %v4939_v18 = vsel %vm4931_vm12, %v4927_v54, %v4935_v1 }
 0x9c6   :  { %v4946_v16 = vadd.f32 %v10939_v60, %v4938_v6  ;;  %v4947_v9 = vadd.f32 %v10946_v17, %v4939_v18  ;;  %v5086_v13 = vsel %vm5078_vm13, %v5074_v2, %v5082_v19  ;;  %v5083_v8 = vmul.f32 0.2, %v5075_v21 }
 0x9c7   :  { %v4952_v4 = vsel %vm4948_vm10, %v4945_v3, -inf  ;;  %v4949_v15 = vsel %vm4948_vm10, %v4944_v5, -inf  ;;  %vm5079_vm14 = vcmp.gt.f32.partialorder %v5075_v21, 0.0  ;;  %v5090_v12 = vadd.f32 %v10937_v56, %v5086_v13 }
 0x9c8   :  { %4953 = vmax.xlane.f32.xlu0 %v4952_v4  ;;  %4950 = vmax.xlane.f32.xlu1 %v4949_v15  ;;  %v4955_v10 = vsel %vm4948_vm10, %v4946_v16, -inf  ;;  %v4958_v11 = vsel %vm4948_vm10, %v4947_v9, -inf  ;;  %v5087_v34 = vsel %vm5079_vm14, %v5075_v21, %v5083_v8  ;;  %v5084_v35 = vmul.f32 0.2, %v5076_v25 }
 0x9c9   :  { %vm5080_vm15 = vcmp.gt.f32.partialorder %v5076_v25, 0.0  ;;  %v5094_v37 = vsel %vm4948_vm10, %v5090_v12, -inf  ;;  %v5091_v38 = vadd.f32 %v10935_v55, %v5087_v34  ;;  %v5085_v41 = vmul.f32 0.2, %v5077_v36 }
 0x9ca   :  { %v5088_v40 = vsel %vm5080_vm15, %v5076_v25, %v5084_v35  ;;  %vm5081_vm0 = vcmp.gt.f32.partialorder %v5077_v36, 0.0 }
 0x9cb   :  { %v5097_v42 = vsel %vm4948_vm10, %v5091_v38, -inf  ;;  %v5092_v43 = vadd.f32 %v10939_v60, %v5088_v40  ;;  %v5089_v44 = vsel %vm5081_vm0, %v5077_v36, %v5085_v41 }
 0x9cc   :  { %4956 = vmax.xlane.f32.xlu1 %v4955_v10  ;;  %v5093_v46 = vadd.f32 %v10946_v17, %v5089_v44 }
 0x9cd   :  { %v5100_v45 = vsel %vm4948_vm10, %v5092_v43, -inf }
 0x9ce   :  { %v5103_v47 = vsel %vm4948_vm10, %v5093_v46, -inf }
 0x9d0   :  { %4959 = vmax.xlane.f32.xlu1 %v4958_v11 }
 0x9d4   :  { %5095 = vmax.xlane.f32.xlu1 %v5094_v37 }
 0x9d8   :  { %5098 = vmax.xlane.f32.xlu1 %v5097_v42 }
 0x9dc   :  { %5101 = vmax.xlane.f32.xlu1 %v5100_v45 }
 0x9e0   :  { %5104 = vmax.xlane.f32.xlu1 %v5103_v47 }
 0xa55   :  { %v4954_v49 = vpop.xlane.xlu0 %4953  ;;  %v4951_v50 = vpop.xlane.xlu1 %4950 }
 0xa56   :  { %v4962_v51 = vsub.f32 %v4945_v3, %v4954_v49  ;;  %v4961_v52 = vsub.f32 %v4944_v5, %v4951_v50 }
 0xa58   :  { %v4965_v53 = vmul.f32 1.442695, %v4961_v52  ;;  %v4967_v54 = vmul.f32 1.442695, %v4962_v51 }
 0xa59   :  { %v4957_v57 = vpop.xlane.xlu1 %4956 }
 0xa5a   :  { %v4963_v58 = vsub.f32 %v4946_v16, %v4957_v57  ;;  %9654 = vpow2.f32 %v4965_v53 }
 0xa5b   :  { %9656 = vpow2.f32 %v4967_v54 }
 0xa5c   :  { %v4969_v59 = vmul.f32 1.442695, %v4963_v58 }
 0xa5d   :  { %v4960_v61 = vpop.xlane.xlu1 %4959 }
 0xa5e   :  { %v4964_v62 = vsub.f32 %v4947_v9, %v4960_v61  ;;  %9658 = vpow2.f32 %v4969_v59 }
 0xa60   :  { %v4971_v0 = vmul.f32 1.442695, %v4964_v62 }
 0xa61   :  { %v5096_v1 = vpop.xlane.xlu1 %5095 }
 0xa62   :  { %9660 = vpow2.f32 %v4971_v0  ;;  %v5106_v2 = vsub.f32 %v5090_v12, %v5096_v1 }
 0xa64   :  { %v5110_v6 = vmul.f32 1.442695, %v5106_v2  ;;  %v9655_v4 = vpop.eup %9654 }
 0xa65   :  { %v5099_v15 = vpop.xlane.xlu1 %5098  ;;  %v4973_v5 = vsel %vm4948_vm10, %v9655_v4, 0.0  ;;  %v9657_v18 = vpop.eup %9656 }
 0xa66   :  { %9662 = vpow2.f32 %v5110_v6  ;;  %v5107_v3 = vsub.f32 %v5091_v38, %v5099_v15  ;;  %4974 = vadd.xlane.f32.xlu1 %v4973_v5  ;;  %v4976_v24 = vsel %vm4948_vm10, %v9657_v18, 0.0  ;;  %v9375_v15 = vld [vmem:[#allocation29 + $0x2c] ss:$20 sps:$4 sm:$0xff]   ;;  %v9378_v5 = vld [vmem:[#allocation29 + $0x54] ss:$20 sps:$4 sm:$0xff]  }
 0xa68   :  { %v5112_v16 = vmul.f32 1.442695, %v5107_v3  ;;  %v9659_v10 = vpop.eup %9658  ;;  %v9373_v3 = vld [vmem:[#allocation29 + $0x28] ss:$20 sps:$4 sm:$0xff]  }
 0xa69   :  { %v5102_v19 = vpop.xlane.xlu1 %5101  ;;  %v4979_v11 = vsel %vm4948_vm10, %v9659_v10, 0.0 }
 0xa6a   :  { %9664 = vpow2.f32 %v5112_v16  ;;  %v5108_v21 = vsub.f32 %v5092_v43, %v5102_v19  ;;  %4977 = vadd.xlane.f32.xlu1 %v4976_v24  ;;  %v9381_v16 = vld [vmem:[#allocation29 + $0x7c] ss:$20 sps:$4 sm:$0xff]   ;;  %v9379_v19 = vld [vmem:[#allocation29 + $0x78] ss:$20 sps:$4 sm:$0xff]   ;;  %v9382_v24 = vld [vmem:[#allocation29 + $0xa0] ss:$20 sps:$4 sm:$0xff]  }
 0xa6c   :  { %v9661_v9 = vpop.eup %9660  ;;  %v5114_v13 = vmul.f32 1.442695, %v5108_v21  ;;  %v9384_v21 = vld [vmem:[#allocation29 + $0xa4] ss:$20 sps:$4 sm:$0xff]  }
 0xa6d   :  { %v5105_v8 = vpop.xlane.xlu1 %5104  ;;  %v4982_v25 = vsel %vm4948_vm10, %v9661_v9, 0.0 }
 0xa6e   :  { %9666 = vpow2.f32 %v5114_v13  ;;  %v5109_v14 = vsub.f32 %v5093_v46, %v5105_v8  ;;  %4983 = vadd.xlane.f32.xlu0 %v4982_v25  ;;  %4980 = vadd.xlane.f32.xlu1 %v4979_v11  ;;  %v9390_v13 = vld [vmem:[#allocation29 + $0xf4] ss:$20 sps:$4 sm:$0xff]   ;;  %v9388_v8 = vld [vmem:[#allocation29 + $0xf0] ss:$20 sps:$4 sm:$0xff]  }
 0xa6f   :  { %v9393_v25 = vld [vmem:[#allocation29 + $0x11c] ss:$20 sps:$4 sm:$0xff]   ;;  %v9396_v11 = vld [vmem:[#allocation29 + $0x144] ss:$20 sps:$4 sm:$0xff]  }
 0xa70   :  { %v9663_v12 = vpop.eup %9662  ;;  %v5116_v34 = vmul.f32 1.442695, %v5109_v14  ;;  %v9391_v14 = vld [vmem:[#allocation29 + $0x118] ss:$20 sps:$4 sm:$0xff]  }
 0xa71   :  { %v5118_v35 = vsel %vm4948_vm10, %v9663_v12, 0.0 }
 0xa72   :  { %9668 = vpow2.f32 %v5116_v34  ;;  %5119 = vadd.xlane.f32.xlu1 %v5118_v35  ;;  %v9399_v34 = vld [vmem:[#allocation29 + $0x16c] ss:$20 sps:$4 sm:$0xff]   ;;  %v9397_v35 = vld [vmem:[#allocation29 + $0x168] ss:$20 sps:$4 sm:$0xff]  }
 0xa74   :  { %v9665_v36 = vpop.eup %9664 }
 0xa75   :  { %v5121_v37 = vsel %vm4948_vm10, %v9665_v36, 0.0 }
 0xa76   :  { %5122 = vadd.xlane.f32.xlu0 %v5121_v37  ;;  %v9400_v37 = vld [vmem:[#allocation29 + $0x190] ss:$20 sps:$4 sm:$0xff]  }
 0xa78   :  { %v9667_v38 = vpop.eup %9666 }
 0xa79   :  { %v5124_v40 = vsel %vm4948_vm10, %v9667_v38, 0.0 }
 0xa7a   :  { %5125 = vadd.xlane.f32.xlu1 %v5124_v40  ;;  %v9403_v40 = vld [vmem:[#allocation29 + $0x1b8] ss:$20 sps:$4 sm:$0xff]  }
 0xa7c   :  { %v9669_v41 = vpop.eup %9668 }
 0xa7d   :  { %v5127_v42 = vsel %vm4948_vm10, %v9669_v41, 0.0 }
 0xa7e   :  { %5128 = vadd.xlane.f32.xlu0 %v5127_v42  ;;  %v9406_v42 = vld [vmem:[#allocation29 + $0x1e0] ss:$20 sps:$4 sm:$0xff]  }
 0xaf3   :  { %v4975_v43 = vpop.xlane.xlu1 %4974 }
 0xaf4   :  { %9670 = vrcp.f32 %v4975_v43  ;;  %v9411_v43 = vld [vmem:[#allocation29 + $0x20c] ss:$20 sps:$4 sm:$0xff]  }
 0xaf7   :  { %v4978_v44 = vpop.xlane.xlu1 %4977 }
 0xaf8   :  { %9672 = vrcp.f32 %v4978_v44  ;;  %v9409_v44 = vld [vmem:[#allocation29 + $0x208] ss:$20 sps:$4 sm:$0xff]  }
 0xafb   :  { %v4984_v45 = vpop.xlane.xlu0 %4983  ;;  %v4981_v46 = vpop.xlane.xlu1 %4980 }
 0xafc   :  { %9674 = vrcp.f32 %v4984_v45  ;;  %v9414_v45 = vld [vmem:[#allocation29 + $0x234] ss:$20 sps:$4 sm:$0xff]  }
 0xafd   :  { %9676 = vrcp.f32 %v4981_v46  ;;  %v9412_v46 = vld [vmem:[#allocation29 + $0x230] ss:$20 sps:$4 sm:$0xff]  }
 0xafe   :  { %v9671_v47 = vpop.eup %9670 }
 0xaff   :  { %v4989_v51 = vmul.f32 %v9671_v47, %v9655_v4  ;;  %v5120_v53 = vpop.xlane.xlu1 %5119  ;;  %v9370_v4 = vld [vmem:[#allocation29] ss:$20 sps:$4 sm:$0xff]   ;;  %v9417_v47 = vld [vmem:[#allocation29 + $0x25c] ss:$20 sps:$4 sm:$0xff]  }
 0xb02   :  { %v9673_v49 = vpop.eup %9672 }
 0xb03   :  { %v5123_v50 = vpop.xlane.xlu0 %5122  ;;  %v4990_v52 = vmul.f32 %v9673_v49, %v9657_v18  ;;  %v9376_v18 = vld [vmem:[#allocation29 + $0x50] ss:$20 sps:$4 sm:$0xff]   ;;  %v9415_v49 = vld [vmem:[#allocation29 + $0x258] ss:$20 sps:$4 sm:$0xff]  }
 0xb04   :  { %9678 = vrcp.f32 %v5123_v50  ;;  %v9420_v50 = vld [vmem:[#allocation29 + $0x284] ss:$20 sps:$4 sm:$0xff]  }
 0xb05   :  { %v4993_v57 = vpack.c.bf16 %v4990_v52, %v4989_v51  ;;  %9680 = vrcp.f32 %v5120_v53  ;;  %v5199_v51 = vld [vmem:[#allocation25] sm:$0xf] }
 0xb06   :  { %v9675_v54 = vpop.eup %9674  ;;  %v5204_v52 = vrot.slane %v5199_v51, %v10852_v29 }
 0xb07   :  { %v9677_v58 = vpop.eup %9676  ;;  %8156 = vmatmul.mubr.msk.bf16.vlgmr.msra.gmra.mrb[40].mxu1 %vm4948_vm10, %v4993_v57  ;;  %v4992_v61 = vmul.f32 %v9675_v54, %v9661_v9  ;;  %v5126_v0 = vpop.xlane.xlu1 %5125  ;;  %v9385_v9 = vld [vmem:[#allocation29 + $0xc8] ss:$20 sps:$4 sm:$0xff]   ;;  %v5208_v54 = vrot.slane %v5199_v51, %v10855_v31 }
 0xb08   :  { %5147 = vmatpush1.bf16.msra.mxu1 %v4862_v23  ;;  %5043 = vmatprep.mubr.bf16.mxu1 %v10333_v48  ;;  %v4991_v59 = vmul.f32 %v9677_v58, %v9659_v10  ;;  %v9387_v10 = vld [vmem:[#allocation29 + $0xcc] ss:$20 sps:$4 sm:$0xff]  }
 0xb09   :  { %5148 = vmatprep.subr.bf16.mxu1 %v4867_v7 }
 0xb0a   :  { %v4994_v1 = vpack.c.bf16 %v4992_v61, %v4991_v59 }
 0xb0b   :  { %v5129_v62 = vpop.xlane.xlu0 %5128 }
 0xb0c   :  { %9682 = vrcp.f32 %v5129_v62  ;;  %5149 = vmatpush1.bf16.msra.mxu1 %v4866_v32  ;;  %v9372_v32 = vld [vmem:[#allocation29 + $0x4] ss:$20 sps:$4 sm:$0xff]  }
 0xb0d   :  { %9684 = vrcp.f32 %v5126_v0  ;;  %6577 = vmatprep.subr.bf16.mxu1 %v9372_v32 }
 0xb0e   :  { %v9679_v2 = vpop.eup %9678 }
 0xb0f   :  { %8157 = vmatmul.mubr.msk.bf16.gmra.mrb[44].mxu1 %vm4948_vm10, %v4994_v1  ;;  %v9681_v20 = vpop.eup %9680  ;;  %v5135_v22 = vmul.f32 %v9679_v2, %v9665_v36  ;;  %v9402_v36 = vld [vmem:[#allocation29 + $0x194] ss:$20 sps:$4 sm:$0xff]  }
 0xb10   :  { %5178 = vmatprep.mubr.bf16.mxu1 %v10333_v48  ;;  %v5134_v23 = vmul.f32 %v9681_v20, %v9663_v12  ;;  %v9394_v12 = vld [vmem:[#allocation29 + $0x140] ss:$20 sps:$4 sm:$0xff]  }
 0xb12   :  { %v5138_v27 = vpack.c.bf16 %v5135_v22, %v5134_v23 }
 0xb16   :  { %v9683_v33 = vpop.eup %9682 }
 0xb17   :  { %8158 = vmatmul.mubr.msk.bf16.vlgmr.msra.gmra.mrb[48].mxu1 %vm4948_vm10, %v5138_v27  ;;  %v9685_v7 = vpop.eup %9684  ;;  %v5137_v6 = vmul.f32 %v9683_v33, %v9669_v41  ;;  %v9408_v41 = vld [vmem:[#allocation29 + $0x1e4] ss:$20 sps:$4 sm:$0xff]   ;;  %v10986_v33 = vsub.s32 2, %v10849_v28 }
 0xb18   :  { %5188 = vmatprep.mubr.bf16.mxu1 %v10333_v48  ;;  %v5136_v26 = vmul.f32 %v9685_v7, %v9667_v38  ;;  %6578 = vmatpush1.bf16.msra.mxu1 %v9370_v4  ;;  %v9405_v38 = vld [vmem:[#allocation29 + $0x1bc] ss:$20 sps:$4 sm:$0xff]  }
 0xb19   :  { %6579 = vmatprep.subr.bf16.mxu1 %v9375_v15 }
 0xb1a   :  { %v5139_v30 = vpack.c.bf16 %v5137_v6, %v5136_v26 }
 0xb1c   :  { %6580 = vmatpush1.bf16.msra.mxu1 %v9373_v3  ;;  %v10989_v3 = vsub.s32 3, %v10849_v28 }
 0xb1d   :  { %6581 = vmatprep.subr.bf16.mxu1 %v9378_v5 }
 0xb1f   :  { %8159 = vmatmul.mubr.msk.bf16.gmra.mrb[52].mxu1 %vm4948_vm10, %v5139_v30 }
 0xb20   :  { %6582 = vmatpush1.bf16.msra.mxu1 %v9376_v18  ;;  %v5212_v18 = vrot.slane %v5199_v51, %v10986_v33 }
 0xb21   :  { %6583 = vmatprep.subr.bf16.mxu1 %v9381_v16 }
 0xb24   :  { %6584 = vmatpush1.bf16.msra.mxu1 %v9379_v19 }
 0xb25   :  { %6585 = vmatprep.subr.bf16.mxu1 %v9384_v21 }
 0xb28   :  { %6586 = vmatpush1.bf16.msra.mxu1 %v9382_v24 }
 0xb29   :  { %6587 = vmatprep.subr.bf16.mxu1 %v9387_v10  ;;  %v5216_v10 = vrot.slane %v5199_v51, %v10989_v3 }
 0xb2c   :  { %6588 = vmatpush1.bf16.msra.mxu1 %v9385_v9 }
 0xb2d   :  { %6589 = vmatprep.subr.bf16.mxu1 %v9390_v13 }
 0xb30   :  { %6590 = vmatpush1.bf16.msra.mxu1 %v9388_v8 }
 0xb31   :  { %6591 = vmatprep.subr.bf16.mxu1 %v9393_v25 }
 0xb34   :  { %6592 = vmatpush1.bf16.msra.mxu1 %v9391_v14 }
 0xb35   :  { %6593 = vmatprep.subr.bf16.mxu1 %v9396_v11 }
 0xb38   :  { %6594 = vmatpush1.bf16.msra.mxu1 %v9394_v12 }
 0xb39   :  { %6595 = vmatprep.subr.bf16.mxu1 %v9399_v34 }
 0xb3c   :  { %6596 = vmatpush1.bf16.msra.mxu1 %v9397_v35 }
 0xb3d   :  { %6597 = vmatprep.subr.bf16.mxu1 %v9402_v36 }
 0xb40   :  { %6598 = vmatpush1.bf16.msra.mxu1 %v9400_v37 }
 0xb41   :  { %6599 = vmatprep.subr.bf16.mxu1 %v9405_v38 }
 0xb44   :  { %6600 = vmatpush1.bf16.msra.mxu1 %v9403_v40 }
 0xb45   :  { %6601 = vmatprep.subr.bf16.mxu1 %v9408_v41 }
 0xb48   :  { %6602 = vmatpush1.bf16.msra.mxu1 %v9406_v42 }
 0xb49   :  { %6603 = vmatprep.subr.bf16.mxu1 %v9411_v43 }
 0xb4c   :  { %6604 = vmatpush1.bf16.msra.mxu1 %v9409_v44 }
 0xb4d   :  { %6605 = vmatprep.subr.bf16.mxu1 %v9414_v45 }
 0xb50   :  { %6606 = vmatpush1.bf16.msra.mxu1 %v9412_v46 }
 0xb51   :  { %6607 = vmatprep.subr.bf16.mxu1 %v9417_v47 }
 0xb54   :  { %6608 = vmatpush1.bf16.msra.mxu1 %v9415_v49 }
 0xb55   :  { %6630 = vmatprep.subr.bf16.mxu1 %v9420_v50 }
 0xbda   :  { %v5035_v53 = vpop.f32.mrb[40].mxu1 }
 0xbdb   :  { %v5037_v57 = vpop.f32.mrb[41].mxu1  ;;  %v5221_v59 = vadd.f32 %v5204_v52, %v5035_v53 }
 0xbdc   :  { %v5039_v58 = vpop.f32.mrb[42].mxu1  ;;  %v5222_v0 = vadd.f32 %v5208_v54, %v5037_v57 }
 0xbdd   :  { %v5225_v61 = vadd.f32 %v5204_v52, %v5039_v58  ;;  %v5041_v62 = vpop.f32.mrb[43].mxu1 }
 0xbde   :  { %v5226_v1 = vadd.f32 %v5208_v54, %v5041_v62 }
 0xbdf   :  { %v5239_v2 = vadd.f32 %v5225_v61, %v5221_v59 }
 0xbe0   :  { %v5248_v20 = vadd.f32 %v5226_v1, %v5222_v0 }
 0xbe2   :  { %v5045_v22 = vpop.f32.mrb[44].mxu1 }
 0xbe3   :  { %v5229_v23 = vadd.f32 %v5204_v52, %v5045_v22  ;;  %v5047_v27 = vpop.f32.mrb[45].mxu1 }
 0xbe4   :  { %v5230_v7 = vadd.f32 %v5208_v54, %v5047_v27  ;;  %v5049_v6 = vpop.f32.mrb[46].mxu1 }
 0xbe5   :  { %v5240_v26 = vadd.f32 %v5239_v2, %v5229_v23  ;;  %v5233_v30 = vadd.f32 %v5204_v52, %v5049_v6  ;;  %v5051_v32 = vpop.f32.mrb[47].mxu1 }
 0xbe6   :  { %v5249_v4 = vadd.f32 %v5248_v20, %v5230_v7  ;;  %v5234_v15 = vadd.f32 %v5208_v54, %v5051_v32 }
 0xbe7   :  { %v5241_v5 = vadd.f32 %v5240_v26, %v5233_v30 }
 0xbe8   :  { %v5250_v16 = vadd.f32 %v5249_v4, %v5234_v15 }
 0xbe9   :  { %v5242_v19 = vrot.slane %v5241_v5, 4 }
 0xbea   :  { %v5251_v21 = vrot.slane %v5250_v16, 4  ;;  %v5180_v24 = vpop.f32.mrb[48].mxu1 }
 0xbeb   :  { %v5243_v9 = vadd.f32 %v5242_v19, %v5241_v5  ;;  %v10993_v13 = vadd.f32 %v5212_v18, %v5180_v24  ;;  %v5182_v8 = vpop.f32.mrb[49].mxu1 }
 0xbec   :  { %v5252_v25 = vadd.f32 %v5251_v21, %v5250_v16  ;;  %v5184_v14 = vpop.f32.mrb[50].mxu1  ;;  %v10997_v35 = vadd.f32 %v5216_v10, %v5182_v8 }
 0xbed   :  { %v5244_v11 = vrot.slane %v5243_v9, 2  ;;  %v10995_v12 = vadd.f32 %v5212_v18, %v5184_v14  ;;  %v5186_v28 = vpop.f32.mrb[51].mxu1 }
 0xbee   :  { %v5253_v34 = vrot.slane %v5252_v25, 2  ;;  %v10999_v36 = vadd.f32 %v5216_v10, %v5186_v28 }
 0xbef   :  { %v5245_v37 = vadd.f32 %v5244_v11, %v5243_v9  ;;  %v5257_v38 = vadd.f32 %v10995_v12, %v10993_v13 }
 0xbf0   :  { %v5254_v40 = vadd.f32 %v5253_v34, %v5252_v25  ;;  %v5266_v41 = vadd.f32 %v10999_v36, %v10997_v35 }
 0xbf1   :  { %v5246_v42 = vrot.slane %v5245_v37, 1 }
 0xbf2   :  { %v5255_v43 = vrot.slane %v5254_v40, 1  ;;  %v5190_v44 = vpop.f32.mrb[52].mxu1 }
 0xbf3   :  { %v5247_v45 = vadd.f32 %v5246_v42, %v5245_v37  ;;  %v11005_v46 = vadd.f32 %v5212_v18, %v5190_v44  ;;  %v5192_v47 = vpop.f32.mrb[53].mxu1 }
 0xbf4   :  { %v5256_v49 = vadd.f32 %v5255_v43, %v5254_v40  ;;  %v11007_v50 = vadd.f32 %v5216_v10, %v5192_v47  ;;  %v5194_v51 = vpop.f32.mrb[54].mxu1 }
 0xbf5   :  { %v5275_v52 = vmul.f32 0.03125, %v5247_v45  ;;  %v5258_v53 = vadd.f32 %v5257_v38, %v11005_v46  ;;  %v5235_v54 = vadd.f32 %v5212_v18, %v5194_v51  ;;  %v5196_v57 = vpop.f32.mrb[55].mxu1 }
 0xbf6   :  { %v5276_v58 = vmul.f32 0.03125, %v5256_v49  ;;  %v5267_v62 = vadd.f32 %v5266_v41, %v11007_v50  ;;  %v11011_v2 = vadd.f32 %v5216_v10, %v5196_v57 }
 0xbf7   :  { %v11013_v20 = vsub.f32 %v5221_v59, %v5275_v52  ;;  %v11015_v22 = vsub.f32 %v5225_v61, %v5275_v52  ;;  %v11017_v27 = vsub.f32 %v5229_v23, %v5275_v52  ;;  %v11019_v6 = vsub.f32 %v5233_v30, %v5275_v52 }
 0xbf8   :  { %v11021_v26 = vsub.f32 %v5222_v0, %v5276_v58  ;;  %v11023_v32 = vsub.f32 %v5226_v1, %v5276_v58  ;;  %v11025_v4 = vsub.f32 %v5230_v7, %v5276_v58  ;;  %v11027_v5 = vsub.f32 %v5234_v15, %v5276_v58 }
 0xbf9   :  { %v5295_v18 = vmul.f32 %v11013_v20, %v11013_v20  ;;  %v5299_v59 = vmul.f32 %v11015_v22, %v11015_v22  ;;  %v5303_v0 = vmul.f32 %v11017_v27, %v11017_v27  ;;  %v5259_v7 = vadd.f32 %v5258_v53, %v5235_v54 }
 0xbfa   :  { %v5296_v61 = vmul.f32 %v11021_v26, %v11021_v26  ;;  %v5300_v23 = vmul.f32 %v11023_v32, %v11023_v32  ;;  %v5268_v30 = vadd.f32 %v5267_v62, %v11011_v2  ;;  %v5304_v15 = vmul.f32 %v11025_v4, %v11025_v4 }
 0xbfb   :  { %v5311_v1 = vadd.f32 %v5299_v59, %v5295_v18  ;;  %v5307_v19 = vmul.f32 %v11019_v6, %v11019_v6  ;;  %v5260_v24 = vrot.slane %v5259_v7, 4  ;;  %v5308_v9 = vmul.f32 %v11027_v5, %v11027_v5 }
 0xbfc   :  { %v5320_v16 = vadd.f32 %v5300_v23, %v5296_v61  ;;  %v5269_v10 = vrot.slane %v5268_v30, 4 }
 0xbfd   :  { %v5312_v21 = vadd.f32 %v5311_v1, %v5303_v0  ;;  %v5261_v14 = vadd.f32 %v5260_v24, %v5259_v7 }
 0xbfe   :  { %v5321_v8 = vadd.f32 %v5320_v16, %v5304_v15  ;;  %v5270_v11 = vadd.f32 %v5269_v10, %v5268_v30 }
 0xbff   :  { %v5313_v25 = vadd.f32 %v5312_v21, %v5307_v19  ;;  %v5262_v37 = vrot.slane %v5261_v14, 2 }
 0xc00   :  { %v5322_v28 = vadd.f32 %v5321_v8, %v5308_v9  ;;  %v5271_v38 = vrot.slane %v5270_v11, 2 }
 0xc01   :  { %v5314_v34 = vrot.slane %v5313_v25, 4  ;;  %v5263_v42 = vadd.f32 %v5262_v37, %v5261_v14 }
 0xc02   :  { %v5323_v40 = vrot.slane %v5322_v28, 4  ;;  %v5272_v43 = vadd.f32 %v5271_v38, %v5270_v11 }
 0xc03   :  { %v5315_v41 = vadd.f32 %v5314_v34, %v5313_v25  ;;  %v5264_v47 = vrot.slane %v5263_v42, 1 }
 0xc04   :  { %v5324_v44 = vadd.f32 %v5323_v40, %v5322_v28  ;;  %v5273_v49 = vrot.slane %v5272_v43, 1 }
 0xc05   :  { %v5316_v45 = vrot.slane %v5315_v41, 2  ;;  %v5265_v53 = vadd.f32 %v5264_v47, %v5263_v42  ;;  %v11087_v42 = vld [vmem:[#allocation28] sm:$0xf] }
 0xc06   :  { %v5325_v51 = vrot.slane %v5324_v44, 2  ;;  %v5274_v57 = vadd.f32 %v5273_v49, %v5272_v43 }
 0xc07   :  { %v5317_v52 = vadd.f32 %v5316_v45, %v5315_v41  ;;  %v5277_v18 = vmul.f32 0.03125, %v5265_v53  ;;  %v11085_v41 = vld [vmem:[#allocation26] sm:$0xf] }
 0xc08   :  { %v5326_v58 = vadd.f32 %v5325_v51, %v5324_v44  ;;  %v5278_v59 = vmul.f32 0.03125, %v5274_v57  ;;  %v5379_v49 = vrot.slane %v11085_v41, %v10852_v29  ;;  %v5416_v51 = vrot.slane %v11087_v42, %v10852_v29 }
 0xc09   :  { %v5318_v62 = vrot.slane %v5317_v52, 1  ;;  %v11047_v0 = vsub.f32 %v10993_v13, %v5277_v18  ;;  %v11050_v1 = vsub.f32 %v10995_v12, %v5277_v18  ;;  %v11053_v7 = vsub.f32 %v11005_v46, %v5277_v18 }
 0xc0a   :  { %v5327_v61 = vrot.slane %v5326_v58, 1  ;;  %v11055_v15 = vsub.f32 %v5235_v54, %v5277_v18  ;;  %v11058_v16 = vsub.f32 %v10997_v35, %v5278_v59  ;;  %v11061_v19 = vsub.f32 %v10999_v36, %v5278_v59 }
 0xc0b   :  { %v5319_v23 = vadd.f32 %v5318_v62, %v5317_v52  ;;  %v5297_v13 = vmul.f32 %v11047_v0, %v11047_v0  ;;  %v5301_v12 = vmul.f32 %v11050_v1, %v11050_v1  ;;  %v5305_v46 = vmul.f32 %v11053_v7, %v11053_v7 }
 0xc0c   :  { %v5328_v30 = vadd.f32 %v5327_v61, %v5326_v58  ;;  %v11070_v54 = vsub.f32 %v11007_v50, %v5278_v59  ;;  %v11073_v35 = vsub.f32 %v11011_v2, %v5278_v59  ;;  %v5298_v9 = vmul.f32 %v11058_v16, %v11058_v16 }
 0xc0d   :  { %v5347_v21 = vmul.f32 0.03125, %v5319_v23  ;;  %v5329_v36 = vadd.f32 %v5301_v12, %v5297_v13  ;;  %v5302_v8 = vmul.f32 %v11061_v19, %v11061_v19  ;;  %v5309_v14 = vmul.f32 %v11055_v15, %v11055_v15 }
 0xc0e   :  { %v5348_v24 = vmul.f32 0.03125, %v5328_v30  ;;  %v5306_v50 = vmul.f32 %v11070_v54, %v11070_v54  ;;  %v5310_v34 = vmul.f32 %v11073_v35, %v11073_v35  ;;  %v5383_v53 = vrot.slane %v11085_v41, %v10855_v31 }
 0xc0f   :  { %v5351_v10 = vadd.f32 1e-05, %v5347_v21  ;;  %v5330_v11 = vadd.f32 %v5329_v36, %v5305_v46  ;;  %v5338_v28 = vadd.f32 %v5302_v8, %v5298_v9  ;;  %v5420_v57 = vrot.slane %v11087_v42, %v10855_v31 }
 0xc10   :  { %v5352_v25 = vadd.f32 1e-05, %v5348_v24 }
 0xc11   :  { %9686 = vrsqrt.f32 %v5351_v10  ;;  %v5331_v2 = vadd.f32 %v5330_v11, %v5309_v14  ;;  %v5339_v37 = vadd.f32 %v5338_v28, %v5306_v50 }
 0xc12   :  { %9688 = vrsqrt.f32 %v5352_v25 }
 0xc13   :  { %v5332_v38 = vrot.slane %v5331_v2, 4  ;;  %v5340_v40 = vadd.f32 %v5339_v37, %v5310_v34 }
 0xc15   :  { %v5333_v43 = vadd.f32 %v5332_v38, %v5331_v2  ;;  %v5341_v44 = vrot.slane %v5340_v40, 4 }
 0xc17   :  { %v5334_v45 = vrot.slane %v5333_v43, 2  ;;  %v5342_v47 = vadd.f32 %v5341_v44, %v5340_v40 }
 0xc19   :  { %v5335_v58 = vadd.f32 %v5334_v45, %v5333_v43  ;;  %v5343_v62 = vrot.slane %v5342_v47, 2 }
 0xc1b   :  { %v9687_v52 = vpop.eup %9686  ;;  %v5336_v13 = vrot.slane %v5335_v58, 1  ;;  %v5344_v12 = vadd.f32 %v5343_v62, %v5342_v47 }
 0xc1c   :  { %v9689_v18 = vpop.eup %9688  ;;  %v5359_v59 = vmul.f32 %v9687_v52, %v11013_v20  ;;  %v5363_v61 = vmul.f32 %v9687_v52, %v11015_v22  ;;  %v5371_v23 = vmul.f32 %v9687_v52, %v11019_v6  ;;  %v5367_v30 = vmul.f32 %v9687_v52, %v11017_v27 }
 0xc1d   :  { %v5372_v21 = vmul.f32 %v9689_v18, %v11027_v5  ;;  %v5360_v24 = vmul.f32 %v9689_v18, %v11021_v26  ;;  %v5364_v9 = vmul.f32 %v9689_v18, %v11023_v32  ;;  %v5337_v25 = vadd.f32 %v5336_v13, %v5335_v58 }
 0xc1e   :  { %v5396_v46 = vmul.f32 %v5379_v49, %v5359_v59  ;;  %v5400_v10 = vmul.f32 %v5379_v49, %v5363_v61  ;;  %v5408_v36 = vmul.f32 %v5379_v49, %v5371_v23  ;;  %v5345_v20 = vrot.slane %v5344_v12, 1 }
 0xc1f   :  { %v5409_v8 = vmul.f32 %v5383_v53, %v5372_v21  ;;  %v5397_v14 = vmul.f32 %v5383_v53, %v5360_v24  ;;  %v5401_v6 = vmul.f32 %v5383_v53, %v5364_v9  ;;  %v5349_v50 = vmul.f32 0.03125, %v5337_v25 }
 0xc20   :  { %v11104_v22 = vadd.f32 %v5416_v51, %v5408_v36  ;;  %v11106_v11 = vadd.f32 %v5416_v51, %v5396_v46  ;;  %v11108_v27 = vadd.f32 %v5416_v51, %v5400_v10  ;;  %v5346_v26 = vadd.f32 %v5345_v20, %v5344_v12 }
 0xc21   :  { %v11110_v5 = vadd.f32 %v5420_v57, %v5409_v8  ;;  %v11112_v28 = vadd.f32 %v5420_v57, %v5397_v14  ;;  %v11114_v2 = vadd.f32 %v5420_v57, %v5401_v6  ;;  %v5353_v34 = vadd.f32 1e-05, %v5349_v50 }
 0xc22   :  { %v5477_v32 = vmin.f32 %v11104_v22, 0.0  ;;  %v5350_v37 = vmul.f32 0.03125, %v5346_v26  ;;  %v5465_v44 = vmin.f32 %v11106_v11, 0.0  ;;  %v5469_v47 = vmin.f32 %v11108_v27, 0.0 }
 0xc23   :  { %v5478_v38 = vmin.f32 %v11110_v5, 0.0  ;;  %v5466_v40 = vmin.f32 %v11112_v28, 0.0  ;;  %v5470_v43 = vmin.f32 %v11114_v2, 0.0  ;;  %9690 = vrsqrt.f32 %v5353_v34 }
 0xc24   :  { %v5354_v45 = vadd.f32 1e-05, %v5350_v37  ;;  %v5368_v52 = vmul.f32 %v9689_v18, %v11025_v4  ;;  %v5481_v59 = vmul.f32 1.442695, %v5465_v44  ;;  %v5404_v61 = vmul.f32 %v5379_v49, %v5367_v30 }
 0xc25   :  { %v5483_v58 = vmul.f32 1.442695, %v5466_v40  ;;  %v5491_v62 = vmul.f32 1.442695, %v5470_v43  ;;  %v5489_v23 = vmul.f32 1.442695, %v5469_v47  ;;  %v11139_v30 = vrot.slane %v11085_v41, %v10989_v3 }
 0xc26   :  { %9692 = vrsqrt.f32 %v5354_v45  ;;  %v5405_v21 = vmul.f32 %v5383_v53, %v5368_v52  ;;  %v5507_v13 = vmul.f32 1.442695, %v5478_v38  ;;  %v11123_v12 = vadd.f32 %v5416_v51, %v5404_v61 }
 0xc27   :  { %9694 = vpow2.f32 %v5483_v58  ;;  %v5505_v46 = vmul.f32 1.442695, %v5477_v32  ;;  %v11131_v53 = vrot.slane %v11085_v41, %v10986_v33  ;;  %v11135_v51 = vrot.slane %v11087_v42, %v10986_v33 }
 0xc28   :  { %9696 = vpow2.f32 %v5491_v62  ;;  %v11125_v24 = vadd.f32 %v5420_v57, %v5405_v21  ;;  %v5473_v10 = vmin.f32 %v11123_v12, 0.0  ;;  %v11143_v36 = vrot.slane %v11087_v42, %v10989_v3 }
 0xc29   :  { %9698 = vpow2.f32 %v5481_v59  ;;  %vm5449_vm1 = vcmp.gt.f32.partialorder %v11106_v11, 0.0  ;;  %vm5450_vm2 = vcmp.gt.f32.partialorder %v11112_v28, 0.0  ;;  %vm5454_vm3 = vcmp.gt.f32.partialorder %v11114_v2, 0.0 }
 0xc2a   :  { %9700 = vpow2.f32 %v5489_v23  ;;  %v5474_v4 = vmin.f32 %v11125_v24, 0.0  ;;  %v5497_v18 = vmul.f32 1.442695, %v5473_v10  ;;  %vm5453_vm4 = vcmp.gt.f32.partialorder %v11108_v27, 0.0 }
 0xc2b   :  { %9702 = vpow2.f32 %v5507_v13  ;;  %vm5462_vm5 = vcmp.gt.f32.partialorder %v11110_v5, 0.0  ;;  %vm5461_vm6 = vcmp.gt.f32.partialorder %v11104_v22, 0.0  ;;  %v9418_v13 = vld [vmem:[#allocation29 + $0x280] ss:$20 sps:$4 sm:$0xff]   ;;  %vm5457_vm7 = vcmp.gt.f32.partialorder %v11123_v12, 0.0 }
 0xc2c   :  { %v5499_v49 = vmul.f32 1.442695, %v5474_v4  ;;  %9704 = vpow2.f32 %v5505_v46  ;;  %vm5458_vm8 = vcmp.gt.f32.partialorder %v11125_v24, 0.0 }
 0xc2d   :  { %9706 = vpow2.f32 %v5497_v18  ;;  %v9691_v57 = vpop.eup %9690 }
 0xc2e   :  { %9708 = vpow2.f32 %v5499_v49  ;;  %v5361_v9 = vmul.f32 %v9691_v57, %v11047_v0  ;;  %v5365_v8 = vmul.f32 %v9691_v57, %v11050_v1  ;;  %v5373_v25 = vmul.f32 %v9691_v57, %v11055_v15  ;;  %v9423_v49 = vld [vmem:[#allocation29 + $0x2ac] ss:$20 sps:$4 sm:$0xff]  }
 0xc2f   :  { %v11150_v20 = vmul.f32 %v9691_v57, %v11053_v7 }
 0xc30   :  { %v9693_v14 = vpop.eup %9692  ;;  %v5398_v42 = vmul.f32 %v11131_v53, %v5361_v9  ;;  %v5402_v0 = vmul.f32 %v11131_v53, %v5365_v8  ;;  %v5410_v1 = vmul.f32 %v11131_v53, %v5373_v25 }
 0xc31   :  { %v9695_v41 = vpop.eup %9694  ;;  %v5374_v15 = vmul.f32 %v9693_v14, %v11073_v35  ;;  %v5362_v50 = vmul.f32 %v9693_v14, %v11058_v16  ;;  %v5366_v26 = vmul.f32 %v9693_v14, %v11061_v19  ;;  %v5370_v32 = vmul.f32 %v9693_v14, %v11070_v54 }
 0xc32   :  { %v9697_v7 = vpop.eup %9696  ;;  %v8161_v6 = vadd.f32 -1.0, %v9695_v41  ;;  %v11164_v37 = vadd.f32 %v11135_v51, %v5410_v1  ;;  %v11168_v43 = vadd.f32 %v11135_v51, %v5398_v42  ;;  %v11216_v1 = vadd.f32 %v11135_v51, %v5402_v0 }
 0xc33   :  { %v9699_v34 = vpop.eup %9698  ;;  %v5411_v38 = vmul.f32 %v11139_v30, %v5374_v15  ;;  %v8165_v40 = vadd.f32 -1.0, %v9697_v7  ;;  %v5399_v19 = vmul.f32 %v11139_v30, %v5362_v50  ;;  %v5403_v54 = vmul.f32 %v11139_v30, %v5366_v26  ;;  %v9421_v15 = vld [vmem:[#allocation29 + $0x2a8] ss:$20 sps:$4 sm:$0xff]  }
 0xc34   :  { %v9701_v44 = vpop.eup %9700  ;;  %v5530_v35 = vsel %vm5450_vm2, %v11112_v28, %v8161_v6  ;;  %v8160_v16 = vadd.f32 -1.0, %v9699_v34  ;;  %v5479_v18 = vmin.f32 %v11164_v37, 0.0  ;;  %v5467_v6 = vmin.f32 %v11168_v43, 0.0  ;;  %v9426_v26 = vld [vmem:[#allocation29 + $0x2d4] ss:$20 sps:$4 sm:$0xff]  }
 0xc35   :  { %v9703_v45 = vpop.eup %9702  ;;  %v11176_v47 = vadd.f32 %v11143_v36, %v5411_v38  ;;  %v5534_v52 = vsel %vm5454_vm3, %v11114_v2, %v8165_v40  ;;  %v8164_v58 = vadd.f32 -1.0, %v9701_v44  ;;  %v11188_v23 = vadd.f32 %v11143_v36, %v5399_v19 }
 0xc36   :  { %v9705_v62 = vpop.eup %9704  ;;  %v11182_v59 = vpack.c.bf16 %v5534_v52, %v5530_v35  ;;  %v5529_v28 = vsel %vm5449_vm1, %v11106_v11, %v8160_v16  ;;  %v8173_v61 = vadd.f32 -1.0, %v9703_v45  ;;  %v11195_v10 = vadd.f32 %v11143_v36, %v5403_v54  ;;  %v9424_v35 = vld [vmem:[#allocation29 + $0x2d0] ss:$20 sps:$4 sm:$0xff]  }
 0xc37   :  { %v9707_v21 = vpop.eup %9706  ;;  %v5533_v2 = vsel %vm5453_vm4, %v11108_v27, %v8164_v58  ;;  %v8172_v46 = vadd.f32 -1.0, %v9705_v62  ;;  %v5468_v25 = vmin.f32 %v11188_v23, 0.0  ;;  %v5480_v14 = vmin.f32 %v11176_v47, 0.0  ;;  %v9429_v54 = vld [vmem:[#allocation29 + $0x2fc] ss:$20 sps:$4 sm:$0xff]  }
 0xc38   :  { %v9709_v4 = vpop.eup %9708  ;;  %6609 = vmatprep.mubr.bf16.mxu1 %v11182_v59  ;;  %v11199_v11 = vpack.c.bf16 %v5533_v2, %v5529_v28  ;;  %v8168_v57 = vadd.f32 -1.0, %v9707_v21  ;;  %v5542_v27 = vsel %vm5462_vm5, %v11110_v5, %v8173_v61  ;;  %v5472_v42 = vmin.f32 %v11195_v10, 0.0  ;;  %v9435_v61 = vld [vmem:[#allocation29 + $0x34c] ss:$20 sps:$4 sm:$0xff]  }
 0xc39   :  { %v8169_v9 = vadd.f32 -1.0, %v9709_v4  ;;  %v5541_v8 = vsel %vm5461_vm6, %v11104_v22, %v8172_v46  ;;  %v5487_v7 = vmul.f32 1.442695, %v5468_v25  ;;  %v5485_v38 = vmul.f32 1.442695, %v5467_v6 }
 0xc3a   :  { %6610 = vmatmul.mubr.bf16.vlgmr.msra.gmra.mrb[56].mxu1 %v11199_v11  ;;  %v5537_v41 = vsel %vm5457_vm7, %v11123_v12, %v8168_v57  ;;  %v5495_v34 = vmul.f32 1.442695, %v5472_v42  ;;  %v5471_v12 = vmin.f32 %v11216_v1, 0.0  ;;  %v5407_v0 = vmul.f32 %v11139_v30, %v5370_v32  ;;  %v9433_v57 = vld [vmem:[#allocation29 + $0x348] ss:$20 sps:$4 sm:$0xff]  }
 0xc3b   :  { %6631 = vmatpush1.bf16.msra.mxu1 %v9418_v13  ;;  %v5538_v5 = vsel %vm5458_vm8, %v11125_v24, %v8169_v9  ;;  %v11219_v22 = vpack.c.bf16 %v5541_v8, %v5537_v41  ;;  %9710 = vpow2.f32 %v5487_v7  ;;  %v5511_v40 = vmul.f32 1.442695, %v5480_v14  ;;  %v9438_v25 = vld [vmem:[#allocation29 + $0x374] ss:$20 sps:$4 sm:$0xff]   ;;  %v9441_v6 = vld [vmem:[#allocation29 + $0x39c] ss:$20 sps:$4 sm:$0xff]  }
 0xc3c   :  { %v11222_v50 = vpack.c.bf16 %v5542_v27, %v5538_v5  ;;  %6632 = vmatprep.subr.bf16.mxu1 %v9423_v49  ;;  %9712 = vpow2.f32 %v5495_v34  ;;  %v5493_v24 = vmul.f32 1.442695, %v5471_v12  ;;  %v5406_v44 = vmul.f32 %v11131_v53, %v11150_v20  ;;  %v9427_v20 = vld [vmem:[#allocation29 + $0x2f8] ss:$20 sps:$4 sm:$0xff]  }
 0xc3d   :  { %9714 = vpow2.f32 %v5485_v38  ;;  %v11230_v16 = vadd.f32 %v11143_v36, %v5407_v0  ;;  %v5509_v19 = vmul.f32 1.442695, %v5479_v18  ;;  %v9432_v36 = vld [vmem:[#allocation29 + $0x324] ss:$20 sps:$4 sm:$0xff]   ;;  %vm5452_vm9 = vcmp.gt.f32.partialorder %v11188_v23, 0.0 }
 0xc3e   :  { %6619 = vmatprep.mubr.bf16.mxu1 %v11222_v50  ;;  %9716 = vpow2.f32 %v5493_v24  ;;  %v11233_v30 = vadd.f32 %v11135_v51, %v5406_v44  ;;  %v9430_v51 = vld [vmem:[#allocation29 + $0x320] ss:$20 sps:$4 sm:$0xff]   ;;  %vm5456_vm11 = vcmp.gt.f32.partialorder %v11195_v10, 0.0  ;;  %vm5451_vm12 = vcmp.gt.f32.partialorder %v11168_v43, 0.0  ;;  %v9439_v38 = vld [vmem:[#allocation29 + $0x398] ss:$20 sps:$4 sm:$0xff]  }
 0xc3f   :  { %6633 = vmatpush1.bf16.msra.mxu1 %v9421_v15  ;;  %v5476_v32 = vmin.f32 %v11230_v16, 0.0  ;;  %9718 = vpow2.f32 %v5511_v40  ;;  %vm5455_vm13 = vcmp.gt.f32.partialorder %v11216_v1, 0.0  ;;  %v9436_v15 = vld [vmem:[#allocation29 + $0x370] ss:$20 sps:$4 sm:$0xff]   ;;  %vm5464_vm14 = vcmp.gt.f32.partialorder %v11176_v47, 0.0 }
 0xc40   :  { %6634 = vmatprep.subr.bf16.mxu1 %v9426_v26  ;;  %v5475_v53 = vmin.f32 %v11233_v30, 0.0  ;;  %9720 = vpow2.f32 %v5509_v19  ;;  %vm5463_vm15 = vcmp.gt.f32.partialorder %v11164_v37, 0.0  ;;  %vm5460_vm0 = vcmp.gt.f32.partialorder %v11230_v16, 0.0  ;;  %v9444_v40 = vld [vmem:[#allocation29 + $0x3c4] ss:$20 sps:$4 sm:$0xff]  }
 0xc41   :  { %v5503_v45 = vmul.f32 1.442695, %v5476_v32  ;;  %vm5459_vm1 = vcmp.gt.f32.partialorder %v11233_v30, 0.0  ;;  %v9442_v44 = vld [vmem:[#allocation29 + $0x3c0] ss:$20 sps:$4 sm:$0xff]  }
 0xc42   :  { %6620 = vmatmul.mubr.bf16.gmra.mrb[60].mxu1 %v11219_v22  ;;  %v5501_v52 = vmul.f32 1.442695, %v5475_v53  ;;  %v9448_v19 = vld [vmem:[#allocation29 + $0x410] ss:$20 sps:$4 sm:$0xff]   ;;  %v9451_v32 = vld [vmem:[#allocation29 + $0x438] ss:$20 sps:$4 sm:$0xff]  }
 0xc43   :  { %6635 = vmatpush1.bf16.msra.mxu1 %v9424_v35  ;;  %9722 = vpow2.f32 %v5503_v45  ;;  %v9447_v35 = vld [vmem:[#allocation29 + $0x3ec] ss:$20 sps:$4 sm:$0xff]   ;;  %v9457_v45 = vld [vmem:[#allocation29 + $0x488] ss:$20 sps:$4 sm:$0xff]  }
 0xc44   :  { %6636 = vmatprep.subr.bf16.mxu1 %v9429_v54  ;;  %9724 = vpow2.f32 %v5501_v52  ;;  %v9453_v54 = vld [vmem:[#allocation29 + $0x43c] ss:$20 sps:$4 sm:$0xff]   ;;  %v9454_v53 = vld [vmem:[#allocation29 + $0x460] ss:$20 sps:$4 sm:$0xff]  }
 0xc45   :  { %v9711_v58 = vpop.eup %9710  ;;  %v9460_v52 = vld [vmem:[#allocation29 + $0x4b0] ss:$20 sps:$4 sm:$0xff]  }
 0xc46   :  { %v9713_v62 = vpop.eup %9712  ;;  %v8163_v28 = vadd.f32 -1.0, %v9711_v58  ;;  %v9465_v58 = vld [vmem:[#allocation29 + $0x4dc] ss:$20 sps:$4 sm:$0xff]  }
 0xc47   :  { %6637 = vmatpush1.bf16.msra.mxu1 %v9427_v20  ;;  %v9715_v21 = vpop.eup %9714  ;;  %v8167_v13 = vadd.f32 -1.0, %v9713_v62  ;;  %v9459_v20 = vld [vmem:[#allocation29 + $0x48c] ss:$20 sps:$4 sm:$0xff]  }
 0xc48   :  { %6638 = vmatprep.subr.bf16.mxu1 %v9432_v36  ;;  %v9717_v2 = vpop.eup %9716  ;;  %v5532_v46 = vsel %vm5452_vm9, %v11188_v23, %v8163_v28  ;;  %v8162_v4 = vadd.f32 -1.0, %v9715_v21  ;;  %v9462_v36 = vld [vmem:[#allocation29 + $0x4b4] ss:$20 sps:$4 sm:$0xff]   ;;  %v9468_v62 = vld [vmem:[#allocation29 + $0xc] ss:$20 sps:$4 sm:$0xff]  }
 0xc49   :  { %v9719_v18 = vpop.eup %9718  ;;  %v5536_v49 = vsel %vm5456_vm11, %v11195_v10, %v8167_v13  ;;  %v8166_v9 = vadd.f32 -1.0, %v9717_v2  ;;  %v9466_v28 = vld [vmem:[#allocation29 + $0x8] ss:$20 sps:$4 sm:$0xff]   ;;  %v9469_v21 = vld [vmem:[#allocation29 + $0x30] ss:$20 sps:$4 sm:$0xff]  }
 0xc4a   :  { %v9721_v27 = vpop.eup %9720  ;;  %v11243_v8 = vpack.c.bf16 %v5536_v49, %v5532_v46  ;;  %v5531_v14 = vsel %vm5451_vm12, %v11168_v43, %v8162_v4  ;;  %v8175_v41 = vadd.f32 -1.0, %v9719_v18  ;;  %v9474_v13 = vld [vmem:[#allocation29 + $0x5c] ss:$20 sps:$4 sm:$0xff]   ;;  %v9472_v2 = vld [vmem:[#allocation29 + $0x58] ss:$20 sps:$4 sm:$0xff]  }
 0xc4b   :  { %6639 = vmatpush1.bf16.msra.mxu1 %v9430_v51  ;;  %v5535_v23 = vsel %vm5455_vm13, %v11216_v1, %v8166_v9  ;;  %v8174_v42 = vadd.f32 -1.0, %v9721_v27  ;;  %v9463_v51 = vld [vmem:[#allocation29 + $0x4d8] ss:$20 sps:$4 sm:$0xff]   ;;  %v9475_v4 = vld [vmem:[#allocation29 + $0x80] ss:$20 sps:$4 sm:$0xff]  }
 0xc4c   :  { %6640 = vmatprep.subr.bf16.mxu1 %v9435_v61  ;;  %6662 = vmatprep.mubr.bf16.mxu1 %v11243_v8  ;;  %v11249_v10 = vpack.c.bf16 %v5535_v23, %v5531_v14  ;;  %v5544_v34 = vsel %vm5464_vm14, %v11176_v47, %v8175_v41  ;;  %v9471_v61 = vld [vmem:[#allocation29 + $0x34] ss:$20 sps:$4 sm:$0xff]   ;;  %v9477_v46 = vld [vmem:[#allocation29 + $0x84] ss:$20 sps:$4 sm:$0xff]   ;;  %v9480_v18 = vld [vmem:[#allocation29 + $0xac] ss:$20 sps:$4 sm:$0xff]  }
 0xc4d   :  { %v9723_v5 = vpop.eup %9722  ;;  %v5543_v1 = vsel %vm5463_vm15, %v11164_v37, %v8174_v42  ;;  %v9445_v37 = vld [vmem:[#allocation29 + $0x3e8] ss:$20 sps:$4 sm:$0xff]   ;;  %v9481_v9 = vld [vmem:[#allocation29 + $0xd0] ss:$20 sps:$4 sm:$0xff]   ;;  %v9487_v41 = vld [vmem:[#allocation29 + $0x120] ss:$20 sps:$4 sm:$0xff]  }
 0xc4e   :  { %v9725_v7 = vpop.eup %9724  ;;  %v8171_v26 = vadd.f32 -1.0, %v9723_v5  ;;  %v9478_v49 = vld [vmem:[#allocation29 + $0xa8] ss:$20 sps:$4 sm:$0xff]   ;;  %v9489_v14 = vld [vmem:[#allocation29 + $0x124] ss:$20 sps:$4 sm:$0xff]  }
 0xc4f   :  { %6641 = vmatpush1.bf16.msra.mxu1 %v9433_v57  ;;  %v8170_v43 = vadd.f32 -1.0, %v9725_v7  ;;  %v9483_v57 = vld [vmem:[#allocation29 + $0xd4] ss:$20 sps:$4 sm:$0xff]   ;;  %v9486_v27 = vld [vmem:[#allocation29 + $0xfc] ss:$20 sps:$4 sm:$0xff]  }
 0xc50   :  { %6642 = vmatprep.subr.bf16.mxu1 %v9438_v25  ;;  %v5540_v12 = vsel %vm5460_vm0, %v11230_v16, %v8171_v26  ;;  %v9450_v16 = vld [vmem:[#allocation29 + $0x414] ss:$20 sps:$4 sm:$0xff]   ;;  %v9484_v25 = vld [vmem:[#allocation29 + $0xf8] ss:$20 sps:$4 sm:$0xff]   ;;  %v9498_v7 = vld [vmem:[#allocation29 + $0x19c] ss:$20 sps:$4 sm:$0xff]  }
 0xc51   :  { %v11258_v0 = vpack.c.bf16 %v5544_v34, %v5540_v12  ;;  %v5539_v24 = vsel %vm5459_vm1, %v11233_v30, %v8170_v43  ;;  %v9456_v30 = vld [vmem:[#allocation29 + $0x464] ss:$20 sps:$4 sm:$0xff]   ;;  %v9492_v23 = vld [vmem:[#allocation29 + $0x14c] ss:$20 sps:$4 sm:$0xff]   ;;  %v9490_v42 = vld [vmem:[#allocation29 + $0x148] ss:$20 sps:$4 sm:$0xff]  }
 0xc52   :  { %v11261_v47 = vpack.c.bf16 %v5543_v1, %v5539_v24  ;;  %v9495_v5 = vld [vmem:[#allocation29 + $0x174] ss:$20 sps:$4 sm:$0xff]   ;;  %v9501_v26 = vld [vmem:[#allocation29 + $0x1c4] ss:$20 sps:$4 sm:$0xff]   ;;  %v9504_v43 = vld [vmem:[#allocation29 + $0x1ec] ss:$20 sps:$4 sm:$0xff]  }
 0xc53   :  { %6643 = vmatpush1.bf16.msra.mxu1 %v9436_v15  ;;  %v9493_v15 = vld [vmem:[#allocation29 + $0x170] ss:$20 sps:$4 sm:$0xff]   ;;  %v9499_v34 = vld [vmem:[#allocation29 + $0x1c0] ss:$20 sps:$4 sm:$0xff]   ;;  %v9502_v1 = vld [vmem:[#allocation29 + $0x1e8] ss:$20 sps:$4 sm:$0xff]  }
 0xc54   :  { %6644 = vmatprep.subr.bf16.mxu1 %v9441_v6  ;;  %v9496_v6 = vld [vmem:[#allocation29 + $0x198] ss:$20 sps:$4 sm:$0xff]   ;;  %v9507_v12 = vld [vmem:[#allocation29 + $0x214] ss:$20 sps:$4 sm:$0xff]   ;;  %v9510_v24 = vld [vmem:[#allocation29 + $0x23c] ss:$20 sps:$4 sm:$0xff]  }
 0xc57   :  { %6645 = vmatpush1.bf16.msra.mxu1 %v9439_v38  ;;  %v9505_v38 = vld [vmem:[#allocation29 + $0x210] ss:$20 sps:$4 sm:$0xff]  }
 0xc58   :  { %6646 = vmatprep.subr.bf16.mxu1 %v9444_v40  ;;  %v9508_v40 = vld [vmem:[#allocation29 + $0x238] ss:$20 sps:$4 sm:$0xff]  }
 0xc5b   :  { %6647 = vmatpush1.bf16.msra.mxu1 %v9442_v44  ;;  %v9513_v44 = vld [vmem:[#allocation29 + $0x264] ss:$20 sps:$4 sm:$0xff]  }
 0xc5c   :  { %6648 = vmatprep.subr.bf16.mxu1 %v9447_v35  ;;  %v9511_v35 = vld [vmem:[#allocation29 + $0x260] ss:$20 sps:$4 sm:$0xff]  }
 0xc5f   :  { %6649 = vmatpush1.bf16.msra.mxu1 %v9445_v37  ;;  %v9516_v37 = vld [vmem:[#allocation29 + $0x28c] ss:$20 sps:$4 sm:$0xff]  }
 0xc60   :  { %6650 = vmatprep.subr.bf16.mxu1 %v9450_v16  ;;  %v9514_v16 = vld [vmem:[#allocation29 + $0x288] ss:$20 sps:$4 sm:$0xff]  }
 0xc63   :  { %6651 = vmatpush1.bf16.msra.mxu1 %v9448_v19  ;;  %v9519_v19 = vld [vmem:[#allocation29 + $0x2b4] ss:$20 sps:$4 sm:$0xff]  }
 0xc64   :  { %6652 = vmatprep.subr.bf16.mxu1 %v9453_v54  ;;  %v9517_v54 = vld [vmem:[#allocation29 + $0x2b0] ss:$20 sps:$4 sm:$0xff]  }
 0xc67   :  { %6653 = vmatpush1.bf16.msra.mxu1 %v9451_v32  ;;  %v9522_v32 = vld [vmem:[#allocation29 + $0x2dc] ss:$20 sps:$4 sm:$0xff]  }
 0xc68   :  { %6654 = vmatprep.subr.bf16.mxu1 %v9456_v30  ;;  %v9520_v30 = vld [vmem:[#allocation29 + $0x2d8] ss:$20 sps:$4 sm:$0xff]  }
 0xc6b   :  { %6655 = vmatpush1.bf16.msra.mxu1 %v9454_v53  ;;  %v9525_v53 = vld [vmem:[#allocation29 + $0x304] ss:$20 sps:$4 sm:$0xff]  }
 0xc6c   :  { %6656 = vmatprep.subr.bf16.mxu1 %v9459_v20  ;;  %v9523_v20 = vld [vmem:[#allocation29 + $0x300] ss:$20 sps:$4 sm:$0xff]  }
 0xc6f   :  { %6657 = vmatpush1.bf16.msra.mxu1 %v9457_v45  ;;  %v9528_v45 = vld [vmem:[#allocation29 + $0x32c] ss:$20 sps:$4 sm:$0xff]  }
 0xc70   :  { %6658 = vmatprep.subr.bf16.mxu1 %v9462_v36  ;;  %v9526_v36 = vld [vmem:[#allocation29 + $0x328] ss:$20 sps:$4 sm:$0xff]  }
 0xc73   :  { %6659 = vmatpush1.bf16.msra.mxu1 %v9460_v52  ;;  %v9531_v52 = vld [vmem:[#allocation29 + $0x354] ss:$20 sps:$4 sm:$0xff]  }
 0xc74   :  { %6660 = vmatprep.subr.bf16.mxu1 %v9465_v58  ;;  %v9529_v58 = vld [vmem:[#allocation29 + $0x350] ss:$20 sps:$4 sm:$0xff]  }
 0xc77   :  { %6661 = vmatpush1.bf16.msra.mxu1 %v9463_v51  ;;  %v9534_v51 = vld [vmem:[#allocation29 + $0x37c] ss:$20 sps:$4 sm:$0xff]  }
 0xc78   :  { %6683 = vmatprep.subr.bf16.mxu1 %v9468_v62  ;;  %v9532_v62 = vld [vmem:[#allocation29 + $0x378] ss:$20 sps:$4 sm:$0xff]  }
 0xc7a   :  { %6663 = vmatmul.mubr.bf16.vlgmr.msra.gmra.mrb[56].mxu1 %v11249_v10 }
 0xc7b   :  { %6672 = vmatprep.mubr.bf16.mxu1 %v11258_v0  ;;  %6684 = vmatpush1.bf16.msra.mxu1 %v9466_v28  ;;  %v9537_v28 = vld [vmem:[#allocation29 + $0x3a4] ss:$20 sps:$4 sm:$0xff]  }
 0xc7c   :  { %6685 = vmatprep.subr.bf16.mxu1 %v9471_v61  ;;  %v9535_v61 = vld [vmem:[#allocation29 + $0x3a0] ss:$20 sps:$4 sm:$0xff]  }
 0xc7f   :  { %6686 = vmatpush1.bf16.msra.mxu1 %v9469_v21  ;;  %v9540_v21 = vld [vmem:[#allocation29 + $0x3cc] ss:$20 sps:$4 sm:$0xff]  }
 0xc80   :  { %6687 = vmatprep.subr.bf16.mxu1 %v9474_v13  ;;  %v9538_v13 = vld [vmem:[#allocation29 + $0x3c8] ss:$20 sps:$4 sm:$0xff]  }
 0xc82   :  { %6673 = vmatmul.mubr.bf16.gmra.mrb[60].mxu1 %v11261_v47 }
 0xc83   :  { %6688 = vmatpush1.bf16.msra.mxu1 %v9472_v2  ;;  %6715 = vmatprep.mubr.bf16.mxu1 %v11182_v59  ;;  %v9543_v2 = vld [vmem:[#allocation29 + $0x3f4] ss:$20 sps:$4 sm:$0xff]  }
 0xc84   :  { %6689 = vmatprep.subr.bf16.mxu1 %v9477_v46  ;;  %v9541_v46 = vld [vmem:[#allocation29 + $0x3f0] ss:$20 sps:$4 sm:$0xff]  }
 0xc87   :  { %6690 = vmatpush1.bf16.msra.mxu1 %v9475_v4  ;;  %v9546_v4 = vld [vmem:[#allocation29 + $0x41c] ss:$20 sps:$4 sm:$0xff]  }
 0xc88   :  { %6691 = vmatprep.subr.bf16.mxu1 %v9480_v18  ;;  %v9544_v18 = vld [vmem:[#allocation29 + $0x418] ss:$20 sps:$4 sm:$0xff]  }
 0xc8b   :  { %6692 = vmatpush1.bf16.msra.mxu1 %v9478_v49  ;;  %v9549_v49 = vld [vmem:[#allocation29 + $0x444] ss:$20 sps:$4 sm:$0xff]  }
 0xc8c   :  { %6693 = vmatprep.subr.bf16.mxu1 %v9483_v57  ;;  %v9547_v57 = vld [vmem:[#allocation29 + $0x440] ss:$20 sps:$4 sm:$0xff]  }
 0xc8f   :  { %6694 = vmatpush1.bf16.msra.mxu1 %v9481_v9  ;;  %v9552_v9 = vld [vmem:[#allocation29 + $0x46c] ss:$20 sps:$4 sm:$0xff]  }
 0xc90   :  { %6695 = vmatprep.subr.bf16.mxu1 %v9486_v27  ;;  %v9550_v27 = vld [vmem:[#allocation29 + $0x468] ss:$20 sps:$4 sm:$0xff]  }
 0xc93   :  { %6696 = vmatpush1.bf16.msra.mxu1 %v9484_v25  ;;  %v9555_v25 = vld [vmem:[#allocation29 + $0x494] ss:$20 sps:$4 sm:$0xff]  }
 0xc94   :  { %6697 = vmatprep.subr.bf16.mxu1 %v9489_v14  ;;  %v9553_v14 = vld [vmem:[#allocation29 + $0x490] ss:$20 sps:$4 sm:$0xff]  }
 0xc97   :  { %6698 = vmatpush1.bf16.msra.mxu1 %v9487_v41  ;;  %v9558_v41 = vld [vmem:[#allocation29 + $0x4bc] ss:$20 sps:$4 sm:$0xff]  }
 0xc98   :  { %6699 = vmatprep.subr.bf16.mxu1 %v9492_v23  ;;  %v9556_v23 = vld [vmem:[#allocation29 + $0x4b8] ss:$20 sps:$4 sm:$0xff]  }
 0xc9b   :  { %6700 = vmatpush1.bf16.msra.mxu1 %v9490_v42  ;;  %v9561_v42 = vld [vmem:[#allocation29 + $0x4e4] ss:$20 sps:$4 sm:$0xff]  }
 0xc9c   :  { %6701 = vmatprep.subr.bf16.mxu1 %v9495_v5  ;;  %v9559_v5 = vld [vmem:[#allocation29 + $0x4e0] ss:$20 sps:$4 sm:$0xff]  }
 0xc9f   :  { %6702 = vmatpush1.bf16.msra.mxu1 %v9493_v15  ;;  %v9562_v15 = vld [vmem:[#allocation29 + $0x150] ss:$20 sps:$4 sm:$0xff]  }
 0xca0   :  { %6703 = vmatprep.subr.bf16.mxu1 %v9498_v7  ;;  %v9563_v7 = vld [vmem:[#allocation29 + $0x10] ss:$20 sps:$4 sm:$0xff]  }
 0xca3   :  { %6704 = vmatpush1.bf16.msra.mxu1 %v9496_v6  ;;  %v9564_v6 = vld [vmem:[#allocation29 + $0x178] ss:$20 sps:$4 sm:$0xff]  }
 0xca4   :  { %6705 = vmatprep.subr.bf16.mxu1 %v9501_v26  ;;  %v9565_v26 = vld [vmem:[#allocation29 + $0x38] ss:$20 sps:$4 sm:$0xff]  }
 0xca7   :  { %6706 = vmatpush1.bf16.msra.mxu1 %v9499_v34  ;;  %v9566_v34 = vld [vmem:[#allocation29 + $0x1a0] ss:$20 sps:$4 sm:$0xff]  }
 0xca8   :  { %6707 = vmatprep.subr.bf16.mxu1 %v9504_v43  ;;  %v9567_v43 = vld [vmem:[#allocation29 + $0x60] ss:$20 sps:$4 sm:$0xff]  }
 0xcab   :  { %6708 = vmatpush1.bf16.msra.mxu1 %v9502_v1  ;;  %v9568_v1 = vld [vmem:[#allocation29 + $0x1c8] ss:$20 sps:$4 sm:$0xff]  }
 0xcac   :  { %6709 = vmatprep.subr.bf16.mxu1 %v9507_v12  ;;  %v9569_v12 = vld [vmem:[#allocation29 + $0x88] ss:$20 sps:$4 sm:$0xff]  }
 0xcaf   :  { %6710 = vmatpush1.bf16.msra.mxu1 %v9505_v38  ;;  %v9570_v38 = vld [vmem:[#allocation29 + $0x1f0] ss:$20 sps:$4 sm:$0xff]  }
 0xcb0   :  { %6711 = vmatprep.subr.bf16.mxu1 %v9510_v24  ;;  %v9571_v24 = vld [vmem:[#allocation29 + $0xb0] ss:$20 sps:$4 sm:$0xff]  }
 0xcb3   :  { %6712 = vmatpush1.bf16.msra.mxu1 %v9508_v40  ;;  %v9572_v40 = vld [vmem:[#allocation29 + $0x218] ss:$20 sps:$4 sm:$0xff]  }
 0xcb4   :  { %6713 = vmatprep.subr.bf16.mxu1 %v9513_v44  ;;  %v9573_v44 = vld [vmem:[#allocation29 + $0xd8] ss:$20 sps:$4 sm:$0xff]  }
 0xcb7   :  { %6714 = vmatpush1.bf16.msra.mxu1 %v9511_v35  ;;  %v9574_v35 = vld [vmem:[#allocation29 + $0x240] ss:$20 sps:$4 sm:$0xff]  }
 0xcb8   :  { %6736 = vmatprep.subr.bf16.mxu1 %v9516_v37  ;;  %v9575_v37 = vld [vmem:[#allocation29 + $0x100] ss:$20 sps:$4 sm:$0xff]  }
 0xcba   :  { %6716 = vmatmul.mubr.bf16.vlgmr.msra.gmra.mrb[64].mxu1 %v11199_v11 }
 0xcbb   :  { %6725 = vmatprep.mubr.bf16.mxu1 %v11222_v50  ;;  %6737 = vmatpush1.bf16.msra.mxu1 %v9514_v16  ;;  %v9576_v16 = vld [vmem:[#allocation29 + $0x268] ss:$20 sps:$4 sm:$0xff]  }
 0xcbc   :  { %6738 = vmatprep.subr.bf16.mxu1 %v9519_v19  ;;  %v9577_v19 = vld [vmem:[#allocation29 + $0x128] ss:$20 sps:$4 sm:$0xff]  }
 0xcbf   :  { %6739 = vmatpush1.bf16.msra.mxu1 %v9517_v54  ;;  %v9578_v54 = vld [vmem:[#allocation29 + $0x3d0] ss:$20 sps:$4 sm:$0xff]  }
 0xcc0   :  { %6740 = vmatprep.subr.bf16.mxu1 %v9522_v32  ;;  %v9580_v32 = vld [vmem:[#allocation29 + $0x3f8] ss:$20 sps:$4 sm:$0xff]  }
 0xcc2   :  { %6726 = vmatmul.mubr.bf16.gmra.mrb[68].mxu1 %v11219_v22 }
 0xcc3   :  { %6741 = vmatpush1.bf16.msra.mxu1 %v9520_v30  ;;  %6768 = vmatprep.mubr.bf16.mxu1 %v11243_v8  ;;  %v9581_v30 = vld [vmem:[#allocation29 + $0x2b8] ss:$20 sps:$4 sm:$0xff]  }
 0xcc4   :  { %6742 = vmatprep.subr.bf16.mxu1 %v9525_v53  ;;  %v9582_v53 = vld [vmem:[#allocation29 + $0x420] ss:$20 sps:$4 sm:$0xff]  }
 0xcc7   :  { %6743 = vmatpush1.bf16.msra.mxu1 %v9523_v20  ;;  %v9583_v20 = vld [vmem:[#allocation29 + $0x2e0] ss:$20 sps:$4 sm:$0xff]  }
 0xcc8   :  { %6744 = vmatprep.subr.bf16.mxu1 %v9528_v45  ;;  %v9584_v45 = vld [vmem:[#allocation29 + $0x448] ss:$20 sps:$4 sm:$0xff]  }
 0xccb   :  { %6745 = vmatpush1.bf16.msra.mxu1 %v9526_v36  ;;  %v9585_v36 = vld [vmem:[#allocation29 + $0x308] ss:$20 sps:$4 sm:$0xff]  }
 0xccc   :  { %6746 = vmatprep.subr.bf16.mxu1 %v9531_v52  ;;  %v9586_v52 = vld [vmem:[#allocation29 + $0x470] ss:$20 sps:$4 sm:$0xff]  }
 0xccf   :  { %6747 = vmatpush1.bf16.msra.mxu1 %v9529_v58  ;;  %v9589_v58 = vld [vmem:[#allocation29 + $0x358] ss:$20 sps:$4 sm:$0xff]  }
 0xcd0   :  { %6748 = vmatprep.subr.bf16.mxu1 %v9534_v51  ;;  %v9590_v51 = vld [vmem:[#allocation29 + $0x4c0] ss:$20 sps:$4 sm:$0xff]  }
 0xcd3   :  { %6749 = vmatpush1.bf16.msra.mxu1 %v9532_v62  ;;  %v9591_v62 = vld [vmem:[#allocation29 + $0x380] ss:$20 sps:$4 sm:$0xff]  }
 0xcd4   :  { %6750 = vmatprep.subr.bf16.mxu1 %v9537_v28  ;;  %v9592_v28 = vld [vmem:[#allocation29 + $0x4e8] ss:$20 sps:$4 sm:$0xff]  }
 0xcd7   :  { %6751 = vmatpush1.bf16.msra.mxu1 %v9535_v61 }
 0xcd8   :  { %6752 = vmatprep.subr.bf16.mxu1 %v9540_v21 }
 0xcdb   :  { %6753 = vmatpush1.bf16.msra.mxu1 %v9538_v13 }
 0xcdc   :  { %6754 = vmatprep.subr.bf16.mxu1 %v9543_v2 }
 0xcdf   :  { %6755 = vmatpush1.bf16.msra.mxu1 %v9541_v46 }
 0xce0   :  { %6756 = vmatprep.subr.bf16.mxu1 %v9546_v4 }
 0xce3   :  { %6757 = vmatpush1.bf16.msra.mxu1 %v9544_v18 }
 0xce4   :  { %6758 = vmatprep.subr.bf16.mxu1 %v9549_v49 }
 0xce7   :  { %6759 = vmatpush1.bf16.msra.mxu1 %v9547_v57 }
 0xce8   :  { %6760 = vmatprep.subr.bf16.mxu1 %v9552_v9 }
 0xceb   :  { %6761 = vmatpush1.bf16.msra.mxu1 %v9550_v27 }
 0xcec   :  { %6762 = vmatprep.subr.bf16.mxu1 %v9555_v25 }
 0xcef   :  { %6763 = vmatpush1.bf16.msra.mxu1 %v9553_v14 }
 0xcf0   :  { %6764 = vmatprep.subr.bf16.mxu1 %v9558_v41 }
 0xcf3   :  { %6765 = vmatpush1.bf16.msra.mxu1 %v9556_v23 }
 0xcf4   :  { %6766 = vmatprep.subr.bf16.mxu1 %v9561_v42 }
 0xcf7   :  { %6767 = vmatpush1.bf16.msra.mxu1 %v9559_v5 }
 0xcf8   :  { %8393 = vmatprep.subr.bf16.mxu1 %v9562_v15 }
 0xcfa   :  { %6769 = vmatmul.mubr.bf16.vlgmr.msra.gmra.mrb[64].mxu1 %v11249_v10 }
 0xcfb   :  { %6778 = vmatprep.mubr.bf16.mxu1 %v11258_v0  ;;  %8394 = vmatpush3.bf16.msra.mxu1 %v9563_v7 }
 0xcfc   :  { %8395 = vmatprep.subr.bf16.mxu1 %v9564_v6 }
 0xcff   :  { %8396 = vmatpush3.bf16.msra.mxu1 %v9565_v26 }
 0xd00   :  { %8397 = vmatprep.subr.bf16.mxu1 %v9566_v34 }
 0xd02   :  { %6779 = vmatmul.mubr.bf16.gmra.mrb[68].mxu1 %v11261_v47 }
 0xd03   :  { %8398 = vmatpush3.bf16.msra.mxu1 %v9567_v43  ;;  %6821 = vmatprep.mubr.bf16.mxu1 %v11182_v59  ;;  %v9579_v59 = vld [vmem:[#allocation29 + $0x290] ss:$20 sps:$4 sm:$0xff]  }
 0xd04   :  { %8399 = vmatprep.subr.bf16.mxu1 %v9568_v1 }
 0xd07   :  { %8400 = vmatpush3.bf16.msra.mxu1 %v9569_v12 }
 0xd08   :  { %8401 = vmatprep.subr.bf16.mxu1 %v9570_v38 }
 0xd0b   :  { %8402 = vmatpush3.bf16.msra.mxu1 %v9571_v24 }
 0xd0c   :  { %8403 = vmatprep.subr.bf16.mxu1 %v9572_v40 }
 0xd0f   :  { %8404 = vmatpush3.bf16.msra.mxu1 %v9573_v44 }
 0xd10   :  { %8405 = vmatprep.subr.bf16.mxu1 %v9574_v35 }
 0xd13   :  { %8406 = vmatpush3.bf16.msra.mxu1 %v9575_v37 }
 0xd14   :  { %8407 = vmatprep.subr.bf16.mxu1 %v9576_v16 }
 0xd17   :  { %8408 = vmatpush3.bf16.msra.mxu1 %v9577_v19 }
 0xd18   :  { %8421 = vmatprep.subr.bf16.mxu1 %v9578_v54 }
 0xd1a   :  { %6822 = vmatmul.mubr.bf16.vlgmr.msra.gmra.mrb[72].mxu1 %v11199_v11  ;;  %v9587_v11 = vld [vmem:[#allocation29 + $0x330] ss:$20 sps:$4 sm:$0xff]  }
 0xd1b   :  { %6829 = vmatprep.mubr.bf16.mxu1 %v11222_v50  ;;  %8422 = vmatpush3.bf16.msra.mxu1 %v9579_v59  ;;  %v9588_v50 = vld [vmem:[#allocation29 + $0x498] ss:$20 sps:$4 sm:$0xff]  }
 0xd1c   :  { %8423 = vmatprep.subr.bf16.mxu1 %v9580_v32 }
 0xd1f   :  { %8424 = vmatpush3.bf16.msra.mxu1 %v9581_v30 }
 0xd20   :  { %8425 = vmatprep.subr.bf16.mxu1 %v9582_v53 }
 0xd22   :  { %6830 = vmatmul.mubr.bf16.gmra.mrb[76].mxu1 %v11219_v22  ;;  %v9593_v22 = vld [vmem:[#allocation29 + $0x3a8] ss:$20 sps:$4 sm:$0xff]  }
 0xd23   :  { %8426 = vmatpush3.bf16.msra.mxu1 %v9583_v20  ;;  %6870 = vmatprep.mubr.bf16.mxu1 %v11243_v8 }
 0xd24   :  { %8427 = vmatprep.subr.bf16.mxu1 %v9584_v45 }
 0xd27   :  { %8428 = vmatpush3.bf16.msra.mxu1 %v9585_v36 }
 0xd28   :  { %8429 = vmatprep.subr.bf16.mxu1 %v9586_v52 }
 0xd2b   :  { %8430 = vmatpush3.bf16.msra.mxu1 %v9587_v11 }
 0xd2c   :  { %8431 = vmatprep.subr.bf16.mxu1 %v9588_v50 }
 0xd2f   :  { %8432 = vmatpush3.bf16.msra.mxu1 %v9589_v58 }
 0xd30   :  { %8433 = vmatprep.subr.bf16.mxu1 %v9590_v51 }
 0xd33   :  { %8434 = vmatpush3.bf16.msra.mxu1 %v9591_v62 }
 0xd34   :  { %8435 = vmatprep.subr.bf16.mxu1 %v9592_v28 }
 0xd37   :  { %8436 = vmatpush3.bf16.msra.mxu1 %v9593_v22 }
 0xd3a   :  { %6871 = vmatmul.mubr.bf16.vlgmr.msra.gmra.mrb[80].mxu1 %v11249_v10 }
 0xd3b   :  { %6878 = vmatprep.mubr.bf16.mxu1 %v11258_v0 }
 0xd42   :  { %6879 = vmatmul.mubr.bf16.gmra.mrb[84].mxu1 %v11261_v47 }
 0xd43   :  { %7055 = vmatprep.mubr.bf16.mxu1 %v10333_v48 }
 0xd4d   :  { %v6664_v8 = vpop.f32.mrb[56].mxu1 }
 0xd4e   :  { %v6666_v61 = vpop.f32.mrb[57].mxu1 }
 0xd4f   :  { %v6668_v21 = vpop.f32.mrb[58].mxu1 }
 0xd50   :  { %v6887_v13 = vpack.c.bf16 %v6668_v21, %v6664_v8  ;;  %v6670_v2 = vpop.f32.mrb[59].mxu1 }
 0xd51   :  { %v6888_v46 = vpack.c.bf16 %v6670_v2, %v6666_v61 }
 0xd53   :  { %7023 = vmatprep.subr.bf16.mxu1 %v6888_v46 }
 0xd54   :  { %7024 = vmatpush1.bf16.msra.mxu1 %v6887_v13 }
 0xd55   :  { %v6674_v4 = vpop.f32.mrb[60].mxu1 }
 0xd56   :  { %v6676_v18 = vpop.f32.mrb[61].mxu1 }
 0xd57   :  { %v6678_v49 = vpop.f32.mrb[62].mxu1 }
 0xd58   :  { %v6891_v57 = vpack.c.bf16 %v6678_v49, %v6674_v4  ;;  %v6680_v9 = vpop.f32.mrb[63].mxu1 }
 0xd59   :  { %v6892_v10 = vpack.c.bf16 %v6680_v9, %v6676_v18 }
 0xd5b   :  { %7025 = vmatprep.subr.bf16.mxu1 %v6892_v10 }
 0xd5c   :  { %7026 = vmatpush1.bf16.msra.mxu1 %v6891_v57 }
 0xdcd   :  { %v11283_v0 = vpop.f32.mrb[64].mxu1 }
 0xdce   :  { %v6772_v47 = vpop.f32.mrb[65].mxu1 }
 0xdcf   :  { %v11285_v27 = vpop.f32.mrb[66].mxu1 }
 0xdd0   :  { %v6889_v25 = vpack.c.bf16 %v11285_v27, %v11283_v0  ;;  %v6776_v14 = vpop.f32.mrb[67].mxu1 }
 0xdd1   :  { %v6890_v41 = vpack.c.bf16 %v6776_v14, %v6772_v47 }
 0xdd3   :  { %7168 = vmatprep.subr.bf16.mxu1 %v6890_v41 }
 0xdd5   :  { %v11289_v23 = vpop.f32.mrb[68].mxu1 }
 0xdd6   :  { %v11291_v42 = vpop.f32.mrb[69].mxu1 }
 0xdd7   :  { %v11293_v5 = vpop.f32.mrb[70].mxu1 }
 0xdd8   :  { %v6893_v15 = vpack.c.bf16 %v11293_v5, %v11289_v23  ;;  %v11297_v7 = vpop.f32.mrb[71].mxu1 }
 0xdd9   :  { %v6894_v6 = vpack.c.bf16 %v11297_v7, %v11291_v42 }
 0xded   :  { %v8409_v26 = vpop.f32.mrb[72].mxu1 }
 0xdee   :  { %v8410_v34 = vpop.f32.mrb[73].mxu1 }
 0xdef   :  { %v8411_v43 = vadd.f32 %v8410_v34, %v8409_v26  ;;  %v8412_v1 = vpop.f32.mrb[74].mxu1 }
 0xdf0   :  { %v8413_v12 = vpop.f32.mrb[75].mxu1 }
 0xdf1   :  { %v8414_v38 = vadd.f32 %v8413_v12, %v8412_v1 }
 0xdf5   :  { %v8415_v24 = vpop.f32.mrb[76].mxu1 }
 0xdf6   :  { %v8416_v40 = vpop.f32.mrb[77].mxu1 }
 0xdf7   :  { %v8417_v44 = vadd.f32 %v8416_v40, %v8415_v24  ;;  %v8418_v35 = vpop.f32.mrb[78].mxu1 }
 0xdf8   :  { %v8419_v37 = vpop.f32.mrb[79].mxu1 }
 0xdf9   :  { %v8420_v16 = vadd.f32 %v8419_v37, %v8418_v35 }
 0xe0d   :  { %v8437_v19 = vpop.f32.mrb[80].mxu1 }
 0xe0e   :  { %v8438_v54 = vpop.f32.mrb[81].mxu1 }
 0xe0f   :  { %v8439_v59 = vadd.f32 %v8438_v54, %v8437_v19  ;;  %v8440_v32 = vpop.f32.mrb[82].mxu1 }
 0xe10   :  { %v8441_v30 = vpop.f32.mrb[83].mxu1 }
 0xe11   :  { %v6873_v53 = vadd.f32 %v8439_v59, %v8411_v43  ;;  %v8442_v20 = vadd.f32 %v8441_v30, %v8440_v32 }
 0xe13   :  { %v6876_v45 = vadd.f32 %v8442_v20, %v8414_v38  ;;  %6929 = vperm.xlu1 %8590, %v6873_v53  }
 0xe15   :  { %v8443_v36 = vpop.f32.mrb[84].mxu1  ;;  %6934 = vperm.xlu0 %8587, %v6876_v45  }
 0xe16   :  { %v8444_v52 = vpop.f32.mrb[85].mxu1 }
 0xe17   :  { %v8445_v11 = vadd.f32 %v8444_v52, %v8443_v36  ;;  %v8446_v50 = vpop.f32.mrb[86].mxu1  ;;  %8592 = vset.pattern.permute.xlu1 %v10335_v39 }
 0xe18   :  { %v8447_v58 = vpop.f32.mrb[87].mxu1  ;;  %7081 = vperm.xlu1 %8592, %v6876_v45  }
 0xe19   :  { %v6881_v51 = vadd.f32 %v8445_v11, %v8417_v44  ;;  %v8448_v62 = vadd.f32 %v8447_v58, %v8446_v50  ;;  %8591 = vset.pattern.permute.xlu0 %v10335_v39 }
 0xe1a   :  { %7077 = vperm.xlu0 %8591, %v6873_v53  }
 0xe1b   :  { %v6884_v28 = vadd.f32 %v8448_v62, %v8420_v16 }
 0xe1c   :  { %8593 = vset.pattern.permute.xlu1 %v10334_v63 }
 0xe1d   :  { %6939 = vperm.xlu1 %8593, %v6881_v51  }
 0xe1e   :  { %7089 = vperm.xlu0 %8591, %v6884_v28  }
 0xe21   :  { %8594 = vset.pattern.permute.xlu1 %v10335_v39 }
 0xe22   :  { %7085 = vperm.xlu1 %8594, %v6881_v51  }
 0xe26   :  { %8595 = vset.pattern.permute.xlu1 %v10334_v63 }
 0xe27   :  { %6944 = vperm.xlu1 %8595, %v6884_v28  }
 0xe50   :  { %6895 = vxpose.xlu1.b32.start [1/4] (short) (narrow) %v6873_v53, 8 }
 0xe54   :  { %6896 = vxpose.xlu1.b32.cont [2/4] (short) (narrow) %v6876_v45, 8 }
 0xe58   :  { %6897 = vxpose.xlu1.b32.cont [3/4] (short) (narrow) %v6881_v51, 8 }
 0xe5c   :  { %6898 = vxpose.xlu1.b32.end [4/4] (short) (narrow) %v6884_v28, 8 }
 0xe92   :  { %v6930_v22 = vpop.permute.xlu1 %6929 }
 0xe94   :  { %v6935_v18 = vpop.permute.xlu0 %6934 }
 0xe97   :  { %v7082_v8 = vpop.permute.xlu1 %7081 }
 0xe99   :  { %v7078_v38 = vpop.permute.xlu0 %7077 }
 0xe9c   :  { %v6940_v61 = vpop.permute.xlu1 %6939 }
 0xe9d   :  { %v7090_v53 = vpop.permute.xlu0 %7089 }
 0xea1   :  { %v7086_v21 = vpop.permute.xlu1 %7085 }
 0xea6   :  { %v6945_v13 = vpop.permute.xlu1 %6944 }
 0xed0   :  { %v6911_v2 = vpop.trf.xlu1 }
 0xed1   :  { %v6950_v46 = vrot.slane %v6911_v2, %v10852_v29  ;;  %v7095_v4 = vrot.slane %v6911_v2, %v10855_v31 }
 0xed3   :  { %v7098_v39 = vadd.f32 %v7095_v4, %v7086_v21  ;;  %v6951_v49 = vadd.f32 %v6950_v46, %v6930_v22  ;;  %v6952_v57 = vadd.f32 %v6950_v46, %v6935_v18  ;;  %v6953_v63 = vadd.f32 %v6950_v46, %v6940_v61 }
 0xed4   :  { %v6954_v34 = vadd.f32 %v6950_v46, %v6945_v13  ;;  %v7096_v16 = vadd.f32 %v7095_v4, %v7078_v38  ;;  %v7097_v30 = vadd.f32 %v7095_v4, %v7082_v8  ;;  %v7099_v11 = vadd.f32 %v7095_v4, %v7090_v53 }
 0xed5   :  { %vm7102_vm2 = vcmp.gt.f32.partialorder %v7098_v39, 0.0  ;;  %v7106_v9 = vmul.f32 0.2, %v7098_v39  ;;  %vm6955_vm3 = vcmp.gt.f32.partialorder %v6951_v49, 0.0  ;;  %v6959_v10 = vmul.f32 0.2, %v6951_v49 }
 0xed6   :  { %vm6956_vm4 = vcmp.gt.f32.partialorder %v6952_v57, 0.0  ;;  %v6960_v47 = vmul.f32 0.2, %v6952_v57  ;;  %v6961_v26 = vmul.f32 0.2, %v6953_v63  ;;  %vm6957_vm5 = vcmp.gt.f32.partialorder %v6953_v63, 0.0 }
 0xed7   :  { %v7110_v14 = vsel %vm7102_vm2, %v7098_v39, %v7106_v9  ;;  %v6963_v41 = vsel %vm6955_vm3, %v6951_v49, %v6959_v10  ;;  %v6962_v37 = vmul.f32 0.2, %v6954_v34  ;;  %vm6958_vm6 = vcmp.gt.f32.partialorder %v6954_v34, 0.0 }
 0xed8   :  { %v11309_v43 = vadd.f32 %v10939_v60, %v7110_v14  ;;  %v6967_v1 = vadd.f32 %v10937_v56, %v6963_v41  ;;  %v6964_v12 = vsel %vm6956_vm4, %v6952_v57, %v6960_v47  ;;  %v6965_v35 = vsel %vm6957_vm5, %v6953_v63, %v6961_v26 }
 0xed9   :  { %v6968_v44 = vadd.f32 %v10935_v55, %v6964_v12  ;;  %v6969_v54 = vadd.f32 %v10939_v60, %v6965_v35  ;;  %v6966_v59 = vsel %vm6958_vm6, %v6954_v34, %v6962_v37  ;;  %v7104_v32 = vmul.f32 0.2, %v7096_v16 }
 0xeda   :  { %v7122_v24 = vsel %vm4948_vm10, %v11309_v43, -inf  ;;  %v6971_v40 = vsel %vm4948_vm10, %v6967_v1, -inf  ;;  %vm7100_vm7 = vcmp.gt.f32.partialorder %v7096_v16, 0.0  ;;  %v6970_v45 = vadd.f32 %v10946_v17, %v6966_v59 }
 0xedb   :  { %7123 = vmax.xlane.f32.xlu1 %v7122_v24  ;;  %6972 = vmax.xlane.f32.xlu0 %v6971_v40  ;;  %v6974_v19 = vsel %vm4948_vm10, %v6968_v44, -inf  ;;  %v6977_v20 = vsel %vm4948_vm10, %v6969_v54, -inf  ;;  %v7108_v36 = vsel %vm7100_vm7, %v7096_v16, %v7104_v32  ;;  %v7105_v52 = vmul.f32 0.2, %v7097_v30 }
 0xedc   :  { %vm7101_vm8 = vcmp.gt.f32.partialorder %v7097_v30, 0.0  ;;  %v6980_v50 = vsel %vm4948_vm10, %v6970_v45, -inf  ;;  %v7112_v58 = vadd.f32 %v10937_v56, %v7108_v36  ;;  %v7107_v51 = vmul.f32 0.2, %v7099_v11 }
 0xedd   :  { %v7109_v60 = vsel %vm7101_vm8, %v7097_v30, %v7105_v52  ;;  %vm7103_vm9 = vcmp.gt.f32.partialorder %v7099_v11, 0.0 }
 0xede   :  { %v7116_v62 = vsel %vm4948_vm10, %v7112_v58, -inf  ;;  %v7113_v28 = vadd.f32 %v10935_v55, %v7109_v60  ;;  %v7111_v22 = vsel %vm7103_vm9, %v7099_v11, %v7107_v51 }
 0xedf   :  { %6975 = vmax.xlane.f32.xlu0 %v6974_v19  ;;  %v7115_v61 = vadd.f32 %v10946_v17, %v7111_v22 }
 0xee0   :  { %v7119_v8 = vsel %vm4948_vm10, %v7113_v28, -inf }
 0xee1   :  { %v7125_v21 = vsel %vm4948_vm10, %v7115_v61, -inf }
 0xee3   :  { %6978 = vmax.xlane.f32.xlu0 %v6977_v20 }
 0xee7   :  { %6981 = vmax.xlane.f32.xlu0 %v6980_v50 }
 0xeeb   :  { %7117 = vmax.xlane.f32.xlu0 %v7116_v62 }
 0xeef   :  { %7120 = vmax.xlane.f32.xlu0 %v7119_v8 }
 0xef3   :  { %7126 = vmax.xlane.f32.xlu0 %v7125_v21 }
 0xf68   :  { %v6973_v13 = vpop.xlane.xlu0 %6972  ;;  %v7124_v47 = vpop.xlane.xlu1 %7123 }
 0xf69   :  { %v6983_v56 = vsub.f32 %v6967_v1, %v6973_v13  ;;  %v7130_v1 = vsub.f32 %v11309_v43, %v7124_v47 }
 0xf6b   :  { %v6987_v2 = vmul.f32 1.442695, %v6983_v56  ;;  %v7136_v35 = vmul.f32 1.442695, %v7130_v1 }
 0xf6c   :  { %v6976_v46 = vpop.xlane.xlu0 %6975 }
 0xf6d   :  { %v6984_v4 = vsub.f32 %v6968_v44, %v6976_v46  ;;  %9726 = vpow2.f32 %v6987_v2 }
 0xf6f   :  { %v6989_v18 = vmul.f32 1.442695, %v6984_v4 }
 0xf70   :  { %v6979_v39 = vpop.xlane.xlu0 %6978 }
 0xf71   :  { %9728 = vpow2.f32 %v6989_v18  ;;  %v6985_v55 = vsub.f32 %v6969_v54, %v6979_v39 }
 0xf73   :  { %v6991_v49 = vmul.f32 1.442695, %v6985_v55 }
 0xf74   :  { %v6982_v57 = vpop.xlane.xlu0 %6981 }
 0xf75   :  { %9730 = vpow2.f32 %v6991_v49  ;;  %v6986_v63 = vsub.f32 %v6970_v45, %v6982_v57  ;;  %v7221_v57 = vld [vmem:[#allocation31] sm:$0xf] }
 0xf77   :  { %v6993_v9 = vmul.f32 1.442695, %v6986_v63  ;;  %v9727_v17 = vpop.eup %9726  ;;  %v7226_v63 = vrot.slane %v7221_v57, %v10852_v29 }
 0xf78   :  { %v7118_v10 = vpop.xlane.xlu0 %7117  ;;  %v6995_v41 = vsel %vm4948_vm10, %v9727_v17, 0.0 }
 0xf79   :  { %9732 = vpow2.f32 %v6993_v9  ;;  %v7128_v14 = vsub.f32 %v7112_v58, %v7118_v10  ;;  %6996 = vadd.xlane.f32.xlu0 %v6995_v41 }
 0xf7b   :  { %v9729_v26 = vpop.eup %9728  ;;  %v7132_v34 = vmul.f32 1.442695, %v7128_v14 }
 0xf7c   :  { %v7121_v12 = vpop.xlane.xlu0 %7120  ;;  %v6998_v38 = vsel %vm4948_vm10, %v9729_v26, 0.0 }
 0xf7d   :  { %9734 = vpow2.f32 %v7132_v34  ;;  %v7129_v24 = vsub.f32 %v7113_v28, %v7121_v12  ;;  %6999 = vadd.xlane.f32.xlu0 %v6998_v38 }
 0xf7f   :  { %v9731_v40 = vpop.eup %9730  ;;  %v7134_v44 = vmul.f32 1.442695, %v7129_v24 }
 0xf80   :  { %v7127_v37 = vpop.xlane.xlu0 %7126  ;;  %v7001_v16 = vsel %vm4948_vm10, %v9731_v40, 0.0 }
 0xf81   :  { %9736 = vpow2.f32 %v7134_v44  ;;  %v7131_v19 = vsub.f32 %v7115_v61, %v7127_v37  ;;  %7002 = vadd.xlane.f32.xlu0 %v7001_v16 }
 0xf82   :  { %9738 = vpow2.f32 %v7136_v35 }
 0xf83   :  { %v9733_v54 = vpop.eup %9732  ;;  %v7138_v59 = vmul.f32 1.442695, %v7131_v19 }
 0xf84   :  { %v7004_v43 = vsel %vm4948_vm10, %v9733_v54, 0.0 }
 0xf85   :  { %7005 = vadd.xlane.f32.xlu0 %v7004_v43  ;;  %9740 = vpow2.f32 %v7138_v59 }
 0xf87   :  { %v9735_v32 = vpop.eup %9734 }
 0xf88   :  { %v7140_v30 = vsel %vm4948_vm10, %v9735_v32, 0.0 }
 0xf89   :  { %7141 = vadd.xlane.f32.xlu0 %v7140_v30 }
 0xf8b   :  { %v9737_v53 = vpop.eup %9736 }
 0xf8c   :  { %v7143_v20 = vsel %vm4948_vm10, %v9737_v53, 0.0  ;;  %v9739_v45 = vpop.eup %9738 }
 0xf8d   :  { %7144 = vadd.xlane.f32.xlu0 %v7143_v20  ;;  %v7146_v36 = vsel %vm4948_vm10, %v9739_v45, 0.0 }
 0xf8f   :  { %v9741_v52 = vpop.eup %9740 }
 0xf90   :  { %v7149_v11 = vsel %vm4948_vm10, %v9741_v52, 0.0 }
 0xf91   :  { %7147 = vadd.xlane.f32.xlu0 %v7146_v36  ;;  %v7238_v36 = vrot.slane %v7221_v57, %v10989_v3 }
 0xf95   :  { %7150 = vadd.xlane.f32.xlu0 %v7149_v11 }
0x1006   :  { %v6997_v50 = vpop.xlane.xlu0 %6996 }
0x1007   :  { %9742 = vrcp.f32 %v6997_v50 }
0x100a   :  { %v7000_v58 = vpop.xlane.xlu0 %6999 }
0x100b   :  { %9744 = vrcp.f32 %v7000_v58 }
0x100e   :  { %v7003_v60 = vpop.xlane.xlu0 %7002 }
0x100f   :  { %9746 = vrcp.f32 %v7003_v60 }
0x1011   :  { %v9743_v62 = vpop.eup %9742 }
0x1012   :  { %v7006_v51 = vpop.xlane.xlu0 %7005  ;;  %v7011_v22 = vmul.f32 %v9743_v62, %v9727_v17  ;;  %v7230_v17 = vrot.slane %v7221_v57, %v10855_v31 }
0x1013   :  { %9748 = vrcp.f32 %v7006_v51 }
0x1015   :  { %v9745_v28 = vpop.eup %9744 }
0x1016   :  { %v7012_v8 = vmul.f32 %v9745_v28, %v9729_v26  ;;  %v7142_v61 = vpop.xlane.xlu0 %7141 }
0x1017   :  { %9750 = vrcp.f32 %v7142_v61 }
0x1018   :  { %v7015_v21 = vpack.c.bf16 %v7012_v8, %v7011_v22 }
0x1019   :  { %v9747_v56 = vpop.eup %9746 }
0x101a   :  { %8336 = vmatmul.mubr.msk.bf16.vlgmr.msra.gmra.mrb[88].mxu1 %vm4948_vm10, %v7015_v21  ;;  %v7145_v13 = vpop.xlane.xlu0 %7144  ;;  %v7013_v4 = vmul.f32 %v9747_v56, %v9731_v40 }
0x101b   :  { %7169 = vmatpush1.bf16.msra.mxu1 %v6889_v25  ;;  %9752 = vrcp.f32 %v7145_v13  ;;  %7065 = vmatprep.mubr.bf16.mxu1 %v10333_v48 }
0x101c   :  { %7170 = vmatprep.subr.bf16.mxu1 %v6894_v6 }
0x101d   :  { %v9749_v2 = vpop.eup %9748 }
0x101e   :  { %v7148_v46 = vpop.xlane.xlu0 %7147  ;;  %v7014_v18 = vmul.f32 %v9749_v2, %v9733_v54 }
0x101f   :  { %7171 = vmatpush1.bf16.msra.mxu1 %v6893_v15  ;;  %9754 = vrcp.f32 %v7148_v46 }
0x1020   :  { %v7016_v39 = vpack.c.bf16 %v7014_v18, %v7013_v4 }
0x1021   :  { %v9751_v27 = vpop.eup %9750 }
0x1022   :  { %8337 = vmatmul.mubr.msk.bf16.gmra.mrb[92].mxu1 %vm4948_vm10, %v7016_v39  ;;  %v7151_v0 = vpop.xlane.xlu0 %7150  ;;  %v7156_v42 = vmul.f32 %v9751_v27, %v9735_v32 }
0x1023   :  { %9756 = vrcp.f32 %v7151_v0  ;;  %7200 = vmatprep.mubr.bf16.mxu1 %v10333_v48 }
0x1025   :  { %v9753_v25 = vpop.eup %9752 }
0x1026   :  { %v7157_v7 = vmul.f32 %v9753_v25, %v9737_v53  ;;  %v7234_v53 = vrot.slane %v7221_v57, %v10986_v33 }
0x1028   :  { %v7160_v6 = vpack.c.bf16 %v7157_v7, %v7156_v42 }
0x1029   :  { %v9755_v55 = vpop.eup %9754 }
0x102a   :  { %8338 = vmatmul.mubr.msk.bf16.vlgmr.msra.gmra.mrb[96].mxu1 %vm4948_vm10, %v7160_v6  ;;  %v7158_v5 = vmul.f32 %v9755_v55, %v9739_v45 }
0x102b   :  { %7210 = vmatprep.mubr.bf16.mxu1 %v10333_v48 }
0x102d   :  { %v9757_v23 = vpop.eup %9756 }
0x102e   :  { %v7159_v15 = vmul.f32 %v9757_v23, %v9741_v52 }
0x1030   :  { %v7161_v49 = vpack.c.bf16 %v7159_v15, %v7158_v5 }
0x1032   :  { %8339 = vmatmul.mubr.msk.bf16.gmra.mrb[100].mxu1 %vm4948_vm10, %v7161_v49 }
0x10ed   :  { %v7057_v9 = vpop.f32.mrb[88].mxu1 }
0x10ee   :  { %v7059_v10 = vpop.f32.mrb[89].mxu1  ;;  %v7243_v14 = vadd.f32 %v7226_v63, %v7057_v9 }
0x10ef   :  { %v7061_v47 = vpop.f32.mrb[90].mxu1  ;;  %v7244_v34 = vadd.f32 %v7230_v17, %v7059_v10 }
0x10f0   :  { %v7247_v41 = vadd.f32 %v7226_v63, %v7061_v47  ;;  %v7063_v26 = vpop.f32.mrb[91].mxu1 }
0x10f1   :  { %v7248_v1 = vadd.f32 %v7230_v17, %v7063_v26 }
0x10f2   :  { %v7261_v48 = vadd.f32 %v7247_v41, %v7243_v14 }
0x10f3   :  { %v7270_v12 = vadd.f32 %v7248_v1, %v7244_v34 }
0x10f5   :  { %v7067_v38 = vpop.f32.mrb[92].mxu1 }
0x10f6   :  { %v7251_v24 = vadd.f32 %v7226_v63, %v7067_v38  ;;  %v7069_v40 = vpop.f32.mrb[93].mxu1 }
0x10f7   :  { %v7252_v44 = vadd.f32 %v7230_v17, %v7069_v40  ;;  %v7071_v35 = vpop.f32.mrb[94].mxu1 }
0x10f8   :  { %v7262_v37 = vadd.f32 %v7261_v48, %v7251_v24  ;;  %v7255_v16 = vadd.f32 %v7226_v63, %v7071_v35  ;;  %v7073_v19 = vpop.f32.mrb[95].mxu1 }
0x10f9   :  { %v7271_v54 = vadd.f32 %v7270_v12, %v7252_v44  ;;  %v7256_v59 = vadd.f32 %v7230_v17, %v7073_v19 }
0x10fa   :  { %v7263_v43 = vadd.f32 %v7262_v37, %v7255_v16 }
0x10fb   :  { %v7272_v32 = vadd.f32 %v7271_v54, %v7256_v59 }
0x10fc   :  { %v7264_v30 = vrot.slane %v7263_v43, 4 }
0x10fd   :  { %v7273_v20 = vrot.slane %v7272_v32, 4  ;;  %v7202_v45 = vpop.f32.mrb[96].mxu1 }
0x10fe   :  { %v7265_v52 = vadd.f32 %v7264_v30, %v7263_v43  ;;  %v7204_v11 = vpop.f32.mrb[97].mxu1  ;;  %v11356_v51 = vadd.f32 %v7234_v53, %v7202_v45 }
0x10ff   :  { %v7274_v50 = vadd.f32 %v7273_v20, %v7272_v32  ;;  %v7206_v58 = vpop.f32.mrb[98].mxu1  ;;  %v11360_v8 = vadd.f32 %v7238_v36, %v7204_v11 }
0x1100   :  { %v7266_v60 = vrot.slane %v7265_v52, 2  ;;  %v11358_v62 = vadd.f32 %v7234_v53, %v7206_v58  ;;  %v7208_v28 = vpop.f32.mrb[99].mxu1 }
0x1101   :  { %v7275_v22 = vrot.slane %v7274_v50, 2  ;;  %v11362_v61 = vadd.f32 %v7238_v36, %v7208_v28 }
0x1102   :  { %v7267_v21 = vadd.f32 %v7266_v60, %v7265_v52  ;;  %v7279_v13 = vadd.f32 %v11358_v62, %v11356_v51 }
0x1103   :  { %v7276_v56 = vadd.f32 %v7275_v22, %v7274_v50  ;;  %v7288_v2 = vadd.f32 %v11362_v61, %v11360_v8 }
0x1104   :  { %v7268_v46 = vrot.slane %v7267_v21, 1 }
0x1105   :  { %v7277_v4 = vrot.slane %v7276_v56, 1  ;;  %v7212_v18 = vpop.f32.mrb[100].mxu1 }
0x1106   :  { %v7269_v39 = vadd.f32 %v7268_v46, %v7267_v21  ;;  %v11368_v0 = vadd.f32 %v7234_v53, %v7212_v18  ;;  %v7214_v27 = vpop.f32.mrb[101].mxu1 }
0x1107   :  { %v7278_v25 = vadd.f32 %v7277_v4, %v7276_v56  ;;  %v11370_v42 = vadd.f32 %v7238_v36, %v7214_v27  ;;  %v7216_v7 = vpop.f32.mrb[102].mxu1 }
0x1108   :  { %v7297_v6 = vmul.f32 0.03125, %v7269_v39  ;;  %v7280_v55 = vadd.f32 %v7279_v13, %v11368_v0  ;;  %v7218_v23 = vpop.f32.mrb[103].mxu1  ;;  %v7257_v49 = vadd.f32 %v7234_v53, %v7216_v7 }
0x1109   :  { %v7298_v5 = vmul.f32 0.03125, %v7278_v25  ;;  %v7289_v15 = vadd.f32 %v7288_v2, %v11370_v42  ;;  %v11374_v57 = vadd.f32 %v7238_v36, %v7218_v23 }
0x110a   :  { %v11376_v63 = vsub.f32 %v7243_v14, %v7297_v6  ;;  %v11378_v9 = vsub.f32 %v7247_v41, %v7297_v6  ;;  %v11380_v17 = vsub.f32 %v7251_v24, %v7297_v6  ;;  %v11382_v10 = vsub.f32 %v7255_v16, %v7297_v6 }
0x110b   :  { %v11384_v47 = vsub.f32 %v7244_v34, %v7298_v5  ;;  %v11386_v26 = vsub.f32 %v7248_v1, %v7298_v5  ;;  %v11388_v48 = vsub.f32 %v7252_v44, %v7298_v5  ;;  %v11390_v12 = vsub.f32 %v7256_v59, %v7298_v5 }
0x110c   :  { %v7317_v38 = vmul.f32 %v11376_v63, %v11376_v63  ;;  %v7321_v14 = vmul.f32 %v11378_v9, %v11378_v9  ;;  %v7325_v34 = vmul.f32 %v11380_v17, %v11380_v17  ;;  %v7281_v40 = vadd.f32 %v7280_v55, %v7257_v49 }
0x110d   :  { %v7318_v41 = vmul.f32 %v11384_v47, %v11384_v47  ;;  %v7322_v24 = vmul.f32 %v11386_v26, %v11386_v26  ;;  %v7290_v44 = vadd.f32 %v7289_v15, %v11374_v57  ;;  %v7326_v35 = vmul.f32 %v11388_v48, %v11388_v48 }
0x110e   :  { %v7333_v1 = vadd.f32 %v7321_v14, %v7317_v38  ;;  %v7329_v16 = vmul.f32 %v11382_v10, %v11382_v10  ;;  %v7282_v54 = vrot.slane %v7281_v40, 4  ;;  %v7330_v43 = vmul.f32 %v11390_v12, %v11390_v12 }
0x110f   :  { %v7342_v37 = vadd.f32 %v7322_v24, %v7318_v41  ;;  %v7291_v59 = vrot.slane %v7290_v44, 4 }
0x1110   :  { %v7334_v19 = vadd.f32 %v7333_v1, %v7325_v34  ;;  %v7283_v53 = vadd.f32 %v7282_v54, %v7281_v40 }
0x1111   :  { %v7343_v32 = vadd.f32 %v7342_v37, %v7326_v35  ;;  %v7292_v20 = vadd.f32 %v7291_v59, %v7290_v44 }
0x1112   :  { %v7335_v30 = vadd.f32 %v7334_v19, %v7329_v16  ;;  %v7284_v52 = vrot.slane %v7283_v53, 2 }
0x1113   :  { %v7344_v45 = vadd.f32 %v7343_v32, %v7330_v43  ;;  %v7293_v11 = vrot.slane %v7292_v20, 2 }
0x1114   :  { %v7336_v36 = vrot.slane %v7335_v30, 4  ;;  %v7285_v60 = vadd.f32 %v7284_v52, %v7283_v53  ;;  %v11448_v53 = vld [vmem:[#allocation32] sm:$0xf] }
0x1115   :  { %v7345_v50 = vrot.slane %v7344_v45, 4  ;;  %v7294_v28 = vadd.f32 %v7293_v11, %v7292_v20  ;;  %v11450_v20 = vld [vmem:[#allocation34] sm:$0xf]  ;;  %v7401_v52 = vrot.slane %v11448_v53, %v10852_v29 }
0x1116   :  { %v7337_v58 = vadd.f32 %v7336_v36, %v7335_v30  ;;  %v7286_v13 = vrot.slane %v7285_v60, 1  ;;  %v7438_v11 = vrot.slane %v11450_v20, %v10852_v29 }
0x1117   :  { %v7346_v22 = vadd.f32 %v7345_v50, %v7344_v45  ;;  %v7295_v56 = vrot.slane %v7294_v28, 1 }
0x1118   :  { %v7338_v21 = vrot.slane %v7337_v58, 2  ;;  %v7287_v4 = vadd.f32 %v7286_v13, %v7285_v60  ;;  %v7442_v60 = vrot.slane %v11450_v20, %v10855_v31 }
0x1119   :  { %v7347_v2 = vrot.slane %v7346_v22, 2  ;;  %v7296_v18 = vadd.f32 %v7295_v56, %v7294_v28 }
0x111a   :  { %v7339_v46 = vadd.f32 %v7338_v21, %v7337_v58  ;;  %v7299_v25 = vmul.f32 0.03125, %v7287_v4  ;;  %v7405_v58 = vrot.slane %v11448_v53, %v10855_v31 }
0x111b   :  { %v7348_v39 = vadd.f32 %v7347_v2, %v7346_v22  ;;  %v7300_v7 = vmul.f32 0.03125, %v7296_v18 }
0x111c   :  { %v7340_v27 = vrot.slane %v7339_v46, 1  ;;  %v11410_v23 = vsub.f32 %v11356_v51, %v7299_v25  ;;  %v11413_v5 = vsub.f32 %v11358_v62, %v7299_v25  ;;  %v11416_v15 = vsub.f32 %v11368_v0, %v7299_v25 }
0x111d   :  { %v7349_v6 = vrot.slane %v7348_v39, 1  ;;  %v11418_v14 = vsub.f32 %v7257_v49, %v7299_v25  ;;  %v11421_v41 = vsub.f32 %v11360_v8, %v7300_v7  ;;  %v11424_v24 = vsub.f32 %v11362_v61, %v7300_v7 }
0x111e   :  { %v7341_v55 = vadd.f32 %v7340_v27, %v7339_v46  ;;  %v7319_v51 = vmul.f32 %v11410_v23, %v11410_v23  ;;  %v7323_v62 = vmul.f32 %v11413_v5, %v11413_v5  ;;  %v7327_v0 = vmul.f32 %v11416_v15, %v11416_v15 }
0x111f   :  { %v7350_v38 = vadd.f32 %v7349_v6, %v7348_v39  ;;  %v11433_v49 = vsub.f32 %v11370_v42, %v7300_v7  ;;  %v11436_v8 = vsub.f32 %v11374_v57, %v7300_v7  ;;  %v7320_v44 = vmul.f32 %v11421_v41, %v11421_v41 }
0x1120   :  { %v7369_v34 = vmul.f32 0.03125, %v7341_v55  ;;  %v7351_v61 = vadd.f32 %v7323_v62, %v7319_v51  ;;  %v7324_v35 = vmul.f32 %v11424_v24, %v11424_v24  ;;  %v7331_v16 = vmul.f32 %v11418_v14, %v11418_v14 }
0x1121   :  { %v7370_v1 = vmul.f32 0.03125, %v7350_v38  ;;  %v7328_v42 = vmul.f32 %v11433_v49, %v11433_v49  ;;  %v7332_v59 = vmul.f32 %v11436_v8, %v11436_v8 }
0x1122   :  { %v7373_v40 = vadd.f32 1e-05, %v7369_v34  ;;  %v7352_v19 = vadd.f32 %v7351_v61, %v7327_v0  ;;  %v7360_v54 = vadd.f32 %v7324_v35, %v7320_v44 }
0x1123   :  { %v7374_v37 = vadd.f32 1e-05, %v7370_v1 }
0x1124   :  { %9758 = vrsqrt.f32 %v7373_v40  ;;  %v7353_v57 = vadd.f32 %v7352_v19, %v7331_v16  ;;  %v7361_v43 = vadd.f32 %v7360_v54, %v7328_v42 }
0x1125   :  { %9760 = vrsqrt.f32 %v7374_v37 }
0x1126   :  { %v7354_v32 = vrot.slane %v7353_v57, 4  ;;  %v7362_v30 = vadd.f32 %v7361_v43, %v7332_v59 }
0x1128   :  { %v7355_v45 = vadd.f32 %v7354_v32, %v7353_v57  ;;  %v7363_v36 = vrot.slane %v7362_v30, 4 }
0x112a   :  { %v7356_v28 = vrot.slane %v7355_v45, 2  ;;  %v7364_v22 = vadd.f32 %v7363_v36, %v7362_v30 }
0x112c   :  { %v7365_v51 = vrot.slane %v7364_v22, 2 }
0x112e   :  { %v9759_v50 = vpop.eup %9758  ;;  %v7366_v16 = vadd.f32 %v7365_v51, %v7364_v22 }
0x112f   :  { %v9761_v21 = vpop.eup %9760  ;;  %v7381_v13 = vmul.f32 %v9759_v50, %v11376_v63  ;;  %v7385_v56 = vmul.f32 %v9759_v50, %v11378_v9  ;;  %v7389_v2 = vmul.f32 %v9759_v50, %v11380_v17  ;;  %v7393_v46 = vmul.f32 %v9759_v50, %v11382_v10 }
0x1130   :  { %v7382_v29 = vmul.f32 %v9761_v21, %v11384_v47  ;;  %v7386_v4 = vmul.f32 %v9761_v21, %v11386_v26  ;;  %v7390_v18 = vmul.f32 %v9761_v21, %v11388_v48  ;;  %v7394_v39 = vmul.f32 %v9761_v21, %v11390_v12 }
0x1131   :  { %v7418_v31 = vmul.f32 %v7401_v52, %v7381_v13  ;;  %v7422_v27 = vmul.f32 %v7401_v52, %v7385_v56  ;;  %v7426_v25 = vmul.f32 %v7401_v52, %v7389_v2  ;;  %v7430_v7 = vmul.f32 %v7401_v52, %v7393_v46 }
0x1132   :  { %v7419_v6 = vmul.f32 %v7405_v58, %v7382_v29  ;;  %v7423_v63 = vmul.f32 %v7405_v58, %v7386_v4  ;;  %v7427_v55 = vmul.f32 %v7405_v58, %v7390_v18  ;;  %v7431_v9 = vmul.f32 %v7405_v58, %v7394_v39 }
0x1133   :  { %v7455_v38 = vadd.f32 %v7438_v11, %v7418_v31  ;;  %v7459_v17 = vadd.f32 %v7438_v11, %v7422_v27  ;;  %v7463_v34 = vadd.f32 %v7438_v11, %v7426_v25  ;;  %v11468_v10 = vadd.f32 %v7438_v11, %v7430_v7 }
0x1134   :  { %v7357_v47 = vadd.f32 %v7356_v28, %v7355_v45  ;;  %v11470_v26 = vadd.f32 %v7442_v60, %v7419_v6  ;;  %v11472_v48 = vadd.f32 %v7442_v60, %v7423_v63  ;;  %v11474_v12 = vadd.f32 %v7442_v60, %v7427_v55 }
0x1135   :  { %v11476_v62 = vadd.f32 %v7442_v60, %v7431_v9  ;;  %v7487_v1 = vmin.f32 %v7455_v38, 0.0  ;;  %v7491_v0 = vmin.f32 %v7459_v17, 0.0  ;;  %v7495_v40 = vmin.f32 %v7463_v34, 0.0 }
0x1136   :  { %v7499_v61 = vmin.f32 %v11468_v10, 0.0  ;;  %v7488_v42 = vmin.f32 %v11470_v26, 0.0  ;;  %v7492_v54 = vmin.f32 %v11472_v48, 0.0  ;;  %v7496_v57 = vmin.f32 %v11474_v12, 0.0 }
0x1137   :  { %v7503_v44 = vmul.f32 1.442695, %v7487_v1  ;;  %v7511_v35 = vmul.f32 1.442695, %v7491_v0  ;;  %v7519_v37 = vmul.f32 1.442695, %v7495_v40  ;;  %v7409_v25 = vrot.slane %v11448_v53, %v10986_v33 }
0x1138   :  { %v7527_v19 = vmul.f32 1.442695, %v7499_v61  ;;  %v7500_v59 = vmin.f32 %v11476_v62, 0.0  ;;  %v7358_v43 = vrot.slane %v7357_v47, 1  ;;  %v7367_v32 = vrot.slane %v7366_v16, 1 }
0x1139   :  { %9762 = vpow2.f32 %v7503_v44  ;;  %v7505_v30 = vmul.f32 1.442695, %v7488_v42  ;;  %v7513_v45 = vmul.f32 1.442695, %v7492_v54  ;;  %v7521_v36 = vmul.f32 1.442695, %v7496_v57 }
0x113a   :  { %9764 = vpow2.f32 %v7511_v35  ;;  %v7359_v52 = vadd.f32 %v7358_v43, %v7357_v47  ;;  %v7368_v11 = vadd.f32 %v7367_v32, %v7366_v16  ;;  %v7529_v50 = vmul.f32 1.442695, %v7500_v59 }
0x113b   :  { %9766 = vpow2.f32 %v7519_v37  ;;  %vm7471_vm10 = vcmp.gt.f32.partialorder %v7455_v38, 0.0  ;;  %vm7475_vm11 = vcmp.gt.f32.partialorder %v7459_v17, 0.0  ;;  %vm7479_vm12 = vcmp.gt.f32.partialorder %v7463_v34, 0.0 }
0x113c   :  { %9768 = vpow2.f32 %v7527_v19  ;;  %v7371_v58 = vmul.f32 0.03125, %v7359_v52  ;;  %v7372_v60 = vmul.f32 0.03125, %v7368_v11  ;;  %vm7483_vm13 = vcmp.gt.f32.partialorder %v11468_v10, 0.0 }
0x113d   :  { %9770 = vpow2.f32 %v7505_v30  ;;  %v7446_v55 = vrot.slane %v11450_v20, %v10986_v33  ;;  %vm7472_vm14 = vcmp.gt.f32.partialorder %v11470_v26, 0.0  ;;  %v7413_v47 = vrot.slane %v11448_v53, %v10989_v3 }
0x113e   :  { %9772 = vpow2.f32 %v7513_v45  ;;  %v7375_v28 = vadd.f32 1e-05, %v7371_v58  ;;  %v7376_v22 = vadd.f32 1e-05, %v7372_v60  ;;  %vm7476_vm15 = vcmp.gt.f32.partialorder %v11472_v48, 0.0 }
0x113f   :  { %9774 = vpow2.f32 %v7521_v36  ;;  %v7450_v33 = vrot.slane %v11450_v20, %v10989_v3  ;;  %vm7480_vm0 = vcmp.gt.f32.partialorder %v11474_v12, 0.0  ;;  %vm7484_vm1 = vcmp.gt.f32.partialorder %v11476_v62, 0.0 }
0x1140   :  { %9776 = vpow2.f32 %v7529_v50 }
0x1141   :  { %9778 = vrsqrt.f32 %v7375_v28 }
0x1142   :  { %9780 = vrsqrt.f32 %v7376_v22 }
0x1143   :  { %v9763_v21 = vpop.eup %9762 }
0x1144   :  { %v9765_v13 = vpop.eup %9764  ;;  %v8340_v56 = vadd.f32 -1.0, %v9763_v21 }
0x1145   :  { %v9767_v2 = vpop.eup %9766  ;;  %v8344_v46 = vadd.f32 -1.0, %v9765_v13 }
0x1146   :  { %v9769_v29 = vpop.eup %9768  ;;  %v8348_v4 = vadd.f32 -1.0, %v9767_v2  ;;  %v7551_v18 = vsel %vm7471_vm10, %v7455_v38, %v8340_v56 }
0x1147   :  { %v9771_v39 = vpop.eup %9770  ;;  %v8352_v31 = vadd.f32 -1.0, %v9769_v29  ;;  %v7555_v27 = vsel %vm7475_vm11, %v7459_v17, %v8344_v46  ;;  %7567 = vst [vmem:[#allocation35] sm:$0xff] %v7551_v18 }
0x1148   :  { %v9773_v7 = vpop.eup %9772  ;;  %v7559_v6 = vsel %vm7479_vm12, %v7463_v34, %v8348_v4  ;;  %7571 = vst [vmem:[#allocation35 + $0x20] sm:$0xff] %v7555_v27  ;;  %v8341_v63 = vadd.f32 -1.0, %v9771_v39 }
0x1149   :  { %v9775_v9 = vpop.eup %9774  ;;  %v7563_v38 = vsel %vm7483_vm13, %v11468_v10, %v8352_v31  ;;  %7575 = vst [vmem:[#allocation35 + $0x40] sm:$0xff] %v7559_v6  ;;  %v8345_v17 = vadd.f32 -1.0, %v9773_v7 }
0x114a   :  { %v9777_v51 = vpop.eup %9776  ;;  %7579 = vst [vmem:[#allocation35 + $0x60] sm:$0xff] %v7563_v38  ;;  %v8349_v34 = vadd.f32 -1.0, %v9775_v9  ;;  %v7552_v1 = vsel %vm7472_vm14, %v11470_v26, %v8341_v63 }
0x114b   :  { %v9779_v0 = vpop.eup %9778  ;;  %v8353_v10 = vadd.f32 -1.0, %v9777_v51  ;;  %v7556_v40 = vsel %vm7476_vm15, %v11472_v48, %v8345_v17  ;;  %7568 = vst [vmem:[#allocation35 + $0x8] sm:$0xff] %v7552_v1 }
0x114c   :  { %v9781_v53 = vpop.eup %9780  ;;  %v7560_v61 = vsel %vm7480_vm0, %v11474_v12, %v8349_v34  ;;  %7572 = vst [vmem:[#allocation35 + $0x28] sm:$0xff] %v7556_v40  ;;  %v7383_v44 = vmul.f32 %v9779_v0, %v11410_v23  ;;  %v7387_v26 = vmul.f32 %v9779_v0, %v11413_v5  ;;  %v7391_v35 = vmul.f32 %v9779_v0, %v11416_v15 }
0x114d   :  { %v7564_v3 = vsel %vm7484_vm1, %v11476_v62, %v8353_v10  ;;  %7576 = vst [vmem:[#allocation35 + $0x48] sm:$0xff] %v7560_v61  ;;  %v7395_v20 = vmul.f32 %v9779_v0, %v11418_v14  ;;  %v7384_v37 = vmul.f32 %v9781_v53, %v11421_v41  ;;  %v7388_v48 = vmul.f32 %v9781_v53, %v11424_v24 }
0x114e   :  { %7580 = vst [vmem:[#allocation35 + $0x68] sm:$0xff] %v7564_v3  ;;  %v7420_v16 = vmul.f32 %v7409_v25, %v7383_v44  ;;  %v7424_v19 = vmul.f32 %v7409_v25, %v7387_v26  ;;  %v7428_v12 = vmul.f32 %v7409_v25, %v7391_v35  ;;  %v7392_v42 = vmul.f32 %v9781_v53, %v11433_v49 }
0x114f   :  { %v7432_v23 = vmul.f32 %v7409_v25, %v7395_v20  ;;  %v7396_v5 = vmul.f32 %v9781_v53, %v11436_v8  ;;  %v7421_v54 = vmul.f32 %v7413_v47, %v7384_v37  ;;  %v7425_v15 = vmul.f32 %v7413_v47, %v7388_v48 }
0x1150   :  { %v7457_v57 = vadd.f32 %v7446_v55, %v7420_v16  ;;  %v7461_v62 = vadd.f32 %v7446_v55, %v7424_v19  ;;  %v7465_v59 = vadd.f32 %v7446_v55, %v7428_v12  ;;  %v7429_v43 = vmul.f32 %v7413_v47, %v7392_v42 }
0x1151   :  { %v7469_v14 = vadd.f32 %v7446_v55, %v7432_v23  ;;  %v7433_v32 = vmul.f32 %v7413_v47, %v7396_v5  ;;  %v7458_v30 = vadd.f32 %v7450_v33, %v7421_v54  ;;  %v7462_v52 = vadd.f32 %v7450_v33, %v7425_v15 }
0x1152   :  { %v7489_v41 = vmin.f32 %v7457_v57, 0.0  ;;  %v7493_v24 = vmin.f32 %v7461_v62, 0.0  ;;  %v7497_v45 = vmin.f32 %v7465_v59, 0.0  ;;  %v7466_v50 = vadd.f32 %v7450_v33, %v7429_v43 }
0x1153   :  { %v7501_v36 = vmin.f32 %v7469_v14, 0.0  ;;  %v7470_v49 = vadd.f32 %v7450_v33, %v7433_v32  ;;  %v7490_v28 = vmin.f32 %v7458_v30, 0.0  ;;  %v7494_v22 = vmin.f32 %v7462_v52, 0.0 }
0x1154   :  { %v7507_v11 = vmul.f32 1.442695, %v7489_v41  ;;  %v7515_v58 = vmul.f32 1.442695, %v7493_v24  ;;  %v7523_v60 = vmul.f32 1.442695, %v7497_v45 }
0x1155   :  { %v7531_v8 = vmul.f32 1.442695, %v7501_v36  ;;  %v7498_v21 = vmin.f32 %v7466_v50, 0.0  ;;  %v7502_v13 = vmin.f32 %v7470_v49, 0.0  ;;  %v7509_v56 = vmul.f32 1.442695, %v7490_v28 }
0x1156   :  { %9782 = vpow2.f32 %v7507_v11  ;;  %v7517_v2 = vmul.f32 1.442695, %v7494_v22  ;;  %vm7473_vm2 = vcmp.gt.f32.partialorder %v7457_v57, 0.0  ;;  %vm7477_vm3 = vcmp.gt.f32.partialorder %v7461_v62, 0.0 }
0x1157   :  { %9784 = vpow2.f32 %v7515_v58  ;;  %v7525_v46 = vmul.f32 1.442695, %v7498_v21  ;;  %v7533_v29 = vmul.f32 1.442695, %v7502_v13  ;;  %vm7481_vm4 = vcmp.gt.f32.partialorder %v7465_v59, 0.0 }
0x1158   :  { %9786 = vpow2.f32 %v7523_v60  ;;  %vm7485_vm5 = vcmp.gt.f32.partialorder %v7469_v14, 0.0  ;;  %vm7474_vm6 = vcmp.gt.f32.partialorder %v7458_v30, 0.0  ;;  %vm7478_vm7 = vcmp.gt.f32.partialorder %v7462_v52, 0.0 }
0x1159   :  { %9788 = vpow2.f32 %v7531_v8  ;;  %vm7482_vm8 = vcmp.gt.f32.partialorder %v7466_v50, 0.0  ;;  %vm7486_vm9 = vcmp.gt.f32.partialorder %v7470_v49, 0.0 }
0x115a   :  { %9790 = vpow2.f32 %v7509_v56 }
0x115b   :  { %9792 = vpow2.f32 %v7517_v2 }
0x115c   :  { %9794 = vpow2.f32 %v7525_v46 }
0x115d   :  { %9796 = vpow2.f32 %v7533_v29 }
0x1160   :  { %v9783_v4 = vpop.eup %9782 }
0x1161   :  { %v9785_v18 = vpop.eup %9784  ;;  %v8342_v39 = vadd.f32 -1.0, %v9783_v4 }
0x1162   :  { %v9787_v31 = vpop.eup %9786  ;;  %v8346_v27 = vadd.f32 -1.0, %v9785_v18 }
0x1163   :  { %v9789_v25 = vpop.eup %9788  ;;  %v8350_v7 = vadd.f32 -1.0, %v9787_v31  ;;  %v7553_v6 = vsel %vm7473_vm2, %v7457_v57, %v8342_v39 }
0x1164   :  { %v8354_v63 = vadd.f32 -1.0, %v9789_v25  ;;  %v7557_v55 = vsel %vm7477_vm3, %v7461_v62, %v8346_v27  ;;  %7569 = vst [vmem:[#allocation35 + $0x10] sm:$0xff] %v7553_v6  ;;  %v9791_v9 = vpop.eup %9790 }
0x1165   :  { %v7561_v38 = vsel %vm7481_vm4, %v7465_v59, %v8350_v7  ;;  %7573 = vst [vmem:[#allocation35 + $0x30] sm:$0xff] %v7557_v55  ;;  %v9793_v17 = vpop.eup %9792  ;;  %v8343_v51 = vadd.f32 -1.0, %v9791_v9 }
0x1166   :  { %v7565_v47 = vsel %vm7485_vm5, %v7469_v14, %v8354_v63  ;;  %7577 = vst [vmem:[#allocation35 + $0x50] sm:$0xff] %v7561_v38  ;;  %v9795_v34 = vpop.eup %9794  ;;  %v8347_v1 = vadd.f32 -1.0, %v9793_v17 }
0x1167   :  { %7581 = vst [vmem:[#allocation35 + $0x70] sm:$0xff] %v7565_v47  ;;  %v9797_v33 = vpop.eup %9796  ;;  %v8351_v0 = vadd.f32 -1.0, %v9795_v34  ;;  %v7554_v10 = vsel %vm7474_vm6, %v7458_v30, %v8343_v51 }
0x1168   :  { %v8355_v40 = vadd.f32 -1.0, %v9797_v33  ;;  %v7558_v53 = vsel %vm7478_vm7, %v7462_v52, %v8347_v1  ;;  %7570 = vst [vmem:[#allocation35 + $0x18] sm:$0xff] %v7554_v10 }
0x1169   :  { %v7562_v61 = vsel %vm7482_vm8, %v7466_v50, %v8351_v0  ;;  %7574 = vst [vmem:[#allocation35 + $0x38] sm:$0xff] %v7558_v53 }
0x116a   :  { %v7566_v44 = vsel %vm7486_vm9, %v7470_v49, %v8355_v40  ;;  %7578 = vst [vmem:[#allocation35 + $0x58] sm:$0xff] %v7562_v61 }
0x116b   :  { %7582 = vst [vmem:[#allocation35 + $0x78] sm:$0xff] %v7566_v44 }
0x116c   :  { %10271 = shalt.err (!%p10268_p4)
}
0x116d   :  { %s11573_s0 = sld [smem:[#allocation57_spill]] }
0x1173   :  { %s10272_s26 = scalar_lea.hbm %s11573_s0, 2048 }
0x1174   :  { %p10273_p5 = scmp.ne.s32.totalorder %s11573_s0, %s10272_s26  ;;  %p10276_p6 = scmp.lt.u32.totalorder %s10272_s26, %s11573_s0 }
0x1176   :  { %p10278_p7 = pnand %p10276_p6, %p10273_p5 }
0x1178   :  { %10281 = shalt.err (!%p10278_p7)
}
0x1179   :  { %s10337_s3 = smov 512   ;;  %s10338_s24 = smov 32  }
0x117a   :  { %7594 = dma.vmem_to_hbm [thread:$0]  %s7589_s12, 2048, %s11573_s0, [#allocation4], %s10337_s3, %s10337_s3, %s10338_s24  }
0x117b   :  { %10304 = dma.done.wait [#allocation4], 2048  }
0x117c   :  { %10305 = vsyncadd [#allocation4], 4294965248 }
0x117d   :  { %7598 = vsyncpa [#allocation3], 1 }
0x117e   :  { %7599 = vsyncpa [#allocation6], 1 }
0x117f   :  { %7600 = vsyncpa [#allocation9], 1 }
0x1180   :  { %7601 = vsyncpa [#allocation12], 1 }
0x1181   :  { %7602 = vsyncpa [#allocation15], 1 }
0x1182   :  { %7603 = vsyncpa [#allocation18], 1 }
0x1183   :  { %7604 = vsyncpa [#allocation21], 1 }
0x1184   :  { %7605 = vsyncpa [#allocation24], 1 }
0x1185   :  { %7606 = vsyncpa [#allocation27], 1 }
0x1186   :  { %7607 = vsyncpa [#allocation30], 1 }
0x1187   :  { %7608 = vsyncpa [#allocation33], 1 }
0x1188   :  { %7609 = vsyncpa [#allocation4], 1 }

</bundles_post_ra>
